<compile_context>
chip_gen: v7x
topology: tpu7x:2x2x1
jax: 0.10.0
libtpu: 0.0.40
codegen_flags: <defaults>
</compile_context>

<pallas_src>
import functools
import math

import numpy as np
import jax
import jax.numpy as jnp
from jax.experimental import pallas as pl
from jax.experimental.pallas import tpu as pltpu


LANE = 128


# -----------------------------------------------------------------------------
# Config (mirrors the fields the PyTorch Model reads from `configs`)
# -----------------------------------------------------------------------------
class Config:
    task_name = "classification"
    seq_len = 16
    enc_in = 4
    d_model = 32
    n_heads = 4
    e_layers = 2
    d_ff = 64
    dropout = 0.1               # eval mode -> identity
    patch_len_list = (2, 4)     # stride_list == patch_len_list
    augmentations = ("none",)   # identity
    single_channel = False
    num_class = 5
    output_attention = False
    no_inter_attn = False
    activation = "gelu"
    pred_len = 0


def _patch_nums(cfg):
    return [(cfg.seq_len - P) // P + 2 for P in cfg.patch_len_list]


# -----------------------------------------------------------------------------
# In-kernel math helpers (elementwise stays f32)
# -----------------------------------------------------------------------------
def _gelu_tanh(x):
    # tanh-approximate GELU (tanh lowers to the EUP slot, freeing the VALU).
    c = math.sqrt(2.0 / math.pi)
    return 0.5 * x * (1.0 + jnp.tanh(c * (x + 0.044715 * x * x * x)))


def _act(x, name):
    if name == "gelu":
        return _gelu_tanh(x)
    if name == "relu":
        return jnp.maximum(x, 0.0)
    return x


# -----------------------------------------------------------------------------
# Parameter / constant packing: many tiny 2-D arrays -> one lane-padded slab
# -----------------------------------------------------------------------------
class _Packer:
    """Row-concatenates small 2-D arrays into one lane-padded slab so the kernel
    gets a single DMA per slab; offsets are static Python ints."""

    def __init__(self, lanes):
        self.lanes = lanes
        self.layout = {}          # name -> (row_offset, rows, cols)
        self._blocks = []
        self._off = 0

    def add(self, name, arr):
        arr = np.asarray(arr, dtype=np.float32)
        if arr.ndim == 1:
            arr = arr[None, :]
        r, c = arr.shape
        assert c <= self.lanes, (name, arr.shape, self.lanes)
        rp = ((r + 7) // 8) * 8   # keep every entry 8-sublane aligned
        buf = np.zeros((rp, self.lanes), np.float32)
        buf[:r, :c] = arr
        self.layout[name] = (self._off, r, c)
        self._blocks.append(buf)
        self._off += rp

    def pack(self, dtype):
        return jnp.asarray(np.concatenate(self._blocks, axis=0), dtype=dtype)


def _positional_embedding(d_model, max_len):
    pe = np.zeros((max_len, d_model), dtype=np.float32)
    pos = np.arange(0, max_len, dtype=np.float32)[:, None]
    div = np.exp(np.arange(0, d_model, 2, dtype=np.float32)
                 * -(math.log(10000.0) / d_model))
    pe[:, 0::2] = np.sin(pos * div)
    pe[:, 1::2] = np.cos(pos * div)
    return pe


def init_packed_params(key, cfg):
    """Deterministic parameter construction, packed once at init (bf16 slab)."""
    L, C, D = cfg.seq_len, cfg.enc_in, cfg.d_model
    H, dk = cfg.n_heads, cfg.d_model // cfg.n_heads
    G = len(cfg.patch_len_list)
    Ns = _patch_nums(cfg)
    n_attn = cfg.e_layers * (G + 1)           # per layer: G intra + 1 inter (router)
    n_norm = 2 * cfg.e_layers + 1             # norm1/norm2 per layer + final norm
    n_pad = max(LANE, pl.cdiv(cfg.num_class, LANE) * LANE)
    pe = _positional_embedding(D, max(Ns))

    keys = iter(jax.random.split(key, 1024))

    def w(shape, scale=0.02):
        return np.asarray(scale * jax.random.normal(next(keys), shape,
                                                    dtype=jnp.float32))

    pk = _Packer(LANE)
    # Attention: per-head weights as separate row blocks (no lane slicing in-kernel).
    for a in range(n_attn):
        for h in range(H):
            pk.add(f"wq_{a}_{h}", w((D, dk)))
            pk.add(f"wk_{a}_{h}", w((D, dk)))
            pk.add(f"wv_{a}_{h}", w((D, dk)))
            pk.add(f"wo_{a}_{h}", w((dk, D)))
            pk.add(f"bq_{a}_{h}", np.zeros((1, dk), np.float32))
            pk.add(f"bk_{a}_{h}", np.zeros((1, dk), np.float32))
            pk.add(f"bv_{a}_{h}", np.zeros((1, dk), np.float32))
        pk.add(f"bo_{a}", np.zeros((1, D), np.float32))
    # FFN 1x1 convs.
    for l in range(cfg.e_layers):
        pk.add(f"w1_{l}", w((D, cfg.d_ff)))
        pk.add(f"b1_{l}", np.zeros((1, cfg.d_ff), np.float32))
        pk.add(f"w2_{l}", w((cfg.d_ff, D)))
        pk.add(f"b2_{l}", np.zeros((1, D), np.float32))
    # LayerNorm affine params (norm1/norm2 per layer + final encoder norm).
    for i in range(n_norm):
        pk.add(f"lng_{i}", np.ones((1, D), np.float32))
        pk.add(f"lnb_{i}", np.zeros((1, D), np.float32))
    # Patch (value) embedding split per within-patch position p; positional +
    # learnable granularity embeddings pre-summed.
    for g, P in enumerate(cfg.patch_len_list):
        for p in range(P):
            pk.add(f"wemb_{g}_{p}", w((C, D)))
        pk.add(f"eb_{g}", pe[:Ns[g]] + w((1, D), scale=1.0))
    # Classification head split per granularity (avoids a lane concat in-kernel);
    # lane-padded to 128 outputs (zero beyond num_class).
    for g in range(G):
        wp = np.zeros((D, n_pad), np.float32)
        wp[:, :cfg.num_class] = w((D, cfg.num_class))
        pk.add(f"wproj_{g}", wp)
    pk.add("bproj", np.zeros((1, n_pad), np.float32))

    return pk.pack(jnp.bfloat16), pk.layout, n_pad


def _build_const_slab(cfg, TB):
    """Structural constants for a TB-sample block: patch-unfold selection,
    block-diagonal attention masks, router / pooling selection matrices."""
    L = cfg.seq_len
    G = len(cfg.patch_len_list)
    Ns = _patch_nums(cfg)
    lanes = TB * max(L, max(Ns), G)
    NEG = -1e30

    pk = _Packer(lanes)
    for g, P in enumerate(cfg.patch_len_list):
        N = Ns[g]
        # ReplicationPad1d((0, P)) + unfold(P, P): slab row b*N+n selects
        # x[b, min(n*P+p, L-1), :]  (last patch is the replicated last step).
        for p in range(P):
            S = np.zeros((TB * N, TB * L), np.float32)
            for b in range(TB):
                for n in range(N):
                    S[b * N + n, b * L + min(n * P + p, L - 1)] = 1.0
            pk.add(f"sel_{g}_{p}", S)
        # block-diagonal additive attention mask (no cross-sample attention)
        m = np.full((TB * N, TB * N), NEG, np.float32)
        for b in range(TB):
            m[b * N:(b + 1) * N, b * N:(b + 1) * N] = 0.0
        pk.add(f"mask_{g}", m)
        # router construction / broadcast-back / final mean-pool selections
        r = np.zeros((TB * G, TB * N), np.float32)
        bsel = np.zeros((TB * N, TB * G), np.float32)
        pool = np.zeros((TB, TB * N), np.float32)
        for b in range(TB):
            r[b * G + g, b * N:(b + 1) * N] = 1.0
            bsel[b * N:(b + 1) * N, b * G + g] = 1.0
            pool[b, b * N:(b + 1) * N] = 1.0
        pk.add(f"rsel_{g}", r)
        pk.add(f"bsel_{g}", bsel)
        pk.add(f"pool_{g}", pool)
    mr = np.full((TB * G, TB * G), NEG, np.float32)
    for b in range(TB):
        mr[b * G:(b + 1) * G, b * G:(b + 1) * G] = 0.0
    pk.add("mask_r", mr)
    return pk.pack(jnp.float32), pk.layout


# -----------------------------------------------------------------------------
# Fused forward kernel: one grid step == TB samples, whole network.
# -----------------------------------------------------------------------------
def _medformer_kernel(x_ref, w_ref, c_ref, o_ref, *, W, CN, cfg, TB, n_pad):
    L, C, D = cfg.seq_len, cfg.enc_in, cfg.d_model
    H, dk = cfg.n_heads, cfg.d_model // cfg.n_heads
    G = len(cfg.patch_len_list)
    Ns = _patch_nums(cfg)
    e_layers = cfg.e_layers
    no_inter = cfg.no_inter_attn or G <= 1
    scale = 1.0 / math.sqrt(dk)
    eps = 1e-5
    f32, bf16 = jnp.float32, jnp.bfloat16

    def wget(name):
        off, r, c = W[name]
        return w_ref[off:off + r, 0:c]            # bf16, static row/lane slice

    def wgetf(name):
        return wget(name).astype(f32)

    def cget(name):
        off, r, c = CN[name]
        return c_ref[off:off + r, 0:c]            # f32 structural constant

    def mm(a, b):
        # bf16 MXU operands, f32 accumulation.
        return jnp.dot(a.astype(bf16), b.astype(bf16),
                       preferred_element_type=f32)

    def mm_nt(a, b):
        # a @ b.T without materializing a transpose (contract last dims).
        return jax.lax.dot_general(a.astype(bf16), b.astype(bf16),
                                   (((1,), (1,)), ((), ())),
                                   preferred_element_type=f32)

    def layer_norm(x, idx):
        mu = jnp.mean(x, axis=-1, keepdims=True)
        xc = x - mu
        var = jnp.mean(xc * xc, axis=-1, keepdims=True)
        return (xc * jax.lax.rsqrt(var + eps) * wgetf(f"lng_{idx}")
                + wgetf(f"lnb_{idx}"))

    def mha(xin, a, mask):
        # xin: [M, D] slab of TB per-sample token blocks.  `mask` keeps the
        # attention block-diagonal (per-sample softmax).  Heads are row blocks
        # of the weight slab; sum_h o_h @ Wo_h == concat_h(o_h) @ Wo.
        acc = wgetf(f"bo_{a}") + jnp.zeros((xin.shape[0], D), f32)
        for h in range(H):
            q = mm(xin, wget(f"wq_{a}_{h}")) + wgetf(f"bq_{a}_{h}")
            k = mm(xin, wget(f"wk_{a}_{h}")) + wgetf(f"bk_{a}_{h}")
            v = mm(xin, wget(f"wv_{a}_{h}")) + wgetf(f"bv_{a}_{h}")
            s = mm_nt(q, k) * scale + mask
            s = s - jnp.max(s, axis=-1, keepdims=True)
            p = jnp.exp(s)
            p = p * pl.reciprocal(jnp.sum(p, axis=-1, keepdims=True), approx=True)
            o = mm(p, v)                                    # [M, dk]
            acc = acc + mm(o, wget(f"wo_{a}_{h}"))          # [M, D]
        return acc

    x = x_ref[...].astype(f32)                              # [TB*L, C]

    # ---- ListPatchEmbedding: pad + unfold + linear as selection matmuls ----
    xs = []
    for g in range(G):
        P, N = cfg.patch_len_list[g], Ns[g]
        emb = jnp.zeros((TB * N, D), f32)
        for p in range(P):
            xw = mm(x, wget(f"wemb_{g}_{p}"))               # [TB*L, D]
            emb = emb + mm(cget(f"sel_{g}_{p}"), xw)        # [TB*N, D]
        eb = wgetf(f"eb_{g}")                               # [N, D] pos + gran emb
        emb = emb + jnp.concatenate([eb] * TB, axis=0)
        xs.append(emb)

    masks = [cget(f"mask_{g}") for g in range(G)]
    mask_r = cget("mask_r")

    # ---- Encoder: e_layers x (intra-attn, router inter-attn, FFN) ----
    for l in range(e_layers):
        attn = [mha(xs[g], l * (G + 1) + g, masks[g]) for g in range(G)]
        if not no_inter:
            routers = jnp.zeros((TB * G, D), f32)
            for g in range(G):
                routers = routers + mm(cget(f"rsel_{g}"), xs[g]) * (1.0 / Ns[g])
            r_out = mha(routers, l * (G + 1) + G, mask_r)   # [TB*G, D]
            attn = [attn[g] + mm(cget(f"bsel_{g}"), r_out) for g in range(G)]
        nxt = []
        for g in range(G):
            xn = layer_norm(xs[g] + attn[g], 2 * l)
            y = _act(mm(xn, wget(f"w1_{l}")) + wgetf(f"b1_{l}"), cfg.activation)
            y = mm(y, wget(f"w2_{l}")) + wgetf(f"b2_{l}")
            nxt.append(layer_norm(xn + y, 2 * l + 1))
        xs = nxt

    # ---- final norm, per-granularity mean-pool (MXU), gelu, projection ----
    logits = jnp.zeros((TB, n_pad), f32) + wgetf("bproj")
    for g in range(G):
        xf = layer_norm(xs[g], 2 * e_layers)
        pooled = mm(cget(f"pool_{g}"), xf) * (1.0 / Ns[g])  # [TB, D]
        logits = logits + mm(_gelu_tanh(pooled), wget(f"wproj_{g}"))
    o_ref[...] = logits                                     # lane-dense [TB, 128]


# -----------------------------------------------------------------------------
# Wrapper: single trivial reshape + the single pallas_call
# -----------------------------------------------------------------------------
def medformer_forward(wslab, x_enc, *, cfg, layout, n_pad):
    assert cfg.task_name == "classification"
    B, L, C = x_enc.shape
    assert L == cfg.seq_len and C == cfg.enc_in

    TB = min(B, 16)                       # samples per grid step (matmul-M batching)
    Bp = pl.cdiv(B, TB) * TB
    if Bp != B:
        x_enc = jnp.concatenate(
            [x_enc, jnp.zeros((Bp - B, L, C), x_enc.dtype)], axis=0)
    xr = x_enc.reshape(Bp * L, C)         # the only wrapper-side glue op

    cslab, clayout = _build_const_slab(cfg, TB)   # trace-time numpy constants

    kernel = functools.partial(_medformer_kernel, W=layout, CN=clayout,
                               cfg=cfg, TB=TB, n_pad=n_pad)

    out = pl.pallas_call(
        kernel,
        out_shape=jax.ShapeDtypeStruct((Bp, n_pad), jnp.float32),
        grid=(Bp // TB,),
        in_specs=[
            pl.BlockSpec((TB * L, C), lambda i: (i, 0)),
            pl.BlockSpec(wslab.shape, lambda i: (0, 0)),
            pl.BlockSpec(cslab.shape, lambda i: (0, 0)),
        ],
        out_specs=pl.BlockSpec((TB, n_pad), lambda i: (i, 0)),
        compiler_params=pltpu.CompilerParams(
            dimension_semantics=("parallel",),
            vmem_limit_bytes=32 * 1024 * 1024),
    )(xr, wslab, cslab)
    return out[:B, :cfg.num_class]


# -----------------------------------------------------------------------------
if __name__ == "__main__":
    cfg = Config()
    key = jax.random.PRNGKey(0)
    k_x, k_p = jax.random.split(key)

    # x_enc: [batch=2, seq_len=16, enc_in=4]; x_mark_enc / decoder inputs are
    # unused by the PyTorch forward for classification.
    x_enc = jax.random.normal(k_x, (2, cfg.seq_len, cfg.enc_in), dtype=jnp.float32)
    wslab, layout, n_pad = init_packed_params(k_p, cfg)

    fwd = jax.jit(functools.partial(medformer_forward, cfg=cfg,
                                    layout=layout, n_pad=n_pad))
    logits = jax.block_until_ready(fwd(wslab, x_enc))

    assert logits.shape == (2, cfg.num_class), logits.shape
    assert bool(jnp.all(jnp.isfinite(logits)))
    print("KERNEL_OK")
</pallas_src>

<mosaic_0001>
module attributes {stable_mosaic.version = 11 : i64} {
  func.func @_medformer_kernel(%arg0: i32, %arg1: memref<32x4xf32, #tpu.memory_space<vmem>>, %arg2: memref<3568x128xbf16, #tpu.memory_space<vmem>>, %arg3: memref<232x32xf32, #tpu.memory_space<vmem>>, %arg4: memref<2x128xf32, #tpu.memory_space<vmem>>) attributes {dimension_semantics = [#tpu.dimension_semantics<parallel>], iteration_bounds = array<i64: 1>, scalar_prefetch = 0 : i64, scratch_operands = 0 : i64, tpu.core_type = #tpu.core_type<tc>, window_params = [{transform_indices = @transform_0, window_bounds = array<i64: 32, 4>}, {pipeline_mode = #tpu.pipeline_mode<synchronous>, transform_indices = @transform_1, window_bounds = array<i64: 3568, 128>}, {pipeline_mode = #tpu.pipeline_mode<synchronous>, transform_indices = @transform_2, window_bounds = array<i64: 232, 32>}, {transform_indices = @transform_3, window_bounds = array<i64: 2, 128>}]} {
    %c0 = arith.constant 0 : index
    %c0_0 = arith.constant 0 : index
    %0 = vector.load %arg1[%c0, %c0_0] : memref<32x4xf32, #tpu.memory_space<vmem>>, vector<32x4xf32>
    %cst = arith.constant 0.000000e+00 : f32
    %1 = vector.broadcast %cst : f32 to vector<18x32xf32>
    %c3424 = arith.constant 3424 : index
    %c0_1 = arith.constant 0 : index
    %2 = vector.load %arg2[%c3424, %c0_1] : memref<3568x128xbf16, #tpu.memory_space<vmem>>, vector<4x32xbf16>
    %3 = arith.truncf %0 : vector<32x4xf32> to vector<32x4xbf16>
    %cst_2 = arith.constant dense<0.000000e+00> : vector<32x32xf32>
    %4 = tpu.matmul %3, %2, %cst_2 {dimension_numbers = #tpu.dot_dimension_numbers<[1], [0], [0], [1], [0, 0, 1, 1], [], []>} : vector<32x4xbf16>, vector<4x32xbf16>, vector<32x32xf32> -> vector<32x32xf32>
    %c0_3 = arith.constant 0 : index
    %c0_4 = arith.constant 0 : index
    %5 = vector.load %arg3[%c0_3, %c0_4] : memref<232x32xf32, #tpu.memory_space<vmem>>, vector<18x32xf32>
    %6 = arith.truncf %5 : vector<18x32xf32> to vector<18x32xbf16>
    %7 = arith.truncf %4 : vector<32x32xf32> to vector<32x32xbf16>
    %cst_5 = arith.constant dense<0.000000e+00> : vector<18x32xf32>
    %8 = tpu.matmul %6, %7, %cst_5 {dimension_numbers = #tpu.dot_dimension_numbers<[1], [0], [0], [1], [0, 0, 1, 1], [], []>} : vector<18x32xbf16>, vector<32x32xbf16>, vector<18x32xf32> -> vector<18x32xf32>
    %9 = arith.addf %1, %8 : vector<18x32xf32>
    %c3432 = arith.constant 3432 : index
    %c0_6 = arith.constant 0 : index
    %10 = vector.load %arg2[%c3432, %c0_6] : memref<3568x128xbf16, #tpu.memory_space<vmem>>, vector<4x32xbf16>
    %11 = arith.truncf %0 : vector<32x4xf32> to vector<32x4xbf16>
    %cst_7 = arith.constant dense<0.000000e+00> : vector<32x32xf32>
    %12 = tpu.matmul %11, %10, %cst_7 {dimension_numbers = #tpu.dot_dimension_numbers<[1], [0], [0], [1], [0, 0, 1, 1], [], []>} : vector<32x4xbf16>, vector<4x32xbf16>, vector<32x32xf32> -> vector<32x32xf32>
    %c24 = arith.constant 24 : index
    %c0_8 = arith.constant 0 : index
    %13 = vector.load %arg3[%c24, %c0_8] : memref<232x32xf32, #tpu.memory_space<vmem>>, vector<18x32xf32>
    %14 = arith.truncf %13 : vector<18x32xf32> to vector<18x32xbf16>
    %15 = arith.truncf %12 : vector<32x32xf32> to vector<32x32xbf16>
    %cst_9 = arith.constant dense<0.000000e+00> : vector<18x32xf32>
    %16 = tpu.matmul %14, %15, %cst_9 {dimension_numbers = #tpu.dot_dimension_numbers<[1], [0], [0], [1], [0, 0, 1, 1], [], []>} : vector<18x32xbf16>, vector<32x32xbf16>, vector<18x32xf32> -> vector<18x32xf32>
    %17 = arith.addf %9, %16 : vector<18x32xf32>
    %c3440 = arith.constant 3440 : index
    %c0_10 = arith.constant 0 : index
    %18 = vector.load %arg2[%c3440, %c0_10] : memref<3568x128xbf16, #tpu.memory_space<vmem>>, vector<9x32xbf16>
    %19 = arith.extf %18 : vector<9x32xbf16> to vector<9x32xf32>
    %20 = tpu.concatenate %19, %19 in 0 : vector<9x32xf32>, vector<9x32xf32> -> vector<18x32xf32>
    %21 = arith.addf %17, %20 : vector<18x32xf32>
    %cst_11 = arith.constant 0.000000e+00 : f32
    %22 = vector.broadcast %cst_11 : f32 to vector<10x32xf32>
    %c3456 = arith.constant 3456 : index
    %c0_12 = arith.constant 0 : index
    %23 = vector.load %arg2[%c3456, %c0_12] : memref<3568x128xbf16, #tpu.memory_space<vmem>>, vector<4x32xbf16>
    %24 = arith.truncf %0 : vector<32x4xf32> to vector<32x4xbf16>
    %cst_13 = arith.constant dense<0.000000e+00> : vector<32x32xf32>
    %25 = tpu.matmul %24, %23, %cst_13 {dimension_numbers = #tpu.dot_dimension_numbers<[1], [0], [0], [1], [0, 0, 1, 1], [], []>} : vector<32x4xbf16>, vector<4x32xbf16>, vector<32x32xf32> -> vector<32x32xf32>
    %c112 = arith.constant 112 : index
    %c0_14 = arith.constant 0 : index
    %26 = vector.load %arg3[%c112, %c0_14] : memref<232x32xf32, #tpu.memory_space<vmem>>, vector<10x32xf32>
    %27 = arith.truncf %26 : vector<10x32xf32> to vector<10x32xbf16>
    %28 = arith.truncf %25 : vector<32x32xf32> to vector<32x32xbf16>
    %cst_15 = arith.constant dense<0.000000e+00> : vector<10x32xf32>
    %29 = tpu.matmul %27, %28, %cst_15 {dimension_numbers = #tpu.dot_dimension_numbers<[1], [0], [0], [1], [0, 0, 1, 1], [], []>} : vector<10x32xbf16>, vector<32x32xbf16>, vector<10x32xf32> -> vector<10x32xf32>
    %30 = arith.addf %22, %29 : vector<10x32xf32>
    %c3464 = arith.constant 3464 : index
    %c0_16 = arith.constant 0 : index
    %31 = vector.load %arg2[%c3464, %c0_16] : memref<3568x128xbf16, #tpu.memory_space<vmem>>, vector<4x32xbf16>
    %32 = arith.truncf %0 : vector<32x4xf32> to vector<32x4xbf16>
    %cst_17 = arith.constant dense<0.000000e+00> : vector<32x32xf32>
    %33 = tpu.matmul %32, %31, %cst_17 {dimension_numbers = #tpu.dot_dimension_numbers<[1], [0], [0], [1], [0, 0, 1, 1], [], []>} : vector<32x4xbf16>, vector<4x32xbf16>, vector<32x32xf32> -> vector<32x32xf32>
    %c128 = arith.constant 128 : index
    %c0_18 = arith.constant 0 : index
    %34 = vector.load %arg3[%c128, %c0_18] : memref<232x32xf32, #tpu.memory_space<vmem>>, vector<10x32xf32>
    %35 = arith.truncf %34 : vector<10x32xf32> to vector<10x32xbf16>
    %36 = arith.truncf %33 : vector<32x32xf32> to vector<32x32xbf16>
    %cst_19 = arith.constant dense<0.000000e+00> : vector<10x32xf32>
    %37 = tpu.matmul %35, %36, %cst_19 {dimension_numbers = #tpu.dot_dimension_numbers<[1], [0], [0], [1], [0, 0, 1, 1], [], []>} : vector<10x32xbf16>, vector<32x32xbf16>, vector<10x32xf32> -> vector<10x32xf32>
    %38 = arith.addf %30, %37 : vector<10x32xf32>
    %c3472 = arith.constant 3472 : index
    %c0_20 = arith.constant 0 : index
    %39 = vector.load %arg2[%c3472, %c0_20] : memref<3568x128xbf16, #tpu.memory_space<vmem>>, vector<4x32xbf16>
    %40 = arith.truncf %0 : vector<32x4xf32> to vector<32x4xbf16>
    %cst_21 = arith.constant dense<0.000000e+00> : vector<32x32xf32>
    %41 = tpu.matmul %40, %39, %cst_21 {dimension_numbers = #tpu.dot_dimension_numbers<[1], [0], [0], [1], [0, 0, 1, 1], [], []>} : vector<32x4xbf16>, vector<4x32xbf16>, vector<32x32xf32> -> vector<32x32xf32>
    %c144 = arith.constant 144 : index
    %c0_22 = arith.constant 0 : index
    %42 = vector.load %arg3[%c144, %c0_22] : memref<232x32xf32, #tpu.memory_space<vmem>>, vector<10x32xf32>
    %43 = arith.truncf %42 : vector<10x32xf32> to vector<10x32xbf16>
    %44 = arith.truncf %41 : vector<32x32xf32> to vector<32x32xbf16>
    %cst_23 = arith.constant dense<0.000000e+00> : vector<10x32xf32>
    %45 = tpu.matmul %43, %44, %cst_23 {dimension_numbers = #tpu.dot_dimension_numbers<[1], [0], [0], [1], [0, 0, 1, 1], [], []>} : vector<10x32xbf16>, vector<32x32xbf16>, vector<10x32xf32> -> vector<10x32xf32>
    %46 = arith.addf %38, %45 : vector<10x32xf32>
    %c3480 = arith.constant 3480 : index
    %c0_24 = arith.constant 0 : index
    %47 = vector.load %arg2[%c3480, %c0_24] : memref<3568x128xbf16, #tpu.memory_space<vmem>>, vector<4x32xbf16>
    %48 = arith.truncf %0 : vector<32x4xf32> to vector<32x4xbf16>
    %cst_25 = arith.constant dense<0.000000e+00> : vector<32x32xf32>
    %49 = tpu.matmul %48, %47, %cst_25 {dimension_numbers = #tpu.dot_dimension_numbers<[1], [0], [0], [1], [0, 0, 1, 1], [], []>} : vector<32x4xbf16>, vector<4x32xbf16>, vector<32x32xf32> -> vector<32x32xf32>
    %c160 = arith.constant 160 : index
    %c0_26 = arith.constant 0 : index
    %50 = vector.load %arg3[%c160, %c0_26] : memref<232x32xf32, #tpu.memory_space<vmem>>, vector<10x32xf32>
    %51 = arith.truncf %50 : vector<10x32xf32> to vector<10x32xbf16>
    %52 = arith.truncf %49 : vector<32x32xf32> to vector<32x32xbf16>
    %cst_27 = arith.constant dense<0.000000e+00> : vector<10x32xf32>
    %53 = tpu.matmul %51, %52, %cst_27 {dimension_numbers = #tpu.dot_dimension_numbers<[1], [0], [0], [1], [0, 0, 1, 1], [], []>} : vector<10x32xbf16>, vector<32x32xbf16>, vector<10x32xf32> -> vector<10x32xf32>
    %54 = arith.addf %46, %53 : vector<10x32xf32>
    %c3488 = arith.constant 3488 : index
    %c0_28 = arith.constant 0 : index
    %55 = vector.load %arg2[%c3488, %c0_28] : memref<3568x128xbf16, #tpu.memory_space<vmem>>, vector<5x32xbf16>
    %56 = arith.extf %55 : vector<5x32xbf16> to vector<5x32xf32>
    %57 = tpu.concatenate %56, %56 in 0 : vector<5x32xf32>, vector<5x32xf32> -> vector<10x32xf32>
    %58 = arith.addf %54, %57 : vector<10x32xf32>
    %c48 = arith.constant 48 : index
    %c0_29 = arith.constant 0 : index
    %59 = vector.load %arg3[%c48, %c0_29] : memref<232x32xf32, #tpu.memory_space<vmem>>, vector<18x18xf32>
    %c176 = arith.constant 176 : index
    %c0_30 = arith.constant 0 : index
    %60 = vector.load %arg3[%c176, %c0_30] : memref<232x32xf32, #tpu.memory_space<vmem>>, vector<10x10xf32>
    %c224 = arith.constant 224 : index
    %c0_31 = arith.constant 0 : index
    %61 = vector.load %arg3[%c224, %c0_31] : memref<232x32xf32, #tpu.memory_space<vmem>>, vector<4x4xf32>
    %c512 = arith.constant 512 : index
    %c0_32 = arith.constant 0 : index
    %62 = vector.load %arg2[%c512, %c0_32] : memref<3568x128xbf16, #tpu.memory_space<vmem>>, vector<1x32xbf16>
    %63 = arith.extf %62 : vector<1x32xbf16> to vector<1x32xf32>
    %cst_33 = arith.constant 0.000000e+00 : f32
    %64 = vector.broadcast %cst_33 : f32 to vector<18x32xf32>
    %65 = vector.broadcast %63 : vector<1x32xf32> to vector<18x32xf32>
    %66 = arith.addf %65, %64 : vector<18x32xf32>
    %c0_34 = arith.constant 0 : index
    %c0_35 = arith.constant 0 : index
    %67 = vector.load %arg2[%c0_34, %c0_35] : memref<3568x128xbf16, #tpu.memory_space<vmem>>, vector<32x8xbf16>
    %68 = arith.truncf %21 : vector<18x32xf32> to vector<18x32xbf16>
    %cst_36 = arith.constant dense<0.000000e+00> : vector<18x8xf32>
    %69 = tpu.matmul %68, %67, %cst_36 {dimension_numbers = #tpu.dot_dimension_numbers<[1], [0], [0], [1], [0, 0, 1, 1], [], []>} : vector<18x32xbf16>, vector<32x8xbf16>, vector<18x8xf32> -> vector<18x8xf32>
    %c104 = arith.constant 104 : index
    %c0_37 = arith.constant 0 : index
    %70 = vector.load %arg2[%c104, %c0_37] : memref<3568x128xbf16, #tpu.memory_space<vmem>>, vector<1x8xbf16>
    %71 = arith.extf %70 : vector<1x8xbf16> to vector<1x8xf32>
    %72 = vector.broadcast %71 : vector<1x8xf32> to vector<18x8xf32>
    %73 = arith.addf %69, %72 : vector<18x8xf32>
    %c32 = arith.constant 32 : index
    %c0_38 = arith.constant 0 : index
    %74 = vector.load %arg2[%c32, %c0_38] : memref<3568x128xbf16, #tpu.memory_space<vmem>>, vector<32x8xbf16>
    %75 = arith.truncf %21 : vector<18x32xf32> to vector<18x32xbf16>
    %cst_39 = arith.constant dense<0.000000e+00> : vector<18x8xf32>
    %76 = tpu.matmul %75, %74, %cst_39 {dimension_numbers = #tpu.dot_dimension_numbers<[1], [0], [0], [1], [0, 0, 1, 1], [], []>} : vector<18x32xbf16>, vector<32x8xbf16>, vector<18x8xf32> -> vector<18x8xf32>
    %c112_40 = arith.constant 112 : index
    %c0_41 = arith.constant 0 : index
    %77 = vector.load %arg2[%c112_40, %c0_41] : memref<3568x128xbf16, #tpu.memory_space<vmem>>, vector<1x8xbf16>
    %78 = arith.extf %77 : vector<1x8xbf16> to vector<1x8xf32>
    %79 = vector.broadcast %78 : vector<1x8xf32> to vector<18x8xf32>
    %80 = arith.addf %76, %79 : vector<18x8xf32>
    %c64 = arith.constant 64 : index
    %c0_42 = arith.constant 0 : index
    %81 = vector.load %arg2[%c64, %c0_42] : memref<3568x128xbf16, #tpu.memory_space<vmem>>, vector<32x8xbf16>
    %82 = arith.truncf %21 : vector<18x32xf32> to vector<18x32xbf16>
    %cst_43 = arith.constant dense<0.000000e+00> : vector<18x8xf32>
    %83 = tpu.matmul %82, %81, %cst_43 {dimension_numbers = #tpu.dot_dimension_numbers<[1], [0], [0], [1], [0, 0, 1, 1], [], []>} : vector<18x32xbf16>, vector<32x8xbf16>, vector<18x8xf32> -> vector<18x8xf32>
    %c120 = arith.constant 120 : index
    %c0_44 = arith.constant 0 : index
    %84 = vector.load %arg2[%c120, %c0_44] : memref<3568x128xbf16, #tpu.memory_space<vmem>>, vector<1x8xbf16>
    %85 = arith.extf %84 : vector<1x8xbf16> to vector<1x8xf32>
    %86 = vector.broadcast %85 : vector<1x8xf32> to vector<18x8xf32>
    %87 = arith.addf %83, %86 : vector<18x8xf32>
    %88 = arith.truncf %73 : vector<18x8xf32> to vector<18x8xbf16>
    %89 = arith.truncf %80 : vector<18x8xf32> to vector<18x8xbf16>
    %cst_45 = arith.constant dense<0.000000e+00> : vector<18x18xf32>
    %90 = tpu.matmul %88, %89, %cst_45 {dimension_numbers = #tpu.dot_dimension_numbers<[1], [1], [0], [0], [0, 0, 1, 0], [], []>} : vector<18x8xbf16>, vector<18x8xbf16>, vector<18x18xf32> -> vector<18x18xf32>
    %cst_46 = arith.constant 0.353553385 : f32
    %91 = vector.broadcast %cst_46 : f32 to vector<18x18xf32>
    %92 = arith.mulf %90, %91 : vector<18x18xf32>
    %93 = arith.addf %92, %59 : vector<18x18xf32>
    %cst_47 = arith.constant dense<0xFF800000> : vector<18xf32>
    %94 = vector.multi_reduction <maximumf>, %93, %cst_47 [1] : vector<18x18xf32> to vector<18xf32>
    %95 = vector.shape_cast %94 : vector<18xf32> to vector<18x1xf32>
    %96 = vector.broadcast %95 : vector<18x1xf32> to vector<18x18xf32>
    %97 = arith.subf %93, %96 : vector<18x18xf32>
    %98 = math.exp %97 : vector<18x18xf32>
    %cst_48 = arith.constant dense<0.000000e+00> : vector<18xf32>
    %99 = vector.multi_reduction <add>, %98, %cst_48 [1] : vector<18x18xf32> to vector<18xf32>
    %100 = vector.shape_cast %99 : vector<18xf32> to vector<18x1xf32>
    %101 = tpu.reciprocal %100 {approx = true} : vector<18x1xf32> -> vector<18x1xf32>
    %102 = vector.broadcast %101 : vector<18x1xf32> to vector<18x18xf32>
    %103 = arith.mulf %98, %102 : vector<18x18xf32>
    %104 = arith.truncf %103 : vector<18x18xf32> to vector<18x18xbf16>
    %105 = arith.truncf %87 : vector<18x8xf32> to vector<18x8xbf16>
    %cst_49 = arith.constant dense<0.000000e+00> : vector<18x8xf32>
    %106 = tpu.matmul %104, %105, %cst_49 {dimension_numbers = #tpu.dot_dimension_numbers<[1], [0], [0], [1], [0, 0, 1, 1], [], []>} : vector<18x18xbf16>, vector<18x8xbf16>, vector<18x8xf32> -> vector<18x8xf32>
    %c96 = arith.constant 96 : index
    %c0_50 = arith.constant 0 : index
    %107 = vector.load %arg2[%c96, %c0_50] : memref<3568x128xbf16, #tpu.memory_space<vmem>>, vector<8x32xbf16>
    %108 = arith.truncf %106 : vector<18x8xf32> to vector<18x8xbf16>
    %cst_51 = arith.constant dense<0.000000e+00> : vector<18x32xf32>
    %109 = tpu.matmul %108, %107, %cst_51 {dimension_numbers = #tpu.dot_dimension_numbers<[1], [0], [0], [1], [0, 0, 1, 1], [], []>} : vector<18x8xbf16>, vector<8x32xbf16>, vector<18x32xf32> -> vector<18x32xf32>
    %110 = arith.addf %66, %109 : vector<18x32xf32>
    %c128_52 = arith.constant 128 : index
    %c0_53 = arith.constant 0 : index
    %111 = vector.load %arg2[%c128_52, %c0_53] : memref<3568x128xbf16, #tpu.memory_space<vmem>>, vector<32x8xbf16>
    %112 = arith.truncf %21 : vector<18x32xf32> to vector<18x32xbf16>
    %cst_54 = arith.constant dense<0.000000e+00> : vector<18x8xf32>
    %113 = tpu.matmul %112, %111, %cst_54 {dimension_numbers = #tpu.dot_dimension_numbers<[1], [0], [0], [1], [0, 0, 1, 1], [], []>} : vector<18x32xbf16>, vector<32x8xbf16>, vector<18x8xf32> -> vector<18x8xf32>
    %c232 = arith.constant 232 : index
    %c0_55 = arith.constant 0 : index
    %114 = vector.load %arg2[%c232, %c0_55] : memref<3568x128xbf16, #tpu.memory_space<vmem>>, vector<1x8xbf16>
    %115 = arith.extf %114 : vector<1x8xbf16> to vector<1x8xf32>
    %116 = vector.broadcast %115 : vector<1x8xf32> to vector<18x8xf32>
    %117 = arith.addf %113, %116 : vector<18x8xf32>
    %c160_56 = arith.constant 160 : index
    %c0_57 = arith.constant 0 : index
    %118 = vector.load %arg2[%c160_56, %c0_57] : memref<3568x128xbf16, #tpu.memory_space<vmem>>, vector<32x8xbf16>
    %119 = arith.truncf %21 : vector<18x32xf32> to vector<18x32xbf16>
    %cst_58 = arith.constant dense<0.000000e+00> : vector<18x8xf32>
    %120 = tpu.matmul %119, %118, %cst_58 {dimension_numbers = #tpu.dot_dimension_numbers<[1], [0], [0], [1], [0, 0, 1, 1], [], []>} : vector<18x32xbf16>, vector<32x8xbf16>, vector<18x8xf32> -> vector<18x8xf32>
    %c240 = arith.constant 240 : index
    %c0_59 = arith.constant 0 : index
    %121 = vector.load %arg2[%c240, %c0_59] : memref<3568x128xbf16, #tpu.memory_space<vmem>>, vector<1x8xbf16>
    %122 = arith.extf %121 : vector<1x8xbf16> to vector<1x8xf32>
    %123 = vector.broadcast %122 : vector<1x8xf32> to vector<18x8xf32>
    %124 = arith.addf %120, %123 : vector<18x8xf32>
    %c192 = arith.constant 192 : index
    %c0_60 = arith.constant 0 : index
    %125 = vector.load %arg2[%c192, %c0_60] : memref<3568x128xbf16, #tpu.memory_space<vmem>>, vector<32x8xbf16>
    %126 = arith.truncf %21 : vector<18x32xf32> to vector<18x32xbf16>
    %cst_61 = arith.constant dense<0.000000e+00> : vector<18x8xf32>
    %127 = tpu.matmul %126, %125, %cst_61 {dimension_numbers = #tpu.dot_dimension_numbers<[1], [0], [0], [1], [0, 0, 1, 1], [], []>} : vector<18x32xbf16>, vector<32x8xbf16>, vector<18x8xf32> -> vector<18x8xf32>
    %c248 = arith.constant 248 : index
    %c0_62 = arith.constant 0 : index
    %128 = vector.load %arg2[%c248, %c0_62] : memref<3568x128xbf16, #tpu.memory_space<vmem>>, vector<1x8xbf16>
    %129 = arith.extf %128 : vector<1x8xbf16> to vector<1x8xf32>
    %130 = vector.broadcast %129 : vector<1x8xf32> to vector<18x8xf32>
    %131 = arith.addf %127, %130 : vector<18x8xf32>
    %132 = arith.truncf %117 : vector<18x8xf32> to vector<18x8xbf16>
    %133 = arith.truncf %124 : vector<18x8xf32> to vector<18x8xbf16>
    %cst_63 = arith.constant dense<0.000000e+00> : vector<18x18xf32>
    %134 = tpu.matmul %132, %133, %cst_63 {dimension_numbers = #tpu.dot_dimension_numbers<[1], [1], [0], [0], [0, 0, 1, 0], [], []>} : vector<18x8xbf16>, vector<18x8xbf16>, vector<18x18xf32> -> vector<18x18xf32>
    %cst_64 = arith.constant 0.353553385 : f32
    %135 = vector.broadcast %cst_64 : f32 to vector<18x18xf32>
    %136 = arith.mulf %134, %135 : vector<18x18xf32>
    %137 = arith.addf %136, %59 : vector<18x18xf32>
    %cst_65 = arith.constant dense<0xFF800000> : vector<18xf32>
    %138 = vector.multi_reduction <maximumf>, %137, %cst_65 [1] : vector<18x18xf32> to vector<18xf32>
    %139 = vector.shape_cast %138 : vector<18xf32> to vector<18x1xf32>
    %140 = vector.broadcast %139 : vector<18x1xf32> to vector<18x18xf32>
    %141 = arith.subf %137, %140 : vector<18x18xf32>
    %142 = math.exp %141 : vector<18x18xf32>
    %cst_66 = arith.constant dense<0.000000e+00> : vector<18xf32>
    %143 = vector.multi_reduction <add>, %142, %cst_66 [1] : vector<18x18xf32> to vector<18xf32>
    %144 = vector.shape_cast %143 : vector<18xf32> to vector<18x1xf32>
    %145 = tpu.reciprocal %144 {approx = true} : vector<18x1xf32> -> vector<18x1xf32>
    %146 = vector.broadcast %145 : vector<18x1xf32> to vector<18x18xf32>
    %147 = arith.mulf %142, %146 : vector<18x18xf32>
    %148 = arith.truncf %147 : vector<18x18xf32> to vector<18x18xbf16>
    %149 = arith.truncf %131 : vector<18x8xf32> to vector<18x8xbf16>
    %cst_67 = arith.constant dense<0.000000e+00> : vector<18x8xf32>
    %150 = tpu.matmul %148, %149, %cst_67 {dimension_numbers = #tpu.dot_dimension_numbers<[1], [0], [0], [1], [0, 0, 1, 1], [], []>} : vector<18x18xbf16>, vector<18x8xbf16>, vector<18x8xf32> -> vector<18x8xf32>
    %c224_68 = arith.constant 224 : index
    %c0_69 = arith.constant 0 : index
    %151 = vector.load %arg2[%c224_68, %c0_69] : memref<3568x128xbf16, #tpu.memory_space<vmem>>, vector<8x32xbf16>
    %152 = arith.truncf %150 : vector<18x8xf32> to vector<18x8xbf16>
    %cst_70 = arith.constant dense<0.000000e+00> : vector<18x32xf32>
    %153 = tpu.matmul %152, %151, %cst_70 {dimension_numbers = #tpu.dot_dimension_numbers<[1], [0], [0], [1], [0, 0, 1, 1], [], []>} : vector<18x8xbf16>, vector<8x32xbf16>, vector<18x32xf32> -> vector<18x32xf32>
    %154 = arith.addf %110, %153 : vector<18x32xf32>
    %c256 = arith.constant 256 : index
    %c0_71 = arith.constant 0 : index
    %155 = vector.load %arg2[%c256, %c0_71] : memref<3568x128xbf16, #tpu.memory_space<vmem>>, vector<32x8xbf16>
    %156 = arith.truncf %21 : vector<18x32xf32> to vector<18x32xbf16>
    %cst_72 = arith.constant dense<0.000000e+00> : vector<18x8xf32>
    %157 = tpu.matmul %156, %155, %cst_72 {dimension_numbers = #tpu.dot_dimension_numbers<[1], [0], [0], [1], [0, 0, 1, 1], [], []>} : vector<18x32xbf16>, vector<32x8xbf16>, vector<18x8xf32> -> vector<18x8xf32>
    %c360 = arith.constant 360 : index
    %c0_73 = arith.constant 0 : index
    %158 = vector.load %arg2[%c360, %c0_73] : memref<3568x128xbf16, #tpu.memory_space<vmem>>, vector<1x8xbf16>
    %159 = arith.extf %158 : vector<1x8xbf16> to vector<1x8xf32>
    %160 = vector.broadcast %159 : vector<1x8xf32> to vector<18x8xf32>
    %161 = arith.addf %157, %160 : vector<18x8xf32>
    %c288 = arith.constant 288 : index
    %c0_74 = arith.constant 0 : index
    %162 = vector.load %arg2[%c288, %c0_74] : memref<3568x128xbf16, #tpu.memory_space<vmem>>, vector<32x8xbf16>
    %163 = arith.truncf %21 : vector<18x32xf32> to vector<18x32xbf16>
    %cst_75 = arith.constant dense<0.000000e+00> : vector<18x8xf32>
    %164 = tpu.matmul %163, %162, %cst_75 {dimension_numbers = #tpu.dot_dimension_numbers<[1], [0], [0], [1], [0, 0, 1, 1], [], []>} : vector<18x32xbf16>, vector<32x8xbf16>, vector<18x8xf32> -> vector<18x8xf32>
    %c368 = arith.constant 368 : index
    %c0_76 = arith.constant 0 : index
    %165 = vector.load %arg2[%c368, %c0_76] : memref<3568x128xbf16, #tpu.memory_space<vmem>>, vector<1x8xbf16>
    %166 = arith.extf %165 : vector<1x8xbf16> to vector<1x8xf32>
    %167 = vector.broadcast %166 : vector<1x8xf32> to vector<18x8xf32>
    %168 = arith.addf %164, %167 : vector<18x8xf32>
    %c320 = arith.constant 320 : index
    %c0_77 = arith.constant 0 : index
    %169 = vector.load %arg2[%c320, %c0_77] : memref<3568x128xbf16, #tpu.memory_space<vmem>>, vector<32x8xbf16>
    %170 = arith.truncf %21 : vector<18x32xf32> to vector<18x32xbf16>
    %cst_78 = arith.constant dense<0.000000e+00> : vector<18x8xf32>
    %171 = tpu.matmul %170, %169, %cst_78 {dimension_numbers = #tpu.dot_dimension_numbers<[1], [0], [0], [1], [0, 0, 1, 1], [], []>} : vector<18x32xbf16>, vector<32x8xbf16>, vector<18x8xf32> -> vector<18x8xf32>
    %c376 = arith.constant 376 : index
    %c0_79 = arith.constant 0 : index
    %172 = vector.load %arg2[%c376, %c0_79] : memref<3568x128xbf16, #tpu.memory_space<vmem>>, vector<1x8xbf16>
    %173 = arith.extf %172 : vector<1x8xbf16> to vector<1x8xf32>
    %174 = vector.broadcast %173 : vector<1x8xf32> to vector<18x8xf32>
    %175 = arith.addf %171, %174 : vector<18x8xf32>
    %176 = arith.truncf %161 : vector<18x8xf32> to vector<18x8xbf16>
    %177 = arith.truncf %168 : vector<18x8xf32> to vector<18x8xbf16>
    %cst_80 = arith.constant dense<0.000000e+00> : vector<18x18xf32>
    %178 = tpu.matmul %176, %177, %cst_80 {dimension_numbers = #tpu.dot_dimension_numbers<[1], [1], [0], [0], [0, 0, 1, 0], [], []>} : vector<18x8xbf16>, vector<18x8xbf16>, vector<18x18xf32> -> vector<18x18xf32>
    %cst_81 = arith.constant 0.353553385 : f32
    %179 = vector.broadcast %cst_81 : f32 to vector<18x18xf32>
    %180 = arith.mulf %178, %179 : vector<18x18xf32>
    %181 = arith.addf %180, %59 : vector<18x18xf32>
    %cst_82 = arith.constant dense<0xFF800000> : vector<18xf32>
    %182 = vector.multi_reduction <maximumf>, %181, %cst_82 [1] : vector<18x18xf32> to vector<18xf32>
    %183 = vector.shape_cast %182 : vector<18xf32> to vector<18x1xf32>
    %184 = vector.broadcast %183 : vector<18x1xf32> to vector<18x18xf32>
    %185 = arith.subf %181, %184 : vector<18x18xf32>
    %186 = math.exp %185 : vector<18x18xf32>
    %cst_83 = arith.constant dense<0.000000e+00> : vector<18xf32>
    %187 = vector.multi_reduction <add>, %186, %cst_83 [1] : vector<18x18xf32> to vector<18xf32>
    %188 = vector.shape_cast %187 : vector<18xf32> to vector<18x1xf32>
    %189 = tpu.reciprocal %188 {approx = true} : vector<18x1xf32> -> vector<18x1xf32>
    %190 = vector.broadcast %189 : vector<18x1xf32> to vector<18x18xf32>
    %191 = arith.mulf %186, %190 : vector<18x18xf32>
    %192 = arith.truncf %191 : vector<18x18xf32> to vector<18x18xbf16>
    %193 = arith.truncf %175 : vector<18x8xf32> to vector<18x8xbf16>
    %cst_84 = arith.constant dense<0.000000e+00> : vector<18x8xf32>
    %194 = tpu.matmul %192, %193, %cst_84 {dimension_numbers = #tpu.dot_dimension_numbers<[1], [0], [0], [1], [0, 0, 1, 1], [], []>} : vector<18x18xbf16>, vector<18x8xbf16>, vector<18x8xf32> -> vector<18x8xf32>
    %c352 = arith.constant 352 : index
    %c0_85 = arith.constant 0 : index
    %195 = vector.load %arg2[%c352, %c0_85] : memref<3568x128xbf16, #tpu.memory_space<vmem>>, vector<8x32xbf16>
    %196 = arith.truncf %194 : vector<18x8xf32> to vector<18x8xbf16>
    %cst_86 = arith.constant dense<0.000000e+00> : vector<18x32xf32>
    %197 = tpu.matmul %196, %195, %cst_86 {dimension_numbers = #tpu.dot_dimension_numbers<[1], [0], [0], [1], [0, 0, 1, 1], [], []>} : vector<18x8xbf16>, vector<8x32xbf16>, vector<18x32xf32> -> vector<18x32xf32>
    %198 = arith.addf %154, %197 : vector<18x32xf32>
    %c384 = arith.constant 384 : index
    %c0_87 = arith.constant 0 : index
    %199 = vector.load %arg2[%c384, %c0_87] : memref<3568x128xbf16, #tpu.memory_space<vmem>>, vector<32x8xbf16>
    %200 = arith.truncf %21 : vector<18x32xf32> to vector<18x32xbf16>
    %cst_88 = arith.constant dense<0.000000e+00> : vector<18x8xf32>
    %201 = tpu.matmul %200, %199, %cst_88 {dimension_numbers = #tpu.dot_dimension_numbers<[1], [0], [0], [1], [0, 0, 1, 1], [], []>} : vector<18x32xbf16>, vector<32x8xbf16>, vector<18x8xf32> -> vector<18x8xf32>
    %c488 = arith.constant 488 : index
    %c0_89 = arith.constant 0 : index
    %202 = vector.load %arg2[%c488, %c0_89] : memref<3568x128xbf16, #tpu.memory_space<vmem>>, vector<1x8xbf16>
    %203 = arith.extf %202 : vector<1x8xbf16> to vector<1x8xf32>
    %204 = vector.broadcast %203 : vector<1x8xf32> to vector<18x8xf32>
    %205 = arith.addf %201, %204 : vector<18x8xf32>
    %c416 = arith.constant 416 : index
    %c0_90 = arith.constant 0 : index
    %206 = vector.load %arg2[%c416, %c0_90] : memref<3568x128xbf16, #tpu.memory_space<vmem>>, vector<32x8xbf16>
    %207 = arith.truncf %21 : vector<18x32xf32> to vector<18x32xbf16>
    %cst_91 = arith.constant dense<0.000000e+00> : vector<18x8xf32>
    %208 = tpu.matmul %207, %206, %cst_91 {dimension_numbers = #tpu.dot_dimension_numbers<[1], [0], [0], [1], [0, 0, 1, 1], [], []>} : vector<18x32xbf16>, vector<32x8xbf16>, vector<18x8xf32> -> vector<18x8xf32>
    %c496 = arith.constant 496 : index
    %c0_92 = arith.constant 0 : index
    %209 = vector.load %arg2[%c496, %c0_92] : memref<3568x128xbf16, #tpu.memory_space<vmem>>, vector<1x8xbf16>
    %210 = arith.extf %209 : vector<1x8xbf16> to vector<1x8xf32>
    %211 = vector.broadcast %210 : vector<1x8xf32> to vector<18x8xf32>
    %212 = arith.addf %208, %211 : vector<18x8xf32>
    %c448 = arith.constant 448 : index
    %c0_93 = arith.constant 0 : index
    %213 = vector.load %arg2[%c448, %c0_93] : memref<3568x128xbf16, #tpu.memory_space<vmem>>, vector<32x8xbf16>
    %214 = arith.truncf %21 : vector<18x32xf32> to vector<18x32xbf16>
    %cst_94 = arith.constant dense<0.000000e+00> : vector<18x8xf32>
    %215 = tpu.matmul %214, %213, %cst_94 {dimension_numbers = #tpu.dot_dimension_numbers<[1], [0], [0], [1], [0, 0, 1, 1], [], []>} : vector<18x32xbf16>, vector<32x8xbf16>, vector<18x8xf32> -> vector<18x8xf32>
    %c504 = arith.constant 504 : index
    %c0_95 = arith.constant 0 : index
    %216 = vector.load %arg2[%c504, %c0_95] : memref<3568x128xbf16, #tpu.memory_space<vmem>>, vector<1x8xbf16>
    %217 = arith.extf %216 : vector<1x8xbf16> to vector<1x8xf32>
    %218 = vector.broadcast %217 : vector<1x8xf32> to vector<18x8xf32>
    %219 = arith.addf %215, %218 : vector<18x8xf32>
    %220 = arith.truncf %205 : vector<18x8xf32> to vector<18x8xbf16>
    %221 = arith.truncf %212 : vector<18x8xf32> to vector<18x8xbf16>
    %cst_96 = arith.constant dense<0.000000e+00> : vector<18x18xf32>
    %222 = tpu.matmul %220, %221, %cst_96 {dimension_numbers = #tpu.dot_dimension_numbers<[1], [1], [0], [0], [0, 0, 1, 0], [], []>} : vector<18x8xbf16>, vector<18x8xbf16>, vector<18x18xf32> -> vector<18x18xf32>
    %cst_97 = arith.constant 0.353553385 : f32
    %223 = vector.broadcast %cst_97 : f32 to vector<18x18xf32>
    %224 = arith.mulf %222, %223 : vector<18x18xf32>
    %225 = arith.addf %224, %59 : vector<18x18xf32>
    %cst_98 = arith.constant dense<0xFF800000> : vector<18xf32>
    %226 = vector.multi_reduction <maximumf>, %225, %cst_98 [1] : vector<18x18xf32> to vector<18xf32>
    %227 = vector.shape_cast %226 : vector<18xf32> to vector<18x1xf32>
    %228 = vector.broadcast %227 : vector<18x1xf32> to vector<18x18xf32>
    %229 = arith.subf %225, %228 : vector<18x18xf32>
    %230 = math.exp %229 : vector<18x18xf32>
    %cst_99 = arith.constant dense<0.000000e+00> : vector<18xf32>
    %231 = vector.multi_reduction <add>, %230, %cst_99 [1] : vector<18x18xf32> to vector<18xf32>
    %232 = vector.shape_cast %231 : vector<18xf32> to vector<18x1xf32>
    %233 = tpu.reciprocal %232 {approx = true} : vector<18x1xf32> -> vector<18x1xf32>
    %234 = vector.broadcast %233 : vector<18x1xf32> to vector<18x18xf32>
    %235 = arith.mulf %230, %234 : vector<18x18xf32>
    %236 = arith.truncf %235 : vector<18x18xf32> to vector<18x18xbf16>
    %237 = arith.truncf %219 : vector<18x8xf32> to vector<18x8xbf16>
    %cst_100 = arith.constant dense<0.000000e+00> : vector<18x8xf32>
    %238 = tpu.matmul %236, %237, %cst_100 {dimension_numbers = #tpu.dot_dimension_numbers<[1], [0], [0], [1], [0, 0, 1, 1], [], []>} : vector<18x18xbf16>, vector<18x8xbf16>, vector<18x8xf32> -> vector<18x8xf32>
    %c480 = arith.constant 480 : index
    %c0_101 = arith.constant 0 : index
    %239 = vector.load %arg2[%c480, %c0_101] : memref<3568x128xbf16, #tpu.memory_space<vmem>>, vector<8x32xbf16>
    %240 = arith.truncf %238 : vector<18x8xf32> to vector<18x8xbf16>
    %cst_102 = arith.constant dense<0.000000e+00> : vector<18x32xf32>
    %241 = tpu.matmul %240, %239, %cst_102 {dimension_numbers = #tpu.dot_dimension_numbers<[1], [0], [0], [1], [0, 0, 1, 1], [], []>} : vector<18x8xbf16>, vector<8x32xbf16>, vector<18x32xf32> -> vector<18x32xf32>
    %242 = arith.addf %198, %241 : vector<18x32xf32>
    %c1032 = arith.constant 1032 : index
    %c0_103 = arith.constant 0 : index
    %243 = vector.load %arg2[%c1032, %c0_103] : memref<3568x128xbf16, #tpu.memory_space<vmem>>, vector<1x32xbf16>
    %244 = arith.extf %243 : vector<1x32xbf16> to vector<1x32xf32>
    %cst_104 = arith.constant 0.000000e+00 : f32
    %245 = vector.broadcast %cst_104 : f32 to vector<10x32xf32>
    %246 = vector.broadcast %244 : vector<1x32xf32> to vector<10x32xf32>
    %247 = arith.addf %246, %245 : vector<10x32xf32>
    %c520 = arith.constant 520 : index
    %c0_105 = arith.constant 0 : index
    %248 = vector.load %arg2[%c520, %c0_105] : memref<3568x128xbf16, #tpu.memory_space<vmem>>, vector<32x8xbf16>
    %249 = arith.truncf %58 : vector<10x32xf32> to vector<10x32xbf16>
    %cst_106 = arith.constant dense<0.000000e+00> : vector<10x8xf32>
    %250 = tpu.matmul %249, %248, %cst_106 {dimension_numbers = #tpu.dot_dimension_numbers<[1], [0], [0], [1], [0, 0, 1, 1], [], []>} : vector<10x32xbf16>, vector<32x8xbf16>, vector<10x8xf32> -> vector<10x8xf32>
    %c624 = arith.constant 624 : index
    %c0_107 = arith.constant 0 : index
    %251 = vector.load %arg2[%c624, %c0_107] : memref<3568x128xbf16, #tpu.memory_space<vmem>>, vector<1x8xbf16>
    %252 = arith.extf %251 : vector<1x8xbf16> to vector<1x8xf32>
    %253 = vector.broadcast %252 : vector<1x8xf32> to vector<10x8xf32>
    %254 = arith.addf %250, %253 : vector<10x8xf32>
    %c552 = arith.constant 552 : index
    %c0_108 = arith.constant 0 : index
    %255 = vector.load %arg2[%c552, %c0_108] : memref<3568x128xbf16, #tpu.memory_space<vmem>>, vector<32x8xbf16>
    %256 = arith.truncf %58 : vector<10x32xf32> to vector<10x32xbf16>
    %cst_109 = arith.constant dense<0.000000e+00> : vector<10x8xf32>
    %257 = tpu.matmul %256, %255, %cst_109 {dimension_numbers = #tpu.dot_dimension_numbers<[1], [0], [0], [1], [0, 0, 1, 1], [], []>} : vector<10x32xbf16>, vector<32x8xbf16>, vector<10x8xf32> -> vector<10x8xf32>
    %c632 = arith.constant 632 : index
    %c0_110 = arith.constant 0 : index
    %258 = vector.load %arg2[%c632, %c0_110] : memref<3568x128xbf16, #tpu.memory_space<vmem>>, vector<1x8xbf16>
    %259 = arith.extf %258 : vector<1x8xbf16> to vector<1x8xf32>
    %260 = vector.broadcast %259 : vector<1x8xf32> to vector<10x8xf32>
    %261 = arith.addf %257, %260 : vector<10x8xf32>
    %c584 = arith.constant 584 : index
    %c0_111 = arith.constant 0 : index
    %262 = vector.load %arg2[%c584, %c0_111] : memref<3568x128xbf16, #tpu.memory_space<vmem>>, vector<32x8xbf16>
    %263 = arith.truncf %58 : vector<10x32xf32> to vector<10x32xbf16>
    %cst_112 = arith.constant dense<0.000000e+00> : vector<10x8xf32>
    %264 = tpu.matmul %263, %262, %cst_112 {dimension_numbers = #tpu.dot_dimension_numbers<[1], [0], [0], [1], [0, 0, 1, 1], [], []>} : vector<10x32xbf16>, vector<32x8xbf16>, vector<10x8xf32> -> vector<10x8xf32>
    %c640 = arith.constant 640 : index
    %c0_113 = arith.constant 0 : index
    %265 = vector.load %arg2[%c640, %c0_113] : memref<3568x128xbf16, #tpu.memory_space<vmem>>, vector<1x8xbf16>
    %266 = arith.extf %265 : vector<1x8xbf16> to vector<1x8xf32>
    %267 = vector.broadcast %266 : vector<1x8xf32> to vector<10x8xf32>
    %268 = arith.addf %264, %267 : vector<10x8xf32>
    %269 = arith.truncf %254 : vector<10x8xf32> to vector<10x8xbf16>
    %270 = arith.truncf %261 : vector<10x8xf32> to vector<10x8xbf16>
    %cst_114 = arith.constant dense<0.000000e+00> : vector<10x10xf32>
    %271 = tpu.matmul %269, %270, %cst_114 {dimension_numbers = #tpu.dot_dimension_numbers<[1], [1], [0], [0], [0, 0, 1, 0], [], []>} : vector<10x8xbf16>, vector<10x8xbf16>, vector<10x10xf32> -> vector<10x10xf32>
    %cst_115 = arith.constant 0.353553385 : f32
    %272 = vector.broadcast %cst_115 : f32 to vector<10x10xf32>
    %273 = arith.mulf %271, %272 : vector<10x10xf32>
    %274 = arith.addf %273, %60 : vector<10x10xf32>
    %cst_116 = arith.constant dense<0xFF800000> : vector<10xf32>
    %275 = vector.multi_reduction <maximumf>, %274, %cst_116 [1] : vector<10x10xf32> to vector<10xf32>
    %276 = vector.shape_cast %275 : vector<10xf32> to vector<10x1xf32>
    %277 = vector.broadcast %276 : vector<10x1xf32> to vector<10x10xf32>
    %278 = arith.subf %274, %277 : vector<10x10xf32>
    %279 = math.exp %278 : vector<10x10xf32>
    %cst_117 = arith.constant dense<0.000000e+00> : vector<10xf32>
    %280 = vector.multi_reduction <add>, %279, %cst_117 [1] : vector<10x10xf32> to vector<10xf32>
    %281 = vector.shape_cast %280 : vector<10xf32> to vector<10x1xf32>
    %282 = tpu.reciprocal %281 {approx = true} : vector<10x1xf32> -> vector<10x1xf32>
    %283 = vector.broadcast %282 : vector<10x1xf32> to vector<10x10xf32>
    %284 = arith.mulf %279, %283 : vector<10x10xf32>
    %285 = arith.truncf %284 : vector<10x10xf32> to vector<10x10xbf16>
    %286 = arith.truncf %268 : vector<10x8xf32> to vector<10x8xbf16>
    %cst_118 = arith.constant dense<0.000000e+00> : vector<10x8xf32>
    %287 = tpu.matmul %285, %286, %cst_118 {dimension_numbers = #tpu.dot_dimension_numbers<[1], [0], [0], [1], [0, 0, 1, 1], [], []>} : vector<10x10xbf16>, vector<10x8xbf16>, vector<10x8xf32> -> vector<10x8xf32>
    %c616 = arith.constant 616 : index
    %c0_119 = arith.constant 0 : index
    %288 = vector.load %arg2[%c616, %c0_119] : memref<3568x128xbf16, #tpu.memory_space<vmem>>, vector<8x32xbf16>
    %289 = arith.truncf %287 : vector<10x8xf32> to vector<10x8xbf16>
    %cst_120 = arith.constant dense<0.000000e+00> : vector<10x32xf32>
    %290 = tpu.matmul %289, %288, %cst_120 {dimension_numbers = #tpu.dot_dimension_numbers<[1], [0], [0], [1], [0, 0, 1, 1], [], []>} : vector<10x8xbf16>, vector<8x32xbf16>, vector<10x32xf32> -> vector<10x32xf32>
    %291 = arith.addf %247, %290 : vector<10x32xf32>
    %c648 = arith.constant 648 : index
    %c0_121 = arith.constant 0 : index
    %292 = vector.load %arg2[%c648, %c0_121] : memref<3568x128xbf16, #tpu.memory_space<vmem>>, vector<32x8xbf16>
    %293 = arith.truncf %58 : vector<10x32xf32> to vector<10x32xbf16>
    %cst_122 = arith.constant dense<0.000000e+00> : vector<10x8xf32>
    %294 = tpu.matmul %293, %292, %cst_122 {dimension_numbers = #tpu.dot_dimension_numbers<[1], [0], [0], [1], [0, 0, 1, 1], [], []>} : vector<10x32xbf16>, vector<32x8xbf16>, vector<10x8xf32> -> vector<10x8xf32>
    %c752 = arith.constant 752 : index
    %c0_123 = arith.constant 0 : index
    %295 = vector.load %arg2[%c752, %c0_123] : memref<3568x128xbf16, #tpu.memory_space<vmem>>, vector<1x8xbf16>
    %296 = arith.extf %295 : vector<1x8xbf16> to vector<1x8xf32>
    %297 = vector.broadcast %296 : vector<1x8xf32> to vector<10x8xf32>
    %298 = arith.addf %294, %297 : vector<10x8xf32>
    %c680 = arith.constant 680 : index
    %c0_124 = arith.constant 0 : index
    %299 = vector.load %arg2[%c680, %c0_124] : memref<3568x128xbf16, #tpu.memory_space<vmem>>, vector<32x8xbf16>
    %300 = arith.truncf %58 : vector<10x32xf32> to vector<10x32xbf16>
    %cst_125 = arith.constant dense<0.000000e+00> : vector<10x8xf32>
    %301 = tpu.matmul %300, %299, %cst_125 {dimension_numbers = #tpu.dot_dimension_numbers<[1], [0], [0], [1], [0, 0, 1, 1], [], []>} : vector<10x32xbf16>, vector<32x8xbf16>, vector<10x8xf32> -> vector<10x8xf32>
    %c760 = arith.constant 760 : index
    %c0_126 = arith.constant 0 : index
    %302 = vector.load %arg2[%c760, %c0_126] : memref<3568x128xbf16, #tpu.memory_space<vmem>>, vector<1x8xbf16>
    %303 = arith.extf %302 : vector<1x8xbf16> to vector<1x8xf32>
    %304 = vector.broadcast %303 : vector<1x8xf32> to vector<10x8xf32>
    %305 = arith.addf %301, %304 : vector<10x8xf32>
    %c712 = arith.constant 712 : index
    %c0_127 = arith.constant 0 : index
    %306 = vector.load %arg2[%c712, %c0_127] : memref<3568x128xbf16, #tpu.memory_space<vmem>>, vector<32x8xbf16>
    %307 = arith.truncf %58 : vector<10x32xf32> to vector<10x32xbf16>
    %cst_128 = arith.constant dense<0.000000e+00> : vector<10x8xf32>
    %308 = tpu.matmul %307, %306, %cst_128 {dimension_numbers = #tpu.dot_dimension_numbers<[1], [0], [0], [1], [0, 0, 1, 1], [], []>} : vector<10x32xbf16>, vector<32x8xbf16>, vector<10x8xf32> -> vector<10x8xf32>
    %c768 = arith.constant 768 : index
    %c0_129 = arith.constant 0 : index
    %309 = vector.load %arg2[%c768, %c0_129] : memref<3568x128xbf16, #tpu.memory_space<vmem>>, vector<1x8xbf16>
    %310 = arith.extf %309 : vector<1x8xbf16> to vector<1x8xf32>
    %311 = vector.broadcast %310 : vector<1x8xf32> to vector<10x8xf32>
    %312 = arith.addf %308, %311 : vector<10x8xf32>
    %313 = arith.truncf %298 : vector<10x8xf32> to vector<10x8xbf16>
    %314 = arith.truncf %305 : vector<10x8xf32> to vector<10x8xbf16>
    %cst_130 = arith.constant dense<0.000000e+00> : vector<10x10xf32>
    %315 = tpu.matmul %313, %314, %cst_130 {dimension_numbers = #tpu.dot_dimension_numbers<[1], [1], [0], [0], [0, 0, 1, 0], [], []>} : vector<10x8xbf16>, vector<10x8xbf16>, vector<10x10xf32> -> vector<10x10xf32>
    %cst_131 = arith.constant 0.353553385 : f32
    %316 = vector.broadcast %cst_131 : f32 to vector<10x10xf32>
    %317 = arith.mulf %315, %316 : vector<10x10xf32>
    %318 = arith.addf %317, %60 : vector<10x10xf32>
    %cst_132 = arith.constant dense<0xFF800000> : vector<10xf32>
    %319 = vector.multi_reduction <maximumf>, %318, %cst_132 [1] : vector<10x10xf32> to vector<10xf32>
    %320 = vector.shape_cast %319 : vector<10xf32> to vector<10x1xf32>
    %321 = vector.broadcast %320 : vector<10x1xf32> to vector<10x10xf32>
    %322 = arith.subf %318, %321 : vector<10x10xf32>
    %323 = math.exp %322 : vector<10x10xf32>
    %cst_133 = arith.constant dense<0.000000e+00> : vector<10xf32>
    %324 = vector.multi_reduction <add>, %323, %cst_133 [1] : vector<10x10xf32> to vector<10xf32>
    %325 = vector.shape_cast %324 : vector<10xf32> to vector<10x1xf32>
    %326 = tpu.reciprocal %325 {approx = true} : vector<10x1xf32> -> vector<10x1xf32>
    %327 = vector.broadcast %326 : vector<10x1xf32> to vector<10x10xf32>
    %328 = arith.mulf %323, %327 : vector<10x10xf32>
    %329 = arith.truncf %328 : vector<10x10xf32> to vector<10x10xbf16>
    %330 = arith.truncf %312 : vector<10x8xf32> to vector<10x8xbf16>
    %cst_134 = arith.constant dense<0.000000e+00> : vector<10x8xf32>
    %331 = tpu.matmul %329, %330, %cst_134 {dimension_numbers = #tpu.dot_dimension_numbers<[1], [0], [0], [1], [0, 0, 1, 1], [], []>} : vector<10x10xbf16>, vector<10x8xbf16>, vector<10x8xf32> -> vector<10x8xf32>
    %c744 = arith.constant 744 : index
    %c0_135 = arith.constant 0 : index
    %332 = vector.load %arg2[%c744, %c0_135] : memref<3568x128xbf16, #tpu.memory_space<vmem>>, vector<8x32xbf16>
    %333 = arith.truncf %331 : vector<10x8xf32> to vector<10x8xbf16>
    %cst_136 = arith.constant dense<0.000000e+00> : vector<10x32xf32>
    %334 = tpu.matmul %333, %332, %cst_136 {dimension_numbers = #tpu.dot_dimension_numbers<[1], [0], [0], [1], [0, 0, 1, 1], [], []>} : vector<10x8xbf16>, vector<8x32xbf16>, vector<10x32xf32> -> vector<10x32xf32>
    %335 = arith.addf %291, %334 : vector<10x32xf32>
    %c776 = arith.constant 776 : index
    %c0_137 = arith.constant 0 : index
    %336 = vector.load %arg2[%c776, %c0_137] : memref<3568x128xbf16, #tpu.memory_space<vmem>>, vector<32x8xbf16>
    %337 = arith.truncf %58 : vector<10x32xf32> to vector<10x32xbf16>
    %cst_138 = arith.constant dense<0.000000e+00> : vector<10x8xf32>
    %338 = tpu.matmul %337, %336, %cst_138 {dimension_numbers = #tpu.dot_dimension_numbers<[1], [0], [0], [1], [0, 0, 1, 1], [], []>} : vector<10x32xbf16>, vector<32x8xbf16>, vector<10x8xf32> -> vector<10x8xf32>
    %c880 = arith.constant 880 : index
    %c0_139 = arith.constant 0 : index
    %339 = vector.load %arg2[%c880, %c0_139] : memref<3568x128xbf16, #tpu.memory_space<vmem>>, vector<1x8xbf16>
    %340 = arith.extf %339 : vector<1x8xbf16> to vector<1x8xf32>
    %341 = vector.broadcast %340 : vector<1x8xf32> to vector<10x8xf32>
    %342 = arith.addf %338, %341 : vector<10x8xf32>
    %c808 = arith.constant 808 : index
    %c0_140 = arith.constant 0 : index
    %343 = vector.load %arg2[%c808, %c0_140] : memref<3568x128xbf16, #tpu.memory_space<vmem>>, vector<32x8xbf16>
    %344 = arith.truncf %58 : vector<10x32xf32> to vector<10x32xbf16>
    %cst_141 = arith.constant dense<0.000000e+00> : vector<10x8xf32>
    %345 = tpu.matmul %344, %343, %cst_141 {dimension_numbers = #tpu.dot_dimension_numbers<[1], [0], [0], [1], [0, 0, 1, 1], [], []>} : vector<10x32xbf16>, vector<32x8xbf16>, vector<10x8xf32> -> vector<10x8xf32>
    %c888 = arith.constant 888 : index
    %c0_142 = arith.constant 0 : index
    %346 = vector.load %arg2[%c888, %c0_142] : memref<3568x128xbf16, #tpu.memory_space<vmem>>, vector<1x8xbf16>
    %347 = arith.extf %346 : vector<1x8xbf16> to vector<1x8xf32>
    %348 = vector.broadcast %347 : vector<1x8xf32> to vector<10x8xf32>
    %349 = arith.addf %345, %348 : vector<10x8xf32>
    %c840 = arith.constant 840 : index
    %c0_143 = arith.constant 0 : index
    %350 = vector.load %arg2[%c840, %c0_143] : memref<3568x128xbf16, #tpu.memory_space<vmem>>, vector<32x8xbf16>
    %351 = arith.truncf %58 : vector<10x32xf32> to vector<10x32xbf16>
    %cst_144 = arith.constant dense<0.000000e+00> : vector<10x8xf32>
    %352 = tpu.matmul %351, %350, %cst_144 {dimension_numbers = #tpu.dot_dimension_numbers<[1], [0], [0], [1], [0, 0, 1, 1], [], []>} : vector<10x32xbf16>, vector<32x8xbf16>, vector<10x8xf32> -> vector<10x8xf32>
    %c896 = arith.constant 896 : index
    %c0_145 = arith.constant 0 : index
    %353 = vector.load %arg2[%c896, %c0_145] : memref<3568x128xbf16, #tpu.memory_space<vmem>>, vector<1x8xbf16>
    %354 = arith.extf %353 : vector<1x8xbf16> to vector<1x8xf32>
    %355 = vector.broadcast %354 : vector<1x8xf32> to vector<10x8xf32>
    %356 = arith.addf %352, %355 : vector<10x8xf32>
    %357 = arith.truncf %342 : vector<10x8xf32> to vector<10x8xbf16>
    %358 = arith.truncf %349 : vector<10x8xf32> to vector<10x8xbf16>
    %cst_146 = arith.constant dense<0.000000e+00> : vector<10x10xf32>
    %359 = tpu.matmul %357, %358, %cst_146 {dimension_numbers = #tpu.dot_dimension_numbers<[1], [1], [0], [0], [0, 0, 1, 0], [], []>} : vector<10x8xbf16>, vector<10x8xbf16>, vector<10x10xf32> -> vector<10x10xf32>
    %cst_147 = arith.constant 0.353553385 : f32
    %360 = vector.broadcast %cst_147 : f32 to vector<10x10xf32>
    %361 = arith.mulf %359, %360 : vector<10x10xf32>
    %362 = arith.addf %361, %60 : vector<10x10xf32>
    %cst_148 = arith.constant dense<0xFF800000> : vector<10xf32>
    %363 = vector.multi_reduction <maximumf>, %362, %cst_148 [1] : vector<10x10xf32> to vector<10xf32>
    %364 = vector.shape_cast %363 : vector<10xf32> to vector<10x1xf32>
    %365 = vector.broadcast %364 : vector<10x1xf32> to vector<10x10xf32>
    %366 = arith.subf %362, %365 : vector<10x10xf32>
    %367 = math.exp %366 : vector<10x10xf32>
    %cst_149 = arith.constant dense<0.000000e+00> : vector<10xf32>
    %368 = vector.multi_reduction <add>, %367, %cst_149 [1] : vector<10x10xf32> to vector<10xf32>
    %369 = vector.shape_cast %368 : vector<10xf32> to vector<10x1xf32>
    %370 = tpu.reciprocal %369 {approx = true} : vector<10x1xf32> -> vector<10x1xf32>
    %371 = vector.broadcast %370 : vector<10x1xf32> to vector<10x10xf32>
    %372 = arith.mulf %367, %371 : vector<10x10xf32>
    %373 = arith.truncf %372 : vector<10x10xf32> to vector<10x10xbf16>
    %374 = arith.truncf %356 : vector<10x8xf32> to vector<10x8xbf16>
    %cst_150 = arith.constant dense<0.000000e+00> : vector<10x8xf32>
    %375 = tpu.matmul %373, %374, %cst_150 {dimension_numbers = #tpu.dot_dimension_numbers<[1], [0], [0], [1], [0, 0, 1, 1], [], []>} : vector<10x10xbf16>, vector<10x8xbf16>, vector<10x8xf32> -> vector<10x8xf32>
    %c872 = arith.constant 872 : index
    %c0_151 = arith.constant 0 : index
    %376 = vector.load %arg2[%c872, %c0_151] : memref<3568x128xbf16, #tpu.memory_space<vmem>>, vector<8x32xbf16>
    %377 = arith.truncf %375 : vector<10x8xf32> to vector<10x8xbf16>
    %cst_152 = arith.constant dense<0.000000e+00> : vector<10x32xf32>
    %378 = tpu.matmul %377, %376, %cst_152 {dimension_numbers = #tpu.dot_dimension_numbers<[1], [0], [0], [1], [0, 0, 1, 1], [], []>} : vector<10x8xbf16>, vector<8x32xbf16>, vector<10x32xf32> -> vector<10x32xf32>
    %379 = arith.addf %335, %378 : vector<10x32xf32>
    %c904 = arith.constant 904 : index
    %c0_153 = arith.constant 0 : index
    %380 = vector.load %arg2[%c904, %c0_153] : memref<3568x128xbf16, #tpu.memory_space<vmem>>, vector<32x8xbf16>
    %381 = arith.truncf %58 : vector<10x32xf32> to vector<10x32xbf16>
    %cst_154 = arith.constant dense<0.000000e+00> : vector<10x8xf32>
    %382 = tpu.matmul %381, %380, %cst_154 {dimension_numbers = #tpu.dot_dimension_numbers<[1], [0], [0], [1], [0, 0, 1, 1], [], []>} : vector<10x32xbf16>, vector<32x8xbf16>, vector<10x8xf32> -> vector<10x8xf32>
    %c1008 = arith.constant 1008 : index
    %c0_155 = arith.constant 0 : index
    %383 = vector.load %arg2[%c1008, %c0_155] : memref<3568x128xbf16, #tpu.memory_space<vmem>>, vector<1x8xbf16>
    %384 = arith.extf %383 : vector<1x8xbf16> to vector<1x8xf32>
    %385 = vector.broadcast %384 : vector<1x8xf32> to vector<10x8xf32>
    %386 = arith.addf %382, %385 : vector<10x8xf32>
    %c936 = arith.constant 936 : index
    %c0_156 = arith.constant 0 : index
    %387 = vector.load %arg2[%c936, %c0_156] : memref<3568x128xbf16, #tpu.memory_space<vmem>>, vector<32x8xbf16>
    %388 = arith.truncf %58 : vector<10x32xf32> to vector<10x32xbf16>
    %cst_157 = arith.constant dense<0.000000e+00> : vector<10x8xf32>
    %389 = tpu.matmul %388, %387, %cst_157 {dimension_numbers = #tpu.dot_dimension_numbers<[1], [0], [0], [1], [0, 0, 1, 1], [], []>} : vector<10x32xbf16>, vector<32x8xbf16>, vector<10x8xf32> -> vector<10x8xf32>
    %c1016 = arith.constant 1016 : index
    %c0_158 = arith.constant 0 : index
    %390 = vector.load %arg2[%c1016, %c0_158] : memref<3568x128xbf16, #tpu.memory_space<vmem>>, vector<1x8xbf16>
    %391 = arith.extf %390 : vector<1x8xbf16> to vector<1x8xf32>
    %392 = vector.broadcast %391 : vector<1x8xf32> to vector<10x8xf32>
    %393 = arith.addf %389, %392 : vector<10x8xf32>
    %c968 = arith.constant 968 : index
    %c0_159 = arith.constant 0 : index
    %394 = vector.load %arg2[%c968, %c0_159] : memref<3568x128xbf16, #tpu.memory_space<vmem>>, vector<32x8xbf16>
    %395 = arith.truncf %58 : vector<10x32xf32> to vector<10x32xbf16>
    %cst_160 = arith.constant dense<0.000000e+00> : vector<10x8xf32>
    %396 = tpu.matmul %395, %394, %cst_160 {dimension_numbers = #tpu.dot_dimension_numbers<[1], [0], [0], [1], [0, 0, 1, 1], [], []>} : vector<10x32xbf16>, vector<32x8xbf16>, vector<10x8xf32> -> vector<10x8xf32>
    %c1024 = arith.constant 1024 : index
    %c0_161 = arith.constant 0 : index
    %397 = vector.load %arg2[%c1024, %c0_161] : memref<3568x128xbf16, #tpu.memory_space<vmem>>, vector<1x8xbf16>
    %398 = arith.extf %397 : vector<1x8xbf16> to vector<1x8xf32>
    %399 = vector.broadcast %398 : vector<1x8xf32> to vector<10x8xf32>
    %400 = arith.addf %396, %399 : vector<10x8xf32>
    %401 = arith.truncf %386 : vector<10x8xf32> to vector<10x8xbf16>
    %402 = arith.truncf %393 : vector<10x8xf32> to vector<10x8xbf16>
    %cst_162 = arith.constant dense<0.000000e+00> : vector<10x10xf32>
    %403 = tpu.matmul %401, %402, %cst_162 {dimension_numbers = #tpu.dot_dimension_numbers<[1], [1], [0], [0], [0, 0, 1, 0], [], []>} : vector<10x8xbf16>, vector<10x8xbf16>, vector<10x10xf32> -> vector<10x10xf32>
    %cst_163 = arith.constant 0.353553385 : f32
    %404 = vector.broadcast %cst_163 : f32 to vector<10x10xf32>
    %405 = arith.mulf %403, %404 : vector<10x10xf32>
    %406 = arith.addf %405, %60 : vector<10x10xf32>
    %cst_164 = arith.constant dense<0xFF800000> : vector<10xf32>
    %407 = vector.multi_reduction <maximumf>, %406, %cst_164 [1] : vector<10x10xf32> to vector<10xf32>
    %408 = vector.shape_cast %407 : vector<10xf32> to vector<10x1xf32>
    %409 = vector.broadcast %408 : vector<10x1xf32> to vector<10x10xf32>
    %410 = arith.subf %406, %409 : vector<10x10xf32>
    %411 = math.exp %410 : vector<10x10xf32>
    %cst_165 = arith.constant dense<0.000000e+00> : vector<10xf32>
    %412 = vector.multi_reduction <add>, %411, %cst_165 [1] : vector<10x10xf32> to vector<10xf32>
    %413 = vector.shape_cast %412 : vector<10xf32> to vector<10x1xf32>
    %414 = tpu.reciprocal %413 {approx = true} : vector<10x1xf32> -> vector<10x1xf32>
    %415 = vector.broadcast %414 : vector<10x1xf32> to vector<10x10xf32>
    %416 = arith.mulf %411, %415 : vector<10x10xf32>
    %417 = arith.truncf %416 : vector<10x10xf32> to vector<10x10xbf16>
    %418 = arith.truncf %400 : vector<10x8xf32> to vector<10x8xbf16>
    %cst_166 = arith.constant dense<0.000000e+00> : vector<10x8xf32>
    %419 = tpu.matmul %417, %418, %cst_166 {dimension_numbers = #tpu.dot_dimension_numbers<[1], [0], [0], [1], [0, 0, 1, 1], [], []>} : vector<10x10xbf16>, vector<10x8xbf16>, vector<10x8xf32> -> vector<10x8xf32>
    %c1000 = arith.constant 1000 : index
    %c0_167 = arith.constant 0 : index
    %420 = vector.load %arg2[%c1000, %c0_167] : memref<3568x128xbf16, #tpu.memory_space<vmem>>, vector<8x32xbf16>
    %421 = arith.truncf %419 : vector<10x8xf32> to vector<10x8xbf16>
    %cst_168 = arith.constant dense<0.000000e+00> : vector<10x32xf32>
    %422 = tpu.matmul %421, %420, %cst_168 {dimension_numbers = #tpu.dot_dimension_numbers<[1], [0], [0], [1], [0, 0, 1, 1], [], []>} : vector<10x8xbf16>, vector<8x32xbf16>, vector<10x32xf32> -> vector<10x32xf32>
    %423 = arith.addf %379, %422 : vector<10x32xf32>
    %cst_169 = arith.constant 0.000000e+00 : f32
    %424 = vector.broadcast %cst_169 : f32 to vector<4x32xf32>
    %c72 = arith.constant 72 : index
    %c0_170 = arith.constant 0 : index
    %425 = vector.load %arg3[%c72, %c0_170] : memref<232x32xf32, #tpu.memory_space<vmem>>, vector<4x18xf32>
    %426 = arith.truncf %425 : vector<4x18xf32> to vector<4x18xbf16>
    %427 = arith.truncf %21 : vector<18x32xf32> to vector<18x32xbf16>
    %cst_171 = arith.constant dense<0.000000e+00> : vector<4x32xf32>
    %428 = tpu.matmul %426, %427, %cst_171 {dimension_numbers = #tpu.dot_dimension_numbers<[1], [0], [0], [1], [0, 0, 1, 1], [], []>} : vector<4x18xbf16>, vector<18x32xbf16>, vector<4x32xf32> -> vector<4x32xf32>
    %cst_172 = arith.constant 0.111111112 : f32
    %429 = vector.broadcast %cst_172 : f32 to vector<4x32xf32>
    %430 = arith.mulf %428, %429 : vector<4x32xf32>
    %431 = arith.addf %424, %430 : vector<4x32xf32>
    %c192_173 = arith.constant 192 : index
    %c0_174 = arith.constant 0 : index
    %432 = vector.load %arg3[%c192_173, %c0_174] : memref<232x32xf32, #tpu.memory_space<vmem>>, vector<4x10xf32>
    %433 = arith.truncf %432 : vector<4x10xf32> to vector<4x10xbf16>
    %434 = arith.truncf %58 : vector<10x32xf32> to vector<10x32xbf16>
    %cst_175 = arith.constant dense<0.000000e+00> : vector<4x32xf32>
    %435 = tpu.matmul %433, %434, %cst_175 {dimension_numbers = #tpu.dot_dimension_numbers<[1], [0], [0], [1], [0, 0, 1, 1], [], []>} : vector<4x10xbf16>, vector<10x32xbf16>, vector<4x32xf32> -> vector<4x32xf32>
    %cst_176 = arith.constant 2.000000e-01 : f32
    %436 = vector.broadcast %cst_176 : f32 to vector<4x32xf32>
    %437 = arith.mulf %435, %436 : vector<4x32xf32>
    %438 = arith.addf %431, %437 : vector<4x32xf32>
    %c1552 = arith.constant 1552 : index
    %c0_177 = arith.constant 0 : index
    %439 = vector.load %arg2[%c1552, %c0_177] : memref<3568x128xbf16, #tpu.memory_space<vmem>>, vector<1x32xbf16>
    %440 = arith.extf %439 : vector<1x32xbf16> to vector<1x32xf32>
    %cst_178 = arith.constant 0.000000e+00 : f32
    %441 = vector.broadcast %cst_178 : f32 to vector<4x32xf32>
    %442 = vector.broadcast %440 : vector<1x32xf32> to vector<4x32xf32>
    %443 = arith.addf %442, %441 : vector<4x32xf32>
    %c1040 = arith.constant 1040 : index
    %c0_179 = arith.constant 0 : index
    %444 = vector.load %arg2[%c1040, %c0_179] : memref<3568x128xbf16, #tpu.memory_space<vmem>>, vector<32x8xbf16>
    %445 = arith.truncf %438 : vector<4x32xf32> to vector<4x32xbf16>
    %cst_180 = arith.constant dense<0.000000e+00> : vector<4x8xf32>
    %446 = tpu.matmul %445, %444, %cst_180 {dimension_numbers = #tpu.dot_dimension_numbers<[1], [0], [0], [1], [0, 0, 1, 1], [], []>} : vector<4x32xbf16>, vector<32x8xbf16>, vector<4x8xf32> -> vector<4x8xf32>
    %c1144 = arith.constant 1144 : index
    %c0_181 = arith.constant 0 : index
    %447 = vector.load %arg2[%c1144, %c0_181] : memref<3568x128xbf16, #tpu.memory_space<vmem>>, vector<1x8xbf16>
    %448 = arith.extf %447 : vector<1x8xbf16> to vector<1x8xf32>
    %449 = vector.broadcast %448 : vector<1x8xf32> to vector<4x8xf32>
    %450 = arith.addf %446, %449 : vector<4x8xf32>
    %c1072 = arith.constant 1072 : index
    %c0_182 = arith.constant 0 : index
    %451 = vector.load %arg2[%c1072, %c0_182] : memref<3568x128xbf16, #tpu.memory_space<vmem>>, vector<32x8xbf16>
    %452 = arith.truncf %438 : vector<4x32xf32> to vector<4x32xbf16>
    %cst_183 = arith.constant dense<0.000000e+00> : vector<4x8xf32>
    %453 = tpu.matmul %452, %451, %cst_183 {dimension_numbers = #tpu.dot_dimension_numbers<[1], [0], [0], [1], [0, 0, 1, 1], [], []>} : vector<4x32xbf16>, vector<32x8xbf16>, vector<4x8xf32> -> vector<4x8xf32>
    %c1152 = arith.constant 1152 : index
    %c0_184 = arith.constant 0 : index
    %454 = vector.load %arg2[%c1152, %c0_184] : memref<3568x128xbf16, #tpu.memory_space<vmem>>, vector<1x8xbf16>
    %455 = arith.extf %454 : vector<1x8xbf16> to vector<1x8xf32>
    %456 = vector.broadcast %455 : vector<1x8xf32> to vector<4x8xf32>
    %457 = arith.addf %453, %456 : vector<4x8xf32>
    %c1104 = arith.constant 1104 : index
    %c0_185 = arith.constant 0 : index
    %458 = vector.load %arg2[%c1104, %c0_185] : memref<3568x128xbf16, #tpu.memory_space<vmem>>, vector<32x8xbf16>
    %459 = arith.truncf %438 : vector<4x32xf32> to vector<4x32xbf16>
    %cst_186 = arith.constant dense<0.000000e+00> : vector<4x8xf32>
    %460 = tpu.matmul %459, %458, %cst_186 {dimension_numbers = #tpu.dot_dimension_numbers<[1], [0], [0], [1], [0, 0, 1, 1], [], []>} : vector<4x32xbf16>, vector<32x8xbf16>, vector<4x8xf32> -> vector<4x8xf32>
    %c1160 = arith.constant 1160 : index
    %c0_187 = arith.constant 0 : index
    %461 = vector.load %arg2[%c1160, %c0_187] : memref<3568x128xbf16, #tpu.memory_space<vmem>>, vector<1x8xbf16>
    %462 = arith.extf %461 : vector<1x8xbf16> to vector<1x8xf32>
    %463 = vector.broadcast %462 : vector<1x8xf32> to vector<4x8xf32>
    %464 = arith.addf %460, %463 : vector<4x8xf32>
    %465 = arith.truncf %450 : vector<4x8xf32> to vector<4x8xbf16>
    %466 = arith.truncf %457 : vector<4x8xf32> to vector<4x8xbf16>
    %cst_188 = arith.constant dense<0.000000e+00> : vector<4x4xf32>
    %467 = tpu.matmul %465, %466, %cst_188 {dimension_numbers = #tpu.dot_dimension_numbers<[1], [1], [0], [0], [0, 0, 1, 0], [], []>} : vector<4x8xbf16>, vector<4x8xbf16>, vector<4x4xf32> -> vector<4x4xf32>
    %cst_189 = arith.constant 0.353553385 : f32
    %468 = vector.broadcast %cst_189 : f32 to vector<4x4xf32>
    %469 = arith.mulf %467, %468 : vector<4x4xf32>
    %470 = arith.addf %469, %61 : vector<4x4xf32>
    %cst_190 = arith.constant dense<0xFF800000> : vector<4xf32>
    %471 = vector.multi_reduction <maximumf>, %470, %cst_190 [1] : vector<4x4xf32> to vector<4xf32>
    %472 = vector.shape_cast %471 : vector<4xf32> to vector<4x1xf32>
    %473 = vector.broadcast %472 : vector<4x1xf32> to vector<4x4xf32>
    %474 = arith.subf %470, %473 : vector<4x4xf32>
    %475 = math.exp %474 : vector<4x4xf32>
    %cst_191 = arith.constant dense<0.000000e+00> : vector<4xf32>
    %476 = vector.multi_reduction <add>, %475, %cst_191 [1] : vector<4x4xf32> to vector<4xf32>
    %477 = vector.shape_cast %476 : vector<4xf32> to vector<4x1xf32>
    %478 = tpu.reciprocal %477 {approx = true} : vector<4x1xf32> -> vector<4x1xf32>
    %479 = vector.broadcast %478 : vector<4x1xf32> to vector<4x4xf32>
    %480 = arith.mulf %475, %479 : vector<4x4xf32>
    %481 = arith.truncf %480 : vector<4x4xf32> to vector<4x4xbf16>
    %482 = arith.truncf %464 : vector<4x8xf32> to vector<4x8xbf16>
    %cst_192 = arith.constant dense<0.000000e+00> : vector<4x8xf32>
    %483 = tpu.matmul %481, %482, %cst_192 {dimension_numbers = #tpu.dot_dimension_numbers<[1], [0], [0], [1], [0, 0, 1, 1], [], []>} : vector<4x4xbf16>, vector<4x8xbf16>, vector<4x8xf32> -> vector<4x8xf32>
    %c1136 = arith.constant 1136 : index
    %c0_193 = arith.constant 0 : index
    %484 = vector.load %arg2[%c1136, %c0_193] : memref<3568x128xbf16, #tpu.memory_space<vmem>>, vector<8x32xbf16>
    %485 = arith.truncf %483 : vector<4x8xf32> to vector<4x8xbf16>
    %cst_194 = arith.constant dense<0.000000e+00> : vector<4x32xf32>
    %486 = tpu.matmul %485, %484, %cst_194 {dimension_numbers = #tpu.dot_dimension_numbers<[1], [0], [0], [1], [0, 0, 1, 1], [], []>} : vector<4x8xbf16>, vector<8x32xbf16>, vector<4x32xf32> -> vector<4x32xf32>
    %487 = arith.addf %443, %486 : vector<4x32xf32>
    %c1168 = arith.constant 1168 : index
    %c0_195 = arith.constant 0 : index
    %488 = vector.load %arg2[%c1168, %c0_195] : memref<3568x128xbf16, #tpu.memory_space<vmem>>, vector<32x8xbf16>
    %489 = arith.truncf %438 : vector<4x32xf32> to vector<4x32xbf16>
    %cst_196 = arith.constant dense<0.000000e+00> : vector<4x8xf32>
    %490 = tpu.matmul %489, %488, %cst_196 {dimension_numbers = #tpu.dot_dimension_numbers<[1], [0], [0], [1], [0, 0, 1, 1], [], []>} : vector<4x32xbf16>, vector<32x8xbf16>, vector<4x8xf32> -> vector<4x8xf32>
    %c1272 = arith.constant 1272 : index
    %c0_197 = arith.constant 0 : index
    %491 = vector.load %arg2[%c1272, %c0_197] : memref<3568x128xbf16, #tpu.memory_space<vmem>>, vector<1x8xbf16>
    %492 = arith.extf %491 : vector<1x8xbf16> to vector<1x8xf32>
    %493 = vector.broadcast %492 : vector<1x8xf32> to vector<4x8xf32>
    %494 = arith.addf %490, %493 : vector<4x8xf32>
    %c1200 = arith.constant 1200 : index
    %c0_198 = arith.constant 0 : index
    %495 = vector.load %arg2[%c1200, %c0_198] : memref<3568x128xbf16, #tpu.memory_space<vmem>>, vector<32x8xbf16>
    %496 = arith.truncf %438 : vector<4x32xf32> to vector<4x32xbf16>
    %cst_199 = arith.constant dense<0.000000e+00> : vector<4x8xf32>
    %497 = tpu.matmul %496, %495, %cst_199 {dimension_numbers = #tpu.dot_dimension_numbers<[1], [0], [0], [1], [0, 0, 1, 1], [], []>} : vector<4x32xbf16>, vector<32x8xbf16>, vector<4x8xf32> -> vector<4x8xf32>
    %c1280 = arith.constant 1280 : index
    %c0_200 = arith.constant 0 : index
    %498 = vector.load %arg2[%c1280, %c0_200] : memref<3568x128xbf16, #tpu.memory_space<vmem>>, vector<1x8xbf16>
    %499 = arith.extf %498 : vector<1x8xbf16> to vector<1x8xf32>
    %500 = vector.broadcast %499 : vector<1x8xf32> to vector<4x8xf32>
    %501 = arith.addf %497, %500 : vector<4x8xf32>
    %c1232 = arith.constant 1232 : index
    %c0_201 = arith.constant 0 : index
    %502 = vector.load %arg2[%c1232, %c0_201] : memref<3568x128xbf16, #tpu.memory_space<vmem>>, vector<32x8xbf16>
    %503 = arith.truncf %438 : vector<4x32xf32> to vector<4x32xbf16>
    %cst_202 = arith.constant dense<0.000000e+00> : vector<4x8xf32>
    %504 = tpu.matmul %503, %502, %cst_202 {dimension_numbers = #tpu.dot_dimension_numbers<[1], [0], [0], [1], [0, 0, 1, 1], [], []>} : vector<4x32xbf16>, vector<32x8xbf16>, vector<4x8xf32> -> vector<4x8xf32>
    %c1288 = arith.constant 1288 : index
    %c0_203 = arith.constant 0 : index
    %505 = vector.load %arg2[%c1288, %c0_203] : memref<3568x128xbf16, #tpu.memory_space<vmem>>, vector<1x8xbf16>
    %506 = arith.extf %505 : vector<1x8xbf16> to vector<1x8xf32>
    %507 = vector.broadcast %506 : vector<1x8xf32> to vector<4x8xf32>
    %508 = arith.addf %504, %507 : vector<4x8xf32>
    %509 = arith.truncf %494 : vector<4x8xf32> to vector<4x8xbf16>
    %510 = arith.truncf %501 : vector<4x8xf32> to vector<4x8xbf16>
    %cst_204 = arith.constant dense<0.000000e+00> : vector<4x4xf32>
    %511 = tpu.matmul %509, %510, %cst_204 {dimension_numbers = #tpu.dot_dimension_numbers<[1], [1], [0], [0], [0, 0, 1, 0], [], []>} : vector<4x8xbf16>, vector<4x8xbf16>, vector<4x4xf32> -> vector<4x4xf32>
    %cst_205 = arith.constant 0.353553385 : f32
    %512 = vector.broadcast %cst_205 : f32 to vector<4x4xf32>
    %513 = arith.mulf %511, %512 : vector<4x4xf32>
    %514 = arith.addf %513, %61 : vector<4x4xf32>
    %cst_206 = arith.constant dense<0xFF800000> : vector<4xf32>
    %515 = vector.multi_reduction <maximumf>, %514, %cst_206 [1] : vector<4x4xf32> to vector<4xf32>
    %516 = vector.shape_cast %515 : vector<4xf32> to vector<4x1xf32>
    %517 = vector.broadcast %516 : vector<4x1xf32> to vector<4x4xf32>
    %518 = arith.subf %514, %517 : vector<4x4xf32>
    %519 = math.exp %518 : vector<4x4xf32>
    %cst_207 = arith.constant dense<0.000000e+00> : vector<4xf32>
    %520 = vector.multi_reduction <add>, %519, %cst_207 [1] : vector<4x4xf32> to vector<4xf32>
    %521 = vector.shape_cast %520 : vector<4xf32> to vector<4x1xf32>
    %522 = tpu.reciprocal %521 {approx = true} : vector<4x1xf32> -> vector<4x1xf32>
    %523 = vector.broadcast %522 : vector<4x1xf32> to vector<4x4xf32>
    %524 = arith.mulf %519, %523 : vector<4x4xf32>
    %525 = arith.truncf %524 : vector<4x4xf32> to vector<4x4xbf16>
    %526 = arith.truncf %508 : vector<4x8xf32> to vector<4x8xbf16>
    %cst_208 = arith.constant dense<0.000000e+00> : vector<4x8xf32>
    %527 = tpu.matmul %525, %526, %cst_208 {dimension_numbers = #tpu.dot_dimension_numbers<[1], [0], [0], [1], [0, 0, 1, 1], [], []>} : vector<4x4xbf16>, vector<4x8xbf16>, vector<4x8xf32> -> vector<4x8xf32>
    %c1264 = arith.constant 1264 : index
    %c0_209 = arith.constant 0 : index
    %528 = vector.load %arg2[%c1264, %c0_209] : memref<3568x128xbf16, #tpu.memory_space<vmem>>, vector<8x32xbf16>
    %529 = arith.truncf %527 : vector<4x8xf32> to vector<4x8xbf16>
    %cst_210 = arith.constant dense<0.000000e+00> : vector<4x32xf32>
    %530 = tpu.matmul %529, %528, %cst_210 {dimension_numbers = #tpu.dot_dimension_numbers<[1], [0], [0], [1], [0, 0, 1, 1], [], []>} : vector<4x8xbf16>, vector<8x32xbf16>, vector<4x32xf32> -> vector<4x32xf32>
    %531 = arith.addf %487, %530 : vector<4x32xf32>
    %c1296 = arith.constant 1296 : index
    %c0_211 = arith.constant 0 : index
    %532 = vector.load %arg2[%c1296, %c0_211] : memref<3568x128xbf16, #tpu.memory_space<vmem>>, vector<32x8xbf16>
    %533 = arith.truncf %438 : vector<4x32xf32> to vector<4x32xbf16>
    %cst_212 = arith.constant dense<0.000000e+00> : vector<4x8xf32>
    %534 = tpu.matmul %533, %532, %cst_212 {dimension_numbers = #tpu.dot_dimension_numbers<[1], [0], [0], [1], [0, 0, 1, 1], [], []>} : vector<4x32xbf16>, vector<32x8xbf16>, vector<4x8xf32> -> vector<4x8xf32>
    %c1400 = arith.constant 1400 : index
    %c0_213 = arith.constant 0 : index
    %535 = vector.load %arg2[%c1400, %c0_213] : memref<3568x128xbf16, #tpu.memory_space<vmem>>, vector<1x8xbf16>
    %536 = arith.extf %535 : vector<1x8xbf16> to vector<1x8xf32>
    %537 = vector.broadcast %536 : vector<1x8xf32> to vector<4x8xf32>
    %538 = arith.addf %534, %537 : vector<4x8xf32>
    %c1328 = arith.constant 1328 : index
    %c0_214 = arith.constant 0 : index
    %539 = vector.load %arg2[%c1328, %c0_214] : memref<3568x128xbf16, #tpu.memory_space<vmem>>, vector<32x8xbf16>
    %540 = arith.truncf %438 : vector<4x32xf32> to vector<4x32xbf16>
    %cst_215 = arith.constant dense<0.000000e+00> : vector<4x8xf32>
    %541 = tpu.matmul %540, %539, %cst_215 {dimension_numbers = #tpu.dot_dimension_numbers<[1], [0], [0], [1], [0, 0, 1, 1], [], []>} : vector<4x32xbf16>, vector<32x8xbf16>, vector<4x8xf32> -> vector<4x8xf32>
    %c1408 = arith.constant 1408 : index
    %c0_216 = arith.constant 0 : index
    %542 = vector.load %arg2[%c1408, %c0_216] : memref<3568x128xbf16, #tpu.memory_space<vmem>>, vector<1x8xbf16>
    %543 = arith.extf %542 : vector<1x8xbf16> to vector<1x8xf32>
    %544 = vector.broadcast %543 : vector<1x8xf32> to vector<4x8xf32>
    %545 = arith.addf %541, %544 : vector<4x8xf32>
    %c1360 = arith.constant 1360 : index
    %c0_217 = arith.constant 0 : index
    %546 = vector.load %arg2[%c1360, %c0_217] : memref<3568x128xbf16, #tpu.memory_space<vmem>>, vector<32x8xbf16>
    %547 = arith.truncf %438 : vector<4x32xf32> to vector<4x32xbf16>
    %cst_218 = arith.constant dense<0.000000e+00> : vector<4x8xf32>
    %548 = tpu.matmul %547, %546, %cst_218 {dimension_numbers = #tpu.dot_dimension_numbers<[1], [0], [0], [1], [0, 0, 1, 1], [], []>} : vector<4x32xbf16>, vector<32x8xbf16>, vector<4x8xf32> -> vector<4x8xf32>
    %c1416 = arith.constant 1416 : index
    %c0_219 = arith.constant 0 : index
    %549 = vector.load %arg2[%c1416, %c0_219] : memref<3568x128xbf16, #tpu.memory_space<vmem>>, vector<1x8xbf16>
    %550 = arith.extf %549 : vector<1x8xbf16> to vector<1x8xf32>
    %551 = vector.broadcast %550 : vector<1x8xf32> to vector<4x8xf32>
    %552 = arith.addf %548, %551 : vector<4x8xf32>
    %553 = arith.truncf %538 : vector<4x8xf32> to vector<4x8xbf16>
    %554 = arith.truncf %545 : vector<4x8xf32> to vector<4x8xbf16>
    %cst_220 = arith.constant dense<0.000000e+00> : vector<4x4xf32>
    %555 = tpu.matmul %553, %554, %cst_220 {dimension_numbers = #tpu.dot_dimension_numbers<[1], [1], [0], [0], [0, 0, 1, 0], [], []>} : vector<4x8xbf16>, vector<4x8xbf16>, vector<4x4xf32> -> vector<4x4xf32>
    %cst_221 = arith.constant 0.353553385 : f32
    %556 = vector.broadcast %cst_221 : f32 to vector<4x4xf32>
    %557 = arith.mulf %555, %556 : vector<4x4xf32>
    %558 = arith.addf %557, %61 : vector<4x4xf32>
    %cst_222 = arith.constant dense<0xFF800000> : vector<4xf32>
    %559 = vector.multi_reduction <maximumf>, %558, %cst_222 [1] : vector<4x4xf32> to vector<4xf32>
    %560 = vector.shape_cast %559 : vector<4xf32> to vector<4x1xf32>
    %561 = vector.broadcast %560 : vector<4x1xf32> to vector<4x4xf32>
    %562 = arith.subf %558, %561 : vector<4x4xf32>
    %563 = math.exp %562 : vector<4x4xf32>
    %cst_223 = arith.constant dense<0.000000e+00> : vector<4xf32>
    %564 = vector.multi_reduction <add>, %563, %cst_223 [1] : vector<4x4xf32> to vector<4xf32>
    %565 = vector.shape_cast %564 : vector<4xf32> to vector<4x1xf32>
    %566 = tpu.reciprocal %565 {approx = true} : vector<4x1xf32> -> vector<4x1xf32>
    %567 = vector.broadcast %566 : vector<4x1xf32> to vector<4x4xf32>
    %568 = arith.mulf %563, %567 : vector<4x4xf32>
    %569 = arith.truncf %568 : vector<4x4xf32> to vector<4x4xbf16>
    %570 = arith.truncf %552 : vector<4x8xf32> to vector<4x8xbf16>
    %cst_224 = arith.constant dense<0.000000e+00> : vector<4x8xf32>
    %571 = tpu.matmul %569, %570, %cst_224 {dimension_numbers = #tpu.dot_dimension_numbers<[1], [0], [0], [1], [0, 0, 1, 1], [], []>} : vector<4x4xbf16>, vector<4x8xbf16>, vector<4x8xf32> -> vector<4x8xf32>
    %c1392 = arith.constant 1392 : index
    %c0_225 = arith.constant 0 : index
    %572 = vector.load %arg2[%c1392, %c0_225] : memref<3568x128xbf16, #tpu.memory_space<vmem>>, vector<8x32xbf16>
    %573 = arith.truncf %571 : vector<4x8xf32> to vector<4x8xbf16>
    %cst_226 = arith.constant dense<0.000000e+00> : vector<4x32xf32>
    %574 = tpu.matmul %573, %572, %cst_226 {dimension_numbers = #tpu.dot_dimension_numbers<[1], [0], [0], [1], [0, 0, 1, 1], [], []>} : vector<4x8xbf16>, vector<8x32xbf16>, vector<4x32xf32> -> vector<4x32xf32>
    %575 = arith.addf %531, %574 : vector<4x32xf32>
    %c1424 = arith.constant 1424 : index
    %c0_227 = arith.constant 0 : index
    %576 = vector.load %arg2[%c1424, %c0_227] : memref<3568x128xbf16, #tpu.memory_space<vmem>>, vector<32x8xbf16>
    %577 = arith.truncf %438 : vector<4x32xf32> to vector<4x32xbf16>
    %cst_228 = arith.constant dense<0.000000e+00> : vector<4x8xf32>
    %578 = tpu.matmul %577, %576, %cst_228 {dimension_numbers = #tpu.dot_dimension_numbers<[1], [0], [0], [1], [0, 0, 1, 1], [], []>} : vector<4x32xbf16>, vector<32x8xbf16>, vector<4x8xf32> -> vector<4x8xf32>
    %c1528 = arith.constant 1528 : index
    %c0_229 = arith.constant 0 : index
    %579 = vector.load %arg2[%c1528, %c0_229] : memref<3568x128xbf16, #tpu.memory_space<vmem>>, vector<1x8xbf16>
    %580 = arith.extf %579 : vector<1x8xbf16> to vector<1x8xf32>
    %581 = vector.broadcast %580 : vector<1x8xf32> to vector<4x8xf32>
    %582 = arith.addf %578, %581 : vector<4x8xf32>
    %c1456 = arith.constant 1456 : index
    %c0_230 = arith.constant 0 : index
    %583 = vector.load %arg2[%c1456, %c0_230] : memref<3568x128xbf16, #tpu.memory_space<vmem>>, vector<32x8xbf16>
    %584 = arith.truncf %438 : vector<4x32xf32> to vector<4x32xbf16>
    %cst_231 = arith.constant dense<0.000000e+00> : vector<4x8xf32>
    %585 = tpu.matmul %584, %583, %cst_231 {dimension_numbers = #tpu.dot_dimension_numbers<[1], [0], [0], [1], [0, 0, 1, 1], [], []>} : vector<4x32xbf16>, vector<32x8xbf16>, vector<4x8xf32> -> vector<4x8xf32>
    %c1536 = arith.constant 1536 : index
    %c0_232 = arith.constant 0 : index
    %586 = vector.load %arg2[%c1536, %c0_232] : memref<3568x128xbf16, #tpu.memory_space<vmem>>, vector<1x8xbf16>
    %587 = arith.extf %586 : vector<1x8xbf16> to vector<1x8xf32>
    %588 = vector.broadcast %587 : vector<1x8xf32> to vector<4x8xf32>
    %589 = arith.addf %585, %588 : vector<4x8xf32>
    %c1488 = arith.constant 1488 : index
    %c0_233 = arith.constant 0 : index
    %590 = vector.load %arg2[%c1488, %c0_233] : memref<3568x128xbf16, #tpu.memory_space<vmem>>, vector<32x8xbf16>
    %591 = arith.truncf %438 : vector<4x32xf32> to vector<4x32xbf16>
    %cst_234 = arith.constant dense<0.000000e+00> : vector<4x8xf32>
    %592 = tpu.matmul %591, %590, %cst_234 {dimension_numbers = #tpu.dot_dimension_numbers<[1], [0], [0], [1], [0, 0, 1, 1], [], []>} : vector<4x32xbf16>, vector<32x8xbf16>, vector<4x8xf32> -> vector<4x8xf32>
    %c1544 = arith.constant 1544 : index
    %c0_235 = arith.constant 0 : index
    %593 = vector.load %arg2[%c1544, %c0_235] : memref<3568x128xbf16, #tpu.memory_space<vmem>>, vector<1x8xbf16>
    %594 = arith.extf %593 : vector<1x8xbf16> to vector<1x8xf32>
    %595 = vector.broadcast %594 : vector<1x8xf32> to vector<4x8xf32>
    %596 = arith.addf %592, %595 : vector<4x8xf32>
    %597 = arith.truncf %582 : vector<4x8xf32> to vector<4x8xbf16>
    %598 = arith.truncf %589 : vector<4x8xf32> to vector<4x8xbf16>
    %cst_236 = arith.constant dense<0.000000e+00> : vector<4x4xf32>
    %599 = tpu.matmul %597, %598, %cst_236 {dimension_numbers = #tpu.dot_dimension_numbers<[1], [1], [0], [0], [0, 0, 1, 0], [], []>} : vector<4x8xbf16>, vector<4x8xbf16>, vector<4x4xf32> -> vector<4x4xf32>
    %cst_237 = arith.constant 0.353553385 : f32
    %600 = vector.broadcast %cst_237 : f32 to vector<4x4xf32>
    %601 = arith.mulf %599, %600 : vector<4x4xf32>
    %602 = arith.addf %601, %61 : vector<4x4xf32>
    %cst_238 = arith.constant dense<0xFF800000> : vector<4xf32>
    %603 = vector.multi_reduction <maximumf>, %602, %cst_238 [1] : vector<4x4xf32> to vector<4xf32>
    %604 = vector.shape_cast %603 : vector<4xf32> to vector<4x1xf32>
    %605 = vector.broadcast %604 : vector<4x1xf32> to vector<4x4xf32>
    %606 = arith.subf %602, %605 : vector<4x4xf32>
    %607 = math.exp %606 : vector<4x4xf32>
    %cst_239 = arith.constant dense<0.000000e+00> : vector<4xf32>
    %608 = vector.multi_reduction <add>, %607, %cst_239 [1] : vector<4x4xf32> to vector<4xf32>
    %609 = vector.shape_cast %608 : vector<4xf32> to vector<4x1xf32>
    %610 = tpu.reciprocal %609 {approx = true} : vector<4x1xf32> -> vector<4x1xf32>
    %611 = vector.broadcast %610 : vector<4x1xf32> to vector<4x4xf32>
    %612 = arith.mulf %607, %611 : vector<4x4xf32>
    %613 = arith.truncf %612 : vector<4x4xf32> to vector<4x4xbf16>
    %614 = arith.truncf %596 : vector<4x8xf32> to vector<4x8xbf16>
    %cst_240 = arith.constant dense<0.000000e+00> : vector<4x8xf32>
    %615 = tpu.matmul %613, %614, %cst_240 {dimension_numbers = #tpu.dot_dimension_numbers<[1], [0], [0], [1], [0, 0, 1, 1], [], []>} : vector<4x4xbf16>, vector<4x8xbf16>, vector<4x8xf32> -> vector<4x8xf32>
    %c1520 = arith.constant 1520 : index
    %c0_241 = arith.constant 0 : index
    %616 = vector.load %arg2[%c1520, %c0_241] : memref<3568x128xbf16, #tpu.memory_space<vmem>>, vector<8x32xbf16>
    %617 = arith.truncf %615 : vector<4x8xf32> to vector<4x8xbf16>
    %cst_242 = arith.constant dense<0.000000e+00> : vector<4x32xf32>
    %618 = tpu.matmul %617, %616, %cst_242 {dimension_numbers = #tpu.dot_dimension_numbers<[1], [0], [0], [1], [0, 0, 1, 1], [], []>} : vector<4x8xbf16>, vector<8x32xbf16>, vector<4x32xf32> -> vector<4x32xf32>
    %619 = arith.addf %575, %618 : vector<4x32xf32>
    %c80 = arith.constant 80 : index
    %c0_243 = arith.constant 0 : index
    %620 = vector.load %arg3[%c80, %c0_243] : memref<232x32xf32, #tpu.memory_space<vmem>>, vector<18x4xf32>
    %621 = arith.truncf %620 : vector<18x4xf32> to vector<18x4xbf16>
    %622 = arith.truncf %619 : vector<4x32xf32> to vector<4x32xbf16>
    %cst_244 = arith.constant dense<0.000000e+00> : vector<18x32xf32>
    %623 = tpu.matmul %621, %622, %cst_244 {dimension_numbers = #tpu.dot_dimension_numbers<[1], [0], [0], [1], [0, 0, 1, 1], [], []>} : vector<18x4xbf16>, vector<4x32xbf16>, vector<18x32xf32> -> vector<18x32xf32>
    %624 = arith.addf %242, %623 : vector<18x32xf32>
    %c200 = arith.constant 200 : index
    %c0_245 = arith.constant 0 : index
    %625 = vector.load %arg3[%c200, %c0_245] : memref<232x32xf32, #tpu.memory_space<vmem>>, vector<10x4xf32>
    %626 = arith.truncf %625 : vector<10x4xf32> to vector<10x4xbf16>
    %627 = arith.truncf %619 : vector<4x32xf32> to vector<4x32xbf16>
    %cst_246 = arith.constant dense<0.000000e+00> : vector<10x32xf32>
    %628 = tpu.matmul %626, %627, %cst_246 {dimension_numbers = #tpu.dot_dimension_numbers<[1], [0], [0], [1], [0, 0, 1, 1], [], []>} : vector<10x4xbf16>, vector<4x32xbf16>, vector<10x32xf32> -> vector<10x32xf32>
    %629 = arith.addf %423, %628 : vector<10x32xf32>
    %630 = arith.addf %21, %624 : vector<18x32xf32>
    %cst_247 = arith.constant dense<0.000000e+00> : vector<18xf32>
    %631 = vector.multi_reduction <add>, %630, %cst_247 [1] : vector<18x32xf32> to vector<18xf32>
    %632 = vector.shape_cast %631 : vector<18xf32> to vector<18x1xf32>
    %cst_248 = arith.constant 3.200000e+01 : f32
    %633 = vector.broadcast %cst_248 : f32 to vector<18x1xf32>
    %634 = arith.divf %632, %633 : vector<18x1xf32>
    %635 = vector.broadcast %634 : vector<18x1xf32> to vector<18x32xf32>
    %636 = arith.subf %630, %635 : vector<18x32xf32>
    %637 = arith.mulf %636, %636 : vector<18x32xf32>
    %cst_249 = arith.constant dense<0.000000e+00> : vector<18xf32>
    %638 = vector.multi_reduction <add>, %637, %cst_249 [1] : vector<18x32xf32> to vector<18xf32>
    %639 = vector.shape_cast %638 : vector<18xf32> to vector<18x1xf32>
    %cst_250 = arith.constant 3.200000e+01 : f32
    %640 = vector.broadcast %cst_250 : f32 to vector<18x1xf32>
    %641 = arith.divf %639, %640 : vector<18x1xf32>
    %cst_251 = arith.constant 9.99999974E-6 : f32
    %642 = vector.broadcast %cst_251 : f32 to vector<18x1xf32>
    %643 = arith.addf %641, %642 : vector<18x1xf32>
    %644 = math.rsqrt %643 : vector<18x1xf32>
    %645 = vector.broadcast %644 : vector<18x1xf32> to vector<18x32xf32>
    %646 = arith.mulf %636, %645 : vector<18x32xf32>
    %c3344 = arith.constant 3344 : index
    %c0_252 = arith.constant 0 : index
    %647 = vector.load %arg2[%c3344, %c0_252] : memref<3568x128xbf16, #tpu.memory_space<vmem>>, vector<1x32xbf16>
    %648 = arith.extf %647 : vector<1x32xbf16> to vector<1x32xf32>
    %649 = vector.broadcast %648 : vector<1x32xf32> to vector<18x32xf32>
    %650 = arith.mulf %646, %649 : vector<18x32xf32>
    %c3352 = arith.constant 3352 : index
    %c0_253 = arith.constant 0 : index
    %651 = vector.load %arg2[%c3352, %c0_253] : memref<3568x128xbf16, #tpu.memory_space<vmem>>, vector<1x32xbf16>
    %652 = arith.extf %651 : vector<1x32xbf16> to vector<1x32xf32>
    %653 = vector.broadcast %652 : vector<1x32xf32> to vector<18x32xf32>
    %654 = arith.addf %650, %653 : vector<18x32xf32>
    %c3120 = arith.constant 3120 : index
    %c0_254 = arith.constant 0 : index
    %655 = vector.load %arg2[%c3120, %c0_254] : memref<3568x128xbf16, #tpu.memory_space<vmem>>, vector<32x64xbf16>
    %656 = arith.truncf %654 : vector<18x32xf32> to vector<18x32xbf16>
    %cst_255 = arith.constant dense<0.000000e+00> : vector<18x64xf32>
    %657 = tpu.matmul %656, %655, %cst_255 {dimension_numbers = #tpu.dot_dimension_numbers<[1], [0], [0], [1], [0, 0, 1, 1], [], []>} : vector<18x32xbf16>, vector<32x64xbf16>, vector<18x64xf32> -> vector<18x64xf32>
    %c3152 = arith.constant 3152 : index
    %c0_256 = arith.constant 0 : index
    %658 = vector.load %arg2[%c3152, %c0_256] : memref<3568x128xbf16, #tpu.memory_space<vmem>>, vector<1x64xbf16>
    %659 = arith.extf %658 : vector<1x64xbf16> to vector<1x64xf32>
    %660 = vector.broadcast %659 : vector<1x64xf32> to vector<18x64xf32>
    %661 = arith.addf %657, %660 : vector<18x64xf32>
    %cst_257 = arith.constant 5.000000e-01 : f32
    %662 = vector.broadcast %cst_257 : f32 to vector<18x64xf32>
    %663 = arith.mulf %662, %661 : vector<18x64xf32>
    %cst_258 = arith.constant 4.471500e-02 : f32
    %664 = vector.broadcast %cst_258 : f32 to vector<18x64xf32>
    %665 = arith.mulf %664, %661 : vector<18x64xf32>
    %666 = arith.mulf %665, %661 : vector<18x64xf32>
    %667 = arith.mulf %666, %661 : vector<18x64xf32>
    %668 = arith.addf %661, %667 : vector<18x64xf32>
    %cst_259 = arith.constant 0.797884583 : f32
    %669 = vector.broadcast %cst_259 : f32 to vector<18x64xf32>
    %670 = arith.mulf %669, %668 : vector<18x64xf32>
    %671 = math.tanh %670 : vector<18x64xf32>
    %cst_260 = arith.constant 1.000000e+00 : f32
    %672 = vector.broadcast %cst_260 : f32 to vector<18x64xf32>
    %673 = arith.addf %672, %671 : vector<18x64xf32>
    %674 = arith.mulf %663, %673 : vector<18x64xf32>
    %c3160 = arith.constant 3160 : index
    %c0_261 = arith.constant 0 : index
    %675 = vector.load %arg2[%c3160, %c0_261] : memref<3568x128xbf16, #tpu.memory_space<vmem>>, vector<64x32xbf16>
    %676 = arith.truncf %674 : vector<18x64xf32> to vector<18x64xbf16>
    %cst_262 = arith.constant dense<0.000000e+00> : vector<18x32xf32>
    %677 = tpu.matmul %676, %675, %cst_262 {dimension_numbers = #tpu.dot_dimension_numbers<[1], [0], [0], [1], [0, 0, 1, 1], [], []>} : vector<18x64xbf16>, vector<64x32xbf16>, vector<18x32xf32> -> vector<18x32xf32>
    %c3224 = arith.constant 3224 : index
    %c0_263 = arith.constant 0 : index
    %678 = vector.load %arg2[%c3224, %c0_263] : memref<3568x128xbf16, #tpu.memory_space<vmem>>, vector<1x32xbf16>
    %679 = arith.extf %678 : vector<1x32xbf16> to vector<1x32xf32>
    %680 = vector.broadcast %679 : vector<1x32xf32> to vector<18x32xf32>
    %681 = arith.addf %677, %680 : vector<18x32xf32>
    %682 = arith.addf %654, %681 : vector<18x32xf32>
    %cst_264 = arith.constant dense<0.000000e+00> : vector<18xf32>
    %683 = vector.multi_reduction <add>, %682, %cst_264 [1] : vector<18x32xf32> to vector<18xf32>
    %684 = vector.shape_cast %683 : vector<18xf32> to vector<18x1xf32>
    %cst_265 = arith.constant 3.200000e+01 : f32
    %685 = vector.broadcast %cst_265 : f32 to vector<18x1xf32>
    %686 = arith.divf %684, %685 : vector<18x1xf32>
    %687 = vector.broadcast %686 : vector<18x1xf32> to vector<18x32xf32>
    %688 = arith.subf %682, %687 : vector<18x32xf32>
    %689 = arith.mulf %688, %688 : vector<18x32xf32>
    %cst_266 = arith.constant dense<0.000000e+00> : vector<18xf32>
    %690 = vector.multi_reduction <add>, %689, %cst_266 [1] : vector<18x32xf32> to vector<18xf32>
    %691 = vector.shape_cast %690 : vector<18xf32> to vector<18x1xf32>
    %cst_267 = arith.constant 3.200000e+01 : f32
    %692 = vector.broadcast %cst_267 : f32 to vector<18x1xf32>
    %693 = arith.divf %691, %692 : vector<18x1xf32>
    %cst_268 = arith.constant 9.99999974E-6 : f32
    %694 = vector.broadcast %cst_268 : f32 to vector<18x1xf32>
    %695 = arith.addf %693, %694 : vector<18x1xf32>
    %696 = math.rsqrt %695 : vector<18x1xf32>
    %697 = vector.broadcast %696 : vector<18x1xf32> to vector<18x32xf32>
    %698 = arith.mulf %688, %697 : vector<18x32xf32>
    %c3360 = arith.constant 3360 : index
    %c0_269 = arith.constant 0 : index
    %699 = vector.load %arg2[%c3360, %c0_269] : memref<3568x128xbf16, #tpu.memory_space<vmem>>, vector<1x32xbf16>
    %700 = arith.extf %699 : vector<1x32xbf16> to vector<1x32xf32>
    %701 = vector.broadcast %700 : vector<1x32xf32> to vector<18x32xf32>
    %702 = arith.mulf %698, %701 : vector<18x32xf32>
    %c3368 = arith.constant 3368 : index
    %c0_270 = arith.constant 0 : index
    %703 = vector.load %arg2[%c3368, %c0_270] : memref<3568x128xbf16, #tpu.memory_space<vmem>>, vector<1x32xbf16>
    %704 = arith.extf %703 : vector<1x32xbf16> to vector<1x32xf32>
    %705 = vector.broadcast %704 : vector<1x32xf32> to vector<18x32xf32>
    %706 = arith.addf %702, %705 : vector<18x32xf32>
    %707 = arith.addf %58, %629 : vector<10x32xf32>
    %cst_271 = arith.constant dense<0.000000e+00> : vector<10xf32>
    %708 = vector.multi_reduction <add>, %707, %cst_271 [1] : vector<10x32xf32> to vector<10xf32>
    %709 = vector.shape_cast %708 : vector<10xf32> to vector<10x1xf32>
    %cst_272 = arith.constant 3.200000e+01 : f32
    %710 = vector.broadcast %cst_272 : f32 to vector<10x1xf32>
    %711 = arith.divf %709, %710 : vector<10x1xf32>
    %712 = vector.broadcast %711 : vector<10x1xf32> to vector<10x32xf32>
    %713 = arith.subf %707, %712 : vector<10x32xf32>
    %714 = arith.mulf %713, %713 : vector<10x32xf32>
    %cst_273 = arith.constant dense<0.000000e+00> : vector<10xf32>
    %715 = vector.multi_reduction <add>, %714, %cst_273 [1] : vector<10x32xf32> to vector<10xf32>
    %716 = vector.shape_cast %715 : vector<10xf32> to vector<10x1xf32>
    %cst_274 = arith.constant 3.200000e+01 : f32
    %717 = vector.broadcast %cst_274 : f32 to vector<10x1xf32>
    %718 = arith.divf %716, %717 : vector<10x1xf32>
    %cst_275 = arith.constant 9.99999974E-6 : f32
    %719 = vector.broadcast %cst_275 : f32 to vector<10x1xf32>
    %720 = arith.addf %718, %719 : vector<10x1xf32>
    %721 = math.rsqrt %720 : vector<10x1xf32>
    %722 = vector.broadcast %721 : vector<10x1xf32> to vector<10x32xf32>
    %723 = arith.mulf %713, %722 : vector<10x32xf32>
    %c3344_276 = arith.constant 3344 : index
    %c0_277 = arith.constant 0 : index
    %724 = vector.load %arg2[%c3344_276, %c0_277] : memref<3568x128xbf16, #tpu.memory_space<vmem>>, vector<1x32xbf16>
    %725 = arith.extf %724 : vector<1x32xbf16> to vector<1x32xf32>
    %726 = vector.broadcast %725 : vector<1x32xf32> to vector<10x32xf32>
    %727 = arith.mulf %723, %726 : vector<10x32xf32>
    %c3352_278 = arith.constant 3352 : index
    %c0_279 = arith.constant 0 : index
    %728 = vector.load %arg2[%c3352_278, %c0_279] : memref<3568x128xbf16, #tpu.memory_space<vmem>>, vector<1x32xbf16>
    %729 = arith.extf %728 : vector<1x32xbf16> to vector<1x32xf32>
    %730 = vector.broadcast %729 : vector<1x32xf32> to vector<10x32xf32>
    %731 = arith.addf %727, %730 : vector<10x32xf32>
    %c3120_280 = arith.constant 3120 : index
    %c0_281 = arith.constant 0 : index
    %732 = vector.load %arg2[%c3120_280, %c0_281] : memref<3568x128xbf16, #tpu.memory_space<vmem>>, vector<32x64xbf16>
    %733 = arith.truncf %731 : vector<10x32xf32> to vector<10x32xbf16>
    %cst_282 = arith.constant dense<0.000000e+00> : vector<10x64xf32>
    %734 = tpu.matmul %733, %732, %cst_282 {dimension_numbers = #tpu.dot_dimension_numbers<[1], [0], [0], [1], [0, 0, 1, 1], [], []>} : vector<10x32xbf16>, vector<32x64xbf16>, vector<10x64xf32> -> vector<10x64xf32>
    %c3152_283 = arith.constant 3152 : index
    %c0_284 = arith.constant 0 : index
    %735 = vector.load %arg2[%c3152_283, %c0_284] : memref<3568x128xbf16, #tpu.memory_space<vmem>>, vector<1x64xbf16>
    %736 = arith.extf %735 : vector<1x64xbf16> to vector<1x64xf32>
    %737 = vector.broadcast %736 : vector<1x64xf32> to vector<10x64xf32>
    %738 = arith.addf %734, %737 : vector<10x64xf32>
    %cst_285 = arith.constant 5.000000e-01 : f32
    %739 = vector.broadcast %cst_285 : f32 to vector<10x64xf32>
    %740 = arith.mulf %739, %738 : vector<10x64xf32>
    %cst_286 = arith.constant 4.471500e-02 : f32
    %741 = vector.broadcast %cst_286 : f32 to vector<10x64xf32>
    %742 = arith.mulf %741, %738 : vector<10x64xf32>
    %743 = arith.mulf %742, %738 : vector<10x64xf32>
    %744 = arith.mulf %743, %738 : vector<10x64xf32>
    %745 = arith.addf %738, %744 : vector<10x64xf32>
    %cst_287 = arith.constant 0.797884583 : f32
    %746 = vector.broadcast %cst_287 : f32 to vector<10x64xf32>
    %747 = arith.mulf %746, %745 : vector<10x64xf32>
    %748 = math.tanh %747 : vector<10x64xf32>
    %cst_288 = arith.constant 1.000000e+00 : f32
    %749 = vector.broadcast %cst_288 : f32 to vector<10x64xf32>
    %750 = arith.addf %749, %748 : vector<10x64xf32>
    %751 = arith.mulf %740, %750 : vector<10x64xf32>
    %c3160_289 = arith.constant 3160 : index
    %c0_290 = arith.constant 0 : index
    %752 = vector.load %arg2[%c3160_289, %c0_290] : memref<3568x128xbf16, #tpu.memory_space<vmem>>, vector<64x32xbf16>
    %753 = arith.truncf %751 : vector<10x64xf32> to vector<10x64xbf16>
    %cst_291 = arith.constant dense<0.000000e+00> : vector<10x32xf32>
    %754 = tpu.matmul %753, %752, %cst_291 {dimension_numbers = #tpu.dot_dimension_numbers<[1], [0], [0], [1], [0, 0, 1, 1], [], []>} : vector<10x64xbf16>, vector<64x32xbf16>, vector<10x32xf32> -> vector<10x32xf32>
    %c3224_292 = arith.constant 3224 : index
    %c0_293 = arith.constant 0 : index
    %755 = vector.load %arg2[%c3224_292, %c0_293] : memref<3568x128xbf16, #tpu.memory_space<vmem>>, vector<1x32xbf16>
    %756 = arith.extf %755 : vector<1x32xbf16> to vector<1x32xf32>
    %757 = vector.broadcast %756 : vector<1x32xf32> to vector<10x32xf32>
    %758 = arith.addf %754, %757 : vector<10x32xf32>
    %759 = arith.addf %731, %758 : vector<10x32xf32>
    %cst_294 = arith.constant dense<0.000000e+00> : vector<10xf32>
    %760 = vector.multi_reduction <add>, %759, %cst_294 [1] : vector<10x32xf32> to vector<10xf32>
    %761 = vector.shape_cast %760 : vector<10xf32> to vector<10x1xf32>
    %cst_295 = arith.constant 3.200000e+01 : f32
    %762 = vector.broadcast %cst_295 : f32 to vector<10x1xf32>
    %763 = arith.divf %761, %762 : vector<10x1xf32>
    %764 = vector.broadcast %763 : vector<10x1xf32> to vector<10x32xf32>
    %765 = arith.subf %759, %764 : vector<10x32xf32>
    %766 = arith.mulf %765, %765 : vector<10x32xf32>
    %cst_296 = arith.constant dense<0.000000e+00> : vector<10xf32>
    %767 = vector.multi_reduction <add>, %766, %cst_296 [1] : vector<10x32xf32> to vector<10xf32>
    %768 = vector.shape_cast %767 : vector<10xf32> to vector<10x1xf32>
    %cst_297 = arith.constant 3.200000e+01 : f32
    %769 = vector.broadcast %cst_297 : f32 to vector<10x1xf32>
    %770 = arith.divf %768, %769 : vector<10x1xf32>
    %cst_298 = arith.constant 9.99999974E-6 : f32
    %771 = vector.broadcast %cst_298 : f32 to vector<10x1xf32>
    %772 = arith.addf %770, %771 : vector<10x1xf32>
    %773 = math.rsqrt %772 : vector<10x1xf32>
    %774 = vector.broadcast %773 : vector<10x1xf32> to vector<10x32xf32>
    %775 = arith.mulf %765, %774 : vector<10x32xf32>
    %c3360_299 = arith.constant 3360 : index
    %c0_300 = arith.constant 0 : index
    %776 = vector.load %arg2[%c3360_299, %c0_300] : memref<3568x128xbf16, #tpu.memory_space<vmem>>, vector<1x32xbf16>
    %777 = arith.extf %776 : vector<1x32xbf16> to vector<1x32xf32>
    %778 = vector.broadcast %777 : vector<1x32xf32> to vector<10x32xf32>
    %779 = arith.mulf %775, %778 : vector<10x32xf32>
    %c3368_301 = arith.constant 3368 : index
    %c0_302 = arith.constant 0 : index
    %780 = vector.load %arg2[%c3368_301, %c0_302] : memref<3568x128xbf16, #tpu.memory_space<vmem>>, vector<1x32xbf16>
    %781 = arith.extf %780 : vector<1x32xbf16> to vector<1x32xf32>
    %782 = vector.broadcast %781 : vector<1x32xf32> to vector<10x32xf32>
    %783 = arith.addf %779, %782 : vector<10x32xf32>
    %c2072 = arith.constant 2072 : index
    %c0_303 = arith.constant 0 : index
    %784 = vector.load %arg2[%c2072, %c0_303] : memref<3568x128xbf16, #tpu.memory_space<vmem>>, vector<1x32xbf16>
    %785 = arith.extf %784 : vector<1x32xbf16> to vector<1x32xf32>
    %cst_304 = arith.constant 0.000000e+00 : f32
    %786 = vector.broadcast %cst_304 : f32 to vector<18x32xf32>
    %787 = vector.broadcast %785 : vector<1x32xf32> to vector<18x32xf32>
    %788 = arith.addf %787, %786 : vector<18x32xf32>
    %c1560 = arith.constant 1560 : index
    %c0_305 = arith.constant 0 : index
    %789 = vector.load %arg2[%c1560, %c0_305] : memref<3568x128xbf16, #tpu.memory_space<vmem>>, vector<32x8xbf16>
    %790 = arith.truncf %706 : vector<18x32xf32> to vector<18x32xbf16>
    %cst_306 = arith.constant dense<0.000000e+00> : vector<18x8xf32>
    %791 = tpu.matmul %790, %789, %cst_306 {dimension_numbers = #tpu.dot_dimension_numbers<[1], [0], [0], [1], [0, 0, 1, 1], [], []>} : vector<18x32xbf16>, vector<32x8xbf16>, vector<18x8xf32> -> vector<18x8xf32>
    %c1664 = arith.constant 1664 : index
    %c0_307 = arith.constant 0 : index
    %792 = vector.load %arg2[%c1664, %c0_307] : memref<3568x128xbf16, #tpu.memory_space<vmem>>, vector<1x8xbf16>
    %793 = arith.extf %792 : vector<1x8xbf16> to vector<1x8xf32>
    %794 = vector.broadcast %793 : vector<1x8xf32> to vector<18x8xf32>
    %795 = arith.addf %791, %794 : vector<18x8xf32>
    %c1592 = arith.constant 1592 : index
    %c0_308 = arith.constant 0 : index
    %796 = vector.load %arg2[%c1592, %c0_308] : memref<3568x128xbf16, #tpu.memory_space<vmem>>, vector<32x8xbf16>
    %797 = arith.truncf %706 : vector<18x32xf32> to vector<18x32xbf16>
    %cst_309 = arith.constant dense<0.000000e+00> : vector<18x8xf32>
    %798 = tpu.matmul %797, %796, %cst_309 {dimension_numbers = #tpu.dot_dimension_numbers<[1], [0], [0], [1], [0, 0, 1, 1], [], []>} : vector<18x32xbf16>, vector<32x8xbf16>, vector<18x8xf32> -> vector<18x8xf32>
    %c1672 = arith.constant 1672 : index
    %c0_310 = arith.constant 0 : index
    %799 = vector.load %arg2[%c1672, %c0_310] : memref<3568x128xbf16, #tpu.memory_space<vmem>>, vector<1x8xbf16>
    %800 = arith.extf %799 : vector<1x8xbf16> to vector<1x8xf32>
    %801 = vector.broadcast %800 : vector<1x8xf32> to vector<18x8xf32>
    %802 = arith.addf %798, %801 : vector<18x8xf32>
    %c1624 = arith.constant 1624 : index
    %c0_311 = arith.constant 0 : index
    %803 = vector.load %arg2[%c1624, %c0_311] : memref<3568x128xbf16, #tpu.memory_space<vmem>>, vector<32x8xbf16>
    %804 = arith.truncf %706 : vector<18x32xf32> to vector<18x32xbf16>
    %cst_312 = arith.constant dense<0.000000e+00> : vector<18x8xf32>
    %805 = tpu.matmul %804, %803, %cst_312 {dimension_numbers = #tpu.dot_dimension_numbers<[1], [0], [0], [1], [0, 0, 1, 1], [], []>} : vector<18x32xbf16>, vector<32x8xbf16>, vector<18x8xf32> -> vector<18x8xf32>
    %c1680 = arith.constant 1680 : index
    %c0_313 = arith.constant 0 : index
    %806 = vector.load %arg2[%c1680, %c0_313] : memref<3568x128xbf16, #tpu.memory_space<vmem>>, vector<1x8xbf16>
    %807 = arith.extf %806 : vector<1x8xbf16> to vector<1x8xf32>
    %808 = vector.broadcast %807 : vector<1x8xf32> to vector<18x8xf32>
    %809 = arith.addf %805, %808 : vector<18x8xf32>
    %810 = arith.truncf %795 : vector<18x8xf32> to vector<18x8xbf16>
    %811 = arith.truncf %802 : vector<18x8xf32> to vector<18x8xbf16>
    %cst_314 = arith.constant dense<0.000000e+00> : vector<18x18xf32>
    %812 = tpu.matmul %810, %811, %cst_314 {dimension_numbers = #tpu.dot_dimension_numbers<[1], [1], [0], [0], [0, 0, 1, 0], [], []>} : vector<18x8xbf16>, vector<18x8xbf16>, vector<18x18xf32> -> vector<18x18xf32>
    %cst_315 = arith.constant 0.353553385 : f32
    %813 = vector.broadcast %cst_315 : f32 to vector<18x18xf32>
    %814 = arith.mulf %812, %813 : vector<18x18xf32>
    %815 = arith.addf %814, %59 : vector<18x18xf32>
    %cst_316 = arith.constant dense<0xFF800000> : vector<18xf32>
    %816 = vector.multi_reduction <maximumf>, %815, %cst_316 [1] : vector<18x18xf32> to vector<18xf32>
    %817 = vector.shape_cast %816 : vector<18xf32> to vector<18x1xf32>
    %818 = vector.broadcast %817 : vector<18x1xf32> to vector<18x18xf32>
    %819 = arith.subf %815, %818 : vector<18x18xf32>
    %820 = math.exp %819 : vector<18x18xf32>
    %cst_317 = arith.constant dense<0.000000e+00> : vector<18xf32>
    %821 = vector.multi_reduction <add>, %820, %cst_317 [1] : vector<18x18xf32> to vector<18xf32>
    %822 = vector.shape_cast %821 : vector<18xf32> to vector<18x1xf32>
    %823 = tpu.reciprocal %822 {approx = true} : vector<18x1xf32> -> vector<18x1xf32>
    %824 = vector.broadcast %823 : vector<18x1xf32> to vector<18x18xf32>
    %825 = arith.mulf %820, %824 : vector<18x18xf32>
    %826 = arith.truncf %825 : vector<18x18xf32> to vector<18x18xbf16>
    %827 = arith.truncf %809 : vector<18x8xf32> to vector<18x8xbf16>
    %cst_318 = arith.constant dense<0.000000e+00> : vector<18x8xf32>
    %828 = tpu.matmul %826, %827, %cst_318 {dimension_numbers = #tpu.dot_dimension_numbers<[1], [0], [0], [1], [0, 0, 1, 1], [], []>} : vector<18x18xbf16>, vector<18x8xbf16>, vector<18x8xf32> -> vector<18x8xf32>
    %c1656 = arith.constant 1656 : index
    %c0_319 = arith.constant 0 : index
    %829 = vector.load %arg2[%c1656, %c0_319] : memref<3568x128xbf16, #tpu.memory_space<vmem>>, vector<8x32xbf16>
    %830 = arith.truncf %828 : vector<18x8xf32> to vector<18x8xbf16>
    %cst_320 = arith.constant dense<0.000000e+00> : vector<18x32xf32>
    %831 = tpu.matmul %830, %829, %cst_320 {dimension_numbers = #tpu.dot_dimension_numbers<[1], [0], [0], [1], [0, 0, 1, 1], [], []>} : vector<18x8xbf16>, vector<8x32xbf16>, vector<18x32xf32> -> vector<18x32xf32>
    %832 = arith.addf %788, %831 : vector<18x32xf32>
    %c1688 = arith.constant 1688 : index
    %c0_321 = arith.constant 0 : index
    %833 = vector.load %arg2[%c1688, %c0_321] : memref<3568x128xbf16, #tpu.memory_space<vmem>>, vector<32x8xbf16>
    %834 = arith.truncf %706 : vector<18x32xf32> to vector<18x32xbf16>
    %cst_322 = arith.constant dense<0.000000e+00> : vector<18x8xf32>
    %835 = tpu.matmul %834, %833, %cst_322 {dimension_numbers = #tpu.dot_dimension_numbers<[1], [0], [0], [1], [0, 0, 1, 1], [], []>} : vector<18x32xbf16>, vector<32x8xbf16>, vector<18x8xf32> -> vector<18x8xf32>
    %c1792 = arith.constant 1792 : index
    %c0_323 = arith.constant 0 : index
    %836 = vector.load %arg2[%c1792, %c0_323] : memref<3568x128xbf16, #tpu.memory_space<vmem>>, vector<1x8xbf16>
    %837 = arith.extf %836 : vector<1x8xbf16> to vector<1x8xf32>
    %838 = vector.broadcast %837 : vector<1x8xf32> to vector<18x8xf32>
    %839 = arith.addf %835, %838 : vector<18x8xf32>
    %c1720 = arith.constant 1720 : index
    %c0_324 = arith.constant 0 : index
    %840 = vector.load %arg2[%c1720, %c0_324] : memref<3568x128xbf16, #tpu.memory_space<vmem>>, vector<32x8xbf16>
    %841 = arith.truncf %706 : vector<18x32xf32> to vector<18x32xbf16>
    %cst_325 = arith.constant dense<0.000000e+00> : vector<18x8xf32>
    %842 = tpu.matmul %841, %840, %cst_325 {dimension_numbers = #tpu.dot_dimension_numbers<[1], [0], [0], [1], [0, 0, 1, 1], [], []>} : vector<18x32xbf16>, vector<32x8xbf16>, vector<18x8xf32> -> vector<18x8xf32>
    %c1800 = arith.constant 1800 : index
    %c0_326 = arith.constant 0 : index
    %843 = vector.load %arg2[%c1800, %c0_326] : memref<3568x128xbf16, #tpu.memory_space<vmem>>, vector<1x8xbf16>
    %844 = arith.extf %843 : vector<1x8xbf16> to vector<1x8xf32>
    %845 = vector.broadcast %844 : vector<1x8xf32> to vector<18x8xf32>
    %846 = arith.addf %842, %845 : vector<18x8xf32>
    %c1752 = arith.constant 1752 : index
    %c0_327 = arith.constant 0 : index
    %847 = vector.load %arg2[%c1752, %c0_327] : memref<3568x128xbf16, #tpu.memory_space<vmem>>, vector<32x8xbf16>
    %848 = arith.truncf %706 : vector<18x32xf32> to vector<18x32xbf16>
    %cst_328 = arith.constant dense<0.000000e+00> : vector<18x8xf32>
    %849 = tpu.matmul %848, %847, %cst_328 {dimension_numbers = #tpu.dot_dimension_numbers<[1], [0], [0], [1], [0, 0, 1, 1], [], []>} : vector<18x32xbf16>, vector<32x8xbf16>, vector<18x8xf32> -> vector<18x8xf32>
    %c1808 = arith.constant 1808 : index
    %c0_329 = arith.constant 0 : index
    %850 = vector.load %arg2[%c1808, %c0_329] : memref<3568x128xbf16, #tpu.memory_space<vmem>>, vector<1x8xbf16>
    %851 = arith.extf %850 : vector<1x8xbf16> to vector<1x8xf32>
    %852 = vector.broadcast %851 : vector<1x8xf32> to vector<18x8xf32>
    %853 = arith.addf %849, %852 : vector<18x8xf32>
    %854 = arith.truncf %839 : vector<18x8xf32> to vector<18x8xbf16>
    %855 = arith.truncf %846 : vector<18x8xf32> to vector<18x8xbf16>
    %cst_330 = arith.constant dense<0.000000e+00> : vector<18x18xf32>
    %856 = tpu.matmul %854, %855, %cst_330 {dimension_numbers = #tpu.dot_dimension_numbers<[1], [1], [0], [0], [0, 0, 1, 0], [], []>} : vector<18x8xbf16>, vector<18x8xbf16>, vector<18x18xf32> -> vector<18x18xf32>
    %cst_331 = arith.constant 0.353553385 : f32
    %857 = vector.broadcast %cst_331 : f32 to vector<18x18xf32>
    %858 = arith.mulf %856, %857 : vector<18x18xf32>
    %859 = arith.addf %858, %59 : vector<18x18xf32>
    %cst_332 = arith.constant dense<0xFF800000> : vector<18xf32>
    %860 = vector.multi_reduction <maximumf>, %859, %cst_332 [1] : vector<18x18xf32> to vector<18xf32>
    %861 = vector.shape_cast %860 : vector<18xf32> to vector<18x1xf32>
    %862 = vector.broadcast %861 : vector<18x1xf32> to vector<18x18xf32>
    %863 = arith.subf %859, %862 : vector<18x18xf32>
    %864 = math.exp %863 : vector<18x18xf32>
    %cst_333 = arith.constant dense<0.000000e+00> : vector<18xf32>
    %865 = vector.multi_reduction <add>, %864, %cst_333 [1] : vector<18x18xf32> to vector<18xf32>
    %866 = vector.shape_cast %865 : vector<18xf32> to vector<18x1xf32>
    %867 = tpu.reciprocal %866 {approx = true} : vector<18x1xf32> -> vector<18x1xf32>
    %868 = vector.broadcast %867 : vector<18x1xf32> to vector<18x18xf32>
    %869 = arith.mulf %864, %868 : vector<18x18xf32>
    %870 = arith.truncf %869 : vector<18x18xf32> to vector<18x18xbf16>
    %871 = arith.truncf %853 : vector<18x8xf32> to vector<18x8xbf16>
    %cst_334 = arith.constant dense<0.000000e+00> : vector<18x8xf32>
    %872 = tpu.matmul %870, %871, %cst_334 {dimension_numbers = #tpu.dot_dimension_numbers<[1], [0], [0], [1], [0, 0, 1, 1], [], []>} : vector<18x18xbf16>, vector<18x8xbf16>, vector<18x8xf32> -> vector<18x8xf32>
    %c1784 = arith.constant 1784 : index
    %c0_335 = arith.constant 0 : index
    %873 = vector.load %arg2[%c1784, %c0_335] : memref<3568x128xbf16, #tpu.memory_space<vmem>>, vector<8x32xbf16>
    %874 = arith.truncf %872 : vector<18x8xf32> to vector<18x8xbf16>
    %cst_336 = arith.constant dense<0.000000e+00> : vector<18x32xf32>
    %875 = tpu.matmul %874, %873, %cst_336 {dimension_numbers = #tpu.dot_dimension_numbers<[1], [0], [0], [1], [0, 0, 1, 1], [], []>} : vector<18x8xbf16>, vector<8x32xbf16>, vector<18x32xf32> -> vector<18x32xf32>
    %876 = arith.addf %832, %875 : vector<18x32xf32>
    %c1816 = arith.constant 1816 : index
    %c0_337 = arith.constant 0 : index
    %877 = vector.load %arg2[%c1816, %c0_337] : memref<3568x128xbf16, #tpu.memory_space<vmem>>, vector<32x8xbf16>
    %878 = arith.truncf %706 : vector<18x32xf32> to vector<18x32xbf16>
    %cst_338 = arith.constant dense<0.000000e+00> : vector<18x8xf32>
    %879 = tpu.matmul %878, %877, %cst_338 {dimension_numbers = #tpu.dot_dimension_numbers<[1], [0], [0], [1], [0, 0, 1, 1], [], []>} : vector<18x32xbf16>, vector<32x8xbf16>, vector<18x8xf32> -> vector<18x8xf32>
    %c1920 = arith.constant 1920 : index
    %c0_339 = arith.constant 0 : index
    %880 = vector.load %arg2[%c1920, %c0_339] : memref<3568x128xbf16, #tpu.memory_space<vmem>>, vector<1x8xbf16>
    %881 = arith.extf %880 : vector<1x8xbf16> to vector<1x8xf32>
    %882 = vector.broadcast %881 : vector<1x8xf32> to vector<18x8xf32>
    %883 = arith.addf %879, %882 : vector<18x8xf32>
    %c1848 = arith.constant 1848 : index
    %c0_340 = arith.constant 0 : index
    %884 = vector.load %arg2[%c1848, %c0_340] : memref<3568x128xbf16, #tpu.memory_space<vmem>>, vector<32x8xbf16>
    %885 = arith.truncf %706 : vector<18x32xf32> to vector<18x32xbf16>
    %cst_341 = arith.constant dense<0.000000e+00> : vector<18x8xf32>
    %886 = tpu.matmul %885, %884, %cst_341 {dimension_numbers = #tpu.dot_dimension_numbers<[1], [0], [0], [1], [0, 0, 1, 1], [], []>} : vector<18x32xbf16>, vector<32x8xbf16>, vector<18x8xf32> -> vector<18x8xf32>
    %c1928 = arith.constant 1928 : index
    %c0_342 = arith.constant 0 : index
    %887 = vector.load %arg2[%c1928, %c0_342] : memref<3568x128xbf16, #tpu.memory_space<vmem>>, vector<1x8xbf16>
    %888 = arith.extf %887 : vector<1x8xbf16> to vector<1x8xf32>
    %889 = vector.broadcast %888 : vector<1x8xf32> to vector<18x8xf32>
    %890 = arith.addf %886, %889 : vector<18x8xf32>
    %c1880 = arith.constant 1880 : index
    %c0_343 = arith.constant 0 : index
    %891 = vector.load %arg2[%c1880, %c0_343] : memref<3568x128xbf16, #tpu.memory_space<vmem>>, vector<32x8xbf16>
    %892 = arith.truncf %706 : vector<18x32xf32> to vector<18x32xbf16>
    %cst_344 = arith.constant dense<0.000000e+00> : vector<18x8xf32>
    %893 = tpu.matmul %892, %891, %cst_344 {dimension_numbers = #tpu.dot_dimension_numbers<[1], [0], [0], [1], [0, 0, 1, 1], [], []>} : vector<18x32xbf16>, vector<32x8xbf16>, vector<18x8xf32> -> vector<18x8xf32>
    %c1936 = arith.constant 1936 : index
    %c0_345 = arith.constant 0 : index
    %894 = vector.load %arg2[%c1936, %c0_345] : memref<3568x128xbf16, #tpu.memory_space<vmem>>, vector<1x8xbf16>
    %895 = arith.extf %894 : vector<1x8xbf16> to vector<1x8xf32>
    %896 = vector.broadcast %895 : vector<1x8xf32> to vector<18x8xf32>
    %897 = arith.addf %893, %896 : vector<18x8xf32>
    %898 = arith.truncf %883 : vector<18x8xf32> to vector<18x8xbf16>
    %899 = arith.truncf %890 : vector<18x8xf32> to vector<18x8xbf16>
    %cst_346 = arith.constant dense<0.000000e+00> : vector<18x18xf32>
    %900 = tpu.matmul %898, %899, %cst_346 {dimension_numbers = #tpu.dot_dimension_numbers<[1], [1], [0], [0], [0, 0, 1, 0], [], []>} : vector<18x8xbf16>, vector<18x8xbf16>, vector<18x18xf32> -> vector<18x18xf32>
    %cst_347 = arith.constant 0.353553385 : f32
    %901 = vector.broadcast %cst_347 : f32 to vector<18x18xf32>
    %902 = arith.mulf %900, %901 : vector<18x18xf32>
    %903 = arith.addf %902, %59 : vector<18x18xf32>
    %cst_348 = arith.constant dense<0xFF800000> : vector<18xf32>
    %904 = vector.multi_reduction <maximumf>, %903, %cst_348 [1] : vector<18x18xf32> to vector<18xf32>
    %905 = vector.shape_cast %904 : vector<18xf32> to vector<18x1xf32>
    %906 = vector.broadcast %905 : vector<18x1xf32> to vector<18x18xf32>
    %907 = arith.subf %903, %906 : vector<18x18xf32>
    %908 = math.exp %907 : vector<18x18xf32>
    %cst_349 = arith.constant dense<0.000000e+00> : vector<18xf32>
    %909 = vector.multi_reduction <add>, %908, %cst_349 [1] : vector<18x18xf32> to vector<18xf32>
    %910 = vector.shape_cast %909 : vector<18xf32> to vector<18x1xf32>
    %911 = tpu.reciprocal %910 {approx = true} : vector<18x1xf32> -> vector<18x1xf32>
    %912 = vector.broadcast %911 : vector<18x1xf32> to vector<18x18xf32>
    %913 = arith.mulf %908, %912 : vector<18x18xf32>
    %914 = arith.truncf %913 : vector<18x18xf32> to vector<18x18xbf16>
    %915 = arith.truncf %897 : vector<18x8xf32> to vector<18x8xbf16>
    %cst_350 = arith.constant dense<0.000000e+00> : vector<18x8xf32>
    %916 = tpu.matmul %914, %915, %cst_350 {dimension_numbers = #tpu.dot_dimension_numbers<[1], [0], [0], [1], [0, 0, 1, 1], [], []>} : vector<18x18xbf16>, vector<18x8xbf16>, vector<18x8xf32> -> vector<18x8xf32>
    %c1912 = arith.constant 1912 : index
    %c0_351 = arith.constant 0 : index
    %917 = vector.load %arg2[%c1912, %c0_351] : memref<3568x128xbf16, #tpu.memory_space<vmem>>, vector<8x32xbf16>
    %918 = arith.truncf %916 : vector<18x8xf32> to vector<18x8xbf16>
    %cst_352 = arith.constant dense<0.000000e+00> : vector<18x32xf32>
    %919 = tpu.matmul %918, %917, %cst_352 {dimension_numbers = #tpu.dot_dimension_numbers<[1], [0], [0], [1], [0, 0, 1, 1], [], []>} : vector<18x8xbf16>, vector<8x32xbf16>, vector<18x32xf32> -> vector<18x32xf32>
    %920 = arith.addf %876, %919 : vector<18x32xf32>
    %c1944 = arith.constant 1944 : index
    %c0_353 = arith.constant 0 : index
    %921 = vector.load %arg2[%c1944, %c0_353] : memref<3568x128xbf16, #tpu.memory_space<vmem>>, vector<32x8xbf16>
    %922 = arith.truncf %706 : vector<18x32xf32> to vector<18x32xbf16>
    %cst_354 = arith.constant dense<0.000000e+00> : vector<18x8xf32>
    %923 = tpu.matmul %922, %921, %cst_354 {dimension_numbers = #tpu.dot_dimension_numbers<[1], [0], [0], [1], [0, 0, 1, 1], [], []>} : vector<18x32xbf16>, vector<32x8xbf16>, vector<18x8xf32> -> vector<18x8xf32>
    %c2048 = arith.constant 2048 : index
    %c0_355 = arith.constant 0 : index
    %924 = vector.load %arg2[%c2048, %c0_355] : memref<3568x128xbf16, #tpu.memory_space<vmem>>, vector<1x8xbf16>
    %925 = arith.extf %924 : vector<1x8xbf16> to vector<1x8xf32>
    %926 = vector.broadcast %925 : vector<1x8xf32> to vector<18x8xf32>
    %927 = arith.addf %923, %926 : vector<18x8xf32>
    %c1976 = arith.constant 1976 : index
    %c0_356 = arith.constant 0 : index
    %928 = vector.load %arg2[%c1976, %c0_356] : memref<3568x128xbf16, #tpu.memory_space<vmem>>, vector<32x8xbf16>
    %929 = arith.truncf %706 : vector<18x32xf32> to vector<18x32xbf16>
    %cst_357 = arith.constant dense<0.000000e+00> : vector<18x8xf32>
    %930 = tpu.matmul %929, %928, %cst_357 {dimension_numbers = #tpu.dot_dimension_numbers<[1], [0], [0], [1], [0, 0, 1, 1], [], []>} : vector<18x32xbf16>, vector<32x8xbf16>, vector<18x8xf32> -> vector<18x8xf32>
    %c2056 = arith.constant 2056 : index
    %c0_358 = arith.constant 0 : index
    %931 = vector.load %arg2[%c2056, %c0_358] : memref<3568x128xbf16, #tpu.memory_space<vmem>>, vector<1x8xbf16>
    %932 = arith.extf %931 : vector<1x8xbf16> to vector<1x8xf32>
    %933 = vector.broadcast %932 : vector<1x8xf32> to vector<18x8xf32>
    %934 = arith.addf %930, %933 : vector<18x8xf32>
    %c2008 = arith.constant 2008 : index
    %c0_359 = arith.constant 0 : index
    %935 = vector.load %arg2[%c2008, %c0_359] : memref<3568x128xbf16, #tpu.memory_space<vmem>>, vector<32x8xbf16>
    %936 = arith.truncf %706 : vector<18x32xf32> to vector<18x32xbf16>
    %cst_360 = arith.constant dense<0.000000e+00> : vector<18x8xf32>
    %937 = tpu.matmul %936, %935, %cst_360 {dimension_numbers = #tpu.dot_dimension_numbers<[1], [0], [0], [1], [0, 0, 1, 1], [], []>} : vector<18x32xbf16>, vector<32x8xbf16>, vector<18x8xf32> -> vector<18x8xf32>
    %c2064 = arith.constant 2064 : index
    %c0_361 = arith.constant 0 : index
    %938 = vector.load %arg2[%c2064, %c0_361] : memref<3568x128xbf16, #tpu.memory_space<vmem>>, vector<1x8xbf16>
    %939 = arith.extf %938 : vector<1x8xbf16> to vector<1x8xf32>
    %940 = vector.broadcast %939 : vector<1x8xf32> to vector<18x8xf32>
    %941 = arith.addf %937, %940 : vector<18x8xf32>
    %942 = arith.truncf %927 : vector<18x8xf32> to vector<18x8xbf16>
    %943 = arith.truncf %934 : vector<18x8xf32> to vector<18x8xbf16>
    %cst_362 = arith.constant dense<0.000000e+00> : vector<18x18xf32>
    %944 = tpu.matmul %942, %943, %cst_362 {dimension_numbers = #tpu.dot_dimension_numbers<[1], [1], [0], [0], [0, 0, 1, 0], [], []>} : vector<18x8xbf16>, vector<18x8xbf16>, vector<18x18xf32> -> vector<18x18xf32>
    %cst_363 = arith.constant 0.353553385 : f32
    %945 = vector.broadcast %cst_363 : f32 to vector<18x18xf32>
    %946 = arith.mulf %944, %945 : vector<18x18xf32>
    %947 = arith.addf %946, %59 : vector<18x18xf32>
    %cst_364 = arith.constant dense<0xFF800000> : vector<18xf32>
    %948 = vector.multi_reduction <maximumf>, %947, %cst_364 [1] : vector<18x18xf32> to vector<18xf32>
    %949 = vector.shape_cast %948 : vector<18xf32> to vector<18x1xf32>
    %950 = vector.broadcast %949 : vector<18x1xf32> to vector<18x18xf32>
    %951 = arith.subf %947, %950 : vector<18x18xf32>
    %952 = math.exp %951 : vector<18x18xf32>
    %cst_365 = arith.constant dense<0.000000e+00> : vector<18xf32>
    %953 = vector.multi_reduction <add>, %952, %cst_365 [1] : vector<18x18xf32> to vector<18xf32>
    %954 = vector.shape_cast %953 : vector<18xf32> to vector<18x1xf32>
    %955 = tpu.reciprocal %954 {approx = true} : vector<18x1xf32> -> vector<18x1xf32>
    %956 = vector.broadcast %955 : vector<18x1xf32> to vector<18x18xf32>
    %957 = arith.mulf %952, %956 : vector<18x18xf32>
    %958 = arith.truncf %957 : vector<18x18xf32> to vector<18x18xbf16>
    %959 = arith.truncf %941 : vector<18x8xf32> to vector<18x8xbf16>
    %cst_366 = arith.constant dense<0.000000e+00> : vector<18x8xf32>
    %960 = tpu.matmul %958, %959, %cst_366 {dimension_numbers = #tpu.dot_dimension_numbers<[1], [0], [0], [1], [0, 0, 1, 1], [], []>} : vector<18x18xbf16>, vector<18x8xbf16>, vector<18x8xf32> -> vector<18x8xf32>
    %c2040 = arith.constant 2040 : index
    %c0_367 = arith.constant 0 : index
    %961 = vector.load %arg2[%c2040, %c0_367] : memref<3568x128xbf16, #tpu.memory_space<vmem>>, vector<8x32xbf16>
    %962 = arith.truncf %960 : vector<18x8xf32> to vector<18x8xbf16>
    %cst_368 = arith.constant dense<0.000000e+00> : vector<18x32xf32>
    %963 = tpu.matmul %962, %961, %cst_368 {dimension_numbers = #tpu.dot_dimension_numbers<[1], [0], [0], [1], [0, 0, 1, 1], [], []>} : vector<18x8xbf16>, vector<8x32xbf16>, vector<18x32xf32> -> vector<18x32xf32>
    %964 = arith.addf %920, %963 : vector<18x32xf32>
    %c2592 = arith.constant 2592 : index
    %c0_369 = arith.constant 0 : index
    %965 = vector.load %arg2[%c2592, %c0_369] : memref<3568x128xbf16, #tpu.memory_space<vmem>>, vector<1x32xbf16>
    %966 = arith.extf %965 : vector<1x32xbf16> to vector<1x32xf32>
    %cst_370 = arith.constant 0.000000e+00 : f32
    %967 = vector.broadcast %cst_370 : f32 to vector<10x32xf32>
    %968 = vector.broadcast %966 : vector<1x32xf32> to vector<10x32xf32>
    %969 = arith.addf %968, %967 : vector<10x32xf32>
    %c2080 = arith.constant 2080 : index
    %c0_371 = arith.constant 0 : index
    %970 = vector.load %arg2[%c2080, %c0_371] : memref<3568x128xbf16, #tpu.memory_space<vmem>>, vector<32x8xbf16>
    %971 = arith.truncf %783 : vector<10x32xf32> to vector<10x32xbf16>
    %cst_372 = arith.constant dense<0.000000e+00> : vector<10x8xf32>
    %972 = tpu.matmul %971, %970, %cst_372 {dimension_numbers = #tpu.dot_dimension_numbers<[1], [0], [0], [1], [0, 0, 1, 1], [], []>} : vector<10x32xbf16>, vector<32x8xbf16>, vector<10x8xf32> -> vector<10x8xf32>
    %c2184 = arith.constant 2184 : index
    %c0_373 = arith.constant 0 : index
    %973 = vector.load %arg2[%c2184, %c0_373] : memref<3568x128xbf16, #tpu.memory_space<vmem>>, vector<1x8xbf16>
    %974 = arith.extf %973 : vector<1x8xbf16> to vector<1x8xf32>
    %975 = vector.broadcast %974 : vector<1x8xf32> to vector<10x8xf32>
    %976 = arith.addf %972, %975 : vector<10x8xf32>
    %c2112 = arith.constant 2112 : index
    %c0_374 = arith.constant 0 : index
    %977 = vector.load %arg2[%c2112, %c0_374] : memref<3568x128xbf16, #tpu.memory_space<vmem>>, vector<32x8xbf16>
    %978 = arith.truncf %783 : vector<10x32xf32> to vector<10x32xbf16>
    %cst_375 = arith.constant dense<0.000000e+00> : vector<10x8xf32>
    %979 = tpu.matmul %978, %977, %cst_375 {dimension_numbers = #tpu.dot_dimension_numbers<[1], [0], [0], [1], [0, 0, 1, 1], [], []>} : vector<10x32xbf16>, vector<32x8xbf16>, vector<10x8xf32> -> vector<10x8xf32>
    %c2192 = arith.constant 2192 : index
    %c0_376 = arith.constant 0 : index
    %980 = vector.load %arg2[%c2192, %c0_376] : memref<3568x128xbf16, #tpu.memory_space<vmem>>, vector<1x8xbf16>
    %981 = arith.extf %980 : vector<1x8xbf16> to vector<1x8xf32>
    %982 = vector.broadcast %981 : vector<1x8xf32> to vector<10x8xf32>
    %983 = arith.addf %979, %982 : vector<10x8xf32>
    %c2144 = arith.constant 2144 : index
    %c0_377 = arith.constant 0 : index
    %984 = vector.load %arg2[%c2144, %c0_377] : memref<3568x128xbf16, #tpu.memory_space<vmem>>, vector<32x8xbf16>
    %985 = arith.truncf %783 : vector<10x32xf32> to vector<10x32xbf16>
    %cst_378 = arith.constant dense<0.000000e+00> : vector<10x8xf32>
    %986 = tpu.matmul %985, %984, %cst_378 {dimension_numbers = #tpu.dot_dimension_numbers<[1], [0], [0], [1], [0, 0, 1, 1], [], []>} : vector<10x32xbf16>, vector<32x8xbf16>, vector<10x8xf32> -> vector<10x8xf32>
    %c2200 = arith.constant 2200 : index
    %c0_379 = arith.constant 0 : index
    %987 = vector.load %arg2[%c2200, %c0_379] : memref<3568x128xbf16, #tpu.memory_space<vmem>>, vector<1x8xbf16>
    %988 = arith.extf %987 : vector<1x8xbf16> to vector<1x8xf32>
    %989 = vector.broadcast %988 : vector<1x8xf32> to vector<10x8xf32>
    %990 = arith.addf %986, %989 : vector<10x8xf32>
    %991 = arith.truncf %976 : vector<10x8xf32> to vector<10x8xbf16>
    %992 = arith.truncf %983 : vector<10x8xf32> to vector<10x8xbf16>
    %cst_380 = arith.constant dense<0.000000e+00> : vector<10x10xf32>
    %993 = tpu.matmul %991, %992, %cst_380 {dimension_numbers = #tpu.dot_dimension_numbers<[1], [1], [0], [0], [0, 0, 1, 0], [], []>} : vector<10x8xbf16>, vector<10x8xbf16>, vector<10x10xf32> -> vector<10x10xf32>
    %cst_381 = arith.constant 0.353553385 : f32
    %994 = vector.broadcast %cst_381 : f32 to vector<10x10xf32>
    %995 = arith.mulf %993, %994 : vector<10x10xf32>
    %996 = arith.addf %995, %60 : vector<10x10xf32>
    %cst_382 = arith.constant dense<0xFF800000> : vector<10xf32>
    %997 = vector.multi_reduction <maximumf>, %996, %cst_382 [1] : vector<10x10xf32> to vector<10xf32>
    %998 = vector.shape_cast %997 : vector<10xf32> to vector<10x1xf32>
    %999 = vector.broadcast %998 : vector<10x1xf32> to vector<10x10xf32>
    %1000 = arith.subf %996, %999 : vector<10x10xf32>
    %1001 = math.exp %1000 : vector<10x10xf32>
    %cst_383 = arith.constant dense<0.000000e+00> : vector<10xf32>
    %1002 = vector.multi_reduction <add>, %1001, %cst_383 [1] : vector<10x10xf32> to vector<10xf32>
    %1003 = vector.shape_cast %1002 : vector<10xf32> to vector<10x1xf32>
    %1004 = tpu.reciprocal %1003 {approx = true} : vector<10x1xf32> -> vector<10x1xf32>
    %1005 = vector.broadcast %1004 : vector<10x1xf32> to vector<10x10xf32>
    %1006 = arith.mulf %1001, %1005 : vector<10x10xf32>
    %1007 = arith.truncf %1006 : vector<10x10xf32> to vector<10x10xbf16>
    %1008 = arith.truncf %990 : vector<10x8xf32> to vector<10x8xbf16>
    %cst_384 = arith.constant dense<0.000000e+00> : vector<10x8xf32>
    %1009 = tpu.matmul %1007, %1008, %cst_384 {dimension_numbers = #tpu.dot_dimension_numbers<[1], [0], [0], [1], [0, 0, 1, 1], [], []>} : vector<10x10xbf16>, vector<10x8xbf16>, vector<10x8xf32> -> vector<10x8xf32>
    %c2176 = arith.constant 2176 : index
    %c0_385 = arith.constant 0 : index
    %1010 = vector.load %arg2[%c2176, %c0_385] : memref<3568x128xbf16, #tpu.memory_space<vmem>>, vector<8x32xbf16>
    %1011 = arith.truncf %1009 : vector<10x8xf32> to vector<10x8xbf16>
    %cst_386 = arith.constant dense<0.000000e+00> : vector<10x32xf32>
    %1012 = tpu.matmul %1011, %1010, %cst_386 {dimension_numbers = #tpu.dot_dimension_numbers<[1], [0], [0], [1], [0, 0, 1, 1], [], []>} : vector<10x8xbf16>, vector<8x32xbf16>, vector<10x32xf32> -> vector<10x32xf32>
    %1013 = arith.addf %969, %1012 : vector<10x32xf32>
    %c2208 = arith.constant 2208 : index
    %c0_387 = arith.constant 0 : index
    %1014 = vector.load %arg2[%c2208, %c0_387] : memref<3568x128xbf16, #tpu.memory_space<vmem>>, vector<32x8xbf16>
    %1015 = arith.truncf %783 : vector<10x32xf32> to vector<10x32xbf16>
    %cst_388 = arith.constant dense<0.000000e+00> : vector<10x8xf32>
    %1016 = tpu.matmul %1015, %1014, %cst_388 {dimension_numbers = #tpu.dot_dimension_numbers<[1], [0], [0], [1], [0, 0, 1, 1], [], []>} : vector<10x32xbf16>, vector<32x8xbf16>, vector<10x8xf32> -> vector<10x8xf32>
    %c2312 = arith.constant 2312 : index
    %c0_389 = arith.constant 0 : index
    %1017 = vector.load %arg2[%c2312, %c0_389] : memref<3568x128xbf16, #tpu.memory_space<vmem>>, vector<1x8xbf16>
    %1018 = arith.extf %1017 : vector<1x8xbf16> to vector<1x8xf32>
    %1019 = vector.broadcast %1018 : vector<1x8xf32> to vector<10x8xf32>
    %1020 = arith.addf %1016, %1019 : vector<10x8xf32>
    %c2240 = arith.constant 2240 : index
    %c0_390 = arith.constant 0 : index
    %1021 = vector.load %arg2[%c2240, %c0_390] : memref<3568x128xbf16, #tpu.memory_space<vmem>>, vector<32x8xbf16>
    %1022 = arith.truncf %783 : vector<10x32xf32> to vector<10x32xbf16>
    %cst_391 = arith.constant dense<0.000000e+00> : vector<10x8xf32>
    %1023 = tpu.matmul %1022, %1021, %cst_391 {dimension_numbers = #tpu.dot_dimension_numbers<[1], [0], [0], [1], [0, 0, 1, 1], [], []>} : vector<10x32xbf16>, vector<32x8xbf16>, vector<10x8xf32> -> vector<10x8xf32>
    %c2320 = arith.constant 2320 : index
    %c0_392 = arith.constant 0 : index
    %1024 = vector.load %arg2[%c2320, %c0_392] : memref<3568x128xbf16, #tpu.memory_space<vmem>>, vector<1x8xbf16>
    %1025 = arith.extf %1024 : vector<1x8xbf16> to vector<1x8xf32>
    %1026 = vector.broadcast %1025 : vector<1x8xf32> to vector<10x8xf32>
    %1027 = arith.addf %1023, %1026 : vector<10x8xf32>
    %c2272 = arith.constant 2272 : index
    %c0_393 = arith.constant 0 : index
    %1028 = vector.load %arg2[%c2272, %c0_393] : memref<3568x128xbf16, #tpu.memory_space<vmem>>, vector<32x8xbf16>
    %1029 = arith.truncf %783 : vector<10x32xf32> to vector<10x32xbf16>
    %cst_394 = arith.constant dense<0.000000e+00> : vector<10x8xf32>
    %1030 = tpu.matmul %1029, %1028, %cst_394 {dimension_numbers = #tpu.dot_dimension_numbers<[1], [0], [0], [1], [0, 0, 1, 1], [], []>} : vector<10x32xbf16>, vector<32x8xbf16>, vector<10x8xf32> -> vector<10x8xf32>
    %c2328 = arith.constant 2328 : index
    %c0_395 = arith.constant 0 : index
    %1031 = vector.load %arg2[%c2328, %c0_395] : memref<3568x128xbf16, #tpu.memory_space<vmem>>, vector<1x8xbf16>
    %1032 = arith.extf %1031 : vector<1x8xbf16> to vector<1x8xf32>
    %1033 = vector.broadcast %1032 : vector<1x8xf32> to vector<10x8xf32>
    %1034 = arith.addf %1030, %1033 : vector<10x8xf32>
    %1035 = arith.truncf %1020 : vector<10x8xf32> to vector<10x8xbf16>
    %1036 = arith.truncf %1027 : vector<10x8xf32> to vector<10x8xbf16>
    %cst_396 = arith.constant dense<0.000000e+00> : vector<10x10xf32>
    %1037 = tpu.matmul %1035, %1036, %cst_396 {dimension_numbers = #tpu.dot_dimension_numbers<[1], [1], [0], [0], [0, 0, 1, 0], [], []>} : vector<10x8xbf16>, vector<10x8xbf16>, vector<10x10xf32> -> vector<10x10xf32>
    %cst_397 = arith.constant 0.353553385 : f32
    %1038 = vector.broadcast %cst_397 : f32 to vector<10x10xf32>
    %1039 = arith.mulf %1037, %1038 : vector<10x10xf32>
    %1040 = arith.addf %1039, %60 : vector<10x10xf32>
    %cst_398 = arith.constant dense<0xFF800000> : vector<10xf32>
    %1041 = vector.multi_reduction <maximumf>, %1040, %cst_398 [1] : vector<10x10xf32> to vector<10xf32>
    %1042 = vector.shape_cast %1041 : vector<10xf32> to vector<10x1xf32>
    %1043 = vector.broadcast %1042 : vector<10x1xf32> to vector<10x10xf32>
    %1044 = arith.subf %1040, %1043 : vector<10x10xf32>
    %1045 = math.exp %1044 : vector<10x10xf32>
    %cst_399 = arith.constant dense<0.000000e+00> : vector<10xf32>
    %1046 = vector.multi_reduction <add>, %1045, %cst_399 [1] : vector<10x10xf32> to vector<10xf32>
    %1047 = vector.shape_cast %1046 : vector<10xf32> to vector<10x1xf32>
    %1048 = tpu.reciprocal %1047 {approx = true} : vector<10x1xf32> -> vector<10x1xf32>
    %1049 = vector.broadcast %1048 : vector<10x1xf32> to vector<10x10xf32>
    %1050 = arith.mulf %1045, %1049 : vector<10x10xf32>
    %1051 = arith.truncf %1050 : vector<10x10xf32> to vector<10x10xbf16>
    %1052 = arith.truncf %1034 : vector<10x8xf32> to vector<10x8xbf16>
    %cst_400 = arith.constant dense<0.000000e+00> : vector<10x8xf32>
    %1053 = tpu.matmul %1051, %1052, %cst_400 {dimension_numbers = #tpu.dot_dimension_numbers<[1], [0], [0], [1], [0, 0, 1, 1], [], []>} : vector<10x10xbf16>, vector<10x8xbf16>, vector<10x8xf32> -> vector<10x8xf32>
    %c2304 = arith.constant 2304 : index
    %c0_401 = arith.constant 0 : index
    %1054 = vector.load %arg2[%c2304, %c0_401] : memref<3568x128xbf16, #tpu.memory_space<vmem>>, vector<8x32xbf16>
    %1055 = arith.truncf %1053 : vector<10x8xf32> to vector<10x8xbf16>
    %cst_402 = arith.constant dense<0.000000e+00> : vector<10x32xf32>
    %1056 = tpu.matmul %1055, %1054, %cst_402 {dimension_numbers = #tpu.dot_dimension_numbers<[1], [0], [0], [1], [0, 0, 1, 1], [], []>} : vector<10x8xbf16>, vector<8x32xbf16>, vector<10x32xf32> -> vector<10x32xf32>
    %1057 = arith.addf %1013, %1056 : vector<10x32xf32>
    %c2336 = arith.constant 2336 : index
    %c0_403 = arith.constant 0 : index
    %1058 = vector.load %arg2[%c2336, %c0_403] : memref<3568x128xbf16, #tpu.memory_space<vmem>>, vector<32x8xbf16>
    %1059 = arith.truncf %783 : vector<10x32xf32> to vector<10x32xbf16>
    %cst_404 = arith.constant dense<0.000000e+00> : vector<10x8xf32>
    %1060 = tpu.matmul %1059, %1058, %cst_404 {dimension_numbers = #tpu.dot_dimension_numbers<[1], [0], [0], [1], [0, 0, 1, 1], [], []>} : vector<10x32xbf16>, vector<32x8xbf16>, vector<10x8xf32> -> vector<10x8xf32>
    %c2440 = arith.constant 2440 : index
    %c0_405 = arith.constant 0 : index
    %1061 = vector.load %arg2[%c2440, %c0_405] : memref<3568x128xbf16, #tpu.memory_space<vmem>>, vector<1x8xbf16>
    %1062 = arith.extf %1061 : vector<1x8xbf16> to vector<1x8xf32>
    %1063 = vector.broadcast %1062 : vector<1x8xf32> to vector<10x8xf32>
    %1064 = arith.addf %1060, %1063 : vector<10x8xf32>
    %c2368 = arith.constant 2368 : index
    %c0_406 = arith.constant 0 : index
    %1065 = vector.load %arg2[%c2368, %c0_406] : memref<3568x128xbf16, #tpu.memory_space<vmem>>, vector<32x8xbf16>
    %1066 = arith.truncf %783 : vector<10x32xf32> to vector<10x32xbf16>
    %cst_407 = arith.constant dense<0.000000e+00> : vector<10x8xf32>
    %1067 = tpu.matmul %1066, %1065, %cst_407 {dimension_numbers = #tpu.dot_dimension_numbers<[1], [0], [0], [1], [0, 0, 1, 1], [], []>} : vector<10x32xbf16>, vector<32x8xbf16>, vector<10x8xf32> -> vector<10x8xf32>
    %c2448 = arith.constant 2448 : index
    %c0_408 = arith.constant 0 : index
    %1068 = vector.load %arg2[%c2448, %c0_408] : memref<3568x128xbf16, #tpu.memory_space<vmem>>, vector<1x8xbf16>
    %1069 = arith.extf %1068 : vector<1x8xbf16> to vector<1x8xf32>
    %1070 = vector.broadcast %1069 : vector<1x8xf32> to vector<10x8xf32>
    %1071 = arith.addf %1067, %1070 : vector<10x8xf32>
    %c2400 = arith.constant 2400 : index
    %c0_409 = arith.constant 0 : index
    %1072 = vector.load %arg2[%c2400, %c0_409] : memref<3568x128xbf16, #tpu.memory_space<vmem>>, vector<32x8xbf16>
    %1073 = arith.truncf %783 : vector<10x32xf32> to vector<10x32xbf16>
    %cst_410 = arith.constant dense<0.000000e+00> : vector<10x8xf32>
    %1074 = tpu.matmul %1073, %1072, %cst_410 {dimension_numbers = #tpu.dot_dimension_numbers<[1], [0], [0], [1], [0, 0, 1, 1], [], []>} : vector<10x32xbf16>, vector<32x8xbf16>, vector<10x8xf32> -> vector<10x8xf32>
    %c2456 = arith.constant 2456 : index
    %c0_411 = arith.constant 0 : index
    %1075 = vector.load %arg2[%c2456, %c0_411] : memref<3568x128xbf16, #tpu.memory_space<vmem>>, vector<1x8xbf16>
    %1076 = arith.extf %1075 : vector<1x8xbf16> to vector<1x8xf32>
    %1077 = vector.broadcast %1076 : vector<1x8xf32> to vector<10x8xf32>
    %1078 = arith.addf %1074, %1077 : vector<10x8xf32>
    %1079 = arith.truncf %1064 : vector<10x8xf32> to vector<10x8xbf16>
    %1080 = arith.truncf %1071 : vector<10x8xf32> to vector<10x8xbf16>
    %cst_412 = arith.constant dense<0.000000e+00> : vector<10x10xf32>
    %1081 = tpu.matmul %1079, %1080, %cst_412 {dimension_numbers = #tpu.dot_dimension_numbers<[1], [1], [0], [0], [0, 0, 1, 0], [], []>} : vector<10x8xbf16>, vector<10x8xbf16>, vector<10x10xf32> -> vector<10x10xf32>
    %cst_413 = arith.constant 0.353553385 : f32
    %1082 = vector.broadcast %cst_413 : f32 to vector<10x10xf32>
    %1083 = arith.mulf %1081, %1082 : vector<10x10xf32>
    %1084 = arith.addf %1083, %60 : vector<10x10xf32>
    %cst_414 = arith.constant dense<0xFF800000> : vector<10xf32>
    %1085 = vector.multi_reduction <maximumf>, %1084, %cst_414 [1] : vector<10x10xf32> to vector<10xf32>
    %1086 = vector.shape_cast %1085 : vector<10xf32> to vector<10x1xf32>
    %1087 = vector.broadcast %1086 : vector<10x1xf32> to vector<10x10xf32>
    %1088 = arith.subf %1084, %1087 : vector<10x10xf32>
    %1089 = math.exp %1088 : vector<10x10xf32>
    %cst_415 = arith.constant dense<0.000000e+00> : vector<10xf32>
    %1090 = vector.multi_reduction <add>, %1089, %cst_415 [1] : vector<10x10xf32> to vector<10xf32>
    %1091 = vector.shape_cast %1090 : vector<10xf32> to vector<10x1xf32>
    %1092 = tpu.reciprocal %1091 {approx = true} : vector<10x1xf32> -> vector<10x1xf32>
    %1093 = vector.broadcast %1092 : vector<10x1xf32> to vector<10x10xf32>
    %1094 = arith.mulf %1089, %1093 : vector<10x10xf32>
    %1095 = arith.truncf %1094 : vector<10x10xf32> to vector<10x10xbf16>
    %1096 = arith.truncf %1078 : vector<10x8xf32> to vector<10x8xbf16>
    %cst_416 = arith.constant dense<0.000000e+00> : vector<10x8xf32>
    %1097 = tpu.matmul %1095, %1096, %cst_416 {dimension_numbers = #tpu.dot_dimension_numbers<[1], [0], [0], [1], [0, 0, 1, 1], [], []>} : vector<10x10xbf16>, vector<10x8xbf16>, vector<10x8xf32> -> vector<10x8xf32>
    %c2432 = arith.constant 2432 : index
    %c0_417 = arith.constant 0 : index
    %1098 = vector.load %arg2[%c2432, %c0_417] : memref<3568x128xbf16, #tpu.memory_space<vmem>>, vector<8x32xbf16>
    %1099 = arith.truncf %1097 : vector<10x8xf32> to vector<10x8xbf16>
    %cst_418 = arith.constant dense<0.000000e+00> : vector<10x32xf32>
    %1100 = tpu.matmul %1099, %1098, %cst_418 {dimension_numbers = #tpu.dot_dimension_numbers<[1], [0], [0], [1], [0, 0, 1, 1], [], []>} : vector<10x8xbf16>, vector<8x32xbf16>, vector<10x32xf32> -> vector<10x32xf32>
    %1101 = arith.addf %1057, %1100 : vector<10x32xf32>
    %c2464 = arith.constant 2464 : index
    %c0_419 = arith.constant 0 : index
    %1102 = vector.load %arg2[%c2464, %c0_419] : memref<3568x128xbf16, #tpu.memory_space<vmem>>, vector<32x8xbf16>
    %1103 = arith.truncf %783 : vector<10x32xf32> to vector<10x32xbf16>
    %cst_420 = arith.constant dense<0.000000e+00> : vector<10x8xf32>
    %1104 = tpu.matmul %1103, %1102, %cst_420 {dimension_numbers = #tpu.dot_dimension_numbers<[1], [0], [0], [1], [0, 0, 1, 1], [], []>} : vector<10x32xbf16>, vector<32x8xbf16>, vector<10x8xf32> -> vector<10x8xf32>
    %c2568 = arith.constant 2568 : index
    %c0_421 = arith.constant 0 : index
    %1105 = vector.load %arg2[%c2568, %c0_421] : memref<3568x128xbf16, #tpu.memory_space<vmem>>, vector<1x8xbf16>
    %1106 = arith.extf %1105 : vector<1x8xbf16> to vector<1x8xf32>
    %1107 = vector.broadcast %1106 : vector<1x8xf32> to vector<10x8xf32>
    %1108 = arith.addf %1104, %1107 : vector<10x8xf32>
    %c2496 = arith.constant 2496 : index
    %c0_422 = arith.constant 0 : index
    %1109 = vector.load %arg2[%c2496, %c0_422] : memref<3568x128xbf16, #tpu.memory_space<vmem>>, vector<32x8xbf16>
    %1110 = arith.truncf %783 : vector<10x32xf32> to vector<10x32xbf16>
    %cst_423 = arith.constant dense<0.000000e+00> : vector<10x8xf32>
    %1111 = tpu.matmul %1110, %1109, %cst_423 {dimension_numbers = #tpu.dot_dimension_numbers<[1], [0], [0], [1], [0, 0, 1, 1], [], []>} : vector<10x32xbf16>, vector<32x8xbf16>, vector<10x8xf32> -> vector<10x8xf32>
    %c2576 = arith.constant 2576 : index
    %c0_424 = arith.constant 0 : index
    %1112 = vector.load %arg2[%c2576, %c0_424] : memref<3568x128xbf16, #tpu.memory_space<vmem>>, vector<1x8xbf16>
    %1113 = arith.extf %1112 : vector<1x8xbf16> to vector<1x8xf32>
    %1114 = vector.broadcast %1113 : vector<1x8xf32> to vector<10x8xf32>
    %1115 = arith.addf %1111, %1114 : vector<10x8xf32>
    %c2528 = arith.constant 2528 : index
    %c0_425 = arith.constant 0 : index
    %1116 = vector.load %arg2[%c2528, %c0_425] : memref<3568x128xbf16, #tpu.memory_space<vmem>>, vector<32x8xbf16>
    %1117 = arith.truncf %783 : vector<10x32xf32> to vector<10x32xbf16>
    %cst_426 = arith.constant dense<0.000000e+00> : vector<10x8xf32>
    %1118 = tpu.matmul %1117, %1116, %cst_426 {dimension_numbers = #tpu.dot_dimension_numbers<[1], [0], [0], [1], [0, 0, 1, 1], [], []>} : vector<10x32xbf16>, vector<32x8xbf16>, vector<10x8xf32> -> vector<10x8xf32>
    %c2584 = arith.constant 2584 : index
    %c0_427 = arith.constant 0 : index
    %1119 = vector.load %arg2[%c2584, %c0_427] : memref<3568x128xbf16, #tpu.memory_space<vmem>>, vector<1x8xbf16>
    %1120 = arith.extf %1119 : vector<1x8xbf16> to vector<1x8xf32>
    %1121 = vector.broadcast %1120 : vector<1x8xf32> to vector<10x8xf32>
    %1122 = arith.addf %1118, %1121 : vector<10x8xf32>
    %1123 = arith.truncf %1108 : vector<10x8xf32> to vector<10x8xbf16>
    %1124 = arith.truncf %1115 : vector<10x8xf32> to vector<10x8xbf16>
    %cst_428 = arith.constant dense<0.000000e+00> : vector<10x10xf32>
    %1125 = tpu.matmul %1123, %1124, %cst_428 {dimension_numbers = #tpu.dot_dimension_numbers<[1], [1], [0], [0], [0, 0, 1, 0], [], []>} : vector<10x8xbf16>, vector<10x8xbf16>, vector<10x10xf32> -> vector<10x10xf32>
    %cst_429 = arith.constant 0.353553385 : f32
    %1126 = vector.broadcast %cst_429 : f32 to vector<10x10xf32>
    %1127 = arith.mulf %1125, %1126 : vector<10x10xf32>
    %1128 = arith.addf %1127, %60 : vector<10x10xf32>
    %cst_430 = arith.constant dense<0xFF800000> : vector<10xf32>
    %1129 = vector.multi_reduction <maximumf>, %1128, %cst_430 [1] : vector<10x10xf32> to vector<10xf32>
    %1130 = vector.shape_cast %1129 : vector<10xf32> to vector<10x1xf32>
    %1131 = vector.broadcast %1130 : vector<10x1xf32> to vector<10x10xf32>
    %1132 = arith.subf %1128, %1131 : vector<10x10xf32>
    %1133 = math.exp %1132 : vector<10x10xf32>
    %cst_431 = arith.constant dense<0.000000e+00> : vector<10xf32>
    %1134 = vector.multi_reduction <add>, %1133, %cst_431 [1] : vector<10x10xf32> to vector<10xf32>
    %1135 = vector.shape_cast %1134 : vector<10xf32> to vector<10x1xf32>
    %1136 = tpu.reciprocal %1135 {approx = true} : vector<10x1xf32> -> vector<10x1xf32>
    %1137 = vector.broadcast %1136 : vector<10x1xf32> to vector<10x10xf32>
    %1138 = arith.mulf %1133, %1137 : vector<10x10xf32>
    %1139 = arith.truncf %1138 : vector<10x10xf32> to vector<10x10xbf16>
    %1140 = arith.truncf %1122 : vector<10x8xf32> to vector<10x8xbf16>
    %cst_432 = arith.constant dense<0.000000e+00> : vector<10x8xf32>
    %1141 = tpu.matmul %1139, %1140, %cst_432 {dimension_numbers = #tpu.dot_dimension_numbers<[1], [0], [0], [1], [0, 0, 1, 1], [], []>} : vector<10x10xbf16>, vector<10x8xbf16>, vector<10x8xf32> -> vector<10x8xf32>
    %c2560 = arith.constant 2560 : index
    %c0_433 = arith.constant 0 : index
    %1142 = vector.load %arg2[%c2560, %c0_433] : memref<3568x128xbf16, #tpu.memory_space<vmem>>, vector<8x32xbf16>
    %1143 = arith.truncf %1141 : vector<10x8xf32> to vector<10x8xbf16>
    %cst_434 = arith.constant dense<0.000000e+00> : vector<10x32xf32>
    %1144 = tpu.matmul %1143, %1142, %cst_434 {dimension_numbers = #tpu.dot_dimension_numbers<[1], [0], [0], [1], [0, 0, 1, 1], [], []>} : vector<10x8xbf16>, vector<8x32xbf16>, vector<10x32xf32> -> vector<10x32xf32>
    %1145 = arith.addf %1101, %1144 : vector<10x32xf32>
    %cst_435 = arith.constant 0.000000e+00 : f32
    %1146 = vector.broadcast %cst_435 : f32 to vector<4x32xf32>
    %c72_436 = arith.constant 72 : index
    %c0_437 = arith.constant 0 : index
    %1147 = vector.load %arg3[%c72_436, %c0_437] : memref<232x32xf32, #tpu.memory_space<vmem>>, vector<4x18xf32>
    %1148 = arith.truncf %1147 : vector<4x18xf32> to vector<4x18xbf16>
    %1149 = arith.truncf %706 : vector<18x32xf32> to vector<18x32xbf16>
    %cst_438 = arith.constant dense<0.000000e+00> : vector<4x32xf32>
    %1150 = tpu.matmul %1148, %1149, %cst_438 {dimension_numbers = #tpu.dot_dimension_numbers<[1], [0], [0], [1], [0, 0, 1, 1], [], []>} : vector<4x18xbf16>, vector<18x32xbf16>, vector<4x32xf32> -> vector<4x32xf32>
    %cst_439 = arith.constant 0.111111112 : f32
    %1151 = vector.broadcast %cst_439 : f32 to vector<4x32xf32>
    %1152 = arith.mulf %1150, %1151 : vector<4x32xf32>
    %1153 = arith.addf %1146, %1152 : vector<4x32xf32>
    %c192_440 = arith.constant 192 : index
    %c0_441 = arith.constant 0 : index
    %1154 = vector.load %arg3[%c192_440, %c0_441] : memref<232x32xf32, #tpu.memory_space<vmem>>, vector<4x10xf32>
    %1155 = arith.truncf %1154 : vector<4x10xf32> to vector<4x10xbf16>
    %1156 = arith.truncf %783 : vector<10x32xf32> to vector<10x32xbf16>
    %cst_442 = arith.constant dense<0.000000e+00> : vector<4x32xf32>
    %1157 = tpu.matmul %1155, %1156, %cst_442 {dimension_numbers = #tpu.dot_dimension_numbers<[1], [0], [0], [1], [0, 0, 1, 1], [], []>} : vector<4x10xbf16>, vector<10x32xbf16>, vector<4x32xf32> -> vector<4x32xf32>
    %cst_443 = arith.constant 2.000000e-01 : f32
    %1158 = vector.broadcast %cst_443 : f32 to vector<4x32xf32>
    %1159 = arith.mulf %1157, %1158 : vector<4x32xf32>
    %1160 = arith.addf %1153, %1159 : vector<4x32xf32>
    %c3112 = arith.constant 3112 : index
    %c0_444 = arith.constant 0 : index
    %1161 = vector.load %arg2[%c3112, %c0_444] : memref<3568x128xbf16, #tpu.memory_space<vmem>>, vector<1x32xbf16>
    %1162 = arith.extf %1161 : vector<1x32xbf16> to vector<1x32xf32>
    %cst_445 = arith.constant 0.000000e+00 : f32
    %1163 = vector.broadcast %cst_445 : f32 to vector<4x32xf32>
    %1164 = vector.broadcast %1162 : vector<1x32xf32> to vector<4x32xf32>
    %1165 = arith.addf %1164, %1163 : vector<4x32xf32>
    %c2600 = arith.constant 2600 : index
    %c0_446 = arith.constant 0 : index
    %1166 = vector.load %arg2[%c2600, %c0_446] : memref<3568x128xbf16, #tpu.memory_space<vmem>>, vector<32x8xbf16>
    %1167 = arith.truncf %1160 : vector<4x32xf32> to vector<4x32xbf16>
    %cst_447 = arith.constant dense<0.000000e+00> : vector<4x8xf32>
    %1168 = tpu.matmul %1167, %1166, %cst_447 {dimension_numbers = #tpu.dot_dimension_numbers<[1], [0], [0], [1], [0, 0, 1, 1], [], []>} : vector<4x32xbf16>, vector<32x8xbf16>, vector<4x8xf32> -> vector<4x8xf32>
    %c2704 = arith.constant 2704 : index
    %c0_448 = arith.constant 0 : index
    %1169 = vector.load %arg2[%c2704, %c0_448] : memref<3568x128xbf16, #tpu.memory_space<vmem>>, vector<1x8xbf16>
    %1170 = arith.extf %1169 : vector<1x8xbf16> to vector<1x8xf32>
    %1171 = vector.broadcast %1170 : vector<1x8xf32> to vector<4x8xf32>
    %1172 = arith.addf %1168, %1171 : vector<4x8xf32>
    %c2632 = arith.constant 2632 : index
    %c0_449 = arith.constant 0 : index
    %1173 = vector.load %arg2[%c2632, %c0_449] : memref<3568x128xbf16, #tpu.memory_space<vmem>>, vector<32x8xbf16>
    %1174 = arith.truncf %1160 : vector<4x32xf32> to vector<4x32xbf16>
    %cst_450 = arith.constant dense<0.000000e+00> : vector<4x8xf32>
    %1175 = tpu.matmul %1174, %1173, %cst_450 {dimension_numbers = #tpu.dot_dimension_numbers<[1], [0], [0], [1], [0, 0, 1, 1], [], []>} : vector<4x32xbf16>, vector<32x8xbf16>, vector<4x8xf32> -> vector<4x8xf32>
    %c2712 = arith.constant 2712 : index
    %c0_451 = arith.constant 0 : index
    %1176 = vector.load %arg2[%c2712, %c0_451] : memref<3568x128xbf16, #tpu.memory_space<vmem>>, vector<1x8xbf16>
    %1177 = arith.extf %1176 : vector<1x8xbf16> to vector<1x8xf32>
    %1178 = vector.broadcast %1177 : vector<1x8xf32> to vector<4x8xf32>
    %1179 = arith.addf %1175, %1178 : vector<4x8xf32>
    %c2664 = arith.constant 2664 : index
    %c0_452 = arith.constant 0 : index
    %1180 = vector.load %arg2[%c2664, %c0_452] : memref<3568x128xbf16, #tpu.memory_space<vmem>>, vector<32x8xbf16>
    %1181 = arith.truncf %1160 : vector<4x32xf32> to vector<4x32xbf16>
    %cst_453 = arith.constant dense<0.000000e+00> : vector<4x8xf32>
    %1182 = tpu.matmul %1181, %1180, %cst_453 {dimension_numbers = #tpu.dot_dimension_numbers<[1], [0], [0], [1], [0, 0, 1, 1], [], []>} : vector<4x32xbf16>, vector<32x8xbf16>, vector<4x8xf32> -> vector<4x8xf32>
    %c2720 = arith.constant 2720 : index
    %c0_454 = arith.constant 0 : index
    %1183 = vector.load %arg2[%c2720, %c0_454] : memref<3568x128xbf16, #tpu.memory_space<vmem>>, vector<1x8xbf16>
    %1184 = arith.extf %1183 : vector<1x8xbf16> to vector<1x8xf32>
    %1185 = vector.broadcast %1184 : vector<1x8xf32> to vector<4x8xf32>
    %1186 = arith.addf %1182, %1185 : vector<4x8xf32>
    %1187 = arith.truncf %1172 : vector<4x8xf32> to vector<4x8xbf16>
    %1188 = arith.truncf %1179 : vector<4x8xf32> to vector<4x8xbf16>
    %cst_455 = arith.constant dense<0.000000e+00> : vector<4x4xf32>
    %1189 = tpu.matmul %1187, %1188, %cst_455 {dimension_numbers = #tpu.dot_dimension_numbers<[1], [1], [0], [0], [0, 0, 1, 0], [], []>} : vector<4x8xbf16>, vector<4x8xbf16>, vector<4x4xf32> -> vector<4x4xf32>
    %cst_456 = arith.constant 0.353553385 : f32
    %1190 = vector.broadcast %cst_456 : f32 to vector<4x4xf32>
    %1191 = arith.mulf %1189, %1190 : vector<4x4xf32>
    %1192 = arith.addf %1191, %61 : vector<4x4xf32>
    %cst_457 = arith.constant dense<0xFF800000> : vector<4xf32>
    %1193 = vector.multi_reduction <maximumf>, %1192, %cst_457 [1] : vector<4x4xf32> to vector<4xf32>
    %1194 = vector.shape_cast %1193 : vector<4xf32> to vector<4x1xf32>
    %1195 = vector.broadcast %1194 : vector<4x1xf32> to vector<4x4xf32>
    %1196 = arith.subf %1192, %1195 : vector<4x4xf32>
    %1197 = math.exp %1196 : vector<4x4xf32>
    %cst_458 = arith.constant dense<0.000000e+00> : vector<4xf32>
    %1198 = vector.multi_reduction <add>, %1197, %cst_458 [1] : vector<4x4xf32> to vector<4xf32>
    %1199 = vector.shape_cast %1198 : vector<4xf32> to vector<4x1xf32>
    %1200 = tpu.reciprocal %1199 {approx = true} : vector<4x1xf32> -> vector<4x1xf32>
    %1201 = vector.broadcast %1200 : vector<4x1xf32> to vector<4x4xf32>
    %1202 = arith.mulf %1197, %1201 : vector<4x4xf32>
    %1203 = arith.truncf %1202 : vector<4x4xf32> to vector<4x4xbf16>
    %1204 = arith.truncf %1186 : vector<4x8xf32> to vector<4x8xbf16>
    %cst_459 = arith.constant dense<0.000000e+00> : vector<4x8xf32>
    %1205 = tpu.matmul %1203, %1204, %cst_459 {dimension_numbers = #tpu.dot_dimension_numbers<[1], [0], [0], [1], [0, 0, 1, 1], [], []>} : vector<4x4xbf16>, vector<4x8xbf16>, vector<4x8xf32> -> vector<4x8xf32>
    %c2696 = arith.constant 2696 : index
    %c0_460 = arith.constant 0 : index
    %1206 = vector.load %arg2[%c2696, %c0_460] : memref<3568x128xbf16, #tpu.memory_space<vmem>>, vector<8x32xbf16>
    %1207 = arith.truncf %1205 : vector<4x8xf32> to vector<4x8xbf16>
    %cst_461 = arith.constant dense<0.000000e+00> : vector<4x32xf32>
    %1208 = tpu.matmul %1207, %1206, %cst_461 {dimension_numbers = #tpu.dot_dimension_numbers<[1], [0], [0], [1], [0, 0, 1, 1], [], []>} : vector<4x8xbf16>, vector<8x32xbf16>, vector<4x32xf32> -> vector<4x32xf32>
    %1209 = arith.addf %1165, %1208 : vector<4x32xf32>
    %c2728 = arith.constant 2728 : index
    %c0_462 = arith.constant 0 : index
    %1210 = vector.load %arg2[%c2728, %c0_462] : memref<3568x128xbf16, #tpu.memory_space<vmem>>, vector<32x8xbf16>
    %1211 = arith.truncf %1160 : vector<4x32xf32> to vector<4x32xbf16>
    %cst_463 = arith.constant dense<0.000000e+00> : vector<4x8xf32>
    %1212 = tpu.matmul %1211, %1210, %cst_463 {dimension_numbers = #tpu.dot_dimension_numbers<[1], [0], [0], [1], [0, 0, 1, 1], [], []>} : vector<4x32xbf16>, vector<32x8xbf16>, vector<4x8xf32> -> vector<4x8xf32>
    %c2832 = arith.constant 2832 : index
    %c0_464 = arith.constant 0 : index
    %1213 = vector.load %arg2[%c2832, %c0_464] : memref<3568x128xbf16, #tpu.memory_space<vmem>>, vector<1x8xbf16>
    %1214 = arith.extf %1213 : vector<1x8xbf16> to vector<1x8xf32>
    %1215 = vector.broadcast %1214 : vector<1x8xf32> to vector<4x8xf32>
    %1216 = arith.addf %1212, %1215 : vector<4x8xf32>
    %c2760 = arith.constant 2760 : index
    %c0_465 = arith.constant 0 : index
    %1217 = vector.load %arg2[%c2760, %c0_465] : memref<3568x128xbf16, #tpu.memory_space<vmem>>, vector<32x8xbf16>
    %1218 = arith.truncf %1160 : vector<4x32xf32> to vector<4x32xbf16>
    %cst_466 = arith.constant dense<0.000000e+00> : vector<4x8xf32>
    %1219 = tpu.matmul %1218, %1217, %cst_466 {dimension_numbers = #tpu.dot_dimension_numbers<[1], [0], [0], [1], [0, 0, 1, 1], [], []>} : vector<4x32xbf16>, vector<32x8xbf16>, vector<4x8xf32> -> vector<4x8xf32>
    %c2840 = arith.constant 2840 : index
    %c0_467 = arith.constant 0 : index
    %1220 = vector.load %arg2[%c2840, %c0_467] : memref<3568x128xbf16, #tpu.memory_space<vmem>>, vector<1x8xbf16>
    %1221 = arith.extf %1220 : vector<1x8xbf16> to vector<1x8xf32>
    %1222 = vector.broadcast %1221 : vector<1x8xf32> to vector<4x8xf32>
    %1223 = arith.addf %1219, %1222 : vector<4x8xf32>
    %c2792 = arith.constant 2792 : index
    %c0_468 = arith.constant 0 : index
    %1224 = vector.load %arg2[%c2792, %c0_468] : memref<3568x128xbf16, #tpu.memory_space<vmem>>, vector<32x8xbf16>
    %1225 = arith.truncf %1160 : vector<4x32xf32> to vector<4x32xbf16>
    %cst_469 = arith.constant dense<0.000000e+00> : vector<4x8xf32>
    %1226 = tpu.matmul %1225, %1224, %cst_469 {dimension_numbers = #tpu.dot_dimension_numbers<[1], [0], [0], [1], [0, 0, 1, 1], [], []>} : vector<4x32xbf16>, vector<32x8xbf16>, vector<4x8xf32> -> vector<4x8xf32>
    %c2848 = arith.constant 2848 : index
    %c0_470 = arith.constant 0 : index
    %1227 = vector.load %arg2[%c2848, %c0_470] : memref<3568x128xbf16, #tpu.memory_space<vmem>>, vector<1x8xbf16>
    %1228 = arith.extf %1227 : vector<1x8xbf16> to vector<1x8xf32>
    %1229 = vector.broadcast %1228 : vector<1x8xf32> to vector<4x8xf32>
    %1230 = arith.addf %1226, %1229 : vector<4x8xf32>
    %1231 = arith.truncf %1216 : vector<4x8xf32> to vector<4x8xbf16>
    %1232 = arith.truncf %1223 : vector<4x8xf32> to vector<4x8xbf16>
    %cst_471 = arith.constant dense<0.000000e+00> : vector<4x4xf32>
    %1233 = tpu.matmul %1231, %1232, %cst_471 {dimension_numbers = #tpu.dot_dimension_numbers<[1], [1], [0], [0], [0, 0, 1, 0], [], []>} : vector<4x8xbf16>, vector<4x8xbf16>, vector<4x4xf32> -> vector<4x4xf32>
    %cst_472 = arith.constant 0.353553385 : f32
    %1234 = vector.broadcast %cst_472 : f32 to vector<4x4xf32>
    %1235 = arith.mulf %1233, %1234 : vector<4x4xf32>
    %1236 = arith.addf %1235, %61 : vector<4x4xf32>
    %cst_473 = arith.constant dense<0xFF800000> : vector<4xf32>
    %1237 = vector.multi_reduction <maximumf>, %1236, %cst_473 [1] : vector<4x4xf32> to vector<4xf32>
    %1238 = vector.shape_cast %1237 : vector<4xf32> to vector<4x1xf32>
    %1239 = vector.broadcast %1238 : vector<4x1xf32> to vector<4x4xf32>
    %1240 = arith.subf %1236, %1239 : vector<4x4xf32>
    %1241 = math.exp %1240 : vector<4x4xf32>
    %cst_474 = arith.constant dense<0.000000e+00> : vector<4xf32>
    %1242 = vector.multi_reduction <add>, %1241, %cst_474 [1] : vector<4x4xf32> to vector<4xf32>
    %1243 = vector.shape_cast %1242 : vector<4xf32> to vector<4x1xf32>
    %1244 = tpu.reciprocal %1243 {approx = true} : vector<4x1xf32> -> vector<4x1xf32>
    %1245 = vector.broadcast %1244 : vector<4x1xf32> to vector<4x4xf32>
    %1246 = arith.mulf %1241, %1245 : vector<4x4xf32>
    %1247 = arith.truncf %1246 : vector<4x4xf32> to vector<4x4xbf16>
    %1248 = arith.truncf %1230 : vector<4x8xf32> to vector<4x8xbf16>
    %cst_475 = arith.constant dense<0.000000e+00> : vector<4x8xf32>
    %1249 = tpu.matmul %1247, %1248, %cst_475 {dimension_numbers = #tpu.dot_dimension_numbers<[1], [0], [0], [1], [0, 0, 1, 1], [], []>} : vector<4x4xbf16>, vector<4x8xbf16>, vector<4x8xf32> -> vector<4x8xf32>
    %c2824 = arith.constant 2824 : index
    %c0_476 = arith.constant 0 : index
    %1250 = vector.load %arg2[%c2824, %c0_476] : memref<3568x128xbf16, #tpu.memory_space<vmem>>, vector<8x32xbf16>
    %1251 = arith.truncf %1249 : vector<4x8xf32> to vector<4x8xbf16>
    %cst_477 = arith.constant dense<0.000000e+00> : vector<4x32xf32>
    %1252 = tpu.matmul %1251, %1250, %cst_477 {dimension_numbers = #tpu.dot_dimension_numbers<[1], [0], [0], [1], [0, 0, 1, 1], [], []>} : vector<4x8xbf16>, vector<8x32xbf16>, vector<4x32xf32> -> vector<4x32xf32>
    %1253 = arith.addf %1209, %1252 : vector<4x32xf32>
    %c2856 = arith.constant 2856 : index
    %c0_478 = arith.constant 0 : index
    %1254 = vector.load %arg2[%c2856, %c0_478] : memref<3568x128xbf16, #tpu.memory_space<vmem>>, vector<32x8xbf16>
    %1255 = arith.truncf %1160 : vector<4x32xf32> to vector<4x32xbf16>
    %cst_479 = arith.constant dense<0.000000e+00> : vector<4x8xf32>
    %1256 = tpu.matmul %1255, %1254, %cst_479 {dimension_numbers = #tpu.dot_dimension_numbers<[1], [0], [0], [1], [0, 0, 1, 1], [], []>} : vector<4x32xbf16>, vector<32x8xbf16>, vector<4x8xf32> -> vector<4x8xf32>
    %c2960 = arith.constant 2960 : index
    %c0_480 = arith.constant 0 : index
    %1257 = vector.load %arg2[%c2960, %c0_480] : memref<3568x128xbf16, #tpu.memory_space<vmem>>, vector<1x8xbf16>
    %1258 = arith.extf %1257 : vector<1x8xbf16> to vector<1x8xf32>
    %1259 = vector.broadcast %1258 : vector<1x8xf32> to vector<4x8xf32>
    %1260 = arith.addf %1256, %1259 : vector<4x8xf32>
    %c2888 = arith.constant 2888 : index
    %c0_481 = arith.constant 0 : index
    %1261 = vector.load %arg2[%c2888, %c0_481] : memref<3568x128xbf16, #tpu.memory_space<vmem>>, vector<32x8xbf16>
    %1262 = arith.truncf %1160 : vector<4x32xf32> to vector<4x32xbf16>
    %cst_482 = arith.constant dense<0.000000e+00> : vector<4x8xf32>
    %1263 = tpu.matmul %1262, %1261, %cst_482 {dimension_numbers = #tpu.dot_dimension_numbers<[1], [0], [0], [1], [0, 0, 1, 1], [], []>} : vector<4x32xbf16>, vector<32x8xbf16>, vector<4x8xf32> -> vector<4x8xf32>
    %c2968 = arith.constant 2968 : index
    %c0_483 = arith.constant 0 : index
    %1264 = vector.load %arg2[%c2968, %c0_483] : memref<3568x128xbf16, #tpu.memory_space<vmem>>, vector<1x8xbf16>
    %1265 = arith.extf %1264 : vector<1x8xbf16> to vector<1x8xf32>
    %1266 = vector.broadcast %1265 : vector<1x8xf32> to vector<4x8xf32>
    %1267 = arith.addf %1263, %1266 : vector<4x8xf32>
    %c2920 = arith.constant 2920 : index
    %c0_484 = arith.constant 0 : index
    %1268 = vector.load %arg2[%c2920, %c0_484] : memref<3568x128xbf16, #tpu.memory_space<vmem>>, vector<32x8xbf16>
    %1269 = arith.truncf %1160 : vector<4x32xf32> to vector<4x32xbf16>
    %cst_485 = arith.constant dense<0.000000e+00> : vector<4x8xf32>
    %1270 = tpu.matmul %1269, %1268, %cst_485 {dimension_numbers = #tpu.dot_dimension_numbers<[1], [0], [0], [1], [0, 0, 1, 1], [], []>} : vector<4x32xbf16>, vector<32x8xbf16>, vector<4x8xf32> -> vector<4x8xf32>
    %c2976 = arith.constant 2976 : index
    %c0_486 = arith.constant 0 : index
    %1271 = vector.load %arg2[%c2976, %c0_486] : memref<3568x128xbf16, #tpu.memory_space<vmem>>, vector<1x8xbf16>
    %1272 = arith.extf %1271 : vector<1x8xbf16> to vector<1x8xf32>
    %1273 = vector.broadcast %1272 : vector<1x8xf32> to vector<4x8xf32>
    %1274 = arith.addf %1270, %1273 : vector<4x8xf32>
    %1275 = arith.truncf %1260 : vector<4x8xf32> to vector<4x8xbf16>
    %1276 = arith.truncf %1267 : vector<4x8xf32> to vector<4x8xbf16>
    %cst_487 = arith.constant dense<0.000000e+00> : vector<4x4xf32>
    %1277 = tpu.matmul %1275, %1276, %cst_487 {dimension_numbers = #tpu.dot_dimension_numbers<[1], [1], [0], [0], [0, 0, 1, 0], [], []>} : vector<4x8xbf16>, vector<4x8xbf16>, vector<4x4xf32> -> vector<4x4xf32>
    %cst_488 = arith.constant 0.353553385 : f32
    %1278 = vector.broadcast %cst_488 : f32 to vector<4x4xf32>
    %1279 = arith.mulf %1277, %1278 : vector<4x4xf32>
    %1280 = arith.addf %1279, %61 : vector<4x4xf32>
    %cst_489 = arith.constant dense<0xFF800000> : vector<4xf32>
    %1281 = vector.multi_reduction <maximumf>, %1280, %cst_489 [1] : vector<4x4xf32> to vector<4xf32>
    %1282 = vector.shape_cast %1281 : vector<4xf32> to vector<4x1xf32>
    %1283 = vector.broadcast %1282 : vector<4x1xf32> to vector<4x4xf32>
    %1284 = arith.subf %1280, %1283 : vector<4x4xf32>
    %1285 = math.exp %1284 : vector<4x4xf32>
    %cst_490 = arith.constant dense<0.000000e+00> : vector<4xf32>
    %1286 = vector.multi_reduction <add>, %1285, %cst_490 [1] : vector<4x4xf32> to vector<4xf32>
    %1287 = vector.shape_cast %1286 : vector<4xf32> to vector<4x1xf32>
    %1288 = tpu.reciprocal %1287 {approx = true} : vector<4x1xf32> -> vector<4x1xf32>
    %1289 = vector.broadcast %1288 : vector<4x1xf32> to vector<4x4xf32>
    %1290 = arith.mulf %1285, %1289 : vector<4x4xf32>
    %1291 = arith.truncf %1290 : vector<4x4xf32> to vector<4x4xbf16>
    %1292 = arith.truncf %1274 : vector<4x8xf32> to vector<4x8xbf16>
    %cst_491 = arith.constant dense<0.000000e+00> : vector<4x8xf32>
    %1293 = tpu.matmul %1291, %1292, %cst_491 {dimension_numbers = #tpu.dot_dimension_numbers<[1], [0], [0], [1], [0, 0, 1, 1], [], []>} : vector<4x4xbf16>, vector<4x8xbf16>, vector<4x8xf32> -> vector<4x8xf32>
    %c2952 = arith.constant 2952 : index
    %c0_492 = arith.constant 0 : index
    %1294 = vector.load %arg2[%c2952, %c0_492] : memref<3568x128xbf16, #tpu.memory_space<vmem>>, vector<8x32xbf16>
    %1295 = arith.truncf %1293 : vector<4x8xf32> to vector<4x8xbf16>
    %cst_493 = arith.constant dense<0.000000e+00> : vector<4x32xf32>
    %1296 = tpu.matmul %1295, %1294, %cst_493 {dimension_numbers = #tpu.dot_dimension_numbers<[1], [0], [0], [1], [0, 0, 1, 1], [], []>} : vector<4x8xbf16>, vector<8x32xbf16>, vector<4x32xf32> -> vector<4x32xf32>
    %1297 = arith.addf %1253, %1296 : vector<4x32xf32>
    %c2984 = arith.constant 2984 : index
    %c0_494 = arith.constant 0 : index
    %1298 = vector.load %arg2[%c2984, %c0_494] : memref<3568x128xbf16, #tpu.memory_space<vmem>>, vector<32x8xbf16>
    %1299 = arith.truncf %1160 : vector<4x32xf32> to vector<4x32xbf16>
    %cst_495 = arith.constant dense<0.000000e+00> : vector<4x8xf32>
    %1300 = tpu.matmul %1299, %1298, %cst_495 {dimension_numbers = #tpu.dot_dimension_numbers<[1], [0], [0], [1], [0, 0, 1, 1], [], []>} : vector<4x32xbf16>, vector<32x8xbf16>, vector<4x8xf32> -> vector<4x8xf32>
    %c3088 = arith.constant 3088 : index
    %c0_496 = arith.constant 0 : index
    %1301 = vector.load %arg2[%c3088, %c0_496] : memref<3568x128xbf16, #tpu.memory_space<vmem>>, vector<1x8xbf16>
    %1302 = arith.extf %1301 : vector<1x8xbf16> to vector<1x8xf32>
    %1303 = vector.broadcast %1302 : vector<1x8xf32> to vector<4x8xf32>
    %1304 = arith.addf %1300, %1303 : vector<4x8xf32>
    %c3016 = arith.constant 3016 : index
    %c0_497 = arith.constant 0 : index
    %1305 = vector.load %arg2[%c3016, %c0_497] : memref<3568x128xbf16, #tpu.memory_space<vmem>>, vector<32x8xbf16>
    %1306 = arith.truncf %1160 : vector<4x32xf32> to vector<4x32xbf16>
    %cst_498 = arith.constant dense<0.000000e+00> : vector<4x8xf32>
    %1307 = tpu.matmul %1306, %1305, %cst_498 {dimension_numbers = #tpu.dot_dimension_numbers<[1], [0], [0], [1], [0, 0, 1, 1], [], []>} : vector<4x32xbf16>, vector<32x8xbf16>, vector<4x8xf32> -> vector<4x8xf32>
    %c3096 = arith.constant 3096 : index
    %c0_499 = arith.constant 0 : index
    %1308 = vector.load %arg2[%c3096, %c0_499] : memref<3568x128xbf16, #tpu.memory_space<vmem>>, vector<1x8xbf16>
    %1309 = arith.extf %1308 : vector<1x8xbf16> to vector<1x8xf32>
    %1310 = vector.broadcast %1309 : vector<1x8xf32> to vector<4x8xf32>
    %1311 = arith.addf %1307, %1310 : vector<4x8xf32>
    %c3048 = arith.constant 3048 : index
    %c0_500 = arith.constant 0 : index
    %1312 = vector.load %arg2[%c3048, %c0_500] : memref<3568x128xbf16, #tpu.memory_space<vmem>>, vector<32x8xbf16>
    %1313 = arith.truncf %1160 : vector<4x32xf32> to vector<4x32xbf16>
    %cst_501 = arith.constant dense<0.000000e+00> : vector<4x8xf32>
    %1314 = tpu.matmul %1313, %1312, %cst_501 {dimension_numbers = #tpu.dot_dimension_numbers<[1], [0], [0], [1], [0, 0, 1, 1], [], []>} : vector<4x32xbf16>, vector<32x8xbf16>, vector<4x8xf32> -> vector<4x8xf32>
    %c3104 = arith.constant 3104 : index
    %c0_502 = arith.constant 0 : index
    %1315 = vector.load %arg2[%c3104, %c0_502] : memref<3568x128xbf16, #tpu.memory_space<vmem>>, vector<1x8xbf16>
    %1316 = arith.extf %1315 : vector<1x8xbf16> to vector<1x8xf32>
    %1317 = vector.broadcast %1316 : vector<1x8xf32> to vector<4x8xf32>
    %1318 = arith.addf %1314, %1317 : vector<4x8xf32>
    %1319 = arith.truncf %1304 : vector<4x8xf32> to vector<4x8xbf16>
    %1320 = arith.truncf %1311 : vector<4x8xf32> to vector<4x8xbf16>
    %cst_503 = arith.constant dense<0.000000e+00> : vector<4x4xf32>
    %1321 = tpu.matmul %1319, %1320, %cst_503 {dimension_numbers = #tpu.dot_dimension_numbers<[1], [1], [0], [0], [0, 0, 1, 0], [], []>} : vector<4x8xbf16>, vector<4x8xbf16>, vector<4x4xf32> -> vector<4x4xf32>
    %cst_504 = arith.constant 0.353553385 : f32
    %1322 = vector.broadcast %cst_504 : f32 to vector<4x4xf32>
    %1323 = arith.mulf %1321, %1322 : vector<4x4xf32>
    %1324 = arith.addf %1323, %61 : vector<4x4xf32>
    %cst_505 = arith.constant dense<0xFF800000> : vector<4xf32>
    %1325 = vector.multi_reduction <maximumf>, %1324, %cst_505 [1] : vector<4x4xf32> to vector<4xf32>
    %1326 = vector.shape_cast %1325 : vector<4xf32> to vector<4x1xf32>
    %1327 = vector.broadcast %1326 : vector<4x1xf32> to vector<4x4xf32>
    %1328 = arith.subf %1324, %1327 : vector<4x4xf32>
    %1329 = math.exp %1328 : vector<4x4xf32>
    %cst_506 = arith.constant dense<0.000000e+00> : vector<4xf32>
    %1330 = vector.multi_reduction <add>, %1329, %cst_506 [1] : vector<4x4xf32> to vector<4xf32>
    %1331 = vector.shape_cast %1330 : vector<4xf32> to vector<4x1xf32>
    %1332 = tpu.reciprocal %1331 {approx = true} : vector<4x1xf32> -> vector<4x1xf32>
    %1333 = vector.broadcast %1332 : vector<4x1xf32> to vector<4x4xf32>
    %1334 = arith.mulf %1329, %1333 : vector<4x4xf32>
    %1335 = arith.truncf %1334 : vector<4x4xf32> to vector<4x4xbf16>
    %1336 = arith.truncf %1318 : vector<4x8xf32> to vector<4x8xbf16>
    %cst_507 = arith.constant dense<0.000000e+00> : vector<4x8xf32>
    %1337 = tpu.matmul %1335, %1336, %cst_507 {dimension_numbers = #tpu.dot_dimension_numbers<[1], [0], [0], [1], [0, 0, 1, 1], [], []>} : vector<4x4xbf16>, vector<4x8xbf16>, vector<4x8xf32> -> vector<4x8xf32>
    %c3080 = arith.constant 3080 : index
    %c0_508 = arith.constant 0 : index
    %1338 = vector.load %arg2[%c3080, %c0_508] : memref<3568x128xbf16, #tpu.memory_space<vmem>>, vector<8x32xbf16>
    %1339 = arith.truncf %1337 : vector<4x8xf32> to vector<4x8xbf16>
    %cst_509 = arith.constant dense<0.000000e+00> : vector<4x32xf32>
    %1340 = tpu.matmul %1339, %1338, %cst_509 {dimension_numbers = #tpu.dot_dimension_numbers<[1], [0], [0], [1], [0, 0, 1, 1], [], []>} : vector<4x8xbf16>, vector<8x32xbf16>, vector<4x32xf32> -> vector<4x32xf32>
    %1341 = arith.addf %1297, %1340 : vector<4x32xf32>
    %c80_510 = arith.constant 80 : index
    %c0_511 = arith.constant 0 : index
    %1342 = vector.load %arg3[%c80_510, %c0_511] : memref<232x32xf32, #tpu.memory_space<vmem>>, vector<18x4xf32>
    %1343 = arith.truncf %1342 : vector<18x4xf32> to vector<18x4xbf16>
    %1344 = arith.truncf %1341 : vector<4x32xf32> to vector<4x32xbf16>
    %cst_512 = arith.constant dense<0.000000e+00> : vector<18x32xf32>
    %1345 = tpu.matmul %1343, %1344, %cst_512 {dimension_numbers = #tpu.dot_dimension_numbers<[1], [0], [0], [1], [0, 0, 1, 1], [], []>} : vector<18x4xbf16>, vector<4x32xbf16>, vector<18x32xf32> -> vector<18x32xf32>
    %1346 = arith.addf %964, %1345 : vector<18x32xf32>
    %c200_513 = arith.constant 200 : index
    %c0_514 = arith.constant 0 : index
    %1347 = vector.load %arg3[%c200_513, %c0_514] : memref<232x32xf32, #tpu.memory_space<vmem>>, vector<10x4xf32>
    %1348 = arith.truncf %1347 : vector<10x4xf32> to vector<10x4xbf16>
    %1349 = arith.truncf %1341 : vector<4x32xf32> to vector<4x32xbf16>
    %cst_515 = arith.constant dense<0.000000e+00> : vector<10x32xf32>
    %1350 = tpu.matmul %1348, %1349, %cst_515 {dimension_numbers = #tpu.dot_dimension_numbers<[1], [0], [0], [1], [0, 0, 1, 1], [], []>} : vector<10x4xbf16>, vector<4x32xbf16>, vector<10x32xf32> -> vector<10x32xf32>
    %1351 = arith.addf %1145, %1350 : vector<10x32xf32>
    %1352 = arith.addf %706, %1346 : vector<18x32xf32>
    %cst_516 = arith.constant dense<0.000000e+00> : vector<18xf32>
    %1353 = vector.multi_reduction <add>, %1352, %cst_516 [1] : vector<18x32xf32> to vector<18xf32>
    %1354 = vector.shape_cast %1353 : vector<18xf32> to vector<18x1xf32>
    %cst_517 = arith.constant 3.200000e+01 : f32
    %1355 = vector.broadcast %cst_517 : f32 to vector<18x1xf32>
    %1356 = arith.divf %1354, %1355 : vector<18x1xf32>
    %1357 = vector.broadcast %1356 : vector<18x1xf32> to vector<18x32xf32>
    %1358 = arith.subf %1352, %1357 : vector<18x32xf32>
    %1359 = arith.mulf %1358, %1358 : vector<18x32xf32>
    %cst_518 = arith.constant dense<0.000000e+00> : vector<18xf32>
    %1360 = vector.multi_reduction <add>, %1359, %cst_518 [1] : vector<18x32xf32> to vector<18xf32>
    %1361 = vector.shape_cast %1360 : vector<18xf32> to vector<18x1xf32>
    %cst_519 = arith.constant 3.200000e+01 : f32
    %1362 = vector.broadcast %cst_519 : f32 to vector<18x1xf32>
    %1363 = arith.divf %1361, %1362 : vector<18x1xf32>
    %cst_520 = arith.constant 9.99999974E-6 : f32
    %1364 = vector.broadcast %cst_520 : f32 to vector<18x1xf32>
    %1365 = arith.addf %1363, %1364 : vector<18x1xf32>
    %1366 = math.rsqrt %1365 : vector<18x1xf32>
    %1367 = vector.broadcast %1366 : vector<18x1xf32> to vector<18x32xf32>
    %1368 = arith.mulf %1358, %1367 : vector<18x32xf32>
    %c3376 = arith.constant 3376 : index
    %c0_521 = arith.constant 0 : index
    %1369 = vector.load %arg2[%c3376, %c0_521] : memref<3568x128xbf16, #tpu.memory_space<vmem>>, vector<1x32xbf16>
    %1370 = arith.extf %1369 : vector<1x32xbf16> to vector<1x32xf32>
    %1371 = vector.broadcast %1370 : vector<1x32xf32> to vector<18x32xf32>
    %1372 = arith.mulf %1368, %1371 : vector<18x32xf32>
    %c3384 = arith.constant 3384 : index
    %c0_522 = arith.constant 0 : index
    %1373 = vector.load %arg2[%c3384, %c0_522] : memref<3568x128xbf16, #tpu.memory_space<vmem>>, vector<1x32xbf16>
    %1374 = arith.extf %1373 : vector<1x32xbf16> to vector<1x32xf32>
    %1375 = vector.broadcast %1374 : vector<1x32xf32> to vector<18x32xf32>
    %1376 = arith.addf %1372, %1375 : vector<18x32xf32>
    %c3232 = arith.constant 3232 : index
    %c0_523 = arith.constant 0 : index
    %1377 = vector.load %arg2[%c3232, %c0_523] : memref<3568x128xbf16, #tpu.memory_space<vmem>>, vector<32x64xbf16>
    %1378 = arith.truncf %1376 : vector<18x32xf32> to vector<18x32xbf16>
    %cst_524 = arith.constant dense<0.000000e+00> : vector<18x64xf32>
    %1379 = tpu.matmul %1378, %1377, %cst_524 {dimension_numbers = #tpu.dot_dimension_numbers<[1], [0], [0], [1], [0, 0, 1, 1], [], []>} : vector<18x32xbf16>, vector<32x64xbf16>, vector<18x64xf32> -> vector<18x64xf32>
    %c3264 = arith.constant 3264 : index
    %c0_525 = arith.constant 0 : index
    %1380 = vector.load %arg2[%c3264, %c0_525] : memref<3568x128xbf16, #tpu.memory_space<vmem>>, vector<1x64xbf16>
    %1381 = arith.extf %1380 : vector<1x64xbf16> to vector<1x64xf32>
    %1382 = vector.broadcast %1381 : vector<1x64xf32> to vector<18x64xf32>
    %1383 = arith.addf %1379, %1382 : vector<18x64xf32>
    %cst_526 = arith.constant 5.000000e-01 : f32
    %1384 = vector.broadcast %cst_526 : f32 to vector<18x64xf32>
    %1385 = arith.mulf %1384, %1383 : vector<18x64xf32>
    %cst_527 = arith.constant 4.471500e-02 : f32
    %1386 = vector.broadcast %cst_527 : f32 to vector<18x64xf32>
    %1387 = arith.mulf %1386, %1383 : vector<18x64xf32>
    %1388 = arith.mulf %1387, %1383 : vector<18x64xf32>
    %1389 = arith.mulf %1388, %1383 : vector<18x64xf32>
    %1390 = arith.addf %1383, %1389 : vector<18x64xf32>
    %cst_528 = arith.constant 0.797884583 : f32
    %1391 = vector.broadcast %cst_528 : f32 to vector<18x64xf32>
    %1392 = arith.mulf %1391, %1390 : vector<18x64xf32>
    %1393 = math.tanh %1392 : vector<18x64xf32>
    %cst_529 = arith.constant 1.000000e+00 : f32
    %1394 = vector.broadcast %cst_529 : f32 to vector<18x64xf32>
    %1395 = arith.addf %1394, %1393 : vector<18x64xf32>
    %1396 = arith.mulf %1385, %1395 : vector<18x64xf32>
    %c3272 = arith.constant 3272 : index
    %c0_530 = arith.constant 0 : index
    %1397 = vector.load %arg2[%c3272, %c0_530] : memref<3568x128xbf16, #tpu.memory_space<vmem>>, vector<64x32xbf16>
    %1398 = arith.truncf %1396 : vector<18x64xf32> to vector<18x64xbf16>
    %cst_531 = arith.constant dense<0.000000e+00> : vector<18x32xf32>
    %1399 = tpu.matmul %1398, %1397, %cst_531 {dimension_numbers = #tpu.dot_dimension_numbers<[1], [0], [0], [1], [0, 0, 1, 1], [], []>} : vector<18x64xbf16>, vector<64x32xbf16>, vector<18x32xf32> -> vector<18x32xf32>
    %c3336 = arith.constant 3336 : index
    %c0_532 = arith.constant 0 : index
    %1400 = vector.load %arg2[%c3336, %c0_532] : memref<3568x128xbf16, #tpu.memory_space<vmem>>, vector<1x32xbf16>
    %1401 = arith.extf %1400 : vector<1x32xbf16> to vector<1x32xf32>
    %1402 = vector.broadcast %1401 : vector<1x32xf32> to vector<18x32xf32>
    %1403 = arith.addf %1399, %1402 : vector<18x32xf32>
    %1404 = arith.addf %1376, %1403 : vector<18x32xf32>
    %cst_533 = arith.constant dense<0.000000e+00> : vector<18xf32>
    %1405 = vector.multi_reduction <add>, %1404, %cst_533 [1] : vector<18x32xf32> to vector<18xf32>
    %1406 = vector.shape_cast %1405 : vector<18xf32> to vector<18x1xf32>
    %cst_534 = arith.constant 3.200000e+01 : f32
    %1407 = vector.broadcast %cst_534 : f32 to vector<18x1xf32>
    %1408 = arith.divf %1406, %1407 : vector<18x1xf32>
    %1409 = vector.broadcast %1408 : vector<18x1xf32> to vector<18x32xf32>
    %1410 = arith.subf %1404, %1409 : vector<18x32xf32>
    %1411 = arith.mulf %1410, %1410 : vector<18x32xf32>
    %cst_535 = arith.constant dense<0.000000e+00> : vector<18xf32>
    %1412 = vector.multi_reduction <add>, %1411, %cst_535 [1] : vector<18x32xf32> to vector<18xf32>
    %1413 = vector.shape_cast %1412 : vector<18xf32> to vector<18x1xf32>
    %cst_536 = arith.constant 3.200000e+01 : f32
    %1414 = vector.broadcast %cst_536 : f32 to vector<18x1xf32>
    %1415 = arith.divf %1413, %1414 : vector<18x1xf32>
    %cst_537 = arith.constant 9.99999974E-6 : f32
    %1416 = vector.broadcast %cst_537 : f32 to vector<18x1xf32>
    %1417 = arith.addf %1415, %1416 : vector<18x1xf32>
    %1418 = math.rsqrt %1417 : vector<18x1xf32>
    %1419 = vector.broadcast %1418 : vector<18x1xf32> to vector<18x32xf32>
    %1420 = arith.mulf %1410, %1419 : vector<18x32xf32>
    %c3392 = arith.constant 3392 : index
    %c0_538 = arith.constant 0 : index
    %1421 = vector.load %arg2[%c3392, %c0_538] : memref<3568x128xbf16, #tpu.memory_space<vmem>>, vector<1x32xbf16>
    %1422 = arith.extf %1421 : vector<1x32xbf16> to vector<1x32xf32>
    %1423 = vector.broadcast %1422 : vector<1x32xf32> to vector<18x32xf32>
    %1424 = arith.mulf %1420, %1423 : vector<18x32xf32>
    %c3400 = arith.constant 3400 : index
    %c0_539 = arith.constant 0 : index
    %1425 = vector.load %arg2[%c3400, %c0_539] : memref<3568x128xbf16, #tpu.memory_space<vmem>>, vector<1x32xbf16>
    %1426 = arith.extf %1425 : vector<1x32xbf16> to vector<1x32xf32>
    %1427 = vector.broadcast %1426 : vector<1x32xf32> to vector<18x32xf32>
    %1428 = arith.addf %1424, %1427 : vector<18x32xf32>
    %1429 = arith.addf %783, %1351 : vector<10x32xf32>
    %cst_540 = arith.constant dense<0.000000e+00> : vector<10xf32>
    %1430 = vector.multi_reduction <add>, %1429, %cst_540 [1] : vector<10x32xf32> to vector<10xf32>
    %1431 = vector.shape_cast %1430 : vector<10xf32> to vector<10x1xf32>
    %cst_541 = arith.constant 3.200000e+01 : f32
    %1432 = vector.broadcast %cst_541 : f32 to vector<10x1xf32>
    %1433 = arith.divf %1431, %1432 : vector<10x1xf32>
    %1434 = vector.broadcast %1433 : vector<10x1xf32> to vector<10x32xf32>
    %1435 = arith.subf %1429, %1434 : vector<10x32xf32>
    %1436 = arith.mulf %1435, %1435 : vector<10x32xf32>
    %cst_542 = arith.constant dense<0.000000e+00> : vector<10xf32>
    %1437 = vector.multi_reduction <add>, %1436, %cst_542 [1] : vector<10x32xf32> to vector<10xf32>
    %1438 = vector.shape_cast %1437 : vector<10xf32> to vector<10x1xf32>
    %cst_543 = arith.constant 3.200000e+01 : f32
    %1439 = vector.broadcast %cst_543 : f32 to vector<10x1xf32>
    %1440 = arith.divf %1438, %1439 : vector<10x1xf32>
    %cst_544 = arith.constant 9.99999974E-6 : f32
    %1441 = vector.broadcast %cst_544 : f32 to vector<10x1xf32>
    %1442 = arith.addf %1440, %1441 : vector<10x1xf32>
    %1443 = math.rsqrt %1442 : vector<10x1xf32>
    %1444 = vector.broadcast %1443 : vector<10x1xf32> to vector<10x32xf32>
    %1445 = arith.mulf %1435, %1444 : vector<10x32xf32>
    %c3376_545 = arith.constant 3376 : index
    %c0_546 = arith.constant 0 : index
    %1446 = vector.load %arg2[%c3376_545, %c0_546] : memref<3568x128xbf16, #tpu.memory_space<vmem>>, vector<1x32xbf16>
    %1447 = arith.extf %1446 : vector<1x32xbf16> to vector<1x32xf32>
    %1448 = vector.broadcast %1447 : vector<1x32xf32> to vector<10x32xf32>
    %1449 = arith.mulf %1445, %1448 : vector<10x32xf32>
    %c3384_547 = arith.constant 3384 : index
    %c0_548 = arith.constant 0 : index
    %1450 = vector.load %arg2[%c3384_547, %c0_548] : memref<3568x128xbf16, #tpu.memory_space<vmem>>, vector<1x32xbf16>
    %1451 = arith.extf %1450 : vector<1x32xbf16> to vector<1x32xf32>
    %1452 = vector.broadcast %1451 : vector<1x32xf32> to vector<10x32xf32>
    %1453 = arith.addf %1449, %1452 : vector<10x32xf32>
    %c3232_549 = arith.constant 3232 : index
    %c0_550 = arith.constant 0 : index
    %1454 = vector.load %arg2[%c3232_549, %c0_550] : memref<3568x128xbf16, #tpu.memory_space<vmem>>, vector<32x64xbf16>
    %1455 = arith.truncf %1453 : vector<10x32xf32> to vector<10x32xbf16>
    %cst_551 = arith.constant dense<0.000000e+00> : vector<10x64xf32>
    %1456 = tpu.matmul %1455, %1454, %cst_551 {dimension_numbers = #tpu.dot_dimension_numbers<[1], [0], [0], [1], [0, 0, 1, 1], [], []>} : vector<10x32xbf16>, vector<32x64xbf16>, vector<10x64xf32> -> vector<10x64xf32>
    %c3264_552 = arith.constant 3264 : index
    %c0_553 = arith.constant 0 : index
    %1457 = vector.load %arg2[%c3264_552, %c0_553] : memref<3568x128xbf16, #tpu.memory_space<vmem>>, vector<1x64xbf16>
    %1458 = arith.extf %1457 : vector<1x64xbf16> to vector<1x64xf32>
    %1459 = vector.broadcast %1458 : vector<1x64xf32> to vector<10x64xf32>
    %1460 = arith.addf %1456, %1459 : vector<10x64xf32>
    %cst_554 = arith.constant 5.000000e-01 : f32
    %1461 = vector.broadcast %cst_554 : f32 to vector<10x64xf32>
    %1462 = arith.mulf %1461, %1460 : vector<10x64xf32>
    %cst_555 = arith.constant 4.471500e-02 : f32
    %1463 = vector.broadcast %cst_555 : f32 to vector<10x64xf32>
    %1464 = arith.mulf %1463, %1460 : vector<10x64xf32>
    %1465 = arith.mulf %1464, %1460 : vector<10x64xf32>
    %1466 = arith.mulf %1465, %1460 : vector<10x64xf32>
    %1467 = arith.addf %1460, %1466 : vector<10x64xf32>
    %cst_556 = arith.constant 0.797884583 : f32
    %1468 = vector.broadcast %cst_556 : f32 to vector<10x64xf32>
    %1469 = arith.mulf %1468, %1467 : vector<10x64xf32>
    %1470 = math.tanh %1469 : vector<10x64xf32>
    %cst_557 = arith.constant 1.000000e+00 : f32
    %1471 = vector.broadcast %cst_557 : f32 to vector<10x64xf32>
    %1472 = arith.addf %1471, %1470 : vector<10x64xf32>
    %1473 = arith.mulf %1462, %1472 : vector<10x64xf32>
    %c3272_558 = arith.constant 3272 : index
    %c0_559 = arith.constant 0 : index
    %1474 = vector.load %arg2[%c3272_558, %c0_559] : memref<3568x128xbf16, #tpu.memory_space<vmem>>, vector<64x32xbf16>
    %1475 = arith.truncf %1473 : vector<10x64xf32> to vector<10x64xbf16>
    %cst_560 = arith.constant dense<0.000000e+00> : vector<10x32xf32>
    %1476 = tpu.matmul %1475, %1474, %cst_560 {dimension_numbers = #tpu.dot_dimension_numbers<[1], [0], [0], [1], [0, 0, 1, 1], [], []>} : vector<10x64xbf16>, vector<64x32xbf16>, vector<10x32xf32> -> vector<10x32xf32>
    %c3336_561 = arith.constant 3336 : index
    %c0_562 = arith.constant 0 : index
    %1477 = vector.load %arg2[%c3336_561, %c0_562] : memref<3568x128xbf16, #tpu.memory_space<vmem>>, vector<1x32xbf16>
    %1478 = arith.extf %1477 : vector<1x32xbf16> to vector<1x32xf32>
    %1479 = vector.broadcast %1478 : vector<1x32xf32> to vector<10x32xf32>
    %1480 = arith.addf %1476, %1479 : vector<10x32xf32>
    %1481 = arith.addf %1453, %1480 : vector<10x32xf32>
    %cst_563 = arith.constant dense<0.000000e+00> : vector<10xf32>
    %1482 = vector.multi_reduction <add>, %1481, %cst_563 [1] : vector<10x32xf32> to vector<10xf32>
    %1483 = vector.shape_cast %1482 : vector<10xf32> to vector<10x1xf32>
    %cst_564 = arith.constant 3.200000e+01 : f32
    %1484 = vector.broadcast %cst_564 : f32 to vector<10x1xf32>
    %1485 = arith.divf %1483, %1484 : vector<10x1xf32>
    %1486 = vector.broadcast %1485 : vector<10x1xf32> to vector<10x32xf32>
    %1487 = arith.subf %1481, %1486 : vector<10x32xf32>
    %1488 = arith.mulf %1487, %1487 : vector<10x32xf32>
    %cst_565 = arith.constant dense<0.000000e+00> : vector<10xf32>
    %1489 = vector.multi_reduction <add>, %1488, %cst_565 [1] : vector<10x32xf32> to vector<10xf32>
    %1490 = vector.shape_cast %1489 : vector<10xf32> to vector<10x1xf32>
    %cst_566 = arith.constant 3.200000e+01 : f32
    %1491 = vector.broadcast %cst_566 : f32 to vector<10x1xf32>
    %1492 = arith.divf %1490, %1491 : vector<10x1xf32>
    %cst_567 = arith.constant 9.99999974E-6 : f32
    %1493 = vector.broadcast %cst_567 : f32 to vector<10x1xf32>
    %1494 = arith.addf %1492, %1493 : vector<10x1xf32>
    %1495 = math.rsqrt %1494 : vector<10x1xf32>
    %1496 = vector.broadcast %1495 : vector<10x1xf32> to vector<10x32xf32>
    %1497 = arith.mulf %1487, %1496 : vector<10x32xf32>
    %c3392_568 = arith.constant 3392 : index
    %c0_569 = arith.constant 0 : index
    %1498 = vector.load %arg2[%c3392_568, %c0_569] : memref<3568x128xbf16, #tpu.memory_space<vmem>>, vector<1x32xbf16>
    %1499 = arith.extf %1498 : vector<1x32xbf16> to vector<1x32xf32>
    %1500 = vector.broadcast %1499 : vector<1x32xf32> to vector<10x32xf32>
    %1501 = arith.mulf %1497, %1500 : vector<10x32xf32>
    %c3400_570 = arith.constant 3400 : index
    %c0_571 = arith.constant 0 : index
    %1502 = vector.load %arg2[%c3400_570, %c0_571] : memref<3568x128xbf16, #tpu.memory_space<vmem>>, vector<1x32xbf16>
    %1503 = arith.extf %1502 : vector<1x32xbf16> to vector<1x32xf32>
    %1504 = vector.broadcast %1503 : vector<1x32xf32> to vector<10x32xf32>
    %1505 = arith.addf %1501, %1504 : vector<10x32xf32>
    %cst_572 = arith.constant 0.000000e+00 : f32
    %1506 = vector.broadcast %cst_572 : f32 to vector<2x128xf32>
    %c3560 = arith.constant 3560 : index
    %c0_573 = arith.constant 0 : index
    %1507 = vector.load %arg2[%c3560, %c0_573] : memref<3568x128xbf16, #tpu.memory_space<vmem>>, vector<1x128xbf16>
    %1508 = arith.extf %1507 : vector<1x128xbf16> to vector<1x128xf32>
    %1509 = vector.broadcast %1508 : vector<1x128xf32> to vector<2x128xf32>
    %1510 = arith.addf %1506, %1509 : vector<2x128xf32>
    %cst_574 = arith.constant dense<0.000000e+00> : vector<18xf32>
    %1511 = vector.multi_reduction <add>, %1428, %cst_574 [1] : vector<18x32xf32> to vector<18xf32>
    %1512 = vector.shape_cast %1511 : vector<18xf32> to vector<18x1xf32>
    %cst_575 = arith.constant 3.200000e+01 : f32
    %1513 = vector.broadcast %cst_575 : f32 to vector<18x1xf32>
    %1514 = arith.divf %1512, %1513 : vector<18x1xf32>
    %1515 = vector.broadcast %1514 : vector<18x1xf32> to vector<18x32xf32>
    %1516 = arith.subf %1428, %1515 : vector<18x32xf32>
    %1517 = arith.mulf %1516, %1516 : vector<18x32xf32>
    %cst_576 = arith.constant dense<0.000000e+00> : vector<18xf32>
    %1518 = vector.multi_reduction <add>, %1517, %cst_576 [1] : vector<18x32xf32> to vector<18xf32>
    %1519 = vector.shape_cast %1518 : vector<18xf32> to vector<18x1xf32>
    %cst_577 = arith.constant 3.200000e+01 : f32
    %1520 = vector.broadcast %cst_577 : f32 to vector<18x1xf32>
    %1521 = arith.divf %1519, %1520 : vector<18x1xf32>
    %cst_578 = arith.constant 9.99999974E-6 : f32
    %1522 = vector.broadcast %cst_578 : f32 to vector<18x1xf32>
    %1523 = arith.addf %1521, %1522 : vector<18x1xf32>
    %1524 = math.rsqrt %1523 : vector<18x1xf32>
    %1525 = vector.broadcast %1524 : vector<18x1xf32> to vector<18x32xf32>
    %1526 = arith.mulf %1516, %1525 : vector<18x32xf32>
    %c3408 = arith.constant 3408 : index
    %c0_579 = arith.constant 0 : index
    %1527 = vector.load %arg2[%c3408, %c0_579] : memref<3568x128xbf16, #tpu.memory_space<vmem>>, vector<1x32xbf16>
    %1528 = arith.extf %1527 : vector<1x32xbf16> to vector<1x32xf32>
    %1529 = vector.broadcast %1528 : vector<1x32xf32> to vector<18x32xf32>
    %1530 = arith.mulf %1526, %1529 : vector<18x32xf32>
    %c3416 = arith.constant 3416 : index
    %c0_580 = arith.constant 0 : index
    %1531 = vector.load %arg2[%c3416, %c0_580] : memref<3568x128xbf16, #tpu.memory_space<vmem>>, vector<1x32xbf16>
    %1532 = arith.extf %1531 : vector<1x32xbf16> to vector<1x32xf32>
    %1533 = vector.broadcast %1532 : vector<1x32xf32> to vector<18x32xf32>
    %1534 = arith.addf %1530, %1533 : vector<18x32xf32>
    %c104_581 = arith.constant 104 : index
    %c0_582 = arith.constant 0 : index
    %1535 = vector.load %arg3[%c104_581, %c0_582] : memref<232x32xf32, #tpu.memory_space<vmem>>, vector<2x18xf32>
    %1536 = arith.truncf %1535 : vector<2x18xf32> to vector<2x18xbf16>
    %1537 = arith.truncf %1534 : vector<18x32xf32> to vector<18x32xbf16>
    %cst_583 = arith.constant dense<0.000000e+00> : vector<2x32xf32>
    %1538 = tpu.matmul %1536, %1537, %cst_583 {dimension_numbers = #tpu.dot_dimension_numbers<[1], [0], [0], [1], [0, 0, 1, 1], [], []>} : vector<2x18xbf16>, vector<18x32xbf16>, vector<2x32xf32> -> vector<2x32xf32>
    %cst_584 = arith.constant 0.111111112 : f32
    %1539 = vector.broadcast %cst_584 : f32 to vector<2x32xf32>
    %1540 = arith.mulf %1538, %1539 : vector<2x32xf32>
    %cst_585 = arith.constant 5.000000e-01 : f32
    %1541 = vector.broadcast %cst_585 : f32 to vector<2x32xf32>
    %1542 = arith.mulf %1541, %1540 : vector<2x32xf32>
    %cst_586 = arith.constant 4.471500e-02 : f32
    %1543 = vector.broadcast %cst_586 : f32 to vector<2x32xf32>
    %1544 = arith.mulf %1543, %1540 : vector<2x32xf32>
    %1545 = arith.mulf %1544, %1540 : vector<2x32xf32>
    %1546 = arith.mulf %1545, %1540 : vector<2x32xf32>
    %1547 = arith.addf %1540, %1546 : vector<2x32xf32>
    %cst_587 = arith.constant 0.797884583 : f32
    %1548 = vector.broadcast %cst_587 : f32 to vector<2x32xf32>
    %1549 = arith.mulf %1548, %1547 : vector<2x32xf32>
    %1550 = math.tanh %1549 : vector<2x32xf32>
    %cst_588 = arith.constant 1.000000e+00 : f32
    %1551 = vector.broadcast %cst_588 : f32 to vector<2x32xf32>
    %1552 = arith.addf %1551, %1550 : vector<2x32xf32>
    %1553 = arith.mulf %1542, %1552 : vector<2x32xf32>
    %c3496 = arith.constant 3496 : index
    %c0_589 = arith.constant 0 : index
    %1554 = vector.load %arg2[%c3496, %c0_589] : memref<3568x128xbf16, #tpu.memory_space<vmem>>, vector<32x128xbf16>
    %1555 = arith.truncf %1553 : vector<2x32xf32> to vector<2x32xbf16>
    %cst_590 = arith.constant dense<0.000000e+00> : vector<2x128xf32>
    %1556 = tpu.matmul %1555, %1554, %cst_590 {dimension_numbers = #tpu.dot_dimension_numbers<[1], [0], [0], [1], [0, 0, 1, 1], [], []>} : vector<2x32xbf16>, vector<32x128xbf16>, vector<2x128xf32> -> vector<2x128xf32>
    %1557 = arith.addf %1510, %1556 : vector<2x128xf32>
    %cst_591 = arith.constant dense<0.000000e+00> : vector<10xf32>
    %1558 = vector.multi_reduction <add>, %1505, %cst_591 [1] : vector<10x32xf32> to vector<10xf32>
    %1559 = vector.shape_cast %1558 : vector<10xf32> to vector<10x1xf32>
    %cst_592 = arith.constant 3.200000e+01 : f32
    %1560 = vector.broadcast %cst_592 : f32 to vector<10x1xf32>
    %1561 = arith.divf %1559, %1560 : vector<10x1xf32>
    %1562 = vector.broadcast %1561 : vector<10x1xf32> to vector<10x32xf32>
    %1563 = arith.subf %1505, %1562 : vector<10x32xf32>
    %1564 = arith.mulf %1563, %1563 : vector<10x32xf32>
    %cst_593 = arith.constant dense<0.000000e+00> : vector<10xf32>
    %1565 = vector.multi_reduction <add>, %1564, %cst_593 [1] : vector<10x32xf32> to vector<10xf32>
    %1566 = vector.shape_cast %1565 : vector<10xf32> to vector<10x1xf32>
    %cst_594 = arith.constant 3.200000e+01 : f32
    %1567 = vector.broadcast %cst_594 : f32 to vector<10x1xf32>
    %1568 = arith.divf %1566, %1567 : vector<10x1xf32>
    %cst_595 = arith.constant 9.99999974E-6 : f32
    %1569 = vector.broadcast %cst_595 : f32 to vector<10x1xf32>
    %1570 = arith.addf %1568, %1569 : vector<10x1xf32>
    %1571 = math.rsqrt %1570 : vector<10x1xf32>
    %1572 = vector.broadcast %1571 : vector<10x1xf32> to vector<10x32xf32>
    %1573 = arith.mulf %1563, %1572 : vector<10x32xf32>
    %c3408_596 = arith.constant 3408 : index
    %c0_597 = arith.constant 0 : index
    %1574 = vector.load %arg2[%c3408_596, %c0_597] : memref<3568x128xbf16, #tpu.memory_space<vmem>>, vector<1x32xbf16>
    %1575 = arith.extf %1574 : vector<1x32xbf16> to vector<1x32xf32>
    %1576 = vector.broadcast %1575 : vector<1x32xf32> to vector<10x32xf32>
    %1577 = arith.mulf %1573, %1576 : vector<10x32xf32>
    %c3416_598 = arith.constant 3416 : index
    %c0_599 = arith.constant 0 : index
    %1578 = vector.load %arg2[%c3416_598, %c0_599] : memref<3568x128xbf16, #tpu.memory_space<vmem>>, vector<1x32xbf16>
    %1579 = arith.extf %1578 : vector<1x32xbf16> to vector<1x32xf32>
    %1580 = vector.broadcast %1579 : vector<1x32xf32> to vector<10x32xf32>
    %1581 = arith.addf %1577, %1580 : vector<10x32xf32>
    %c216 = arith.constant 216 : index
    %c0_600 = arith.constant 0 : index
    %1582 = vector.load %arg3[%c216, %c0_600] : memref<232x32xf32, #tpu.memory_space<vmem>>, vector<2x10xf32>
    %1583 = arith.truncf %1582 : vector<2x10xf32> to vector<2x10xbf16>
    %1584 = arith.truncf %1581 : vector<10x32xf32> to vector<10x32xbf16>
    %cst_601 = arith.constant dense<0.000000e+00> : vector<2x32xf32>
    %1585 = tpu.matmul %1583, %1584, %cst_601 {dimension_numbers = #tpu.dot_dimension_numbers<[1], [0], [0], [1], [0, 0, 1, 1], [], []>} : vector<2x10xbf16>, vector<10x32xbf16>, vector<2x32xf32> -> vector<2x32xf32>
    %cst_602 = arith.constant 2.000000e-01 : f32
    %1586 = vector.broadcast %cst_602 : f32 to vector<2x32xf32>
    %1587 = arith.mulf %1585, %1586 : vector<2x32xf32>
    %cst_603 = arith.constant 5.000000e-01 : f32
    %1588 = vector.broadcast %cst_603 : f32 to vector<2x32xf32>
    %1589 = arith.mulf %1588, %1587 : vector<2x32xf32>
    %cst_604 = arith.constant 4.471500e-02 : f32
    %1590 = vector.broadcast %cst_604 : f32 to vector<2x32xf32>
    %1591 = arith.mulf %1590, %1587 : vector<2x32xf32>
    %1592 = arith.mulf %1591, %1587 : vector<2x32xf32>
    %1593 = arith.mulf %1592, %1587 : vector<2x32xf32>
    %1594 = arith.addf %1587, %1593 : vector<2x32xf32>
    %cst_605 = arith.constant 0.797884583 : f32
    %1595 = vector.broadcast %cst_605 : f32 to vector<2x32xf32>
    %1596 = arith.mulf %1595, %1594 : vector<2x32xf32>
    %1597 = math.tanh %1596 : vector<2x32xf32>
    %cst_606 = arith.constant 1.000000e+00 : f32
    %1598 = vector.broadcast %cst_606 : f32 to vector<2x32xf32>
    %1599 = arith.addf %1598, %1597 : vector<2x32xf32>
    %1600 = arith.mulf %1589, %1599 : vector<2x32xf32>
    %c3528 = arith.constant 3528 : index
    %c0_607 = arith.constant 0 : index
    %1601 = vector.load %arg2[%c3528, %c0_607] : memref<3568x128xbf16, #tpu.memory_space<vmem>>, vector<32x128xbf16>
    %1602 = arith.truncf %1600 : vector<2x32xf32> to vector<2x32xbf16>
    %cst_608 = arith.constant dense<0.000000e+00> : vector<2x128xf32>
    %1603 = tpu.matmul %1602, %1601, %cst_608 {dimension_numbers = #tpu.dot_dimension_numbers<[1], [0], [0], [1], [0, 0, 1, 1], [], []>} : vector<2x32xbf16>, vector<32x128xbf16>, vector<2x128xf32> -> vector<2x128xf32>
    %1604 = arith.addf %1557, %1603 : vector<2x128xf32>
    %c0_609 = arith.constant 0 : index
    %c0_610 = arith.constant 0 : index
    %1605 = vector.load %arg4[%c0_609, %c0_610] : memref<2x128xf32, #tpu.memory_space<vmem>>, vector<2x128xf32>
    tpu.vector_store %arg4[%c0_609, %c0_610], %1604 {strides = array<i32>} : memref<2x128xf32, #tpu.memory_space<vmem>>, vector<2x128xf32>,
    return
  }
  func.func @transform_0(%arg0: i32) -> (i32, i32) {
    %c0_i32 = arith.constant 0 : i32
    %c0_i32_0 = arith.constant 0 : i32
    return %arg0, %c0_i32 : i32, i32
  }
  func.func @transform_1(%arg0: i32) -> (i32, i32) {
    %c0_i32 = arith.constant 0 : i32
    %c0_i32_0 = arith.constant 0 : i32
    %c0_i32_1 = arith.constant 0 : i32
    return %c0_i32, %c0_i32_0 : i32, i32
  }
  func.func @transform_2(%arg0: i32) -> (i32, i32) {
    %c0_i32 = arith.constant 0 : i32
    %c0_i32_0 = arith.constant 0 : i32
    %c0_i32_1 = arith.constant 0 : i32
    return %c0_i32, %c0_i32_0 : i32, i32
  }
  func.func @transform_3(%arg0: i32) -> (i32, i32) {
    %c0_i32 = arith.constant 0 : i32
    %c0_i32_0 = arith.constant 0 : i32
    return %arg0, %c0_i32 : i32, i32
  }
}

</mosaic_0001>

<bundles_post_ra>
// kernel: medformer_forward.1
= control target key start
LH: loop header
LB: loop body
LE: loop exit
PB: predicated region body
PF: predicated region fallthrough
CT: control target
= control target key end

     0   :  { %8 = vsyncpa [#allocation3], 0  ;;  %s16214_s0 = inlined_call_operand.vmem [shape: f32[32,4], index: 0, kind: input, shape index: {}]   ;;  %s16215_s1 = inlined_call_operand.hbm [shape: bf16[3568,128], index: 1, kind: input, shape index: {}]   ;;  %s16216_s2 = inlined_call_operand.hbm [shape: f32[232,32], index: 2, kind: input, shape index: {}]   ;;  %s16217_s3 = inlined_call_operand.hbm [shape: f32[2,128], index: 3, kind: output, shape index: {}]  }
   0x1   :  { %9 = vsyncpa [#allocation6], 0 }
   0x2   :  { %10 = vsyncpa [#allocation4], 0  ;;  %s14504_s12 = smov [#allocation2]   ;;  %s14432_s16 = scalar_lea.hbm %s16215_s1, 28544 }
   0x3   :  { %s18_s13 = sshll.u32 %s14504_s12, 4  ;;  %p14433_p0 = scmp.ne.s32.totalorder %s16215_s1, %s14432_s16  ;;  %s19_s13 = int_to_ptr.vmem [resolvable:$true] %s18_s13 }
   0x4   :  { %p14436_p1 = scmp.lt.u32.totalorder %s14432_s16, %s16215_s1 }
   0x6   :  { %p14438_p2 = pnand %p14436_p1, %p14433_p0 }
   0x8   :  { %14441 = shalt.err (!%p14438_p2)
}
   0x9   :  { %s14442_s21 = scalar_lea.vmem %s19_s13, 28544  ;;  %p14447_p4 = scmp.lt.s32.totalorder %s19_s13, %s19_s13 }
   0xa   :  { %p14443_p3 = scmp.ne.s32.totalorder %s19_s13, %s14442_s21  ;;  %p14448_p5 = scmp.lt.s32.totalorder %s14442_s21, %s14442_s21 }
   0xc   :  { %p14449_p6 = por %p14448_p5, %p14447_p4 }
   0xe   :  { %p14450_p7 = pnand %p14449_p6, %p14443_p3 }
  0x10   :  { %14453 = shalt.err (!%p14450_p7)
}
  0x11   :  { %s14505_s22 = smov 64   ;;  %s14506_s23 = smov 4  }
  0x12   :  { %24 = dma.hbm_to_vmem [thread:$0]  %s16215_s1, 28544, %s19_s13, [#allocation3], %s14505_s22, %s14505_s22, %s14506_s23  }
  0x13   :  { %s14507_s26 = smov [#allocation5]   ;;  %s14454_s30 = scalar_lea.hbm %s16216_s2, 3712 }
  0x14   :  { %s30_s27 = sshll.u32 %s14507_s26, 4  ;;  %p14455_p8 = scmp.ne.s32.totalorder %s16216_s2, %s14454_s30  ;;  %s31_s27 = int_to_ptr.vmem [resolvable:$true] %s30_s27 }
  0x15   :  { %p14458_p9 = scmp.lt.u32.totalorder %s14454_s30, %s16216_s2 }
  0x17   :  { %p14460_p10 = pnand %p14458_p9, %p14455_p8 }
  0x19   :  { %14463 = shalt.err (!%p14460_p10)
}
  0x1a   :  { %s14464_s8 = scalar_lea.vmem %s31_s27, 3712  ;;  %p14469_p12 = scmp.lt.s32.totalorder %s31_s27, %s31_s27 }
  0x1b   :  { %p14465_p11 = scmp.ne.s32.totalorder %s31_s27, %s14464_s8  ;;  %p14470_p13 = scmp.lt.s32.totalorder %s14464_s8, %s14464_s8 }
  0x1d   :  { %p14471_p0 = por %p14470_p13, %p14469_p12 }
  0x1f   :  { %p14472_p1 = pnand %p14471_p0, %p14465_p11 }
  0x21   :  { %14475 = shalt.err (!%p14472_p1)
}
  0x22   :  { %s14508_s1 = smov 128   ;;  %s14509_s9 = smov 8  }
  0x23   :  { %36 = dma.hbm_to_vmem [thread:$0]  %s16216_s2, 3712, %s31_s27, [#allocation6], %s14508_s1, %s14508_s1, %s14509_s9  }
  0x24   :  { %14498 = dma.done.wait [#allocation3], 28544  }
  0x25   :  { %14499 = vsyncadd [#allocation3], 4294938752 }
  0x26   :  { %14500 = dma.done.wait [#allocation6], 3712  }
  0x27   :  { %14501 = vsyncadd [#allocation6], 4294963584  ;;  %vm58_vm0 = vcmask 1041408   ;;  %v48_v0 = vld [vmem:[#allocation2 + $0x6b0] sm:$0x3]  ;;  %v44_v2 = vld [vmem:[%s16214_s0] sm:$0xff] }
  0x28   :  { %v118_v1 = vld [vmem:[#allocation2 + $0x6b4] sm:$0x3]  ;;  %13951 = vmatprep.subr.msk.bf16.mxu0 %vm58_vm0, %v48_v0  ;;  %v60_v3 = vsel %vm58_vm0, %v48_v0, 0  ;;  %v45_v5 = vld [vmem:[%s16214_s0 + $0x8] sm:$0xff]  ;;  %vm51_vm1 = vcmask 31744   ;;  %v47_v7 = vld [vmem:[%s16214_s0 + $0x18] sm:$0xff] }
  0x29   :  { %13952 = vmatprep.subr.msk.bf16.mxu1 %vm58_vm0, %v118_v1  ;;  %v120_v4 = vsel %vm58_vm0, %v118_v1, 0  ;;  %v46_v6 = vld [vmem:[%s16214_s0 + $0x10] sm:$0xff]  ;;  %12635 = vmatpush3.bf16.msra.mxu0 %v60_v3  ;;  %v14573_v8 = vpack.c.bf16 %v45_v5, %v44_v2  ;;  %v172_v11 = vld [vmem:[#allocation5 + $0x20] sm:$0xff]  ;;  %vm178_vm2 = vcmask 261120   ;;  %v112_v14 = vld [vmem:[#allocation5 + $0x8] sm:$0xff]  ;;  %v14510_v36 = vmov 0.0  }
  0x2a   :  { %12641 = vmatpush3.bf16.msra.mxu1 %v120_v4  ;;  %v14575_v9 = vpack.c.bf16 %v47_v7, %v46_v6  ;;  %v171_v10 = vld [vmem:[#allocation5 + $0x18] sm:$0xff]  ;;  %v111_v12 = vld [vmem:[#allocation5] sm:$0xff]  ;;  %v173_v28 = vld [vmem:[#allocation5 + $0x28] sm:$0x3]  ;;  %vm14511_vm3 = vmmov 0   ;;  %vm293_vm4 = vcmask 1040384  }
  0x2b   :  { %12636 = vmatprep.mubr.msk.bf16.mxu0 %vm51_vm1, %v14573_v8  ;;  %12642 = vmatprep.mubr.msk.bf16.mxu1 %vm51_vm1, %v14573_v8  ;;  %v174_v13 = vpack.c.bf16 %v172_v11, %v171_v10  ;;  %v114_v15 = vpack.c.bf16 %v112_v14, %v111_v12  ;;  %v113_v29 = vld [vmem:[#allocation5 + $0x10] sm:$0x3]  ;;  %v303_v30 = vld [vmem:[#allocation2 + $0x6c0] sm:$0x3]  ;;  %v361_v31 = vld [vmem:[#allocation2 + $0x6c4] sm:$0x3]  ;;  %v175_v32 = vpack.c.bf16 %v173_v28, %v173_v28 }
  0x2c   :  { %12637 = vmatmul.mubr.msk.bf16.vlgmr.msra.gmra.mrb[0].mxu0 %vm51_vm1, %v14575_v9  ;;  %v115_v33 = vpack.c.bf16 %v113_v29, %v113_v29  ;;  %v305_v34 = vsel %vm58_vm0, %v303_v30, 0  ;;  %v363_v35 = vsel %vm58_vm0, %v361_v31, 0  ;;  %v414_v60 = vld [vmem:[#allocation5 + $0x80] sm:$0xff]  ;;  %v415_v61 = vld [vmem:[#allocation5 + $0x88] sm:$0x3]  ;;  %v356_v62 = vld [vmem:[#allocation5 + $0x70] sm:$0xff] }
  0x2d   :  { %12643 = vmatmul.mubr.msk.bf16.vlgmr.msra.gmra.mrb[0].mxu1 %vm51_vm1, %v14575_v9  ;;  %12650 = vmatprep.mubr.msk.bf16.mxu0 %vm178_vm2, %v174_v13  ;;  %v357_v63 = vld [vmem:[#allocation5 + $0x78] sm:$0x3]  ;;  %v507_v0 = vld [vmem:[#allocation2 + $0x6c8] sm:$0x3]  ;;  %v416_v1 = vpack.c.bf16 %v415_v61, %v414_v60  ;;  %v287_v4 = vld [vmem:[#allocation2 + $0x6b8] sm:$0xf] }
  0x2e   :  { %12658 = vmatprep.mubr.msk.bf16.mxu1 %vm178_vm2, %v114_v15  ;;  %v358_v2 = vpack.c.bf16 %v357_v63, %v356_v62  ;;  %v509_v3 = vsel %vm58_vm0, %v507_v0, 0  ;;  %v611_v5 = vld [vmem:[#allocation2 + $0x6cc] sm:$0x3]  ;;  %v289_v6 = vunpack.c.l.bf16 %v287_v4  ;;  %v288_v7 = vld [vmem:[#allocation2 + $0x6bc] sm:$0x1]  ;;  %v14000_v13 = vld [vmem:[#allocation2] sm:$0xff]  }
  0x2f   :  { %v290_v10 = vunpack.c.l.bf16 %v288_v7  ;;  %v613_v12 = vsel %vm58_vm0, %v611_v5, 0  ;;  %v889_v62 = vld [vmem:[#allocation2 + $0x3c] sm:$0x1]  ;;  %vm959_vm5 = vcmask 64512   ;;  %vm1033_vm6 = vcmask 140288   ;;  %s14512_s0 = smov [#allocation7]  }
  0x30   :  { %v294_v11 = vrot.slane %v289_v6, 7  ;;  %v890_v4 = vunpack.c.l.bf16 %v889_v62  ;;  %vm1026_vm7 = vcmask 146432   ;;  %vm1131_vm8 = vcmask 1043456   ;;  %s11697_s19 = sshll.u32 %s14512_s0, 4  ;;  %s11698_s19 = int_to_ptr.vmem [resolvable:$true] %s11697_s19 }
  0x31   :  { %v295_v15 = vrot.slane %v290_v10, 7  ;;  %vm720_vm9 = vcmask 1044480   ;;  %vm2750_vm10 = vcmask 80896   ;;  %vm2754_vm11 = vcmask 74752   ;;  %s14476_s20 = scalar_lea.vmem %s11698_s19, 32  ;;  %p14481_p3 = scmp.lt.s32.totalorder %s11698_s19, %s11698_s19 }
  0x32   :  { %v299_v14 = vsel %vm293_vm4, %v290_v10, %v294_v11  ;;  %vm4311_vm12 = vcmask 27648   ;;  %vm5576_vm13 = vcmask 254976   ;;  %vm5774_vm14 = vcmask 523264   ;;  %p14477_p2 = scmp.ne.s32.totalorder %s11698_s19, %s14476_s20  ;;  %p14482_p4 = scmp.lt.s32.totalorder %s14476_s20, %s14476_s20 }
  0x34   :  { %p14483_p5 = por %p14482_p4, %p14481_p3 }
  0x36   :  { %p14484_p6 = pnand %p14483_p5, %p14477_p2 }
  0xff   :  { %v12638_v16 = vpop.f32.mrb[0].mxu0 }
 0x100   :  { %v12644_v17 = vpop.f32.mrb[0].mxu1  ;;  %v96_v18 = vpop.f32.mrb[1].mxu0 }
 0x101   :  { %v156_v19 = vpop.f32.mrb[1].mxu1  ;;  %v12639_v20 = vpop.f32.mrb[2].mxu0 }
 0x102   :  { %v12645_v21 = vpop.f32.mrb[2].mxu1  ;;  %v117_v22 = vpack.c.bf16 %v12639_v20, %v12638_v16  ;;  %v99_v24 = vpop.f32.mrb[3].mxu0 }
 0x103   :  { %v177_v23 = vpack.c.bf16 %v12645_v21, %v12644_v17  ;;  %v159_v25 = vpop.f32.mrb[3].mxu1  ;;  %v116_v26 = vpack.c.bf16 %v99_v24, %v96_v18  ;;  %v14001_v18 = vld [vmem:[#allocation2 + $0x8] sm:$0xff]   ;;  %v14002_v21 = vld [vmem:[#allocation2 + $0x20] sm:$0xff]  }
 0x104   :  { %v176_v27 = vpack.c.bf16 %v159_v25, %v156_v19  ;;  %v296_v19 = vsel %vm293_vm4, %v294_v11, %v295_v15 }
 0x105   :  { %12654 = vmatprep.subr.bf16.mxu1 %v116_v26 }
 0x106   :  { %12646 = vmatprep.subr.bf16.mxu0 %v176_v27  ;;  %12655 = vmatpush3.bf16.msra.mxu1 %v116_v26 }
 0x107   :  { %12647 = vmatpush3.bf16.msra.mxu0 %v176_v27  ;;  %12656 = vmatprep.subr.bf16.mxu1 %v117_v22 }
 0x108   :  { %12648 = vmatprep.subr.bf16.mxu0 %v177_v23 }
 0x10a   :  { %12657 = vmatpush3.bf16.msra.mxu1 %v117_v22 }
 0x10b   :  { %12649 = vmatpush3.bf16.msra.mxu0 %v177_v23  ;;  %13954 = vmatprep.subr.msk.bf16.mxu1 %vm58_vm0, %v361_v31  ;;  %v14003_v23 = vld [vmem:[#allocation2 + $0x28] sm:$0xff]  }
 0x10c   :  { %13953 = vmatprep.subr.msk.bf16.mxu0 %vm58_vm0, %v303_v30 }
 0x10d   :  { %12659 = vmatmul.mubr.msk.bf16.vlgmr.msra.gmra.mrb[4].mxu1 %vm178_vm2, %v115_v33 }
 0x10e   :  { %12651 = vmatmul.mubr.msk.bf16.vlgmr.msra.gmra.mrb[4].mxu0 %vm178_vm2, %v175_v32  ;;  %12669 = vmatpush3.bf16.msra.mxu1 %v363_v35  ;;  %v732_v35 = vlaneseq }
 0x10f   :  { %12663 = vmatpush3.bf16.msra.mxu0 %v305_v34  ;;  %12664 = vmatprep.mubr.msk.bf16.mxu0 %vm51_vm1, %v14573_v8 }
 0x110   :  { %12670 = vmatprep.mubr.msk.bf16.mxu1 %vm51_vm1, %v14573_v8  ;;  %12674 = vmatprep.subr.bf16.mxu0 %v14510_v36 }
 0x111   :  { %12682 = vmatprep.subr.bf16.mxu1 %v14510_v36 }
 0x115   :  { %12671 = vmatmul.mubr.msk.bf16.vlgmr.msra.gmra.mrb[8].mxu1 %vm51_vm1, %v14575_v9 }
 0x116   :  { %12665 = vmatmul.mubr.msk.bf16.vlgmr.msra.gmra.mrb[8].mxu0 %vm51_vm1, %v14575_v9  ;;  %12686 = vmatprep.mubr.msk.bf16.mxu1 %vm14511_vm3, %v14510_v36 }
 0x117   :  { %12678 = vmatprep.mubr.msk.bf16.mxu0 %vm14511_vm3, %v14510_v36 }
 0x1e0   :  { %v12660_v38 = vpop.f32.mrb[4].mxu1 }
 0x1e1   :  { %v12652_v37 = vpop.f32.mrb[4].mxu0  ;;  %v273_v41 = vpop.f32.mrb[5].mxu1 }
 0x1e2   :  { %v14607_v39 = vadd.f32 %v12660_v38, %v12652_v37  ;;  %v219_v40 = vpop.f32.mrb[5].mxu0  ;;  %v12661_v44 = vpop.f32.mrb[6].mxu1 }
 0x1e3   :  { %v274_v42 = vadd.f32 %v273_v41, %v219_v40  ;;  %v12653_v43 = vpop.f32.mrb[6].mxu0  ;;  %v276_v46 = vpop.f32.mrb[7].mxu1  ;;  %v733_v41 = vshrl.u32 %v732_v35, 7  ;;  %v743_v44 = vld [vmem:[#allocation2 + $0x34] sm:$0x1] }
 0x1e4   :  { %v222_v45 = vpop.f32.mrb[7].mxu0  ;;  %v561_v43 = vld [vmem:[#allocation5 + $0x98] sm:$0x3] }
 0x1e5   :  { %v277_v47 = vadd.f32 %v276_v46, %v222_v45  ;;  %v14629_v17 = vadd.f32 %v289_v6, %v274_v42  ;;  %v560_v42 = vld [vmem:[#allocation5 + $0x90] sm:$0xff] }
 0x1e7   :  { %v14627_v16 = vadd.f32 %v299_v14, %v277_v47  ;;  %v562_v47 = vpack.c.bf16 %v561_v43, %v560_v42 }
 0x1e8   :  { %v12672_v49 = vpop.f32.mrb[8].mxu1 }
 0x1e9   :  { %v12666_v48 = vpop.f32.mrb[8].mxu0  ;;  %v399_v51 = vpop.f32.mrb[9].mxu1  ;;  %v14634_v20 = vpack.c.bf16 %v14627_v16, %v14629_v17 }
 0x1ea   :  { %v341_v50 = vpop.f32.mrb[9].mxu0  ;;  %v12673_v53 = vpop.f32.mrb[10].mxu1 }
 0x1eb   :  { %v12667_v52 = vpop.f32.mrb[10].mxu0  ;;  %v418_v55 = vpack.c.bf16 %v12673_v53, %v12672_v49  ;;  %v402_v57 = vpop.f32.mrb[11].mxu1  ;;  %v744_v49 = vunpack.c.l.bf16 %v743_v44 }
 0x1ec   :  { %v360_v54 = vpack.c.bf16 %v12667_v52, %v12666_v48  ;;  %v344_v56 = vpop.f32.mrb[11].mxu0  ;;  %v417_v59 = vpack.c.bf16 %v402_v57, %v399_v51  ;;  %v14658_v48 = vsub.s32 0, %v733_v41  ;;  %v14004_v57 = vld [vmem:[#allocation2 + $0x10] sm:$0xff]  }
 0x1ed   :  { %v359_v58 = vpack.c.bf16 %v344_v56, %v341_v50  ;;  %v665_v56 = vld [vmem:[#allocation5 + $0xa8] sm:$0x3] }
 0x1ee   :  { %12675 = vmatpush3.bf16.msra.mxu0 %v417_v59  ;;  %v894_v6 = vrot.slane %v890_v4, %v14658_v48 }
 0x1ef   :  { %12683 = vmatpush3.bf16.msra.mxu1 %v359_v58  ;;  %12676 = vmatprep.subr.bf16.mxu0 %v14510_v36 }
 0x1f0   :  { %12684 = vmatprep.subr.bf16.mxu1 %v14510_v36 }
 0x1f2   :  { %12677 = vmatpush3.bf16.msra.mxu0 %v418_v55  ;;  %v664_v55 = vld [vmem:[#allocation5 + $0xa0] sm:$0xff] }
 0x1f3   :  { %12685 = vmatpush3.bf16.msra.mxu1 %v360_v54  ;;  %13955 = vmatprep.subr.msk.bf16.mxu0 %vm58_vm0, %v507_v0  ;;  %v748_v54 = vrot.slane %v744_v49, %v14658_v48  ;;  %v666_v61 = vpack.c.bf16 %v665_v56, %v664_v55  ;;  %v14006_v49 = vld [vmem:[#allocation2 + $0x40] sm:$0xff]   ;;  %v1190_v55 = vld [vmem:[#allocation2 + $0x74] sm:$0x1] }
 0x1f4   :  { %12696 = vmatprep.subr.bf16.mxu1 %v14510_v36 }
 0x1f5   :  { %12679 = vmatmul.mubr.msk.bf16.vlgmr.msra.gmra.mrb[12].mxu0 %vm178_vm2, %v416_v1  ;;  %v14005_v1 = vld [vmem:[#allocation2 + $0x18] sm:$0xff]  }
 0x1f6   :  { %12687 = vmatmul.mubr.msk.bf16.vlgmr.msra.gmra.mrb[12].mxu1 %vm178_vm2, %v358_v2  ;;  %12691 = vmatpush3.bf16.msra.mxu0 %v509_v3 }
 0x1f7   :  { %12692 = vmatprep.mubr.msk.bf16.mxu0 %vm51_vm1, %v14573_v8  ;;  %13956 = vmatprep.subr.msk.bf16.mxu0 %vm58_vm0, %v611_v5 }
 0x1f8   :  { %12700 = vmatprep.mubr.msk.bf16.mxu1 %vm14511_vm3, %v14510_v36 }
 0x1fd   :  { %12693 = vmatmul.mubr.msk.bf16.vlgmr.msra.gmra.mrb[16].mxu0 %vm51_vm1, %v14575_v9 }
 0x1fe   :  { %12705 = vmatpush3.bf16.msra.mxu0 %v613_v12  ;;  %12706 = vmatprep.mubr.msk.bf16.mxu0 %vm51_vm1, %v14573_v8  ;;  %v14641_v8 = vadd.f32 %v296_v19, %v14607_v39 }
 0x1ff   :  { %12718 = vmatprep.subr.bf16.mxu0 %v14000_v13 }
 0x200   :  { %v14645_v22 = vpack.c.bf16 %v14641_v8, %v14641_v8 }
 0x205   :  { %12707 = vmatmul.mubr.msk.bf16.vlgmr.msra.gmra.mrb[20].mxu0 %vm51_vm1, %v14575_v9 }
 0x206   :  { %12719 = vmatpush3.bf16.msra.mxu0 %v14000_v13  ;;  %12722 = vmatprep.mubr.msk.bf16.mxu0 %vm178_vm2, %v14634_v20 }
 0x207   :  { %12720 = vmatprep.subr.bf16.mxu0 %v14001_v18 }
 0x20a   :  { %12721 = vmatpush3.bf16.msra.mxu0 %v14001_v18 }
 0x20b   :  { %12734 = vmatprep.subr.bf16.mxu0 %v14002_v21 }
 0x20d   :  { %12723 = vmatmul.mubr.msk.bf16.vlgmr.msra.gmra.mrb[24].mxu0 %vm178_vm2, %v14645_v22 }
 0x20e   :  { %12735 = vmatpush3.bf16.msra.mxu0 %v14002_v21  ;;  %12738 = vmatprep.mubr.msk.bf16.mxu0 %vm178_vm2, %v14634_v20 }
 0x20f   :  { %12736 = vmatprep.subr.bf16.mxu0 %v14003_v23 }
 0x212   :  { %12737 = vmatpush3.bf16.msra.mxu0 %v14003_v23 }
 0x215   :  { %12739 = vmatmul.mubr.msk.bf16.vlgmr.msra.gmra.mrb[28].mxu0 %vm178_vm2, %v14645_v22 }
 0x2c8   :  { %v456_v9 = vpop.f32.mrb[12].mxu0 }
 0x2c9   :  { %v500_v24 = vpop.f32.mrb[12].mxu1  ;;  %v12680_v26 = vpop.f32.mrb[13].mxu0 }
 0x2ca   :  { %v14653_v25 = vadd.f32 %v500_v24, %v456_v9  ;;  %v12688_v27 = vpop.f32.mrb[13].mxu1  ;;  %v459_v28 = vpop.f32.mrb[14].mxu0 }
 0x2cb   :  { %v503_v29 = vpop.f32.mrb[14].mxu1  ;;  %v12681_v31 = vpop.f32.mrb[15].mxu0 }
 0x2cc   :  { %v14655_v30 = vadd.f32 %v503_v29, %v459_v28  ;;  %v12689_v32 = vpop.f32.mrb[15].mxu1 }
 0x2d0   :  { %v12694_v33 = vpop.f32.mrb[16].mxu0 }
 0x2d1   :  { %v545_v34 = vpop.f32.mrb[17].mxu0 }
 0x2d2   :  { %v12695_v37 = vpop.f32.mrb[18].mxu0 }
 0x2d3   :  { %v564_v38 = vpack.c.bf16 %v12695_v37, %v12694_v33  ;;  %v548_v39 = vpop.f32.mrb[19].mxu0  ;;  %v819_v33 = vld [vmem:[#allocation2 + $0x38] sm:$0x1] }
 0x2d4   :  { %v563_v40 = vpack.c.bf16 %v548_v39, %v545_v34 }
 0x2d6   :  { %12697 = vmatpush3.bf16.msra.mxu1 %v563_v40 }
 0x2d7   :  { %12698 = vmatprep.subr.bf16.mxu1 %v14510_v36 }
 0x2d8   :  { %v12708_v45 = vpop.f32.mrb[20].mxu0 }
 0x2d9   :  { %v649_v46 = vpop.f32.mrb[21].mxu0 }
 0x2da   :  { %12699 = vmatpush3.bf16.msra.mxu1 %v564_v38  ;;  %v12709_v50 = vpop.f32.mrb[22].mxu0  ;;  %v820_v38 = vunpack.c.l.bf16 %v819_v33 }
 0x2db   :  { %v668_v51 = vpack.c.bf16 %v12709_v50, %v12708_v45  ;;  %v652_v52 = vpop.f32.mrb[23].mxu0  ;;  %12710 = vmatprep.subr.bf16.mxu1 %v14510_v36 }
 0x2dc   :  { %v667_v53 = vpack.c.bf16 %v652_v52, %v649_v46  ;;  %v824_v40 = vrot.slane %v820_v38, %v14658_v48  ;;  %v14007_v52 = vld [vmem:[#allocation2 + $0x48] sm:$0xff]  }
 0x2dd   :  { %12701 = vmatmul.mubr.msk.bf16.vlgmr.msra.gmra.mrb[16].mxu1 %vm178_vm2, %v562_v47 }
 0x2de   :  { %12711 = vmatpush3.bf16.msra.mxu1 %v667_v53  ;;  %12714 = vmatprep.mubr.msk.bf16.mxu1 %vm14511_vm3, %v14510_v36  ;;  %v14008_v53 = vld [vmem:[#allocation2 + $0x60] sm:$0xff]  }
 0x2df   :  { %12712 = vmatprep.subr.bf16.mxu1 %v14510_v36 }
 0x2e0   :  { %v12724_v58 = vpop.f32.mrb[24].mxu0 }
 0x2e1   :  { %v14666_v59 = vadd.f32 %v12724_v58, %v748_v54  ;;  %v801_v60 = vpop.f32.mrb[25].mxu0 }
 0x2e2   :  { %12713 = vmatpush3.bf16.msra.mxu1 %v668_v51  ;;  %v12725_v63 = vpop.f32.mrb[26].mxu0  ;;  %v802_v2 = vadd.f32 %v801_v60, %v748_v54  ;;  %v14701_v60 = vld [vmem:[#allocation5 + $0x30] sm:$0xff] }
 0x2e3   :  { %v804_v0 = vpop.f32.mrb[27].mxu0  ;;  %12726 = vmatprep.subr.bf16.mxu1 %v14004_v57  ;;  %v956_v51 = vpack.c.bf16 %v14666_v59, %v14666_v59 }
 0x2e4   :  { %v805_v3 = vadd.f32 %v804_v0, %v748_v54  ;;  %v14009_v54 = vld [vmem:[#allocation2 + $0x68] sm:$0xff]  }
 0x2e5   :  { %12715 = vmatmul.mubr.msk.bf16.vlgmr.msra.gmra.mrb[20].mxu1 %vm178_vm2, %v666_v61  ;;  %v1191_v61 = vunpack.c.l.bf16 %v1190_v55 }
 0x2e6   :  { %v955_v5 = vpack.c.bf16 %v805_v3, %v802_v2  ;;  %12727 = vmatpush3.bf16.msra.mxu1 %v14004_v57  ;;  %12730 = vmatprep.mubr.msk.bf16.mxu1 %vm178_vm2, %v14634_v20  ;;  %v14699_v57 = vld [vmem:[#allocation5 + $0x40] sm:$0x3]  ;;  %v14704_v2 = vld [vmem:[#allocation5 + $0x38] sm:$0xff] }
 0x2e7   :  { %12728 = vmatprep.subr.bf16.mxu1 %v14005_v1 }
 0x2e8   :  { %v12740_v7 = vpop.f32.mrb[28].mxu0 }
 0x2e9   :  { %v941_v10 = vpop.f32.mrb[29].mxu0  ;;  %v950_v13 = vadd.f32 %v12740_v7, %v894_v6 }
 0x2ea   :  { %12729 = vmatpush3.bf16.msra.mxu1 %v14005_v1  ;;  %v12741_v11 = vpop.f32.mrb[30].mxu0  ;;  %v942_v14 = vadd.f32 %v941_v10, %v894_v6 }
 0x2eb   :  { %v944_v12 = vpop.f32.mrb[31].mxu0  ;;  %v1064_v19 = vpack.c.bf16 %v950_v13, %v950_v13 }
 0x2ec   :  { %v945_v15 = vadd.f32 %v944_v12, %v894_v6  ;;  %v1195_v6 = vrot.slane %v1191_v61, %v14658_v48 }
 0x2ed   :  { %12731 = vmatmul.mubr.msk.bf16.vlgmr.msra.gmra.mrb[24].mxu1 %vm178_vm2, %v14645_v22  ;;  %v1072_v21 = vsel %vm293_vm4, %v1064_v19, 0 }
 0x2ee   :  { %12746 = vmatprep.mubr.msk.bf16.mxu1 %vm959_vm5, %v955_v5  ;;  %v1063_v18 = vpack.c.bf16 %v945_v15, %v942_v14  ;;  %v1330_v14 = vld [vmem:[#allocation2 + $0x7c] sm:$0x1] }
 0x2f0   :  { %12750 = vmatprep.subr.bf16.mxu0 %v1063_v18 }
 0x2f1   :  { %12751 = vmatpush3.bf16.msra.mxu0 %v1063_v18 }
 0x2f2   :  { %13959 = vmatprep.subr.msk.bf16.mxu0 %vm293_vm4, %v1064_v19 }
 0x2f5   :  { %12753 = vmatpush3.bf16.msra.mxu0 %v1072_v21 }
 0x3b0   :  { %v602_v23 = vpop.f32.mrb[16].mxu1 }
 0x3b1   :  { %v609_v9 = vadd.f32 %v602_v23, %v14653_v25  ;;  %v12702_v24 = vpop.f32.mrb[17].mxu1 }
 0x3b2   :  { %v605_v26 = vpop.f32.mrb[18].mxu1 }
 0x3b3   :  { %v610_v27 = vadd.f32 %v605_v26, %v14655_v30  ;;  %v12703_v28 = vpop.f32.mrb[19].mxu1 }
 0x3b8   :  { %v706_v29 = vpop.f32.mrb[20].mxu1 }
 0x3b9   :  { %v14679_v31 = vadd.f32 %v706_v29, %v609_v9  ;;  %v12716_v32 = vpop.f32.mrb[21].mxu1  ;;  %v1331_v9 = vunpack.c.l.bf16 %v1330_v14 }
 0x3ba   :  { %v709_v34 = vpop.f32.mrb[22].mxu1 }
 0x3bb   :  { %v14681_v35 = vadd.f32 %v709_v34, %v610_v27  ;;  %v12717_v37 = vpop.f32.mrb[23].mxu1  ;;  %v1335_v26 = vrot.slane %v1331_v9, %v14658_v48 }
 0x3c0   :  { %v12732_v39 = vpop.f32.mrb[24].mxu1 }
 0x3c1   :  { %v871_v41 = vpop.f32.mrb[25].mxu1  ;;  %v880_v30 = vadd.f32 %v12732_v39, %v824_v40 }
 0x3c2   :  { %v12733_v25 = vpop.f32.mrb[26].mxu1  ;;  %v872_v43 = vadd.f32 %v871_v41, %v824_v40 }
 0x3c3   :  { %v874_v42 = vpop.f32.mrb[27].mxu1  ;;  %v958_v47 = vpack.c.bf16 %v880_v30, %v880_v30 }
 0x3c4   :  { %v875_v44 = vadd.f32 %v874_v42, %v824_v40 }
 0x3c5   :  { %v970_v50 = vsel %vm959_vm5, %v958_v47, 0 }
 0x3c6   :  { %v957_v45 = vpack.c.bf16 %v875_v44, %v872_v43 }
 0x3c8   :  { %13957 = vmatprep.subr.msk.bf16.mxu1 %vm959_vm5, %v957_v45  ;;  %v967_v46 = vsel %vm959_vm5, %v957_v45, 0 }
 0x3c9   :  { %12743 = vmatpush3.bf16.xpose.msra.mxu1 %v967_v46 }
 0x3ca   :  { %13958 = vmatprep.subr.msk.bf16.mxu1 %vm959_vm5, %v958_v47 }
 0x3d1   :  { %12745 = vmatpush3.bf16.xpose.msra.mxu1 %v970_v50 }
 0x3d2   :  { %12764 = vmatprep.subr.bf16.mxu1 %v14006_v49 }
 0x3d8   :  { %12747 = vmatmul.mubr.msk.bf16.vlgmr.msra.gmra.mrb[28].mxu1 %vm959_vm5, %v956_v51 }
 0x3d9   :  { %12765 = vmatpush3.bf16.msra.mxu1 %v14006_v49  ;;  %12768 = vmatprep.mubr.msk.bf16.mxu1 %vm178_vm2, %v14634_v20 }
 0x3da   :  { %12766 = vmatprep.subr.bf16.mxu1 %v14007_v52 }
 0x3dd   :  { %12767 = vmatpush3.bf16.msra.mxu1 %v14007_v52 }
 0x3de   :  { %12780 = vmatprep.subr.bf16.mxu1 %v14008_v53 }
 0x3e0   :  { %12769 = vmatmul.mubr.msk.bf16.vlgmr.msra.gmra.mrb[32].mxu1 %vm178_vm2, %v14645_v22 }
 0x3e1   :  { %12781 = vmatpush3.bf16.msra.mxu1 %v14008_v53  ;;  %12784 = vmatprep.mubr.msk.bf16.mxu1 %vm178_vm2, %v14634_v20 }
 0x3e2   :  { %12782 = vmatprep.subr.bf16.mxu1 %v14009_v54 }
 0x3e5   :  { %12783 = vmatpush3.bf16.msra.mxu1 %v14009_v54 }
 0x3e8   :  { %12785 = vmatmul.mubr.msk.bf16.vlgmr.msra.gmra.mrb[36].mxu1 %vm178_vm2, %v14645_v22 }
 0x4ab   :  { %v12748_v56 = vpop.f32.mrb[28].mxu1 }
 0x4ac   :  { %v1022_v58 = vmul.f32 0.35355338, %v12748_v56  ;;  %v1006_v59 = vpop.f32.mrb[29].mxu1 }
 0x4ad   :  { %v1020_v62 = vmul.f32 0.35355338, %v1006_v59  ;;  %v12749_v63 = vpop.f32.mrb[30].mxu1 }
 0x4ae   :  { %v1009_v0 = vpop.f32.mrb[31].mxu1  ;;  %v1025_v1 = vadd.f32 %v1022_v58, %v14699_v57 }
 0x4af   :  { %v1021_v3 = vmul.f32 0.35355338, %v1009_v0  ;;  %v1023_v4 = vadd.f32 %v1020_v62, %v14701_v60 }
 0x4b0   :  { %v1034_v5 = vsel %vm1033_vm6, %v1025_v1, -inf }
 0x4b1   :  { %1035 = vmax.xlane.f32.xlu1 %v1034_v5  ;;  %v1027_v7 = vsel %vm1026_vm7, %v1023_v4, -inf  ;;  %v1024_v10 = vadd.f32 %v1021_v3, %v14704_v2  ;;  %v1122_v5 = vld [vmem:[#allocation2 + $0x30] sm:$0xf] }
 0x4b2   :  { %1028 = vmax.xlane.f32.xlu0 %v1027_v7  ;;  %13960 = vmatprep.subr.msk.bf16.mxu0 %vm1131_vm8, %v1122_v5  ;;  %v14010_v7 = vld [vmem:[#allocation2 + $0x50] sm:$0xff]  }
 0x4b3   :  { %v12770_v11 = vpop.f32.mrb[32].mxu1  ;;  %v1030_v18 = vsel %vm1026_vm7, %v1024_v10, -inf }
 0x4b4   :  { %v14711_v12 = vadd.f32 %v12770_v11, %v1195_v6  ;;  %v1242_v13 = vpop.f32.mrb[33].mxu1 }
 0x4b5   :  { %v12771_v15 = vpop.f32.mrb[34].mxu1  ;;  %v14714_v21 = vadd.f32 %v1242_v13, %v1195_v6 }
 0x4b6   :  { %v1245_v19 = vpop.f32.mrb[35].mxu1  ;;  %1031 = vmax.xlane.f32.xlu0 %v1030_v18 }
 0x4b7   :  { %v14716_v23 = vadd.f32 %v1245_v19, %v1195_v6  ;;  %v1133_v6 = vsel %vm1131_vm8, %v1122_v5, 0  ;;  %v14011_v19 = vld [vmem:[#allocation2 + $0x58] sm:$0xff]  }
 0x4b9   :  { %v1396_v24 = vpack.c.bf16 %v14716_v23, %v14714_v21 }
 0x4bb   :  { %v12786_v27 = vpop.f32.mrb[36].mxu1 }
 0x4bc   :  { %v1382_v28 = vpop.f32.mrb[37].mxu1  ;;  %v1391_v33 = vadd.f32 %v12786_v27, %v1335_v26  ;;  %v1260_v27 = vld [vmem:[#allocation2 + $0x78] sm:$0x1] }
 0x4bd   :  { %v12787_v29 = vpop.f32.mrb[38].mxu1  ;;  %v1383_v34 = vadd.f32 %v1382_v28, %v1335_v26 }
 0x4be   :  { %v1385_v32 = vpop.f32.mrb[39].mxu1  ;;  %v1502_v39 = vpack.c.bf16 %v1391_v33, %v1391_v33 }
 0x4bf   :  { %v1386_v37 = vadd.f32 %v1385_v32, %v1335_v26  ;;  %v1261_v32 = vunpack.c.l.bf16 %v1260_v27 }
 0x4c0   :  { %v1510_v40 = vsel %vm293_vm4, %v1502_v39, 0 }
 0x4c1   :  { %v1501_v38 = vpack.c.bf16 %v1386_v37, %v1383_v34  ;;  %v1265_v33 = vrot.slane %v1261_v32, %v14658_v48 }
 0x4c3   :  { %12796 = vmatprep.subr.bf16.mxu1 %v1501_v38 }
 0x4c4   :  { %12797 = vmatpush3.bf16.msra.mxu1 %v1501_v38 }
 0x4c5   :  { %13963 = vmatprep.subr.msk.bf16.mxu1 %vm293_vm4, %v1502_v39 }
 0x4c8   :  { %12799 = vmatpush3.bf16.msra.mxu1 %v1510_v40 }
 0x53e   :  { %v1036_v41 = vpop.xlane.xlu1 %1035 }
 0x53f   :  { %v1039_v25 = vsub.f32 %v1025_v1, %v1036_v41  ;;  %v1029_v42 = vpop.xlane.xlu0 %1028 }
 0x540   :  { %v1037_v43 = vsub.f32 %v1023_v4, %v1029_v42  ;;  %v14012_v42 = vld [vmem:[#allocation2 + $0x80] sm:$0xff]  }
 0x541   :  { %v1044_v44 = vmul.f32 1.442695, %v1039_v25 }
 0x542   :  { %v1040_v30 = vmul.f32 1.442695, %v1037_v43 }
 0x543   :  { %v1032_v45 = vpop.xlane.xlu0 %1031 }
 0x544   :  { %14160 = vpow2.f32 %v1040_v30  ;;  %v1038_v46 = vsub.f32 %v1024_v10, %v1032_v45  ;;  %v14013_v30 = vld [vmem:[#allocation2 + $0x88] sm:$0xff]   ;;  %v14014_v45 = vld [vmem:[#allocation2 + $0xa0] sm:$0xff]  }
 0x545   :  { %14162 = vpow2.f32 %v1044_v44  ;;  %v1397_v44 = vpack.c.bf16 %v14711_v12, %v14711_v12  ;;  %v1627_v12 = vld [vmem:[#allocation2 + $0xb4] sm:$0x1] }
 0x546   :  { %v1042_v47 = vmul.f32 1.442695, %v1038_v46  ;;  %v14015_v46 = vld [vmem:[#allocation2 + $0xa8] sm:$0xff]  }
 0x548   :  { %14164 = vpow2.f32 %v1042_v47 }
 0x54e   :  { %v14161_v49 = vpop.eup %14160 }
 0x54f   :  { %v1046_v50 = vsel %vm1026_vm7, %v14161_v49, 0.0  ;;  %v14163_v51 = vpop.eup %14162 }
 0x550   :  { %1047 = vadd.xlane.f32.xlu1 %v1046_v50  ;;  %v1052_v53 = vsel %vm1033_vm6, %v14163_v51, 0.0  ;;  %v1628_v50 = vunpack.c.l.bf16 %v1627_v12 }
 0x552   :  { %v14165_v52 = vpop.eup %14164 }
 0x553   :  { %v1049_v54 = vsel %vm1026_vm7, %v14165_v52, 0.0 }
 0x554   :  { %1053 = vadd.xlane.f32.xlu1 %v1052_v53  ;;  %1050 = vadd.xlane.f32.xlu0 %v1049_v54 }
 0x5dd   :  { %v1048_v55 = vpop.xlane.xlu1 %1047 }
 0x5de   :  { %14166 = vrcp.f32 %v1048_v55 }
 0x5e1   :  { %v1054_v56 = vpop.xlane.xlu1 %1053  ;;  %v1051_v58 = vpop.xlane.xlu0 %1050 }
 0x5e2   :  { %14168 = vrcp.f32 %v1054_v56 }
 0x5e3   :  { %14170 = vrcp.f32 %v1051_v58  ;;  %v1632_v58 = vrot.slane %v1628_v50, %v14658_v48 }
 0x5e8   :  { %v14167_v59 = vpop.eup %14166 }
 0x5e9   :  { %v1058_v0 = vmul.f32 %v14167_v59, %v14161_v49 }
 0x5ec   :  { %v14169_v61 = vpop.eup %14168 }
 0x5ed   :  { %v14171_v62 = vpop.eup %14170  ;;  %v1060_v63 = vmul.f32 %v14169_v61, %v14163_v51 }
 0x5ee   :  { %v1059_v1 = vmul.f32 %v14171_v62, %v14165_v52 }
 0x5ef   :  { %v1062_v3 = vpack.c.bf16 %v1060_v63, %v1060_v63 }
 0x5f0   :  { %v1061_v4 = vpack.c.bf16 %v1059_v1, %v1058_v0 }
 0x5f2   :  { %12754 = vmatprep.mubr.msk.bf16.mxu0 %vm1026_vm7, %v1061_v4  ;;  %v1767_v4 = vld [vmem:[#allocation2 + $0xbc] sm:$0x1] }
 0x5f3   :  { %12755 = vmatmul.mubr.msk.bf16.vlgmr.msra.gmra.mrb[32].mxu0 %vm1026_vm7, %v1062_v3 }
 0x5f4   :  { %12759 = vmatpush3.bf16.msra.mxu0 %v1133_v6 }
 0x5f5   :  { %12772 = vmatprep.subr.bf16.mxu0 %v14010_v7 }
 0x6c6   :  { %v12756_v10 = vpop.f32.mrb[32].mxu0 }
 0x6c7   :  { %v1108_v11 = vpop.f32.mrb[33].mxu0  ;;  %v1124_v18 = vpack.c.bf16 %v12756_v10, %v12756_v10 }
 0x6c8   :  { %v12757_v13 = vpop.f32.mrb[34].mxu0 }
 0x6c9   :  { %v1111_v14 = vpop.f32.mrb[35].mxu0  ;;  %v1768_v13 = vunpack.c.l.bf16 %v1767_v4 }
 0x6ca   :  { %v1123_v15 = vpack.c.bf16 %v1111_v14, %v1108_v11 }
 0x6cc   :  { %12760 = vmatprep.mubr.msk.bf16.mxu0 %vm959_vm5, %v1123_v15  ;;  %v1772_v15 = vrot.slane %v1768_v13, %v14658_v48 }
 0x6cd   :  { %12761 = vmatmul.mubr.msk.bf16.vlgmr.msra.gmra.mrb[36].mxu0 %vm959_vm5, %v1124_v18 }
 0x6ce   :  { %12773 = vmatpush3.bf16.msra.mxu0 %v14010_v7  ;;  %12776 = vmatprep.mubr.msk.bf16.mxu0 %vm178_vm2, %v14634_v20 }
 0x6cf   :  { %12774 = vmatprep.subr.bf16.mxu0 %v14011_v19 }
 0x6d2   :  { %12775 = vmatpush3.bf16.msra.mxu0 %v14011_v19 }
 0x6d5   :  { %12777 = vmatmul.mubr.msk.bf16.vlgmr.msra.gmra.mrb[40].mxu0 %vm178_vm2, %v14645_v22 }
 0x6d6   :  { %12792 = vmatprep.mubr.msk.bf16.mxu0 %vm959_vm5, %v1396_v24 }
 0x7a0   :  { %v14740_v9 = vpop.f32.mrb[36].mxu0 }
 0x7a1   :  { %v14742_v26 = vpop.f32.mrb[37].mxu0 }
 0x7a2   :  { %v12763_v28 = vpop.f32.mrb[38].mxu0 }
 0x7a3   :  { %v14744_v29 = vpop.f32.mrb[39].mxu0 }
 0x7a8   :  { %v12778_v34 = vpop.f32.mrb[40].mxu0 }
 0x7a9   :  { %v1312_v37 = vpop.f32.mrb[41].mxu0  ;;  %v1321_v40 = vadd.f32 %v12778_v34, %v1265_v33 }
 0x7aa   :  { %v12779_v38 = vpop.f32.mrb[42].mxu0  ;;  %v1313_v41 = vadd.f32 %v1312_v37, %v1265_v33 }
 0x7ab   :  { %v1315_v39 = vpop.f32.mrb[43].mxu0  ;;  %v1399_v24 = vpack.c.bf16 %v1321_v40, %v1321_v40 }
 0x7ac   :  { %v1316_v21 = vadd.f32 %v1315_v39, %v1265_v33 }
 0x7ad   :  { %v1410_v43 = vsel %vm959_vm5, %v1399_v24, 0 }
 0x7ae   :  { %v1398_v23 = vpack.c.bf16 %v1316_v21, %v1313_v41 }
 0x7b0   :  { %13961 = vmatprep.subr.msk.bf16.mxu0 %vm959_vm5, %v1398_v23  ;;  %v1407_v25 = vsel %vm959_vm5, %v1398_v23, 0 }
 0x7b1   :  { %12789 = vmatpush3.bf16.xpose.msra.mxu0 %v1407_v25 }
 0x7b2   :  { %13962 = vmatprep.subr.msk.bf16.mxu0 %vm959_vm5, %v1399_v24 }
 0x7b9   :  { %12791 = vmatpush3.bf16.xpose.msra.mxu0 %v1410_v43 }
 0x7ba   :  { %12810 = vmatprep.subr.bf16.mxu0 %v14012_v42 }
 0x7c0   :  { %12793 = vmatmul.mubr.msk.bf16.vlgmr.msra.gmra.mrb[44].mxu0 %vm959_vm5, %v1397_v44 }
 0x7c1   :  { %12811 = vmatpush3.bf16.msra.mxu0 %v14012_v42  ;;  %12814 = vmatprep.mubr.msk.bf16.mxu0 %vm178_vm2, %v14634_v20 }
 0x7c2   :  { %12812 = vmatprep.subr.bf16.mxu0 %v14013_v30 }
 0x7c5   :  { %12813 = vmatpush3.bf16.msra.mxu0 %v14013_v30 }
 0x7c6   :  { %12826 = vmatprep.subr.bf16.mxu0 %v14014_v45 }
 0x7c8   :  { %12815 = vmatmul.mubr.msk.bf16.vlgmr.msra.gmra.mrb[48].mxu0 %vm178_vm2, %v14645_v22 }
 0x7c9   :  { %12827 = vmatpush3.bf16.msra.mxu0 %v14014_v45  ;;  %12830 = vmatprep.mubr.msk.bf16.mxu0 %vm178_vm2, %v14634_v20 }
 0x7ca   :  { %12828 = vmatprep.subr.bf16.mxu0 %v14015_v46 }
 0x7cd   :  { %12829 = vmatpush3.bf16.msra.mxu0 %v14015_v46 }
 0x7d0   :  { %12831 = vmatmul.mubr.msk.bf16.vlgmr.msra.gmra.mrb[52].mxu0 %vm178_vm2, %v14645_v22 }
 0x893   :  { %v12794_v47 = vpop.f32.mrb[44].mxu0 }
 0x894   :  { %v1446_v49 = vpop.f32.mrb[45].mxu0  ;;  %v1462_v51 = vmul.f32 0.35355338, %v12794_v47 }
 0x895   :  { %v1460_v52 = vmul.f32 0.35355338, %v1446_v49  ;;  %v12795_v53 = vpop.f32.mrb[46].mxu0 }
 0x896   :  { %v1449_v54 = vpop.f32.mrb[47].mxu0  ;;  %v1465_v62 = vadd.f32 %v1462_v51, %v14699_v57 }
 0x897   :  { %v1461_v55 = vmul.f32 0.35355338, %v1449_v54  ;;  %v1463_v56 = vadd.f32 %v1460_v52, %v14701_v60 }
 0x898   :  { %v1472_v6 = vsel %vm1033_vm6, %v1465_v62, -inf }
 0x899   :  { %v1466_v59 = vsel %vm1026_vm7, %v1463_v56, -inf  ;;  %v1464_v61 = vadd.f32 %v1461_v55, %v14704_v2 }
 0x89a   :  { %1467 = vmax.xlane.f32.xlu0 %v1466_v59 }
 0x89b   :  { %v12816_v63 = vpop.f32.mrb[48].mxu0  ;;  %v1469_v0 = vsel %vm1026_vm7, %v1464_v61, -inf }
 0x89c   :  { %v14768_v1 = vadd.f32 %v12816_v63, %v1632_v58  ;;  %v1679_v3 = vpop.f32.mrb[49].mxu0  ;;  %1470 = vmax.xlane.f32.xlu1 %v1469_v0  ;;  %v1560_v63 = vld [vmem:[#allocation2 + $0x70] sm:$0xf] }
 0x89d   :  { %v12817_v5 = vpop.f32.mrb[50].mxu0  ;;  %v14771_v10 = vadd.f32 %v1679_v3, %v1632_v58  ;;  %13964 = vmatprep.subr.msk.bf16.mxu1 %vm1131_vm8, %v1560_v63  ;;  %v1570_v0 = vsel %vm1131_vm8, %v1560_v63, 0  ;;  %v14016_v3 = vld [vmem:[#allocation2 + $0x90] sm:$0xff]  }
 0x89e   :  { %1473 = vmax.xlane.f32.xlu0 %v1472_v6  ;;  %v1682_v7 = vpop.f32.mrb[51].mxu0 }
 0x89f   :  { %v14773_v11 = vadd.f32 %v1682_v7, %v1632_v58 }
 0x8a1   :  { %v1833_v14 = vpack.c.bf16 %v14773_v11, %v14771_v10 }
 0x8a3   :  { %v12832_v18 = vpop.f32.mrb[52].mxu0 }
 0x8a4   :  { %v1819_v19 = vpop.f32.mrb[53].mxu0  ;;  %v1828_v32 = vadd.f32 %v12832_v18, %v1772_v15  ;;  %v14017_v18 = vld [vmem:[#allocation2 + $0x98] sm:$0xff]  }
 0x8a5   :  { %v12833_v27 = vpop.f32.mrb[54].mxu0  ;;  %v1820_v33 = vadd.f32 %v1819_v19, %v1772_v15  ;;  %v730_v19 = vld [vmem:[#allocation2 + $0x100] sm:$0x1] }
 0x8a6   :  { %v1822_v28 = vpop.f32.mrb[55].mxu0  ;;  %v1939_v38 = vpack.c.bf16 %v1828_v32, %v1828_v32  ;;  %v731_v27 = vunpack.c.l.bf16 %v730_v19 }
 0x8a7   :  { %v1823_v34 = vadd.f32 %v1822_v28, %v1772_v15 }
 0x8a8   :  { %v1947_v39 = vsel %vm293_vm4, %v1939_v38, 0  ;;  %v735_v28 = vrot.slane %v731_v27, %v14658_v48 }
 0x8a9   :  { %v1938_v37 = vpack.c.bf16 %v1823_v34, %v1820_v33 }
 0x8aa   :  { %v1185_v32 = vadd.f32 %v14740_v9, %v735_v28  ;;  %v1183_v33 = vadd.f32 %v14742_v26, %v735_v28 }
 0x8ab   :  { %12842 = vmatprep.subr.bf16.mxu0 %v1938_v37 }
 0x8ac   :  { %12843 = vmatpush3.bf16.msra.mxu0 %v1938_v37 }
 0x8ad   :  { %13967 = vmatprep.subr.msk.bf16.mxu0 %vm293_vm4, %v1939_v38 }
 0x8b0   :  { %12845 = vmatpush3.bf16.msra.mxu0 %v1947_v39  ;;  %v1697_v39 = vld [vmem:[#allocation2 + $0xb8] sm:$0x1] }
 0x927   :  { %v1468_v40 = vpop.xlane.xlu0 %1467 }
 0x928   :  { %v1475_v41 = vsub.f32 %v1463_v56, %v1468_v40  ;;  %v1184_v40 = vadd.f32 %v14744_v29, %v735_v28 }
 0x929   :  { %v1471_v21 = vpop.xlane.xlu1 %1470 }
 0x92a   :  { %v1478_v23 = vmul.f32 1.442695, %v1475_v41  ;;  %v1476_v24 = vsub.f32 %v1464_v61, %v1471_v21  ;;  %v1698_v21 = vunpack.c.l.bf16 %v1697_v39 }
 0x92b   :  { %v1474_v25 = vpop.xlane.xlu0 %1473 }
 0x92c   :  { %14172 = vpow2.f32 %v1478_v23  ;;  %v1480_v42 = vmul.f32 1.442695, %v1476_v24  ;;  %v1477_v43 = vsub.f32 %v1465_v62, %v1474_v25  ;;  %v1702_v23 = vrot.slane %v1698_v21, %v14658_v48 }
 0x92e   :  { %14174 = vpow2.f32 %v1480_v42  ;;  %v1482_v44 = vmul.f32 1.442695, %v1477_v43 }
 0x930   :  { %14176 = vpow2.f32 %v1482_v44 }
 0x936   :  { %v14173_v30 = vpop.eup %14172 }
 0x937   :  { %v1484_v45 = vsel %vm1026_vm7, %v14173_v30, 0.0 }
 0x938   :  { %v14175_v46 = vpop.eup %14174  ;;  %1485 = vadd.xlane.f32.xlu1 %v1484_v45 }
 0x939   :  { %v1487_v12 = vsel %vm1026_vm7, %v14175_v46, 0.0 }
 0x93a   :  { %v14177_v47 = vpop.eup %14176  ;;  %1488 = vadd.xlane.f32.xlu0 %v1487_v12 }
 0x93b   :  { %v1490_v49 = vsel %vm1033_vm6, %v14177_v47, 0.0 }
 0x93c   :  { %1491 = vadd.xlane.f32.xlu1 %v1490_v49  ;;  %v14019_v49 = vld [vmem:[#allocation2 + $0xc8] sm:$0xff]  }
 0x9c5   :  { %v1486_v50 = vpop.xlane.xlu1 %1485 }
 0x9c6   :  { %14178 = vrcp.f32 %v1486_v50  ;;  %v14020_v50 = vld [vmem:[#allocation2 + $0xe0] sm:$0xff]  }
 0x9c7   :  { %v1489_v51 = vpop.xlane.xlu0 %1488 }
 0x9c8   :  { %14180 = vrcp.f32 %v1489_v51  ;;  %v14021_v51 = vld [vmem:[#allocation2 + $0xe8] sm:$0xff]  }
 0x9c9   :  { %v1492_v52 = vpop.xlane.xlu1 %1491 }
 0x9ca   :  { %14182 = vrcp.f32 %v1492_v52 }
 0x9d0   :  { %v14179_v53 = vpop.eup %14178 }
 0x9d1   :  { %v1496_v55 = vmul.f32 %v14179_v53, %v14173_v30 }
 0x9d2   :  { %v14181_v54 = vpop.eup %14180 }
 0x9d3   :  { %v1497_v56 = vmul.f32 %v14181_v54, %v14175_v46  ;;  %v14018_v46 = vld [vmem:[#allocation2 + $0xc0] sm:$0xff]  }
 0x9d4   :  { %v14183_v58 = vpop.eup %14182 }
 0x9d5   :  { %v1499_v59 = vpack.c.bf16 %v1497_v56, %v1496_v55  ;;  %v1498_v61 = vmul.f32 %v14183_v58, %v14177_v47  ;;  %v1834_v47 = vpack.c.bf16 %v14768_v1, %v14768_v1  ;;  %v2064_v1 = vld [vmem:[#allocation2 + $0xf4] sm:$0x1] }
 0x9d6   :  { %v2065_v54 = vunpack.c.l.bf16 %v2064_v1 }
 0x9d7   :  { %12800 = vmatprep.mubr.msk.bf16.mxu1 %vm1026_vm7, %v1499_v59  ;;  %v1500_v62 = vpack.c.bf16 %v1498_v61, %v1498_v61 }
 0x9d8   :  { %v2069_v63 = vrot.slane %v2065_v54, %v14658_v48 }
 0x9d9   :  { %12801 = vmatmul.mubr.msk.bf16.vlgmr.msra.gmra.mrb[40].mxu1 %vm1026_vm7, %v1500_v62 }
 0x9da   :  { %12805 = vmatpush3.bf16.msra.mxu1 %v1570_v0 }
 0x9db   :  { %12818 = vmatprep.subr.bf16.mxu1 %v14016_v3 }
 0xaac   :  { %v12802_v4 = vpop.f32.mrb[40].mxu1 }
 0xaad   :  { %v1546_v5 = vpop.f32.mrb[41].mxu1  ;;  %v1562_v15 = vpack.c.bf16 %v12802_v4, %v12802_v4 }
 0xaae   :  { %v12803_v6 = vpop.f32.mrb[42].mxu1 }
 0xaaf   :  { %v1549_v7 = vpop.f32.mrb[43].mxu1 }
 0xab0   :  { %v1561_v13 = vpack.c.bf16 %v1549_v7, %v1546_v5 }
 0xab2   :  { %12806 = vmatprep.mubr.msk.bf16.mxu1 %vm959_vm5, %v1561_v13 }
 0xab3   :  { %12807 = vmatmul.mubr.msk.bf16.vlgmr.msra.gmra.mrb[44].mxu1 %vm959_vm5, %v1562_v15  ;;  %v2204_v15 = vld [vmem:[#allocation2 + $0xfc] sm:$0x1] }
 0xab4   :  { %12819 = vmatpush3.bf16.msra.mxu1 %v14016_v3  ;;  %12822 = vmatprep.mubr.msk.bf16.mxu1 %vm178_vm2, %v14634_v20 }
 0xab5   :  { %12820 = vmatprep.subr.bf16.mxu1 %v14017_v18 }
 0xab8   :  { %12821 = vmatpush3.bf16.msra.mxu1 %v14017_v18 }
 0xabb   :  { %12823 = vmatmul.mubr.msk.bf16.vlgmr.msra.gmra.mrb[48].mxu1 %vm178_vm2, %v14645_v22 }
 0xabc   :  { %12838 = vmatprep.mubr.msk.bf16.mxu1 %vm959_vm5, %v1833_v14 }
 0xb86   :  { %v12808_v34 = vpop.f32.mrb[44].mxu1 }
 0xb87   :  { %v14800_v37 = vadd.f32 %v12808_v34, %v1185_v32  ;;  %v1606_v38 = vpop.f32.mrb[45].mxu1 }
 0xb88   :  { %v14803_v41 = vadd.f32 %v1606_v38, %v1183_v33  ;;  %v12809_v10 = vpop.f32.mrb[46].mxu1  ;;  %v2205_v33 = vunpack.c.l.bf16 %v2204_v15 }
 0xb89   :  { %v1609_v11 = vpop.f32.mrb[47].mxu1 }
 0xb8a   :  { %v14805_v14 = vadd.f32 %v1609_v11, %v1184_v40  ;;  %v2209_v38 = vrot.slane %v2205_v33, %v14658_v48 }
 0xb8e   :  { %v12824_v24 = vpop.f32.mrb[48].mxu1 }
 0xb8f   :  { %v1749_v9 = vpop.f32.mrb[49].mxu1  ;;  %v1758_v42 = vadd.f32 %v12824_v24, %v1702_v23 }
 0xb90   :  { %v12825_v25 = vpop.f32.mrb[50].mxu1  ;;  %v1750_v43 = vadd.f32 %v1749_v9, %v1702_v23 }
 0xb91   :  { %v1752_v26 = vpop.f32.mrb[51].mxu1  ;;  %v1836_v45 = vpack.c.bf16 %v1758_v42, %v1758_v42 }
 0xb92   :  { %v1753_v44 = vadd.f32 %v1752_v26, %v1702_v23 }
 0xb93   :  { %v1847_v12 = vsel %vm959_vm5, %v1836_v45, 0 }
 0xb94   :  { %v1835_v30 = vpack.c.bf16 %v1753_v44, %v1750_v43 }
 0xb96   :  { %13965 = vmatprep.subr.msk.bf16.mxu1 %vm959_vm5, %v1835_v30  ;;  %v1844_v29 = vsel %vm959_vm5, %v1835_v30, 0 }
 0xb97   :  { %12835 = vmatpush3.bf16.xpose.msra.mxu1 %v1844_v29 }
 0xb98   :  { %13966 = vmatprep.subr.msk.bf16.mxu1 %vm959_vm5, %v1836_v45 }
 0xb9f   :  { %12837 = vmatpush3.bf16.xpose.msra.mxu1 %v1847_v12 }
 0xba0   :  { %12856 = vmatprep.subr.bf16.mxu1 %v14018_v46 }
 0xba6   :  { %12839 = vmatmul.mubr.msk.bf16.vlgmr.msra.gmra.mrb[52].mxu1 %vm959_vm5, %v1834_v47 }
 0xba7   :  { %12857 = vmatpush3.bf16.msra.mxu1 %v14018_v46  ;;  %12860 = vmatprep.mubr.msk.bf16.mxu1 %vm178_vm2, %v14634_v20 }
 0xba8   :  { %12858 = vmatprep.subr.bf16.mxu1 %v14019_v49 }
 0xbab   :  { %12859 = vmatpush3.bf16.msra.mxu1 %v14019_v49 }
 0xbac   :  { %12872 = vmatprep.subr.bf16.mxu1 %v14020_v50 }
 0xbae   :  { %12861 = vmatmul.mubr.msk.bf16.vlgmr.msra.gmra.mrb[56].mxu1 %vm178_vm2, %v14645_v22 }
 0xbaf   :  { %12873 = vmatpush3.bf16.msra.mxu1 %v14020_v50  ;;  %12876 = vmatprep.mubr.msk.bf16.mxu1 %vm178_vm2, %v14634_v20 }
 0xbb0   :  { %12874 = vmatprep.subr.bf16.mxu1 %v14021_v51 }
 0xbb3   :  { %12875 = vmatpush3.bf16.msra.mxu1 %v14021_v51 }
 0xbb6   :  { %12877 = vmatmul.mubr.msk.bf16.vlgmr.msra.gmra.mrb[60].mxu1 %vm178_vm2, %v14645_v22 }
 0xc79   :  { %v12840_v52 = vpop.f32.mrb[52].mxu1 }
 0xc7a   :  { %v1883_v53 = vpop.f32.mrb[53].mxu1  ;;  %v1899_v55 = vmul.f32 0.35355338, %v12840_v52 }
 0xc7b   :  { %v1897_v56 = vmul.f32 0.35355338, %v1883_v53  ;;  %v12841_v58 = vpop.f32.mrb[54].mxu1 }
 0xc7c   :  { %v1886_v59 = vpop.f32.mrb[55].mxu1  ;;  %v1902_v4 = vadd.f32 %v1899_v55, %v14699_v57 }
 0xc7d   :  { %v1898_v61 = vmul.f32 0.35355338, %v1886_v59  ;;  %v1900_v62 = vadd.f32 %v1897_v56, %v14701_v60 }
 0xc7e   :  { %v1909_v19 = vsel %vm1033_vm6, %v1902_v4, -inf }
 0xc7f   :  { %v1903_v0 = vsel %vm1026_vm7, %v1900_v62, -inf  ;;  %v1901_v3 = vadd.f32 %v1898_v61, %v14704_v2 }
 0xc80   :  { %1904 = vmax.xlane.f32.xlu0 %v1903_v0 }
 0xc81   :  { %v12862_v5 = vpop.f32.mrb[56].mxu1  ;;  %v1906_v6 = vsel %vm1026_vm7, %v1901_v3, -inf }
 0xc82   :  { %v14829_v7 = vadd.f32 %v12862_v5, %v2069_v63  ;;  %v2116_v13 = vpop.f32.mrb[57].mxu1  ;;  %1907 = vmax.xlane.f32.xlu1 %v1906_v6  ;;  %v1997_v5 = vld [vmem:[#allocation2 + $0xb0] sm:$0xf] }
 0xc83   :  { %v12863_v18 = vpop.f32.mrb[58].mxu1  ;;  %v14832_v28 = vadd.f32 %v2116_v13, %v2069_v63  ;;  %13968 = vmatprep.subr.msk.bf16.mxu0 %vm1131_vm8, %v1997_v5  ;;  %v2007_v6 = vsel %vm1131_vm8, %v1997_v5, 0  ;;  %v14022_v13 = vld [vmem:[#allocation2 + $0xd0] sm:$0xff]  }
 0xc84   :  { %1910 = vmax.xlane.f32.xlu0 %v1909_v19  ;;  %v2119_v27 = vpop.f32.mrb[59].mxu1 }
 0xc85   :  { %v14834_v32 = vadd.f32 %v2119_v27, %v2069_v63 }
 0xc87   :  { %v2270_v34 = vpack.c.bf16 %v14834_v32, %v14832_v28 }
 0xc89   :  { %v12878_v39 = vpop.f32.mrb[60].mxu1 }
 0xc8a   :  { %v2256_v40 = vpop.f32.mrb[61].mxu1  ;;  %v2265_v21 = vadd.f32 %v12878_v39, %v2209_v38  ;;  %v14023_v39 = vld [vmem:[#allocation2 + $0xd8] sm:$0xff]  }
 0xc8b   :  { %v12879_v10 = vpop.f32.mrb[62].mxu1  ;;  %v2257_v23 = vadd.f32 %v2256_v40, %v2209_v38 }
 0xc8c   :  { %v2259_v11 = vpop.f32.mrb[63].mxu1  ;;  %v2376_v25 = vpack.c.bf16 %v2265_v21, %v2265_v21 }
 0xc8d   :  { %v2260_v24 = vadd.f32 %v2259_v11, %v2209_v38  ;;  %v2134_v11 = vld [vmem:[#allocation2 + $0xf8] sm:$0x1] }
 0xc8e   :  { %v2384_v26 = vsel %vm293_vm4, %v2376_v25, 0 }
 0xc8f   :  { %v2375_v9 = vpack.c.bf16 %v2260_v24, %v2257_v23 }
 0xc91   :  { %12888 = vmatprep.subr.bf16.mxu1 %v2375_v9 }
 0xc92   :  { %12889 = vmatpush3.bf16.msra.mxu1 %v2375_v9 }
 0xc93   :  { %13971 = vmatprep.subr.msk.bf16.mxu1 %vm293_vm4, %v2376_v25  ;;  %v2135_v25 = vunpack.c.l.bf16 %v2134_v11 }
 0xc96   :  { %12891 = vmatpush3.bf16.msra.mxu1 %v2384_v26 }
 0xd0d   :  { %v1905_v42 = vpop.xlane.xlu0 %1904 }
 0xd0e   :  { %v1912_v43 = vsub.f32 %v1900_v62, %v1905_v42  ;;  %v2139_v42 = vrot.slane %v2135_v25, %v14658_v48 }
 0xd0f   :  { %v1908_v44 = vpop.xlane.xlu1 %1907 }
 0xd10   :  { %v1915_v30 = vmul.f32 1.442695, %v1912_v43  ;;  %v1913_v45 = vsub.f32 %v1901_v3, %v1908_v44 }
 0xd11   :  { %v1911_v29 = vpop.xlane.xlu0 %1910 }
 0xd12   :  { %14184 = vpow2.f32 %v1915_v30  ;;  %v1917_v46 = vmul.f32 1.442695, %v1913_v45  ;;  %v1914_v12 = vsub.f32 %v1902_v4, %v1911_v29 }
 0xd14   :  { %14186 = vpow2.f32 %v1917_v46  ;;  %v1919_v47 = vmul.f32 1.442695, %v1914_v12 }
 0xd16   :  { %14188 = vpow2.f32 %v1919_v47 }
 0xd1c   :  { %v14185_v49 = vpop.eup %14184 }
 0xd1d   :  { %v1921_v50 = vsel %vm1026_vm7, %v14185_v49, 0.0 }
 0xd1e   :  { %v14187_v51 = vpop.eup %14186  ;;  %1922 = vadd.xlane.f32.xlu1 %v1921_v50  ;;  %v2271_v50 = vpack.c.bf16 %v14829_v7, %v14829_v7 }
 0xd1f   :  { %v1924_v1 = vsel %vm1026_vm7, %v14187_v51, 0.0 }
 0xd20   :  { %v14189_v52 = vpop.eup %14188  ;;  %1925 = vadd.xlane.f32.xlu0 %v1924_v1  ;;  %v14025_v1 = vld [vmem:[#allocation2 + $0x10c] sm:$0xff]  }
 0xd21   :  { %v1927_v53 = vsel %vm1033_vm6, %v14189_v52, 0.0 }
 0xd22   :  { %1928 = vadd.xlane.f32.xlu1 %v1927_v53 }
 0xdab   :  { %v1923_v54 = vpop.xlane.xlu1 %1922 }
 0xdac   :  { %14190 = vrcp.f32 %v1923_v54  ;;  %v14026_v54 = vld [vmem:[#allocation2 + $0x124] sm:$0xff]  }
 0xdad   :  { %v1926_v55 = vpop.xlane.xlu0 %1925 }
 0xdae   :  { %14192 = vrcp.f32 %v1926_v55  ;;  %v14027_v55 = vld [vmem:[#allocation2 + $0x12c] sm:$0xff]  }
 0xdaf   :  { %v1929_v56 = vpop.xlane.xlu1 %1928 }
 0xdb0   :  { %14194 = vrcp.f32 %v1929_v56 }
 0xdb6   :  { %v14191_v58 = vpop.eup %14190 }
 0xdb7   :  { %v1933_v61 = vmul.f32 %v14191_v58, %v14185_v49  ;;  %v14024_v49 = vld [vmem:[#allocation2 + $0x104] sm:$0xff]  }
 0xdb8   :  { %v14193_v59 = vpop.eup %14192 }
 0xdb9   :  { %v1934_v62 = vmul.f32 %v14193_v59, %v14187_v51 }
 0xdba   :  { %v14195_v63 = vpop.eup %14194 }
 0xdbb   :  { %v1936_v0 = vpack.c.bf16 %v1934_v62, %v1933_v61  ;;  %v1935_v3 = vmul.f32 %v14195_v63, %v14189_v52 }
 0xdbd   :  { %12846 = vmatprep.mubr.msk.bf16.mxu0 %vm1026_vm7, %v1936_v0  ;;  %v1937_v4 = vpack.c.bf16 %v1935_v3, %v1935_v3 }
 0xdbf   :  { %12847 = vmatmul.mubr.msk.bf16.vlgmr.msra.gmra.mrb[56].mxu0 %vm1026_vm7, %v1937_v4 }
 0xdc0   :  { %12851 = vmatpush3.bf16.msra.mxu0 %v2007_v6 }
 0xdc1   :  { %12864 = vmatprep.subr.bf16.mxu0 %v14022_v13 }
 0xe92   :  { %v12848_v15 = vpop.f32.mrb[56].mxu0 }
 0xe93   :  { %v1983_v18 = vpop.f32.mrb[57].mxu0  ;;  %v1999_v38 = vpack.c.bf16 %v12848_v15, %v12848_v15 }
 0xe94   :  { %v12849_v19 = vpop.f32.mrb[58].mxu0 }
 0xe95   :  { %v1986_v27 = vpop.f32.mrb[59].mxu0  ;;  %v2638_v19 = vld [vmem:[#allocation2 + $0x140] sm:$0x1] }
 0xe96   :  { %v1998_v33 = vpack.c.bf16 %v1986_v27, %v1983_v18 }
 0xe98   :  { %12852 = vmatprep.mubr.msk.bf16.mxu0 %vm959_vm5, %v1998_v33 }
 0xe99   :  { %12853 = vmatmul.mubr.msk.bf16.vlgmr.msra.gmra.mrb[60].mxu0 %vm959_vm5, %v1999_v38 }
 0xe9a   :  { %12865 = vmatpush3.bf16.msra.mxu0 %v14022_v13  ;;  %12868 = vmatprep.mubr.msk.bf16.mxu0 %vm178_vm2, %v14634_v20 }
 0xe9b   :  { %12866 = vmatprep.subr.bf16.mxu0 %v14023_v39 }
 0xe9e   :  { %12867 = vmatpush3.bf16.msra.mxu0 %v14023_v39 }
 0xea1   :  { %12869 = vmatmul.mubr.msk.bf16.vlgmr.msra.gmra.mrb[64].mxu0 %vm178_vm2, %v14645_v22 }
 0xea2   :  { %12884 = vmatprep.mubr.msk.bf16.mxu0 %vm959_vm5, %v2270_v34 }
 0xf6c   :  { %v12854_v40 = vpop.f32.mrb[60].mxu0 }
 0xf6d   :  { %v2043_v10 = vpop.f32.mrb[61].mxu0  ;;  %v14859_v21 = vadd.f32 %v12854_v40, %v14800_v37  ;;  %v2639_v40 = vunpack.c.l.bf16 %v2638_v19  ;;  %v14028_v19 = vld [vmem:[#allocation2 + $0x114] sm:$0xff]  }
 0xf6e   :  { %v12855_v23 = vpop.f32.mrb[62].mxu0  ;;  %v14862_v24 = vadd.f32 %v2043_v10, %v14803_v41 }
 0xf6f   :  { %v2046_v9 = vpop.f32.mrb[63].mxu0  ;;  %v2643_v10 = vrot.slane %v2639_v40, %v14658_v48 }
 0xf70   :  { %v14865_v26 = vadd.f32 %v2046_v9, %v14805_v14  ;;  %v715_v14 = vld [vmem:[#allocation2 + $0x6d0] sm:$0x7] }
 0xf71   :  { %v716_v12 = vunpack.c.l.bf16 %v715_v14 }
 0xf73   :  { %v718_v47 = vrot.slane %v716_v12, 3 }
 0xf74   :  { %v12870_v28 = vpop.f32.mrb[64].mxu0 }
 0xf75   :  { %v2186_v32 = vpop.f32.mrb[65].mxu0  ;;  %v2195_v44 = vadd.f32 %v12870_v28, %v2139_v42  ;;  %v721_v51 = vsel %vm720_vm9, %v716_v12, %v718_v47  ;;  %v14880_v52 = vadd.f32 %v718_v47, %v14681_v35  ;;  %v2509_v35 = vld [vmem:[#allocation2 + $0x138] sm:$0x1] }
 0xf76   :  { %v12871_v34 = vpop.f32.mrb[66].mxu0  ;;  %v2187_v30 = vadd.f32 %v2186_v32, %v2139_v42  ;;  %v14884_v53 = vadd.f32 %v721_v51, %v14679_v31  ;;  %v2510_v63 = vunpack.c.l.bf16 %v2509_v35 }
 0xf77   :  { %v2189_v43 = vpop.f32.mrb[67].mxu0  ;;  %v2273_v29 = vpack.c.bf16 %v2195_v44, %v2195_v44 }
 0xf78   :  { %v2190_v45 = vadd.f32 %v2189_v43, %v2139_v42  ;;  %v14888_v7 = vpack.c.bf16 %v14880_v52, %v14884_v53  ;;  %v2514_v13 = vrot.slane %v2510_v63, %v14658_v48 }
 0xf79   :  { %v2284_v46 = vsel %vm959_vm5, %v2273_v29, 0 }
 0xf7a   :  { %v2272_v37 = vpack.c.bf16 %v2190_v45, %v2187_v30 }
 0xf7c   :  { %13969 = vmatprep.subr.msk.bf16.mxu0 %vm959_vm5, %v2272_v37  ;;  %v2281_v41 = vsel %vm959_vm5, %v2272_v37, 0 }
 0xf7d   :  { %12881 = vmatpush3.bf16.xpose.msra.mxu0 %v2281_v41 }
 0xf7e   :  { %13970 = vmatprep.subr.msk.bf16.mxu0 %vm959_vm5, %v2273_v29 }
 0xf85   :  { %12883 = vmatpush3.bf16.xpose.msra.mxu0 %v2284_v46 }
 0xf86   :  { %12902 = vmatprep.subr.bf16.mxu0 %v14510_v36 }
 0xf8c   :  { %12885 = vmatmul.mubr.msk.bf16.vlgmr.msra.gmra.mrb[68].mxu0 %vm959_vm5, %v2271_v50 }
 0xf8d   :  { %12903 = vmatpush3.bf16.msra.mxu0 %v14024_v49  ;;  %12906 = vmatprep.mubr.msk.bf16.mxu0 %vm14511_vm3, %v14510_v36 }
 0xf8e   :  { %12904 = vmatprep.subr.bf16.mxu0 %v14510_v36 }
 0xf91   :  { %12905 = vmatpush3.bf16.msra.mxu0 %v14025_v1 }
 0xf92   :  { %12918 = vmatprep.subr.bf16.mxu0 %v14510_v36 }
 0xf94   :  { %12907 = vmatmul.mubr.msk.bf16.vlgmr.msra.gmra.mrb[72].mxu0 %vm178_vm2, %v14888_v7 }
 0xf95   :  { %12919 = vmatpush3.bf16.msra.mxu0 %v14026_v54  ;;  %12922 = vmatprep.mubr.msk.bf16.mxu0 %vm14511_vm3, %v14510_v36 }
 0xf96   :  { %12920 = vmatprep.subr.bf16.mxu0 %v14510_v36 }
 0xf99   :  { %12921 = vmatpush3.bf16.msra.mxu0 %v14027_v55 }
 0xf9a   :  { %12932 = vmatprep.subr.bf16.mxu0 %v14510_v36 }
 0xf9c   :  { %12923 = vmatmul.mubr.msk.bf16.vlgmr.msra.gmra.mrb[76].mxu0 %vm178_vm2, %v14888_v7 }
 0xf9d   :  { %12934 = vmatprep.mubr.msk.bf16.mxu0 %vm14511_vm3, %v14510_v36 }
0x105f   :  { %v12886_v31 = vpop.f32.mrb[68].mxu0 }
0x1060   :  { %v2320_v56 = vpop.f32.mrb[69].mxu0  ;;  %v2336_v58 = vmul.f32 0.35355338, %v12886_v31 }
0x1061   :  { %v2334_v59 = vmul.f32 0.35355338, %v2320_v56  ;;  %v12887_v61 = vpop.f32.mrb[70].mxu0 }
0x1062   :  { %v2323_v62 = vpop.f32.mrb[71].mxu0  ;;  %v2339_v6 = vadd.f32 %v2336_v58, %v14699_v57 }
0x1063   :  { %v2335_v0 = vmul.f32 0.35355338, %v2323_v62  ;;  %v2337_v3 = vadd.f32 %v2334_v59, %v14701_v60 }
0x1064   :  { %v2346_v38 = vsel %vm1033_vm6, %v2339_v6, -inf }
0x1065   :  { %v2340_v4 = vsel %vm1026_vm7, %v2337_v3, -inf  ;;  %v2338_v5 = vadd.f32 %v2335_v0, %v14704_v2 }
0x1066   :  { %2341 = vmax.xlane.f32.xlu0 %v2340_v4 }
0x1067   :  { %v2564_v15 = vpop.f32.mrb[72].mxu0  ;;  %v2343_v18 = vsel %vm1026_vm7, %v2338_v5, -inf }
0x1068   :  { %v12908_v27 = vpop.f32.mrb[73].mxu0  ;;  %2344 = vmax.xlane.f32.xlu1 %v2343_v18  ;;  %v14908_v39 = vadd.f32 %v2564_v15, %v2514_v13 }
0x1069   :  { %v2567_v33 = vpop.f32.mrb[74].mxu0 }
0x106a   :  { %v14910_v60 = vadd.f32 %v2567_v33, %v2514_v13  ;;  %2347 = vmax.xlane.f32.xlu0 %v2346_v38  ;;  %v12909_v2 = vpop.f32.mrb[75].mxu0  ;;  %v14029_v33 = vld [vmem:[#allocation2 + $0x11c] sm:$0xff]  }
0x106b   :  { %v2575_v2 = vld [vmem:[#allocation2 + $0x13c] sm:$0x1] }
0x106c   :  { %v2697_v57 = vpack.c.bf16 %v14910_v60, %v14908_v39 }
0x106f   :  { %v2690_v11 = vpop.f32.mrb[76].mxu0 }
0x1070   :  { %v12924_v23 = vpop.f32.mrb[77].mxu0  ;;  %v2691_v25 = vadd.f32 %v2690_v11, %v2643_v10 }
0x1071   :  { %v2693_v9 = vpop.f32.mrb[78].mxu0 }
0x1072   :  { %v2694_v42 = vadd.f32 %v2693_v9, %v2643_v10  ;;  %v12925_v28 = vpop.f32.mrb[79].mxu0 }
0x1074   :  { %v2775_v32 = vpack.c.bf16 %v2694_v42, %v2691_v25  ;;  %v2576_v25 = vunpack.c.l.bf16 %v2575_v2 }
0x1076   :  { %v2780_v34 = vsel %vm720_vm9, %v2775_v32, 0  ;;  %v2580_v28 = vrot.slane %v2576_v25, %v14658_v48 }
0x1077   :  { %12933 = vmatpush3.bf16.msra.mxu0 %v2780_v34 }
0x1078   :  { %12944 = vmatprep.subr.bf16.mxu0 %v14510_v36 }
0x10f3   :  { %v2342_v43 = vpop.xlane.xlu0 %2341 }
0x10f4   :  { %v2349_v44 = vsub.f32 %v2337_v3, %v2342_v43  ;;  %v2434_v3 = vld [vmem:[#allocation2 + $0xf0] sm:$0xf] }
0x10f5   :  { %v2345_v30 = vpop.xlane.xlu1 %2344  ;;  %13972 = vmatprep.subr.msk.bf16.mxu1 %vm1131_vm8, %v2434_v3  ;;  %v2444_v4 = vsel %vm1131_vm8, %v2434_v3, 0 }
0x10f6   :  { %v2352_v45 = vmul.f32 1.442695, %v2349_v44  ;;  %v2350_v37 = vsub.f32 %v2338_v5, %v2345_v30 }
0x10f7   :  { %v2348_v29 = vpop.xlane.xlu0 %2347 }
0x10f8   :  { %14196 = vpow2.f32 %v2352_v45  ;;  %v2354_v41 = vmul.f32 1.442695, %v2350_v37  ;;  %v2351_v14 = vsub.f32 %v2339_v6, %v2348_v29 }
0x10fa   :  { %14198 = vpow2.f32 %v2354_v41  ;;  %v2356_v46 = vmul.f32 1.442695, %v2351_v14 }
0x10fc   :  { %14200 = vpow2.f32 %v2356_v46  ;;  %v14955_v46 = vld [vmem:[#allocation5 + $0xb8] sm:$0x3] }
0x1102   :  { %v14197_v12 = vpop.eup %14196 }
0x1103   :  { %v2358_v47 = vsel %vm1026_vm7, %v14197_v12, 0.0 }
0x1104   :  { %v14199_v49 = vpop.eup %14198  ;;  %2359 = vadd.xlane.f32.xlu1 %v2358_v47 }
0x1105   :  { %v2361_v50 = vsel %vm1026_vm7, %v14199_v49, 0.0 }
0x1106   :  { %v14201_v51 = vpop.eup %14200  ;;  %2362 = vadd.xlane.f32.xlu0 %v2361_v50 }
0x1107   :  { %v2364_v1 = vsel %vm1033_vm6, %v14201_v51, 0.0 }
0x1108   :  { %2365 = vadd.xlane.f32.xlu1 %v2364_v1 }
0x1191   :  { %v2360_v54 = vpop.xlane.xlu1 %2359 }
0x1192   :  { %14202 = vrcp.f32 %v2360_v54 }
0x1193   :  { %v2363_v55 = vpop.xlane.xlu0 %2362 }
0x1194   :  { %14204 = vrcp.f32 %v2363_v55 }
0x1195   :  { %v2366_v31 = vpop.xlane.xlu1 %2365 }
0x1196   :  { %14206 = vrcp.f32 %v2366_v31 }
0x119c   :  { %v14203_v35 = vpop.eup %14202 }
0x119d   :  { %v2370_v58 = vmul.f32 %v14203_v35, %v14197_v12 }
0x119e   :  { %v14205_v56 = vpop.eup %14204 }
0x119f   :  { %v2371_v59 = vmul.f32 %v14205_v56, %v14199_v49 }
0x11a0   :  { %v14207_v61 = vpop.eup %14206 }
0x11a1   :  { %v2373_v62 = vpack.c.bf16 %v2371_v59, %v2370_v58  ;;  %v2372_v63 = vmul.f32 %v14207_v61, %v14201_v51 }
0x11a3   :  { %12892 = vmatprep.mubr.msk.bf16.mxu1 %vm1026_vm7, %v2373_v62  ;;  %v2374_v0 = vpack.c.bf16 %v2372_v63, %v2372_v63 }
0x11a5   :  { %12893 = vmatmul.mubr.msk.bf16.vlgmr.msra.gmra.mrb[64].mxu1 %vm1026_vm7, %v2374_v0 }
0x11a6   :  { %12897 = vmatpush3.bf16.msra.mxu1 %v2444_v4 }
0x11a7   :  { %12910 = vmatprep.subr.bf16.mxu1 %v14510_v36 }
0x1278   :  { %v12894_v5 = vpop.f32.mrb[64].mxu1 }
0x1279   :  { %v2420_v6 = vpop.f32.mrb[65].mxu1  ;;  %v2436_v27 = vpack.c.bf16 %v12894_v5, %v12894_v5  ;;  %v14030_v5 = vld [vmem:[#allocation2 + $0x144] sm:$0xff]  }
0x127a   :  { %v12895_v13 = vpop.f32.mrb[66].mxu1 }
0x127b   :  { %v2423_v15 = vpop.f32.mrb[67].mxu1  ;;  %v14031_v13 = vld [vmem:[#allocation2 + $0x14c] sm:$0xff]  }
0x127c   :  { %v2435_v18 = vpack.c.bf16 %v2423_v15, %v2420_v6  ;;  %v14032_v15 = vld [vmem:[#allocation2 + $0x164] sm:$0xff]  }
0x127e   :  { %12898 = vmatprep.mubr.msk.bf16.mxu1 %vm959_vm5, %v2435_v18  ;;  %v14033_v18 = vld [vmem:[#allocation2 + $0x16c] sm:$0xff]  }
0x127f   :  { %12899 = vmatmul.mubr.msk.bf16.vlgmr.msra.gmra.mrb[68].mxu1 %vm959_vm5, %v2436_v27 }
0x1280   :  { %12911 = vmatpush3.bf16.msra.mxu1 %v14028_v19  ;;  %12914 = vmatprep.mubr.msk.bf16.mxu1 %vm14511_vm3, %v14510_v36  ;;  %v2823_v19 = vld [vmem:[#allocation2 + $0x134] sm:$0xf] }
0x1281   :  { %12912 = vmatprep.subr.bf16.mxu1 %v14510_v36  ;;  %v2829_v27 = vsel %vm1131_vm8, %v2823_v19, 0 }
0x1284   :  { %12913 = vmatpush3.bf16.msra.mxu1 %v14029_v33 }
0x1285   :  { %12926 = vmatprep.subr.bf16.mxu1 %v14510_v36 }
0x1287   :  { %12915 = vmatmul.mubr.msk.bf16.vlgmr.msra.gmra.mrb[72].mxu1 %vm178_vm2, %v14888_v7 }
0x1288   :  { %12928 = vmatprep.mubr.msk.bf16.mxu1 %vm14511_vm3, %v14510_v36 }
0x1352   :  { %v12900_v38 = vpop.f32.mrb[68].mxu1 }
0x1353   :  { %v14936_v40 = vadd.f32 %v12900_v38, %v14859_v21  ;;  %v2480_v10 = vpop.f32.mrb[69].mxu1  ;;  %v2878_v38 = vld [vmem:[#allocation2 + $0x178] sm:$0x1] }
0x1354   :  { %v14939_v11 = vadd.f32 %v2480_v10, %v14862_v24  ;;  %v12901_v23 = vpop.f32.mrb[70].mxu1 }
0x1355   :  { %v2483_v9 = vpop.f32.mrb[71].mxu1  ;;  %v14034_v23 = vld [vmem:[#allocation2 + $0x154] sm:$0xff]  }
0x1356   :  { %v14942_v42 = vadd.f32 %v2483_v9, %v14865_v26  ;;  %v14953_v26 = vld [vmem:[#allocation5 + $0xb0] sm:$0xff] }
0x135a   :  { %v2627_v32 = vpop.f32.mrb[72].mxu1 }
0x135b   :  { %v12916_v34 = vpop.f32.mrb[73].mxu1  ;;  %v2628_v44 = vadd.f32 %v2627_v32, %v2580_v28  ;;  %v14035_v32 = vld [vmem:[#allocation2 + $0x15c] sm:$0xff]  }
0x135c   :  { %v2630_v43 = vpop.f32.mrb[74].mxu1 }
0x135d   :  { %v2631_v30 = vadd.f32 %v2630_v43, %v2580_v28  ;;  %v12917_v45 = vpop.f32.mrb[75].mxu1  ;;  %v2879_v28 = vunpack.c.l.bf16 %v2878_v38 }
0x135f   :  { %v2698_v21 = vpack.c.bf16 %v2631_v30, %v2628_v44  ;;  %v2883_v34 = vrot.slane %v2879_v28, %v14658_v48  ;;  %v3004_v44 = vld [vmem:[#allocation2 + $0x180] sm:$0x1] }
0x1361   :  { %v2703_v37 = vsel %vm959_vm5, %v2698_v21, 0 }
0x1362   :  { %12927 = vmatpush3.bf16.xpose.msra.mxu1 %v2703_v37 }
0x1363   :  { %12938 = vmatprep.subr.bf16.mxu1 %v14510_v36 }
0x1369   :  { %12929 = vmatmul.mubr.msk.bf16.vlgmr.msra.gmra.mrb[76].mxu1 %vm959_vm5, %v2697_v57 }
0x136a   :  { %12940 = vmatprep.mubr.msk.bf16.mxu1 %vm14511_vm3, %v14510_v36  ;;  %12939 = vmatpush3.bf16.msra.mxu1 %v2829_v27 }
0x136b   :  { %12952 = vmatprep.subr.bf16.mxu1 %v14510_v36 }
0x143c   :  { %v2739_v24 = vpop.f32.mrb[76].mxu1 }
0x143d   :  { %v2746_v29 = vmul.f32 0.35355338, %v2739_v24  ;;  %v12930_v41 = vpop.f32.mrb[77].mxu1 }
0x143e   :  { %v2742_v14 = vpop.f32.mrb[78].mxu1 }
0x143f   :  { %v2747_v12 = vmul.f32 0.35355338, %v2742_v14  ;;  %v12931_v47 = vpop.f32.mrb[79].mxu1  ;;  %v2748_v49 = vadd.f32 %v2746_v29, %v14953_v26  ;;  %v3005_v29 = vunpack.c.l.bf16 %v3004_v44 }
0x1441   :  { %v2751_v39 = vsel %vm2750_vm10, %v2748_v49, -inf  ;;  %v2749_v60 = vadd.f32 %v2747_v12, %v14955_v46  ;;  %v3009_v14 = vrot.slane %v3005_v29, %v14658_v48 }
0x1442   :  { %2752 = vmax.xlane.f32.xlu0 %v2751_v39 }
0x1443   :  { %v2755_v57 = vsel %vm2754_vm11, %v2749_v60, -inf }
0x1444   :  { %2756 = vmax.xlane.f32.xlu1 %v2755_v57 }
0x14cf   :  { %v2753_v50 = vpop.xlane.xlu0 %2752 }
0x14d0   :  { %v2758_v51 = vsub.f32 %v2748_v49, %v2753_v50 }
0x14d1   :  { %v2757_v1 = vpop.xlane.xlu1 %2756 }
0x14d2   :  { %v2760_v54 = vmul.f32 1.442695, %v2758_v51  ;;  %v2759_v55 = vsub.f32 %v2749_v60, %v2757_v1 }
0x14d4   :  { %14208 = vpow2.f32 %v2760_v54  ;;  %v2762_v31 = vmul.f32 1.442695, %v2759_v55  ;;  %v2941_v54 = vld [vmem:[#allocation2 + $0x17c] sm:$0x1] }
0x14d6   :  { %14210 = vpow2.f32 %v2762_v31 }
0x14de   :  { %v14209_v35 = vpop.eup %14208 }
0x14df   :  { %v2764_v56 = vsel %vm2750_vm10, %v14209_v35, 0.0 }
0x14e0   :  { %v14211_v58 = vpop.eup %14210  ;;  %2765 = vadd.xlane.f32.xlu0 %v2764_v56  ;;  %v2942_v56 = vunpack.c.l.bf16 %v2941_v54  ;;  %v3242_v54 = vld [vmem:[#allocation2 + $0x1b8] sm:$0x1] }
0x14e1   :  { %v2767_v59 = vsel %vm2754_vm11, %v14211_v58, 0.0 }
0x14e2   :  { %2768 = vadd.xlane.f32.xlu1 %v2767_v59 }
0x156d   :  { %v2766_v61 = vpop.xlane.xlu0 %2765 }
0x156e   :  { %14212 = vrcp.f32 %v2766_v61 }
0x156f   :  { %v2769_v62 = vpop.xlane.xlu1 %2768 }
0x1570   :  { %14214 = vrcp.f32 %v2769_v62 }
0x1578   :  { %v14213_v63 = vpop.eup %14212 }
0x1579   :  { %v2772_v3 = vmul.f32 %v14213_v63, %v14209_v35 }
0x157a   :  { %v14215_v0 = vpop.eup %14214 }
0x157b   :  { %v2773_v4 = vmul.f32 %v14215_v0, %v14211_v58  ;;  %v2946_v58 = vrot.slane %v2942_v56, %v14658_v48  ;;  %v14040_v56 = vld [vmem:[#allocation2 + $0x194] sm:$0xff]  }
0x157d   :  { %v2774_v6 = vpack.c.bf16 %v2773_v4, %v2772_v3 }
0x157f   :  { %12935 = vmatmul.mubr.msk.bf16.vlgmr.msra.gmra.mrb[80].mxu0 %vm2750_vm10, %v2774_v6 }
0x1580   :  { %12945 = vmatpush3.bf16.msra.mxu0 %v14030_v5  ;;  %12948 = vmatprep.mubr.msk.bf16.mxu0 %vm14511_vm3, %v14510_v36 }
0x1581   :  { %12946 = vmatprep.subr.bf16.mxu0 %v14510_v36 }
0x1584   :  { %12947 = vmatpush3.bf16.msra.mxu0 %v14031_v13 }
0x1585   :  { %12960 = vmatprep.subr.bf16.mxu0 %v14510_v36 }
0x1587   :  { %12949 = vmatmul.mubr.msk.bf16.vlgmr.msra.gmra.mrb[84].mxu0 %vm178_vm2, %v14888_v7 }
0x1588   :  { %12961 = vmatpush3.bf16.msra.mxu0 %v14032_v15  ;;  %12964 = vmatprep.mubr.msk.bf16.mxu0 %vm14511_vm3, %v14510_v36 }
0x1589   :  { %12962 = vmatprep.subr.bf16.mxu0 %v14510_v36 }
0x158c   :  { %12963 = vmatpush3.bf16.msra.mxu0 %v14033_v18 }
0x158d   :  { %12974 = vmatprep.subr.bf16.mxu0 %v14510_v36 }
0x158f   :  { %12965 = vmatmul.mubr.msk.bf16.vlgmr.msra.gmra.mrb[88].mxu0 %vm178_vm2, %v14888_v7 }
0x1590   :  { %12976 = vmatprep.mubr.msk.bf16.mxu0 %vm14511_vm3, %v14510_v36 }
0x1652   :  { %v2816_v33 = vpop.f32.mrb[80].mxu0 }
0x1653   :  { %v12936_v2 = vpop.f32.mrb[81].mxu0 }
0x1654   :  { %v2819_v10 = vpop.f32.mrb[82].mxu0 }
0x1655   :  { %v2824_v9 = vpack.c.bf16 %v2819_v10, %v2816_v33  ;;  %v12937_v25 = vpop.f32.mrb[83].mxu0 }
0x1657   :  { %12941 = vmatmul.mubr.msk.bf16.vlgmr.msra.gmra.mrb[80].mxu1 %vm959_vm5, %v2824_v9 }
0x1658   :  { %12953 = vmatpush3.bf16.msra.mxu1 %v14034_v23  ;;  %12956 = vmatprep.mubr.msk.bf16.mxu1 %vm14511_vm3, %v14510_v36 }
0x1659   :  { %12954 = vmatprep.subr.bf16.mxu1 %v14510_v36 }
0x165a   :  { %v2930_v43 = vpop.f32.mrb[84].mxu0 }
0x165b   :  { %v12950_v30 = vpop.f32.mrb[85].mxu0  ;;  %v2931_v21 = vadd.f32 %v2930_v43, %v2883_v34 }
0x165c   :  { %v2933_v45 = vpop.f32.mrb[86].mxu0  ;;  %12955 = vmatpush3.bf16.msra.mxu1 %v14035_v32 }
0x165d   :  { %v2934_v37 = vadd.f32 %v2933_v45, %v2883_v34  ;;  %v12951_v24 = vpop.f32.mrb[87].mxu0  ;;  %12968 = vmatprep.subr.bf16.mxu1 %v14510_v36 }
0x165f   :  { %v3063_v41 = vpack.c.bf16 %v2934_v37, %v2931_v21  ;;  %12957 = vmatmul.mubr.msk.bf16.vlgmr.msra.gmra.mrb[84].mxu1 %vm178_vm2, %v14888_v7 }
0x1660   :  { %12970 = vmatprep.mubr.msk.bf16.mxu1 %vm14511_vm3, %v14510_v36 }
0x1662   :  { %v3056_v12 = vpop.f32.mrb[88].mxu0 }
0x1663   :  { %v12966_v47 = vpop.f32.mrb[89].mxu0  ;;  %v3057_v39 = vadd.f32 %v3056_v12, %v3009_v14  ;;  %v14036_v12 = vld [vmem:[#allocation2 + $0x184] sm:$0xff]  }
0x1664   :  { %v3059_v49 = vpop.f32.mrb[90].mxu0 }
0x1665   :  { %v3060_v60 = vadd.f32 %v3059_v49, %v3009_v14  ;;  %v12967_v57 = vpop.f32.mrb[91].mxu0  ;;  %v14037_v49 = vld [vmem:[#allocation2 + $0x18c] sm:$0xff]  }
0x1666   :  { %v3187_v57 = vld [vmem:[#allocation2 + $0x174] sm:$0xf] }
0x1667   :  { %v3139_v50 = vpack.c.bf16 %v3060_v60, %v3057_v39  ;;  %v14038_v39 = vld [vmem:[#allocation2 + $0x1a4] sm:$0xff]   ;;  %v14039_v60 = vld [vmem:[#allocation2 + $0x1ac] sm:$0xff]  }
0x1669   :  { %v3144_v51 = vsel %vm720_vm9, %v3139_v50, 0  ;;  %v3193_v50 = vsel %vm1131_vm8, %v3187_v57, 0 }
0x166a   :  { %12975 = vmatpush3.bf16.msra.mxu0 %v3144_v51 }
0x166b   :  { %12986 = vmatprep.subr.bf16.mxu0 %v14510_v36 }
0x172a   :  { %v14993_v1 = vpop.f32.mrb[80].mxu1 }
0x172b   :  { %v12942_v55 = vpop.f32.mrb[81].mxu1 }
0x172c   :  { %v14995_v31 = vpop.f32.mrb[82].mxu1 }
0x172d   :  { %v12943_v35 = vpop.f32.mrb[83].mxu1 }
0x1732   :  { %v2993_v59 = vpop.f32.mrb[84].mxu1 }
0x1733   :  { %v12958_v61 = vpop.f32.mrb[85].mxu1  ;;  %v2994_v63 = vadd.f32 %v2993_v59, %v2946_v58 }
0x1734   :  { %v2996_v62 = vpop.f32.mrb[86].mxu1  ;;  %v3243_v61 = vunpack.c.l.bf16 %v3242_v54 }
0x1735   :  { %v2997_v0 = vadd.f32 %v2996_v62, %v2946_v58  ;;  %v12959_v3 = vpop.f32.mrb[87].mxu1  ;;  %v14041_v62 = vld [vmem:[#allocation2 + $0x19c] sm:$0xff]  }
0x1736   :  { %v3368_v3 = vld [vmem:[#allocation2 + $0x1c0] sm:$0x1] }
0x1737   :  { %v3064_v4 = vpack.c.bf16 %v2997_v0, %v2994_v63  ;;  %v3247_v63 = vrot.slane %v3243_v61, %v14658_v48 }
0x1739   :  { %v3069_v5 = vsel %vm959_vm5, %v3064_v4, 0 }
0x173a   :  { %12969 = vmatpush3.bf16.xpose.msra.mxu1 %v3069_v5 }
0x173b   :  { %12980 = vmatprep.subr.bf16.mxu1 %v14510_v36 }
0x1741   :  { %12971 = vmatmul.mubr.msk.bf16.vlgmr.msra.gmra.mrb[88].mxu1 %vm959_vm5, %v3063_v41 }
0x1742   :  { %12982 = vmatprep.mubr.msk.bf16.mxu1 %vm14511_vm3, %v14510_v36  ;;  %12981 = vmatpush3.bf16.msra.mxu1 %v3193_v50 }
0x1743   :  { %12994 = vmatprep.subr.bf16.mxu1 %v14510_v36 }
0x1814   :  { %v3105_v6 = vpop.f32.mrb[88].mxu1 }
0x1815   :  { %v3112_v13 = vmul.f32 0.35355338, %v3105_v6  ;;  %v12972_v15 = vpop.f32.mrb[89].mxu1 }
0x1816   :  { %v3108_v18 = vpop.f32.mrb[90].mxu1 }
0x1817   :  { %v3113_v19 = vmul.f32 0.35355338, %v3108_v18  ;;  %v12973_v27 = vpop.f32.mrb[91].mxu1  ;;  %v3114_v33 = vadd.f32 %v3112_v13, %v14953_v26  ;;  %v3369_v18 = vunpack.c.l.bf16 %v3368_v3 }
0x1819   :  { %v3116_v38 = vsel %vm2750_vm10, %v3114_v33, -inf  ;;  %v3115_v2 = vadd.f32 %v3113_v19, %v14955_v46  ;;  %v3373_v27 = vrot.slane %v3369_v18, %v14658_v48 }
0x181a   :  { %3117 = vmax.xlane.f32.xlu0 %v3116_v38 }
0x181b   :  { %v3119_v10 = vsel %vm2754_vm11, %v3115_v2, -inf }
0x181c   :  { %3120 = vmax.xlane.f32.xlu1 %v3119_v10 }
0x18a7   :  { %v3118_v23 = vpop.xlane.xlu0 %3117 }
0x18a8   :  { %v3122_v9 = vsub.f32 %v3114_v33, %v3118_v23 }
0x18a9   :  { %v3121_v25 = vpop.xlane.xlu1 %3120 }
0x18aa   :  { %v3124_v28 = vmul.f32 1.442695, %v3122_v9  ;;  %v3123_v32 = vsub.f32 %v3115_v2, %v3121_v25 }
0x18ac   :  { %14216 = vpow2.f32 %v3124_v28  ;;  %v3126_v34 = vmul.f32 1.442695, %v3123_v32  ;;  %v2497_v32 = vld [vmem:[#allocation2 + $0x204] sm:$0x1] }
0x18ae   :  { %14218 = vpow2.f32 %v3126_v34  ;;  %v2498_v34 = vunpack.c.l.bf16 %v2497_v32 }
0x18b6   :  { %v14217_v43 = vpop.eup %14216 }
0x18b7   :  { %v3128_v44 = vsel %vm2750_vm10, %v14217_v43, 0.0 }
0x18b8   :  { %v14219_v30 = vpop.eup %14218  ;;  %3129 = vadd.xlane.f32.xlu0 %v3128_v44 }
0x18b9   :  { %v3131_v45 = vsel %vm2754_vm11, %v14219_v30, 0.0 }
0x18ba   :  { %3132 = vadd.xlane.f32.xlu1 %v3131_v45  ;;  %v3305_v45 = vld [vmem:[#allocation2 + $0x1bc] sm:$0x1] }
0x1945   :  { %v3130_v21 = vpop.xlane.xlu0 %3129 }
0x1946   :  { %14220 = vrcp.f32 %v3130_v21 }
0x1947   :  { %v3133_v37 = vpop.xlane.xlu1 %3132 }
0x1948   :  { %14222 = vrcp.f32 %v3133_v37 }
0x1950   :  { %v14221_v24 = vpop.eup %14220 }
0x1951   :  { %v3136_v41 = vmul.f32 %v14221_v24, %v14217_v43  ;;  %v2502_v43 = vrot.slane %v2498_v34, %v14658_v48  ;;  %v14043_v34 = vld [vmem:[#allocation2 + $0x1cc] sm:$0xff]  }
0x1952   :  { %v14223_v29 = vpop.eup %14222 }
0x1953   :  { %v3137_v14 = vmul.f32 %v14223_v29, %v14219_v30  ;;  %v2872_v44 = vadd.f32 %v14993_v1, %v2502_v43  ;;  %v2873_v21 = vadd.f32 %v14995_v31, %v2502_v43  ;;  %v14044_v43 = vld [vmem:[#allocation2 + $0x1e4] sm:$0xff]  }
0x1955   :  { %v3138_v47 = vpack.c.bf16 %v3137_v14, %v3136_v41 }
0x1957   :  { %12977 = vmatmul.mubr.msk.bf16.vlgmr.msra.gmra.mrb[92].mxu0 %vm2750_vm10, %v3138_v47 }
0x1958   :  { %12987 = vmatpush3.bf16.msra.mxu0 %v14036_v12  ;;  %12990 = vmatprep.mubr.msk.bf16.mxu0 %vm14511_vm3, %v14510_v36  ;;  %v3306_v12 = vunpack.c.l.bf16 %v3305_v45 }
0x1959   :  { %12988 = vmatprep.subr.bf16.mxu0 %v14510_v36 }
0x195a   :  { %v3310_v47 = vrot.slane %v3306_v12, %v14658_v48  ;;  %v14046_v12 = vld [vmem:[#allocation2 + $0x1d4] sm:$0xff]  }
0x195c   :  { %12989 = vmatpush3.bf16.msra.mxu0 %v14037_v49 }
0x195d   :  { %13002 = vmatprep.subr.bf16.mxu0 %v14510_v36 }
0x195f   :  { %12991 = vmatmul.mubr.msk.bf16.vlgmr.msra.gmra.mrb[96].mxu0 %vm178_vm2, %v14888_v7 }
0x1960   :  { %13003 = vmatpush3.bf16.msra.mxu0 %v14038_v39  ;;  %13006 = vmatprep.mubr.msk.bf16.mxu0 %vm14511_vm3, %v14510_v36 }
0x1961   :  { %13004 = vmatprep.subr.bf16.mxu0 %v14510_v36 }
0x1964   :  { %13005 = vmatpush3.bf16.msra.mxu0 %v14039_v60 }
0x1965   :  { %13016 = vmatprep.subr.bf16.mxu0 %v14510_v36 }
0x1967   :  { %13007 = vmatmul.mubr.msk.bf16.vlgmr.msra.gmra.mrb[100].mxu0 %vm178_vm2, %v14888_v7 }
0x1968   :  { %13018 = vmatprep.mubr.msk.bf16.mxu0 %vm14511_vm3, %v14510_v36 }
0x1a2a   :  { %v3180_v51 = vpop.f32.mrb[92].mxu0 }
0x1a2b   :  { %v12978_v55 = vpop.f32.mrb[93].mxu0 }
0x1a2c   :  { %v3183_v35 = vpop.f32.mrb[94].mxu0 }
0x1a2d   :  { %v3188_v58 = vpack.c.bf16 %v3183_v35, %v3180_v51  ;;  %v12979_v59 = vpop.f32.mrb[95].mxu0 }
0x1a2f   :  { %12983 = vmatmul.mubr.msk.bf16.vlgmr.msra.gmra.mrb[92].mxu1 %vm959_vm5, %v3188_v58 }
0x1a30   :  { %12995 = vmatpush3.bf16.msra.mxu1 %v14040_v56  ;;  %12998 = vmatprep.mubr.msk.bf16.mxu1 %vm14511_vm3, %v14510_v36 }
0x1a31   :  { %12996 = vmatprep.subr.bf16.mxu1 %v14510_v36 }
0x1a32   :  { %v3294_v0 = vpop.f32.mrb[96].mxu0 }
0x1a33   :  { %v12992_v4 = vpop.f32.mrb[97].mxu0  ;;  %v3295_v6 = vadd.f32 %v3294_v0, %v3247_v63 }
0x1a34   :  { %v3297_v5 = vpop.f32.mrb[98].mxu0  ;;  %12997 = vmatpush3.bf16.msra.mxu1 %v14041_v62 }
0x1a35   :  { %v3298_v13 = vadd.f32 %v3297_v5, %v3247_v63  ;;  %v12993_v15 = vpop.f32.mrb[99].mxu0  ;;  %13010 = vmatprep.subr.bf16.mxu1 %v14510_v36 }
0x1a37   :  { %v3427_v19 = vpack.c.bf16 %v3298_v13, %v3295_v6  ;;  %12999 = vmatmul.mubr.msk.bf16.vlgmr.msra.gmra.mrb[96].mxu1 %vm178_vm2, %v14888_v7 }
0x1a38   :  { %13012 = vmatprep.mubr.msk.bf16.mxu1 %vm14511_vm3, %v14510_v36 }
0x1a3a   :  { %v3420_v33 = vpop.f32.mrb[100].mxu0 }
0x1a3b   :  { %v13008_v38 = vpop.f32.mrb[101].mxu0  ;;  %v3421_v10 = vadd.f32 %v3420_v33, %v3373_v27 }
0x1a3c   :  { %v3423_v2 = vpop.f32.mrb[102].mxu0 }
0x1a3d   :  { %v3424_v23 = vadd.f32 %v3423_v2, %v3373_v27  ;;  %v13009_v9 = vpop.f32.mrb[103].mxu0 }
0x1a3f   :  { %v3503_v25 = vpack.c.bf16 %v3424_v23, %v3421_v10 }
0x1a41   :  { %v3508_v28 = vsel %vm720_vm9, %v3503_v25, 0 }
0x1a42   :  { %13017 = vmatpush3.bf16.msra.mxu0 %v3508_v28  ;;  %v14042_v28 = vld [vmem:[#allocation2 + $0x1c4] sm:$0xff]  }
0x1a43   :  { %13028 = vmatprep.subr.bf16.mxu0 %v14510_v36 }
0x1b02   :  { %v3229_v30 = vpop.f32.mrb[92].mxu1 }
0x1b03   :  { %v15042_v37 = vadd.f32 %v3229_v30, %v2872_v44  ;;  %v12984_v24 = vpop.f32.mrb[93].mxu1  ;;  %v14045_v44 = vld [vmem:[#allocation2 + $0x1ec] sm:$0xff]   ;;  %v3551_v30 = vld [vmem:[#allocation2 + $0x1b4] sm:$0xf] }
0x1b04   :  { %v3232_v29 = vpop.f32.mrb[94].mxu1  ;;  %v3557_v45 = vsel %vm1131_vm8, %v3551_v30, 0  ;;  %v3606_v24 = vld [vmem:[#allocation2 + $0x1f8] sm:$0x1] }
0x1b05   :  { %v15044_v41 = vadd.f32 %v3232_v29, %v2873_v21  ;;  %v12985_v14 = vpop.f32.mrb[95].mxu1 }
0x1b0a   :  { %v3357_v49 = vpop.f32.mrb[96].mxu1 }
0x1b0b   :  { %v13000_v39 = vpop.f32.mrb[97].mxu1  ;;  %v3358_v57 = vadd.f32 %v3357_v49, %v3310_v47 }
0x1b0c   :  { %v3360_v60 = vpop.f32.mrb[98].mxu1  ;;  %v3607_v39 = vunpack.c.l.bf16 %v3606_v24 }
0x1b0d   :  { %v3361_v50 = vadd.f32 %v3360_v60, %v3310_v47  ;;  %v13001_v1 = vpop.f32.mrb[99].mxu1  ;;  %v14047_v60 = vld [vmem:[#allocation2 + $0x1dc] sm:$0xff]  }
0x1b0e   :  { %v3732_v1 = vld [vmem:[#allocation2 + $0x200] sm:$0x1] }
0x1b0f   :  { %v3428_v51 = vpack.c.bf16 %v3361_v50, %v3358_v57  ;;  %v3611_v57 = vrot.slane %v3607_v39, %v14658_v48 }
0x1b11   :  { %v3433_v54 = vsel %vm959_vm5, %v3428_v51, 0 }
0x1b12   :  { %13011 = vmatpush3.bf16.xpose.msra.mxu1 %v3433_v54 }
0x1b13   :  { %13022 = vmatprep.subr.bf16.mxu1 %v14510_v36 }
0x1b19   :  { %13013 = vmatmul.mubr.msk.bf16.vlgmr.msra.gmra.mrb[100].mxu1 %vm959_vm5, %v3427_v19 }
0x1b1a   :  { %13024 = vmatprep.mubr.msk.bf16.mxu1 %vm14511_vm3, %v14510_v36  ;;  %13023 = vmatpush3.bf16.msra.mxu1 %v3557_v45 }
0x1b1b   :  { %13036 = vmatprep.subr.bf16.mxu1 %v14510_v36 }
0x1bec   :  { %v3469_v31 = vpop.f32.mrb[100].mxu1 }
0x1bed   :  { %v3476_v55 = vmul.f32 0.35355338, %v3469_v31  ;;  %v13014_v35 = vpop.f32.mrb[101].mxu1 }
0x1bee   :  { %v3472_v56 = vpop.f32.mrb[102].mxu1 }
0x1bef   :  { %v3477_v58 = vmul.f32 0.35355338, %v3472_v56  ;;  %v13015_v59 = vpop.f32.mrb[103].mxu1  ;;  %v3478_v61 = vadd.f32 %v3476_v55, %v14953_v26  ;;  %v3733_v56 = vunpack.c.l.bf16 %v3732_v1 }
0x1bf1   :  { %v3480_v62 = vsel %vm2750_vm10, %v3478_v61, -inf  ;;  %v3479_v63 = vadd.f32 %v3477_v58, %v14955_v46  ;;  %v3737_v59 = vrot.slane %v3733_v56, %v14658_v48 }
0x1bf2   :  { %3481 = vmax.xlane.f32.xlu0 %v3480_v62 }
0x1bf3   :  { %v3483_v0 = vsel %vm2754_vm11, %v3479_v63, -inf }
0x1bf4   :  { %3484 = vmax.xlane.f32.xlu1 %v3483_v0 }
0x1c7f   :  { %v3482_v3 = vpop.xlane.xlu0 %3481 }
0x1c80   :  { %v3486_v4 = vsub.f32 %v3478_v61, %v3482_v3 }
0x1c81   :  { %v3485_v5 = vpop.xlane.xlu1 %3484 }
0x1c82   :  { %v3488_v6 = vmul.f32 1.442695, %v3486_v4  ;;  %v3487_v13 = vsub.f32 %v3479_v63, %v3485_v5 }
0x1c84   :  { %14224 = vpow2.f32 %v3488_v6  ;;  %v3490_v15 = vmul.f32 1.442695, %v3487_v13 }
0x1c86   :  { %14226 = vpow2.f32 %v3490_v15  ;;  %v3669_v15 = vld [vmem:[#allocation2 + $0x1fc] sm:$0x1] }
0x1c8e   :  { %v14225_v18 = vpop.eup %14224 }
0x1c8f   :  { %v3492_v19 = vsel %vm2750_vm10, %v14225_v18, 0.0 }
0x1c90   :  { %v14227_v27 = vpop.eup %14226  ;;  %3493 = vadd.xlane.f32.xlu0 %v3492_v19 }
0x1c91   :  { %v3495_v33 = vsel %vm2754_vm11, %v14227_v27, 0.0 }
0x1c92   :  { %3496 = vadd.xlane.f32.xlu1 %v3495_v33 }
0x1d1d   :  { %v3494_v38 = vpop.xlane.xlu0 %3493 }
0x1d1e   :  { %14228 = vrcp.f32 %v3494_v38 }
0x1d1f   :  { %v3497_v2 = vpop.xlane.xlu1 %3496 }
0x1d20   :  { %14230 = vrcp.f32 %v3497_v2  ;;  %v3670_v2 = vunpack.c.l.bf16 %v3669_v15  ;;  %v4020_v15 = vsel %vm720_vm9, %v14888_v7, 0 }
0x1d28   :  { %v14229_v10 = vpop.eup %14228 }
0x1d29   :  { %v3500_v9 = vmul.f32 %v14229_v10, %v14225_v18  ;;  %v3674_v10 = vrot.slane %v3670_v2, %v14658_v48 }
0x1d2a   :  { %v14231_v23 = vpop.eup %14230 }
0x1d2b   :  { %v3501_v25 = vmul.f32 %v14231_v23, %v14227_v27 }
0x1d2d   :  { %v3502_v32 = vpack.c.bf16 %v3501_v25, %v3500_v9 }
0x1d2f   :  { %13019 = vmatmul.mubr.msk.bf16.vlgmr.msra.gmra.mrb[104].mxu0 %vm2750_vm10, %v3502_v32 }
0x1d30   :  { %13029 = vmatpush3.bf16.msra.mxu0 %v14042_v28  ;;  %13032 = vmatprep.mubr.msk.bf16.mxu0 %vm14511_vm3, %v14510_v36 }
0x1d31   :  { %13030 = vmatprep.subr.bf16.mxu0 %v14510_v36 }
0x1d34   :  { %13031 = vmatpush3.bf16.msra.mxu0 %v14043_v34 }
0x1d35   :  { %13044 = vmatprep.subr.bf16.mxu0 %v14510_v36 }
0x1d37   :  { %13033 = vmatmul.mubr.msk.bf16.vlgmr.msra.gmra.mrb[108].mxu0 %vm178_vm2, %v14888_v7 }
0x1d38   :  { %13045 = vmatpush3.bf16.msra.mxu0 %v14044_v43  ;;  %13048 = vmatprep.mubr.msk.bf16.mxu0 %vm14511_vm3, %v14510_v36 }
0x1d39   :  { %13046 = vmatprep.subr.bf16.mxu0 %v14510_v36 }
0x1d3c   :  { %13047 = vmatpush3.bf16.msra.mxu0 %v14045_v44 }
0x1d3d   :  { %13058 = vmatprep.subr.bf16.mxu0 %v14510_v36 }
0x1d3f   :  { %13049 = vmatmul.mubr.msk.bf16.vlgmr.msra.gmra.mrb[112].mxu0 %vm178_vm2, %v14888_v7 }
0x1d40   :  { %13060 = vmatprep.mubr.msk.bf16.mxu0 %vm14511_vm3, %v14510_v36 }
0x1e02   :  { %v3544_v21 = vpop.f32.mrb[104].mxu0 }
0x1e03   :  { %v13020_v29 = vpop.f32.mrb[105].mxu0 }
0x1e04   :  { %v3547_v14 = vpop.f32.mrb[106].mxu0 }
0x1e05   :  { %v3552_v47 = vpack.c.bf16 %v3547_v14, %v3544_v21  ;;  %v13021_v49 = vpop.f32.mrb[107].mxu0 }
0x1e07   :  { %13025 = vmatmul.mubr.msk.bf16.vlgmr.msra.gmra.mrb[104].mxu1 %vm959_vm5, %v3552_v47 }
0x1e08   :  { %13037 = vmatpush3.bf16.msra.mxu1 %v14046_v12  ;;  %13040 = vmatprep.mubr.msk.bf16.mxu1 %vm14511_vm3, %v14510_v36 }
0x1e09   :  { %13038 = vmatprep.subr.bf16.mxu1 %v14510_v36 }
0x1e0a   :  { %v3658_v50 = vpop.f32.mrb[108].mxu0 }
0x1e0b   :  { %v13034_v51 = vpop.f32.mrb[109].mxu0  ;;  %v3659_v31 = vadd.f32 %v3658_v50, %v3611_v57 }
0x1e0c   :  { %v3661_v54 = vpop.f32.mrb[110].mxu0  ;;  %13039 = vmatpush3.bf16.msra.mxu1 %v14047_v60 }
0x1e0d   :  { %v3662_v55 = vadd.f32 %v3661_v54, %v3611_v57  ;;  %v13035_v35 = vpop.f32.mrb[111].mxu0  ;;  %13052 = vmatprep.subr.bf16.mxu1 %v14510_v36 }
0x1e0f   :  { %v3791_v58 = vpack.c.bf16 %v3662_v55, %v3659_v31  ;;  %13041 = vmatmul.mubr.msk.bf16.vlgmr.msra.gmra.mrb[108].mxu1 %vm178_vm2, %v14888_v7  ;;  %v14048_v7 = vld [vmem:[#allocation2 + $0x208] sm:$0xff]  }
0x1e10   :  { %13054 = vmatprep.mubr.msk.bf16.mxu1 %vm14511_vm3, %v14510_v36 }
0x1e12   :  { %v3784_v61 = vpop.f32.mrb[112].mxu0 }
0x1e13   :  { %v13050_v62 = vpop.f32.mrb[113].mxu0  ;;  %v3785_v0 = vadd.f32 %v3784_v61, %v3737_v59 }
0x1e14   :  { %v3787_v63 = vpop.f32.mrb[114].mxu0  ;;  %v3971_v62 = vsel %vm293_vm4, %v14645_v22, 0 }
0x1e15   :  { %v3788_v3 = vadd.f32 %v3787_v63, %v3737_v59  ;;  %v13051_v4 = vpop.f32.mrb[115].mxu0  ;;  %v3915_v63 = vld [vmem:[#allocation2 + $0x1f4] sm:$0xf] }
0x1e17   :  { %v3867_v5 = vpack.c.bf16 %v3788_v3, %v3785_v0  ;;  %v3921_v0 = vsel %vm1131_vm8, %v3915_v63, 0  ;;  %v3966_v3 = vld [vmem:[#allocation5 + $0x48] sm:$0xf] }
0x1e18   :  { %v15116_v4 = vpack.c.bf16 %v3966_v3, %v3966_v3 }
0x1e19   :  { %v3872_v6 = vsel %vm720_vm9, %v3867_v5, 0 }
0x1e1a   :  { %13059 = vmatpush3.bf16.msra.mxu0 %v3872_v6 }
0x1e1b   :  { %13070 = vmatprep.subr.bf16.mxu0 %v14510_v36 }
0x1eda   :  { %v3593_v13 = vpop.f32.mrb[104].mxu1 }
0x1edb   :  { %v15089_v18 = vadd.f32 %v3593_v13, %v15042_v37  ;;  %v13026_v19 = vpop.f32.mrb[105].mxu1 }
0x1edc   :  { %v3596_v27 = vpop.f32.mrb[106].mxu1  ;;  %v4015_v19 = vld [vmem:[#allocation5 + $0xc0] sm:$0xf] }
0x1edd   :  { %v15092_v33 = vadd.f32 %v3596_v27, %v15044_v41  ;;  %v13027_v38 = vpop.f32.mrb[107].mxu1  ;;  %v15128_v27 = vpack.c.bf16 %v4015_v19, %v4015_v19 }
0x1ee2   :  { %v3721_v23 = vpop.f32.mrb[108].mxu1 }
0x1ee3   :  { %v13042_v9 = vpop.f32.mrb[109].mxu1  ;;  %v3722_v28 = vadd.f32 %v3721_v23, %v3674_v10 }
0x1ee4   :  { %v3724_v25 = vpop.f32.mrb[110].mxu1  ;;  %v14049_v9 = vld [vmem:[#allocation2 + $0x218] sm:$0xff]  }
0x1ee5   :  { %v3725_v32 = vadd.f32 %v3724_v25, %v3674_v10  ;;  %v13043_v34 = vpop.f32.mrb[111].mxu1  ;;  %v14050_v25 = vld [vmem:[#allocation2 + $0x210] sm:$0xff]  }
0x1ee7   :  { %v3792_v43 = vpack.c.bf16 %v3725_v32, %v3722_v28  ;;  %v14051_v28 = vld [vmem:[#allocation2 + $0x220] sm:$0xff]  }
0x1ee9   :  { %v3797_v44 = vsel %vm959_vm5, %v3792_v43, 0 }
0x1eea   :  { %13053 = vmatpush3.bf16.xpose.msra.mxu1 %v3797_v44 }
0x1eeb   :  { %13064 = vmatprep.subr.bf16.mxu1 %v14510_v36 }
0x1ef1   :  { %13055 = vmatmul.mubr.msk.bf16.vlgmr.msra.gmra.mrb[112].mxu1 %vm959_vm5, %v3791_v58 }
0x1ef2   :  { %13066 = vmatprep.mubr.msk.bf16.mxu1 %vm14511_vm3, %v14510_v36  ;;  %13065 = vmatpush3.bf16.msra.mxu1 %v3921_v0 }
0x1ef3   :  { %13078 = vmatprep.subr.bf16.mxu1 %v14510_v36 }
0x1fc4   :  { %v3833_v37 = vpop.f32.mrb[112].mxu1 }
0x1fc5   :  { %v3840_v41 = vmul.f32 0.35355338, %v3833_v37  ;;  %v13056_v30 = vpop.f32.mrb[113].mxu1 }
0x1fc6   :  { %v3836_v45 = vpop.f32.mrb[114].mxu1 }
0x1fc7   :  { %v3841_v21 = vmul.f32 0.35355338, %v3836_v45  ;;  %v13057_v24 = vpop.f32.mrb[115].mxu1  ;;  %v3842_v29 = vadd.f32 %v3840_v41, %v14953_v26 }
0x1fc9   :  { %v3844_v14 = vsel %vm2750_vm10, %v3842_v29, -inf  ;;  %v3843_v12 = vadd.f32 %v3841_v21, %v14955_v46 }
0x1fca   :  { %3845 = vmax.xlane.f32.xlu0 %v3844_v14 }
0x1fcb   :  { %v3847_v47 = vsel %vm2754_vm11, %v3843_v12, -inf }
0x1fcc   :  { %3848 = vmax.xlane.f32.xlu1 %v3847_v47  ;;  %v14052_v47 = vld [vmem:[#allocation2 + $0x228] sm:$0xff]  }
0x2057   :  { %v3846_v49 = vpop.xlane.xlu0 %3845 }
0x2058   :  { %v3850_v39 = vsub.f32 %v3842_v29, %v3846_v49 }
0x2059   :  { %v3849_v60 = vpop.xlane.xlu1 %3848 }
0x205a   :  { %v3852_v57 = vmul.f32 1.442695, %v3850_v39  ;;  %v3851_v50 = vsub.f32 %v3843_v12, %v3849_v60  ;;  %v4076_v60 = vld [vmem:[#allocation2 + $0x23c] sm:$0x1] }
0x205c   :  { %14232 = vpow2.f32 %v3852_v57  ;;  %v3854_v1 = vmul.f32 1.442695, %v3851_v50  ;;  %v4203_v50 = vld [vmem:[#allocation2 + $0x244] sm:$0x1] }
0x205e   :  { %14234 = vpow2.f32 %v3854_v1  ;;  %v4077_v1 = vunpack.c.l.bf16 %v4076_v60 }
0x2066   :  { %v14233_v51 = vpop.eup %14232 }
0x2067   :  { %v3856_v54 = vsel %vm2750_vm10, %v14233_v51, 0.0 }
0x2068   :  { %v14235_v26 = vpop.eup %14234  ;;  %3857 = vadd.xlane.f32.xlu0 %v3856_v54 }
0x2069   :  { %v3859_v31 = vsel %vm2754_vm11, %v14235_v26, 0.0 }
0x206a   :  { %3860 = vadd.xlane.f32.xlu1 %v3859_v31 }
0x20f5   :  { %v3858_v46 = vpop.xlane.xlu0 %3857 }
0x20f6   :  { %14236 = vrcp.f32 %v3858_v46 }
0x20f7   :  { %v3861_v55 = vpop.xlane.xlu1 %3860 }
0x20f8   :  { %14238 = vrcp.f32 %v3861_v55  ;;  %v4204_v55 = vunpack.c.l.bf16 %v4203_v50  ;;  %v14058_v50 = vld [vmem:[#allocation2 + $0x258] sm:$0xff]  }
0x20fa   :  { %v4208_v0 = vrot.slane %v4204_v55, %v14658_v48 }
0x2100   :  { %v14237_v35 = vpop.eup %14236 }
0x2101   :  { %v3864_v58 = vmul.f32 %v14237_v35, %v14233_v51 }
0x2102   :  { %v14239_v56 = vpop.eup %14238 }
0x2103   :  { %v3865_v59 = vmul.f32 %v14239_v56, %v14235_v26 }
0x2105   :  { %v3866_v61 = vpack.c.bf16 %v3865_v59, %v3864_v58  ;;  %v4081_v58 = vrot.slane %v4077_v1, %v14658_v48 }
0x2107   :  { %13061 = vmatmul.mubr.msk.bf16.vlgmr.msra.gmra.mrb[116].mxu0 %vm2750_vm10, %v3866_v61 }
0x2108   :  { %13071 = vmatpush3.bf16.msra.mxu0 %v14634_v20  ;;  %13074 = vmatprep.mubr.msk.bf16.mxu0 %vm14511_vm3, %v14510_v36 }
0x2109   :  { %13072 = vmatprep.subr.bf16.mxu0 %v14510_v36 }
0x210c   :  { %13073 = vmatpush3.bf16.msra.mxu0 %v3971_v62 }
0x210d   :  { %13084 = vmatprep.subr.bf16.mxu0 %v14510_v36 }
0x210f   :  { %13075 = vmatmul.mubr.msk.bf16.vlgmr.msra.gmra.mrb[120].mxu0 %vm1026_vm7, %v15116_v4 }
0x2110   :  { %13088 = vmatprep.mubr.msk.bf16.mxu0 %vm14511_vm3, %v14510_v36  ;;  %13085 = vmatpush3.bf16.msra.mxu0 %v14048_v7 }
0x2111   :  { %13086 = vmatprep.subr.bf16.mxu0 %v14510_v36 }
0x2114   :  { %13087 = vmatpush3.bf16.msra.mxu0 %v14050_v25 }
0x2115   :  { %13100 = vmatprep.subr.bf16.mxu0 %v14510_v36 }
0x21da   :  { %v3908_v20 = vpop.f32.mrb[116].mxu0 }
0x21db   :  { %v13062_v22 = vpop.f32.mrb[117].mxu0 }
0x21dc   :  { %v3911_v5 = vpop.f32.mrb[118].mxu0 }
0x21dd   :  { %v3916_v6 = vpack.c.bf16 %v3911_v5, %v3908_v20  ;;  %v13063_v13 = vpop.f32.mrb[119].mxu0 }
0x21df   :  { %13067 = vmatmul.mubr.msk.bf16.vlgmr.msra.gmra.mrb[116].mxu1 %vm959_vm5, %v3916_v6 }
0x21e0   :  { %13079 = vmatpush3.bf16.msra.mxu1 %v4020_v15  ;;  %13080 = vmatprep.mubr.msk.bf16.mxu1 %vm14511_vm3, %v14510_v36 }
0x21e1   :  { %13092 = vmatprep.subr.bf16.mxu1 %v14510_v36 }
0x21e2   :  { %v4007_v38 = vpop.f32.mrb[120].mxu0 }
0x21e3   :  { %v13076_v2 = vpop.f32.mrb[121].mxu0  ;;  %v4013_v30 = vmul.f32 0.11111111, %v4007_v38 }
0x21e4   :  { %v4010_v10 = vpop.f32.mrb[122].mxu0 }
0x21e5   :  { %v13077_v23 = vpop.f32.mrb[123].mxu0  ;;  %v15170_v10 = vld [vmem:[#allocation5 + $0xe0] sm:$0xf] }
0x21e7   :  { %13081 = vmatmul.mubr.msk.bf16.vlgmr.msra.gmra.mrb[120].mxu1 %vm2750_vm10, %v15128_v27 }
0x21e8   :  { %13096 = vmatprep.mubr.msk.bf16.mxu1 %vm14511_vm3, %v14510_v36  ;;  %13093 = vmatpush3.bf16.msra.mxu1 %v14049_v9 }
0x21e9   :  { %13094 = vmatprep.subr.bf16.mxu1 %v14510_v36 }
0x21ec   :  { %13095 = vmatpush3.bf16.msra.mxu1 %v14051_v28 }
0x21ed   :  { %13108 = vmatprep.subr.bf16.mxu1 %v14510_v36 }
0x22b2   :  { %v3957_v32 = vpop.f32.mrb[116].mxu1 }
0x22b3   :  { %v15139_v34 = vadd.f32 %v3957_v32, %v15089_v18  ;;  %v13068_v43 = vpop.f32.mrb[117].mxu1  ;;  %v14053_v18 = vld [vmem:[#allocation2 + $0x230] sm:$0xff]  }
0x22b4   :  { %v3960_v44 = vpop.f32.mrb[118].mxu1 }
0x22b5   :  { %v15142_v37 = vadd.f32 %v3960_v44, %v15092_v33  ;;  %v13069_v41 = vpop.f32.mrb[119].mxu1  ;;  %v4141_v33 = vld [vmem:[#allocation2 + $0x240] sm:$0x1] }
0x22b6   :  { %v4142_v39 = vunpack.c.l.bf16 %v4141_v33  ;;  %v14057_v33 = vld [vmem:[#allocation2 + $0x270] sm:$0xff]  }
0x22b8   :  { %v4146_v57 = vrot.slane %v4142_v39, %v14658_v48  ;;  %v4371_v39 = vld [vmem:[#allocation2 + $0x238] sm:$0xf] }
0x22b9   :  { %v4377_v60 = vsel %vm1131_vm8, %v4371_v39, 0 }
0x22ba   :  { %v4056_v45 = vpop.f32.mrb[120].mxu1 }
0x22bb   :  { %v4062_v21 = vmul.f32 0.2, %v4056_v45  ;;  %v13082_v24 = vpop.f32.mrb[121].mxu1 }
0x22bc   :  { %v4059_v29 = vpop.f32.mrb[122].mxu1 }
0x22bd   :  { %v4063_v14 = vadd.f32 %v4062_v21, %v4013_v30  ;;  %v13083_v12 = vpop.f32.mrb[123].mxu1 }
0x22bf   :  { %v15144_v49 = vpack.c.bf16 %v4063_v14, %v4063_v14  ;;  %v14054_v14 = vld [vmem:[#allocation2 + $0x248] sm:$0xff]  }
0x22c1   :  { %13089 = vmatmul.mubr.msk.bf16.vlgmr.msra.gmra.mrb[124].mxu0 %vm178_vm2, %v15144_v49  ;;  %13097 = vmatmul.mubr.msk.bf16.vlgmr.msra.gmra.mrb[124].mxu1 %vm178_vm2, %v15144_v49 }
0x22c2   :  { %13101 = vmatpush3.bf16.msra.mxu0 %v14052_v47  ;;  %13104 = vmatprep.mubr.msk.bf16.mxu0 %vm14511_vm3, %v14510_v36  ;;  %v14055_v47 = vld [vmem:[#allocation2 + $0x250] sm:$0xff]  }
0x22c3   :  { %13102 = vmatprep.subr.bf16.mxu0 %v14510_v36  ;;  %13110 = vmatprep.mubr.msk.bf16.mxu1 %vm14511_vm3, %v14510_v36 }
0x22c6   :  { %13103 = vmatpush3.bf16.msra.mxu0 %v14053_v18  ;;  %v14056_v18 = vld [vmem:[#allocation2 + $0x268] sm:$0xff]  }
0x22c7   :  { %13114 = vmatprep.subr.bf16.mxu0 %v14510_v36 }
0x22c9   :  { %13105 = vmatmul.mubr.msk.bf16.vlgmr.msra.gmra.mrb[128].mxu0 %vm178_vm2, %v15144_v49 }
0x22ca   :  { %13116 = vmatprep.mubr.msk.bf16.mxu0 %vm14511_vm3, %v14510_v36 }
0x2394   :  { %v4131_v51 = vpop.f32.mrb[124].mxu0  ;;  %v4193_v54 = vpop.f32.mrb[124].mxu1 }
0x2395   :  { %v4194_v26 = vadd.f32 %v4193_v54, %v4146_v57  ;;  %v13090_v31 = vpop.f32.mrb[125].mxu0  ;;  %v13098_v46 = vpop.f32.mrb[125].mxu1  ;;  %v4132_v3 = vadd.f32 %v4131_v51, %v4081_v58 }
0x2396   :  { %v4134_v35 = vpop.f32.mrb[126].mxu0  ;;  %v4196_v56 = vpop.f32.mrb[126].mxu1  ;;  %v14059_v31 = vld [vmem:[#allocation2 + $0x260] sm:$0xff]  }
0x2397   :  { %v4262_v59 = vpack.c.bf16 %v4194_v26, %v4194_v26  ;;  %v13091_v61 = vpop.f32.mrb[127].mxu0  ;;  %v13099_v62 = vpop.f32.mrb[127].mxu1  ;;  %v4261_v13 = vpack.c.bf16 %v4132_v3, %v4132_v3  ;;  %v4548_v46 = vld [vmem:[#allocation2 + $0x284] sm:$0x1] }
0x2398   :  { %v4549_v56 = vunpack.c.l.bf16 %v4548_v46  ;;  %v14063_v46 = vld [vmem:[#allocation2 + $0x2b0] sm:$0xff]  }
0x2399   :  { %v4267_v63 = vsel %vm959_vm5, %v4262_v59, 0 }
0x239a   :  { %13109 = vmatpush3.bf16.xpose.msra.mxu1 %v4267_v63  ;;  %v4553_v61 = vrot.slane %v4549_v56, %v14658_v48 }
0x239b   :  { %13120 = vmatprep.subr.bf16.mxu1 %v14510_v36 }
0x239c   :  { %v4255_v20 = vpop.f32.mrb[128].mxu0 }
0x239d   :  { %v4256_v22 = vadd.f32 %v4255_v20, %v4208_v0  ;;  %v13106_v5 = vpop.f32.mrb[129].mxu0 }
0x239e   :  { %v4258_v6 = vpop.f32.mrb[130].mxu0 }
0x239f   :  { %v4324_v15 = vpack.c.bf16 %v4256_v22, %v4256_v22  ;;  %v13107_v19 = vpop.f32.mrb[131].mxu0  ;;  %v4486_v6 = vld [vmem:[#allocation2 + $0x280] sm:$0x1] }
0x23a1   :  { %v4329_v38 = vsel %vm58_vm0, %v4324_v15, 0  ;;  %13111 = vmatmul.mubr.msk.bf16.vlgmr.msra.gmra.mrb[128].mxu1 %vm959_vm5, %v4261_v13  ;;  %v4487_v13 = vunpack.c.l.bf16 %v4486_v6  ;;  %v4424_v15 = vld [vmem:[#allocation2 + $0x27c] sm:$0x1] }
0x23a2   :  { %13115 = vmatpush3.bf16.msra.mxu0 %v4329_v38  ;;  %13122 = vmatprep.mubr.msk.bf16.mxu1 %vm14511_vm3, %v14510_v36  ;;  %v4425_v38 = vunpack.c.l.bf16 %v4424_v15 }
0x23a3   :  { %13126 = vmatprep.subr.bf16.mxu0 %v14510_v36  ;;  %13121 = vmatpush3.bf16.msra.mxu1 %v4377_v60  ;;  %v4491_v19 = vrot.slane %v4487_v13, %v14658_v48 }
0x23a4   :  { %13134 = vmatprep.subr.bf16.mxu1 %v14510_v36 }
0x2474   :  { %v4303_v2 = vpop.f32.mrb[128].mxu1 }
0x2475   :  { %v4309_v23 = vmul.f32 0.35355338, %v4303_v2  ;;  %v13112_v7 = vpop.f32.mrb[129].mxu1 }
0x2476   :  { %v4306_v9 = vpop.f32.mrb[130].mxu1 }
0x2477   :  { %v13113_v25 = vpop.f32.mrb[131].mxu1  ;;  %v4310_v28 = vadd.f32 %v4309_v23, %v15170_v10 }
0x2478   :  { %v4429_v25 = vrot.slane %v4425_v38, %v14658_v48 }
0x2479   :  { %v4312_v32 = vsel %vm4311_vm12, %v4310_v28, -inf }
0x247a   :  { %4313 = vmax.xlane.f32.xlu0 %v4312_v32 }
0x2507   :  { %v4314_v43 = vpop.xlane.xlu0 %4313 }
0x2508   :  { %v4315_v44 = vsub.f32 %v4310_v28, %v4314_v43 }
0x250a   :  { %v4316_v41 = vmul.f32 1.442695, %v4315_v44 }
0x250c   :  { %14240 = vpow2.f32 %v4316_v41 }
0x2516   :  { %v14241_v30 = vpop.eup %14240 }
0x2517   :  { %v4318_v45 = vsel %vm4311_vm12, %v14241_v30, 0.0 }
0x2518   :  { %4319 = vadd.xlane.f32.xlu1 %v4318_v45 }
0x25a5   :  { %v4320_v21 = vpop.xlane.xlu1 %4319 }
0x25a6   :  { %14242 = vrcp.f32 %v4320_v21 }
0x25b0   :  { %v14243_v24 = vpop.eup %14242 }
0x25b1   :  { %v4322_v29 = vmul.f32 %v14243_v24, %v14241_v30 }
0x25b3   :  { %v4323_v12 = vpack.c.bf16 %v4322_v29, %v4322_v29 }
0x25b5   :  { %13117 = vmatmul.mubr.msk.bf16.vlgmr.msra.gmra.mrb[132].mxu0 %vm51_vm1, %v4323_v12 }
0x25b6   :  { %13127 = vmatpush3.bf16.msra.mxu0 %v14054_v14  ;;  %13130 = vmatprep.mubr.msk.bf16.mxu0 %vm14511_vm3, %v14510_v36 }
0x25b7   :  { %13128 = vmatprep.subr.bf16.mxu0 %v14510_v36 }
0x25ba   :  { %13129 = vmatpush3.bf16.msra.mxu0 %v14055_v47 }
0x25bb   :  { %13142 = vmatprep.subr.bf16.mxu0 %v14510_v36 }
0x25bd   :  { %13131 = vmatmul.mubr.msk.bf16.vlgmr.msra.gmra.mrb[136].mxu0 %vm178_vm2, %v15144_v49 }
0x25be   :  { %13143 = vmatpush3.bf16.msra.mxu0 %v14056_v18  ;;  %13146 = vmatprep.mubr.msk.bf16.mxu0 %vm14511_vm3, %v14510_v36 }
0x25bf   :  { %13144 = vmatprep.subr.bf16.mxu0 %v14510_v36 }
0x25c2   :  { %13145 = vmatpush3.bf16.msra.mxu0 %v14057_v33 }
0x25c3   :  { %13156 = vmatprep.subr.bf16.mxu0 %v14510_v36 }
0x25c5   :  { %13147 = vmatmul.mubr.msk.bf16.vlgmr.msra.gmra.mrb[140].mxu0 %vm178_vm2, %v15144_v49 }
0x25c6   :  { %13158 = vmatprep.mubr.msk.bf16.mxu0 %vm14511_vm3, %v14510_v36 }
0x2688   :  { %v4365_v57 = vpop.f32.mrb[132].mxu0 }
0x2689   :  { %v4372_v1 = vpack.c.bf16 %v4365_v57, %v4365_v57  ;;  %v13118_v51 = vpop.f32.mrb[133].mxu0 }
0x268a   :  { %v4368_v54 = vpop.f32.mrb[134].mxu0  ;;  %v14060_v51 = vld [vmem:[#allocation2 + $0x288] sm:$0xff]  }
0x268b   :  { %v13119_v26 = vpop.f32.mrb[135].mxu0  ;;  %13123 = vmatmul.mubr.msk.bf16.vlgmr.msra.gmra.mrb[132].mxu1 %vm959_vm5, %v4372_v1 }
0x268c   :  { %13135 = vmatpush3.bf16.msra.mxu1 %v14058_v50  ;;  %13138 = vmatprep.mubr.msk.bf16.mxu1 %vm14511_vm3, %v14510_v36  ;;  %v14061_v26 = vld [vmem:[#allocation2 + $0x290] sm:$0xff]  }
0x268d   :  { %13136 = vmatprep.subr.bf16.mxu1 %v14510_v36 }
0x2690   :  { %v4476_v55 = vpop.f32.mrb[136].mxu0  ;;  %13137 = vmatpush3.bf16.msra.mxu1 %v14059_v31  ;;  %v14062_v31 = vld [vmem:[#allocation2 + $0x2a8] sm:$0xff]  }
0x2691   :  { %v13132_v35 = vpop.f32.mrb[137].mxu0  ;;  %13150 = vmatprep.subr.bf16.mxu1 %v14510_v36  ;;  %v4477_v44 = vadd.f32 %v4476_v55, %v4429_v25  ;;  %v4715_v55 = vld [vmem:[#allocation2 + $0x278] sm:$0xf] }
0x2692   :  { %v4479_v58 = vpop.f32.mrb[138].mxu0  ;;  %v4721_v35 = vsel %vm1131_vm8, %v4715_v55, 0 }
0x2693   :  { %v13133_v59 = vpop.f32.mrb[139].mxu0  ;;  %13139 = vmatmul.mubr.msk.bf16.vlgmr.msra.gmra.mrb[136].mxu1 %vm178_vm2, %v15144_v49  ;;  %v4606_v41 = vpack.c.bf16 %v4477_v44, %v4477_v44  ;;  %v14064_v58 = vld [vmem:[#allocation2 + $0x298] sm:$0xff]  }
0x2694   :  { %13152 = vmatprep.mubr.msk.bf16.mxu1 %vm14511_vm3, %v14510_v36 }
0x2698   :  { %v4600_v62 = vpop.f32.mrb[140].mxu0 }
0x2699   :  { %v4601_v63 = vadd.f32 %v4600_v62, %v4553_v61  ;;  %v13148_v0 = vpop.f32.mrb[141].mxu0 }
0x269a   :  { %v4603_v3 = vpop.f32.mrb[142].mxu0  ;;  %v14065_v0 = vld [vmem:[#allocation2 + $0x2a0] sm:$0xff]  }
0x269b   :  { %v4668_v20 = vpack.c.bf16 %v4601_v63, %v4601_v63  ;;  %v13149_v22 = vpop.f32.mrb[143].mxu0  ;;  %v4892_v3 = vld [vmem:[#allocation2 + $0x2c4] sm:$0x1] }
0x269d   :  { %v4673_v5 = vsel %vm58_vm0, %v4668_v20, 0 }
0x269e   :  { %13157 = vmatpush3.bf16.msra.mxu0 %v4673_v5  ;;  %v4893_v5 = vunpack.c.l.bf16 %v4892_v3  ;;  %v14069_v3 = vld [vmem:[#allocation2 + $0x2f0] sm:$0xff]  }
0x269f   :  { %13168 = vmatprep.subr.bf16.mxu0 %v14510_v36 }
0x26a0   :  { %v4897_v15 = vrot.slane %v4893_v5, %v14658_v48 }
0x2766   :  { %v4538_v2 = vpop.f32.mrb[136].mxu1 }
0x2767   :  { %v4539_v23 = vadd.f32 %v4538_v2, %v4491_v19  ;;  %v13140_v7 = vpop.f32.mrb[137].mxu1 }
0x2768   :  { %v4541_v9 = vpop.f32.mrb[138].mxu1 }
0x2769   :  { %v4607_v28 = vpack.c.bf16 %v4539_v23, %v4539_v23  ;;  %v13141_v32 = vpop.f32.mrb[139].mxu1 }
0x276b   :  { %v4612_v43 = vsel %vm959_vm5, %v4607_v28, 0  ;;  %v4830_v28 = vld [vmem:[#allocation2 + $0x2c0] sm:$0x1] }
0x276c   :  { %13151 = vmatpush3.bf16.xpose.msra.mxu1 %v4612_v43  ;;  %v4831_v32 = vunpack.c.l.bf16 %v4830_v28  ;;  %v4768_v43 = vld [vmem:[#allocation2 + $0x2bc] sm:$0x1] }
0x276d   :  { %13162 = vmatprep.subr.bf16.mxu1 %v14510_v36 }
0x276e   :  { %v4835_v44 = vrot.slane %v4831_v32, %v14658_v48 }
0x2773   :  { %13153 = vmatmul.mubr.msk.bf16.vlgmr.msra.gmra.mrb[140].mxu1 %vm959_vm5, %v4606_v41  ;;  %v4769_v41 = vunpack.c.l.bf16 %v4768_v43 }
0x2774   :  { %13164 = vmatprep.mubr.msk.bf16.mxu1 %vm14511_vm3, %v14510_v36  ;;  %13163 = vmatpush3.bf16.msra.mxu1 %v4721_v35 }
0x2775   :  { %13176 = vmatprep.subr.bf16.mxu1 %v14510_v36 }
0x2846   :  { %v4648_v30 = vpop.f32.mrb[140].mxu1 }
0x2847   :  { %v4654_v45 = vmul.f32 0.35355338, %v4648_v30  ;;  %v13154_v21 = vpop.f32.mrb[141].mxu1 }
0x2848   :  { %v4651_v24 = vpop.f32.mrb[142].mxu1 }
0x2849   :  { %v13155_v29 = vpop.f32.mrb[143].mxu1  ;;  %v4655_v14 = vadd.f32 %v4654_v45, %v15170_v10 }
0x284a   :  { %v4773_v29 = vrot.slane %v4769_v41, %v14658_v48 }
0x284b   :  { %v4656_v12 = vsel %vm4311_vm12, %v4655_v14, -inf }
0x284c   :  { %4657 = vmax.xlane.f32.xlu0 %v4656_v12 }
0x28d9   :  { %v4658_v47 = vpop.xlane.xlu0 %4657 }
0x28da   :  { %v4659_v18 = vsub.f32 %v4655_v14, %v4658_v47 }
0x28dc   :  { %v4660_v33 = vmul.f32 1.442695, %v4659_v18 }
0x28de   :  { %14244 = vpow2.f32 %v4660_v33 }
0x28e8   :  { %v14245_v39 = vpop.eup %14244 }
0x28e9   :  { %v4662_v60 = vsel %vm4311_vm12, %v14245_v39, 0.0 }
0x28ea   :  { %4663 = vadd.xlane.f32.xlu1 %v4662_v60 }
0x2977   :  { %v4664_v57 = vpop.xlane.xlu1 %4663 }
0x2978   :  { %14246 = vrcp.f32 %v4664_v57 }
0x2982   :  { %v14247_v50 = vpop.eup %14246 }
0x2983   :  { %v4666_v1 = vmul.f32 %v14247_v50, %v14245_v39 }
0x2985   :  { %v4667_v54 = vpack.c.bf16 %v4666_v1, %v4666_v1 }
0x2987   :  { %13159 = vmatmul.mubr.msk.bf16.vlgmr.msra.gmra.mrb[144].mxu0 %vm51_vm1, %v4667_v54 }
0x2988   :  { %13169 = vmatpush3.bf16.msra.mxu0 %v14060_v51  ;;  %13172 = vmatprep.mubr.msk.bf16.mxu0 %vm14511_vm3, %v14510_v36 }
0x2989   :  { %13170 = vmatprep.subr.bf16.mxu0 %v14510_v36 }
0x298c   :  { %13171 = vmatpush3.bf16.msra.mxu0 %v14061_v26 }
0x298d   :  { %13184 = vmatprep.subr.bf16.mxu0 %v14510_v36 }
0x298f   :  { %13173 = vmatmul.mubr.msk.bf16.vlgmr.msra.gmra.mrb[148].mxu0 %vm178_vm2, %v15144_v49 }
0x2990   :  { %13185 = vmatpush3.bf16.msra.mxu0 %v14062_v31  ;;  %13188 = vmatprep.mubr.msk.bf16.mxu0 %vm14511_vm3, %v14510_v36 }
0x2991   :  { %13186 = vmatprep.subr.bf16.mxu0 %v14510_v36 }
0x2994   :  { %13187 = vmatpush3.bf16.msra.mxu0 %v14063_v46 }
0x2995   :  { %13198 = vmatprep.subr.bf16.mxu0 %v14510_v36 }
0x2997   :  { %13189 = vmatmul.mubr.msk.bf16.vlgmr.msra.gmra.mrb[152].mxu0 %vm178_vm2, %v15144_v49 }
0x2998   :  { %13200 = vmatprep.mubr.msk.bf16.mxu0 %vm14511_vm3, %v14510_v36 }
0x2a5a   :  { %v4709_v56 = vpop.f32.mrb[144].mxu0 }
0x2a5b   :  { %v4716_v59 = vpack.c.bf16 %v4709_v56, %v4709_v56  ;;  %v13160_v61 = vpop.f32.mrb[145].mxu0 }
0x2a5c   :  { %v4712_v62 = vpop.f32.mrb[146].mxu0  ;;  %v14066_v61 = vld [vmem:[#allocation2 + $0x2c8] sm:$0xff]  }
0x2a5d   :  { %v13161_v63 = vpop.f32.mrb[147].mxu0  ;;  %13165 = vmatmul.mubr.msk.bf16.vlgmr.msra.gmra.mrb[132].mxu1 %vm959_vm5, %v4716_v59 }
0x2a5e   :  { %13177 = vmatpush3.bf16.msra.mxu1 %v14064_v58  ;;  %13180 = vmatprep.mubr.msk.bf16.mxu1 %vm14511_vm3, %v14510_v36  ;;  %v14067_v63 = vld [vmem:[#allocation2 + $0x2d0] sm:$0xff]  }
0x2a5f   :  { %13178 = vmatprep.subr.bf16.mxu1 %v14510_v36 }
0x2a62   :  { %v4820_v20 = vpop.f32.mrb[148].mxu0  ;;  %13179 = vmatpush3.bf16.msra.mxu1 %v14065_v0  ;;  %v14068_v0 = vld [vmem:[#allocation2 + $0x2e8] sm:$0xff]  }
0x2a63   :  { %v13174_v22 = vpop.f32.mrb[149].mxu0  ;;  %13192 = vmatprep.subr.bf16.mxu1 %v14510_v36  ;;  %v4821_v18 = vadd.f32 %v4820_v20, %v4773_v29  ;;  %v5059_v20 = vld [vmem:[#allocation2 + $0x2b8] sm:$0xf] }
0x2a64   :  { %v4823_v6 = vpop.f32.mrb[150].mxu0  ;;  %v5065_v22 = vsel %vm1131_vm8, %v5059_v20, 0 }
0x2a65   :  { %v13175_v13 = vpop.f32.mrb[151].mxu0  ;;  %13181 = vmatmul.mubr.msk.bf16.vlgmr.msra.gmra.mrb[144].mxu1 %vm178_vm2, %v15144_v49  ;;  %v4950_v33 = vpack.c.bf16 %v4821_v18, %v4821_v18  ;;  %v14070_v6 = vld [vmem:[#allocation2 + $0x2d8] sm:$0xff]  }
0x2a66   :  { %13194 = vmatprep.mubr.msk.bf16.mxu1 %vm14511_vm3, %v14510_v36 }
0x2a6a   :  { %v4944_v19 = vpop.f32.mrb[152].mxu0 }
0x2a6b   :  { %v4945_v38 = vadd.f32 %v4944_v19, %v4897_v15  ;;  %v13190_v2 = vpop.f32.mrb[153].mxu0 }
0x2a6c   :  { %v4947_v23 = vpop.f32.mrb[154].mxu0  ;;  %v14071_v2 = vld [vmem:[#allocation2 + $0x2e0] sm:$0xff]  }
0x2a6d   :  { %v5012_v7 = vpack.c.bf16 %v4945_v38, %v4945_v38  ;;  %v13191_v9 = vpop.f32.mrb[155].mxu0  ;;  %v5236_v23 = vld [vmem:[#allocation2 + $0x304] sm:$0x1] }
0x2a6f   :  { %v5017_v25 = vsel %vm58_vm0, %v5012_v7, 0 }
0x2a70   :  { %13199 = vmatpush3.bf16.msra.mxu0 %v5017_v25  ;;  %v5237_v25 = vunpack.c.l.bf16 %v5236_v23 }
0x2a71   :  { %13210 = vmatprep.subr.bf16.mxu0 %v14510_v36 }
0x2a72   :  { %v5241_v43 = vrot.slane %v5237_v25, %v14658_v48  ;;  %v5453_v25 = vld [vmem:[#allocation5 + $0x58] sm:$0xff] }
0x2b38   :  { %v4882_v30 = vpop.f32.mrb[144].mxu1 }
0x2b39   :  { %v4883_v45 = vadd.f32 %v4882_v30, %v4835_v44  ;;  %v13182_v21 = vpop.f32.mrb[145].mxu1 }
0x2b3a   :  { %v4885_v24 = vpop.f32.mrb[146].mxu1 }
0x2b3b   :  { %v4951_v14 = vpack.c.bf16 %v4883_v45, %v4883_v45  ;;  %v13183_v12 = vpop.f32.mrb[147].mxu1 }
0x2b3d   :  { %v4956_v47 = vsel %vm959_vm5, %v4951_v14, 0  ;;  %v5174_v14 = vld [vmem:[#allocation2 + $0x300] sm:$0x1] }
0x2b3e   :  { %13193 = vmatpush3.bf16.xpose.msra.mxu1 %v4956_v47  ;;  %v5175_v12 = vunpack.c.l.bf16 %v5174_v14  ;;  %v5112_v47 = vld [vmem:[#allocation2 + $0x2fc] sm:$0x1]  ;;  %v5519_v14 = vld [vmem:[#allocation5 + $0xd0] sm:$0x3] }
0x2b3f   :  { %13204 = vmatprep.subr.bf16.mxu1 %v14510_v36 }
0x2b40   :  { %v5179_v18 = vrot.slane %v5175_v12, %v14658_v48 }
0x2b45   :  { %13195 = vmatmul.mubr.msk.bf16.vlgmr.msra.gmra.mrb[148].mxu1 %vm959_vm5, %v4950_v33 }
0x2b46   :  { %13206 = vmatprep.mubr.msk.bf16.mxu1 %vm14511_vm3, %v14510_v36  ;;  %13205 = vmatpush3.bf16.msra.mxu1 %v5065_v22 }
0x2b47   :  { %13218 = vmatprep.subr.bf16.mxu1 %v14510_v36 }
0x2c18   :  { %v4992_v39 = vpop.f32.mrb[148].mxu1 }
0x2c19   :  { %v4998_v60 = vmul.f32 0.35355338, %v4992_v39  ;;  %v13196_v57 = vpop.f32.mrb[149].mxu1 }
0x2c1a   :  { %v4995_v50 = vpop.f32.mrb[150].mxu1 }
0x2c1b   :  { %v13197_v1 = vpop.f32.mrb[151].mxu1  ;;  %v4999_v51 = vadd.f32 %v4998_v60, %v15170_v10 }
0x2c1d   :  { %v5000_v54 = vsel %vm4311_vm12, %v4999_v51, -inf }
0x2c1e   :  { %5001 = vmax.xlane.f32.xlu0 %v5000_v54 }
0x2cab   :  { %v5002_v26 = vpop.xlane.xlu0 %5001 }
0x2cac   :  { %v5003_v31 = vsub.f32 %v4999_v51, %v5002_v26 }
0x2cae   :  { %v5004_v46 = vmul.f32 1.442695, %v5003_v31 }
0x2cb0   :  { %14248 = vpow2.f32 %v5004_v46 }
0x2cba   :  { %v14249_v55 = vpop.eup %14248 }
0x2cbb   :  { %v5006_v35 = vsel %vm4311_vm12, %v14249_v55, 0.0 }
0x2cbc   :  { %5007 = vadd.xlane.f32.xlu1 %v5006_v35 }
0x2d49   :  { %v5008_v56 = vpop.xlane.xlu1 %5007 }
0x2d4a   :  { %14250 = vrcp.f32 %v5008_v56 }
0x2d54   :  { %v14251_v58 = vpop.eup %14250 }
0x2d55   :  { %v5010_v59 = vmul.f32 %v14251_v58, %v14249_v55 }
0x2d57   :  { %v5011_v62 = vpack.c.bf16 %v5010_v59, %v5010_v59 }
0x2d59   :  { %13201 = vmatmul.mubr.msk.bf16.vlgmr.msra.gmra.mrb[156].mxu0 %vm51_vm1, %v5011_v62 }
0x2d5a   :  { %13211 = vmatpush3.bf16.msra.mxu0 %v14066_v61  ;;  %13214 = vmatprep.mubr.msk.bf16.mxu0 %vm14511_vm3, %v14510_v36 }
0x2d5b   :  { %13212 = vmatprep.subr.bf16.mxu0 %v14510_v36 }
0x2d5e   :  { %13213 = vmatpush3.bf16.msra.mxu0 %v14067_v63 }
0x2d5f   :  { %13226 = vmatprep.subr.bf16.mxu0 %v14510_v36 }
0x2d61   :  { %13215 = vmatmul.mubr.msk.bf16.vlgmr.msra.gmra.mrb[160].mxu0 %vm178_vm2, %v15144_v49 }
0x2d62   :  { %13227 = vmatpush3.bf16.msra.mxu0 %v14068_v0  ;;  %13230 = vmatprep.mubr.msk.bf16.mxu0 %vm14511_vm3, %v14510_v36 }
0x2d63   :  { %13228 = vmatprep.subr.bf16.mxu0 %v14510_v36 }
0x2d66   :  { %13229 = vmatpush3.bf16.msra.mxu0 %v14069_v3 }
0x2d67   :  { %13240 = vmatprep.subr.bf16.mxu0 %v14510_v36 }
0x2d69   :  { %13231 = vmatmul.mubr.msk.bf16.vlgmr.msra.gmra.mrb[164].mxu0 %vm178_vm2, %v15144_v49 }
0x2d6a   :  { %13242 = vmatprep.mubr.msk.bf16.mxu0 %vm14511_vm3, %v14510_v36 }
0x2e2c   :  { %v5053_v5 = vpop.f32.mrb[156].mxu0 }
0x2e2d   :  { %v5060_v13 = vpack.c.bf16 %v5053_v5, %v5053_v5  ;;  %v13202_v15 = vpop.f32.mrb[157].mxu0 }
0x2e2e   :  { %v5056_v19 = vpop.f32.mrb[158].mxu0  ;;  %v5403_v15 = vld [vmem:[#allocation2 + $0x2f8] sm:$0xf] }
0x2e2f   :  { %v13203_v38 = vpop.f32.mrb[159].mxu0  ;;  %13207 = vmatmul.mubr.msk.bf16.vlgmr.msra.gmra.mrb[132].mxu1 %vm959_vm5, %v5060_v13 }
0x2e30   :  { %13219 = vmatpush3.bf16.msra.mxu1 %v14070_v6  ;;  %13222 = vmatprep.mubr.msk.bf16.mxu1 %vm14511_vm3, %v14510_v36 }
0x2e31   :  { %13220 = vmatprep.subr.bf16.mxu1 %v14510_v36 }
0x2e34   :  { %v5164_v7 = vpop.f32.mrb[160].mxu0  ;;  %13221 = vmatpush3.bf16.msra.mxu1 %v14071_v2 }
0x2e35   :  { %v13216_v9 = vpop.f32.mrb[161].mxu0  ;;  %13234 = vmatprep.subr.bf16.mxu1 %v14510_v36 }
0x2e36   :  { %v5167_v28 = vpop.f32.mrb[162].mxu0  ;;  %v5452_v9 = vld [vmem:[#allocation5 + $0x50] sm:$0xff] }
0x2e37   :  { %v13217_v32 = vpop.f32.mrb[163].mxu0  ;;  %13223 = vmatmul.mubr.msk.bf16.vlgmr.msra.gmra.mrb[152].mxu1 %vm178_vm2, %v15144_v49  ;;  %v5113_v49 = vunpack.c.l.bf16 %v5112_v47  ;;  %v15297_v28 = vpack.c.bf16 %v5453_v25, %v5452_v9 }
0x2e38   :  { %13236 = vmatprep.mubr.msk.bf16.mxu1 %vm14511_vm3, %v14510_v36  ;;  %v4064_v32 = vld [vmem:[#allocation2 + $0x308] sm:$0x1] }
0x2e39   :  { %v5117_v50 = vrot.slane %v5113_v49, %v14658_v48 }
0x2e3b   :  { %v5165_v26 = vadd.f32 %v5164_v7, %v5117_v50 }
0x2e3c   :  { %v5288_v44 = vpop.f32.mrb[164].mxu0 }
0x2e3d   :  { %v5289_v41 = vadd.f32 %v5288_v44, %v5241_v43  ;;  %v13232_v30 = vpop.f32.mrb[165].mxu0  ;;  %v5294_v31 = vpack.c.bf16 %v5165_v26, %v5165_v26  ;;  %v4065_v43 = vunpack.c.l.bf16 %v4064_v32 }
0x2e3e   :  { %v5291_v45 = vpop.f32.mrb[166].mxu0 }
0x2e3f   :  { %v5356_v21 = vpack.c.bf16 %v5289_v41, %v5289_v41  ;;  %v13233_v24 = vpop.f32.mrb[167].mxu0  ;;  %v4069_v44 = vrot.slane %v4065_v43, %v14658_v48 }
0x2e40   :  { %v5454_v24 = vld [vmem:[#allocation5 + $0x60] sm:$0x3] }
0x2e41   :  { %v5361_v29 = vsel %vm58_vm0, %v5356_v21, 0  ;;  %v15304_v49 = vpack.c.bf16 %v5454_v24, %v5454_v24 }
0x2e42   :  { %13241 = vmatpush3.bf16.msra.mxu0 %v5361_v29  ;;  %v5518_v29 = vld [vmem:[#allocation5 + $0xc8] sm:$0xff] }
0x2f0a   :  { %v5226_v33 = vpop.f32.mrb[152].mxu1 }
0x2f0b   :  { %v5227_v39 = vadd.f32 %v5226_v33, %v5179_v18  ;;  %v13224_v60 = vpop.f32.mrb[153].mxu1  ;;  %v15306_v33 = vpack.c.bf16 %v5519_v14, %v5518_v29 }
0x2f0c   :  { %v5229_v57 = vpop.f32.mrb[154].mxu1 }
0x2f0d   :  { %v5295_v1 = vpack.c.bf16 %v5227_v39, %v5227_v39  ;;  %v13225_v51 = vpop.f32.mrb[155].mxu1 }
0x2f0f   :  { %v5300_v54 = vsel %vm959_vm5, %v5295_v1, 0 }
0x2f10   :  { %13235 = vmatpush3.bf16.xpose.msra.mxu1 %v5300_v54 }
0x2f11   :  { %13246 = vmatprep.subr.bf16.mxu1 %v14510_v36 }
0x2f17   :  { %13237 = vmatmul.mubr.msk.bf16.vlgmr.msra.gmra.mrb[156].mxu1 %vm959_vm5, %v5294_v31 }
0x2f18   :  { %13248 = vmatprep.mubr.msk.bf16.mxu1 %vm14511_vm3, %v14510_v36 }
0x2fea   :  { %v5336_v46 = vpop.f32.mrb[156].mxu1 }
0x2feb   :  { %v5342_v55 = vmul.f32 0.35355338, %v5336_v46  ;;  %v13238_v35 = vpop.f32.mrb[157].mxu1 }
0x2fec   :  { %v5339_v56 = vpop.f32.mrb[158].mxu1 }
0x2fed   :  { %v13239_v58 = vpop.f32.mrb[159].mxu1  ;;  %v5343_v59 = vadd.f32 %v5342_v55, %v15170_v10  ;;  %v5409_v10 = vsel %vm1131_vm8, %v5403_v15, 0 }
0x2fee   :  { %13247 = vmatpush3.bf16.msra.mxu1 %v5409_v10  ;;  %v14072_v10 = vld [vmem:[#allocation2 + $0x618] sm:$0xff]  }
0x2fef   :  { %v5344_v61 = vsel %vm4311_vm12, %v5343_v59, -inf  ;;  %13258 = vmatprep.subr.bf16.mxu1 %v14510_v36 }
0x2ff0   :  { %5345 = vmax.xlane.f32.xlu0 %v5344_v61 }
0x307d   :  { %v5346_v62 = vpop.xlane.xlu0 %5345 }
0x307e   :  { %v5347_v63 = vsub.f32 %v5343_v59, %v5346_v62 }
0x3080   :  { %v5348_v0 = vmul.f32 1.442695, %v5347_v63 }
0x3082   :  { %14252 = vpow2.f32 %v5348_v0 }
0x308c   :  { %v14253_v3 = vpop.eup %14252 }
0x308d   :  { %v5350_v20 = vsel %vm4311_vm12, %v14253_v3, 0.0 }
0x308e   :  { %5351 = vadd.xlane.f32.xlu1 %v5350_v20 }
0x311b   :  { %v5352_v22 = vpop.xlane.xlu1 %5351 }
0x311c   :  { %14254 = vrcp.f32 %v5352_v22 }
0x3126   :  { %v14255_v5 = vpop.eup %14254 }
0x3127   :  { %v5354_v6 = vmul.f32 %v14255_v5, %v14253_v3 }
0x3129   :  { %v5355_v13 = vpack.c.bf16 %v5354_v6, %v5354_v6 }
0x312b   :  { %13243 = vmatmul.mubr.msk.bf16.vlgmr.msra.gmra.mrb[168].mxu0 %vm51_vm1, %v5355_v13 }
0x312c   :  { %13254 = vmatprep.mubr.msk.bf16.mxu0 %vm51_vm1, %v15297_v28 }
0x31fe   :  { %v5397_v19 = vpop.f32.mrb[168].mxu0 }
0x31ff   :  { %v5404_v38 = vpack.c.bf16 %v5397_v19, %v5397_v19  ;;  %v13244_v2 = vpop.f32.mrb[169].mxu0  ;;  %v14073_v19 = vld [vmem:[#allocation2 + $0x620] sm:$0xff]  }
0x3200   :  { %v5400_v23 = vpop.f32.mrb[170].mxu0 }
0x3201   :  { %v13245_v7 = vpop.f32.mrb[171].mxu0  ;;  %13249 = vmatmul.mubr.msk.bf16.vlgmr.msra.gmra.mrb[132].mxu1 %vm959_vm5, %v5404_v38 }
0x3202   :  { %13260 = vmatprep.mubr.msk.bf16.mxu1 %vm14511_vm3, %v14510_v36 }
0x32d4   :  { %v5445_v41 = vpop.f32.mrb[132].mxu1 }
0x32d5   :  { %v13920_v30 = vadd.f32 %v5445_v41, %v4069_v44  ;;  %v13250_v45 = vpop.f32.mrb[133].mxu1  ;;  %v5611_v44 = vld [vmem:[#allocation2 + $0x688] sm:$0x1] }
0x32d6   :  { %v5448_v21 = vpop.f32.mrb[134].mxu1  ;;  %v5620_v45 = vld [vmem:[#allocation2 + $0x68c] sm:$0x1] }
0x32d7   :  { %v5457_v12 = vpack.c.bf16 %v13920_v30, %v13920_v30  ;;  %v13251_v47 = vpop.f32.mrb[135].mxu1  ;;  %v5612_v30 = vunpack.c.l.bf16 %v5611_v44  ;;  %v5621_v24 = vunpack.c.l.bf16 %v5620_v45 }
0x32d9   :  { %v5465_v18 = vsel %vm58_vm0, %v5457_v12, 0  ;;  %13973 = vmatprep.subr.msk.bf16.mxu0 %vm58_vm0, %v5457_v12  ;;  %v15332_v21 = vrot.slane %v5612_v30, %v14658_v48 }
0x32da   :  { %13253 = vmatpush3.bf16.msra.mxu0 %v5465_v18  ;;  %13259 = vmatpush3.bf16.msra.mxu1 %v5465_v18 }
0x32db   :  { %13264 = vmatprep.subr.bf16.mxu0 %v14072_v10 }
0x32dd   :  { %13255 = vmatmul.mubr.msk.bf16.vlgmr.msra.gmra.mrb[172].mxu0 %vm51_vm1, %v15304_v49  ;;  %13261 = vmatmul.mubr.msk.bf16.vlgmr.msra.gmra.mrb[160].mxu1 %vm51_vm1, %v15306_v33 }
0x32de   :  { %13265 = vmatpush3.bf16.msra.mxu0 %v14072_v10 }
0x32df   :  { %13266 = vmatprep.subr.bf16.mxu0 %v14073_v19 }
0x32e2   :  { %13267 = vmatpush3.bf16.msra.mxu0 %v14073_v19 }
0x32e3   :  { %13284 = vmatprep.subr.bf16.mxu0 %v14510_v36 }
0x33b0   :  { %v13256_v39 = vpop.f32.mrb[172].mxu0  ;;  %v5558_v60 = vpop.f32.mrb[160].mxu1 }
0x33b1   :  { %v5517_v57 = vadd.f32 %v13256_v39, %v14936_v40  ;;  %v15314_v50 = vadd.f32 %v5558_v60, %v15139_v34  ;;  %v5501_v1 = vpop.f32.mrb[173].mxu0  ;;  %v13262_v51 = vpop.f32.mrb[161].mxu1  ;;  %v15336_v39 = vrot.slane %v5621_v24, %v14658_v48 }
0x33b2   :  { %v5515_v54 = vadd.f32 %v5501_v1, %v14939_v11  ;;  %v13257_v26 = vpop.f32.mrb[174].mxu0  ;;  %v5561_v31 = vpop.f32.mrb[162].mxu1 }
0x33b3   :  { %v15318_v46 = vadd.f32 %v5561_v31, %v15142_v37  ;;  %v5504_v55 = vpop.f32.mrb[175].mxu0  ;;  %v13263_v35 = vpop.f32.mrb[163].mxu1  ;;  %v5569_v59 = vadd.f32 %v5517_v57, %v14641_v8 }
0x33b4   :  { %v5516_v56 = vadd.f32 %v5504_v55, %v14942_v42  ;;  %v5567_v58 = vadd.f32 %v5515_v54, %v14629_v17 }
0x33b5   :  { %v5577_v37 = vsel %vm5576_vm13, %v5569_v59, 0.0 }
0x33b6   :  { %v5570_v40 = vsel %vm178_vm2, %v5567_v58, 0.0  ;;  %v5568_v34 = vadd.f32 %v5516_v56, %v14627_v16  ;;  %v15359_v56 = vld [vmem:[#allocation2 + $0x62c] sm:$0xff]  }
0x33b7   :  { %5571 = vadd.xlane.f32.xlu0 %v5570_v40  ;;  %13272 = vmatprep.subr.bf16.mxu1 %v15359_v56  ;;  %v15366_v40 = vld [vmem:[#allocation2 + $0x63c] sm:$0xff]  }
0x33b8   :  { %v5573_v11 = vsel %vm178_vm2, %v5568_v34, 0.0  ;;  %13273 = vmatpush3.bf16.msra.mxu1 %v15359_v56 }
0x33b9   :  { %5574 = vadd.xlane.f32.xlu1 %v5573_v11 }
0x33bb   :  { %5578 = vadd.xlane.f32.xlu0 %v5577_v37 }
0x3444   :  { %v5572_v61 = vpop.xlane.xlu0 %5571 }
0x3445   :  { %v5581_v62 = vmul.f32 0.03125, %v5572_v61 }
0x3446   :  { %v5575_v63 = vpop.xlane.xlu1 %5574 }
0x3447   :  { %v5584_v42 = vsub.f32 %v5567_v58, %v5581_v62  ;;  %v5582_v0 = vmul.f32 0.03125, %v5575_v63  ;;  %v15361_v58 = vld [vmem:[#allocation2 + $0x634] sm:$0xff]  }
0x3448   :  { %v5579_v17 = vpop.xlane.xlu0 %5578  ;;  %13274 = vmatprep.subr.bf16.mxu1 %v15361_v58 }
0x3449   :  { %v5585_v3 = vsub.f32 %v5568_v34, %v5582_v0  ;;  %v5583_v20 = vmul.f32 0.03125, %v5579_v17  ;;  %v5587_v22 = vmul.f32 %v5584_v42, %v5584_v42  ;;  %13275 = vmatpush3.bf16.msra.mxu1 %v15361_v58  ;;  %v15370_v34 = vld [vmem:[#allocation2 + $0x644] sm:$0xff]  }
0x344a   :  { %13276 = vmatprep.subr.bf16.mxu1 %v15366_v40 }
0x344b   :  { %v5586_v16 = vsub.f32 %v5569_v59, %v5583_v20  ;;  %v5590_v8 = vsel %vm178_vm2, %v5587_v22, 0.0  ;;  %v5588_v5 = vmul.f32 %v5585_v3, %v5585_v3  ;;  %v5635_v59 = vld [vmem:[#allocation2 + $0x628] sm:$0x1] }
0x344c   :  { %5591 = vadd.xlane.f32.xlu1 %v5590_v8  ;;  %v5636_v11 = vunpack.c.l.bf16 %v5635_v59 }
0x344d   :  { %v5593_v6 = vsel %vm178_vm2, %v5588_v5, 0.0  ;;  %v5589_v13 = vmul.f32 %v5586_v16, %v5586_v16  ;;  %13277 = vmatpush3.bf16.msra.mxu1 %v15366_v40 }
0x344e   :  { %5594 = vadd.xlane.f32.xlu0 %v5593_v6  ;;  %13278 = vmatprep.subr.bf16.mxu1 %v15370_v34  ;;  %v15376_v37 = vrot.slane %v5636_v11, %v14658_v48 }
0x344f   :  { %v5596_v15 = vsel %vm5576_vm13, %v5589_v13, 0.0 }
0x3450   :  { %5597 = vadd.xlane.f32.xlu1 %v5596_v15 }
0x3451   :  { %13279 = vmatpush3.bf16.msra.mxu1 %v15370_v34 }
0x34d9   :  { %v5592_v38 = vpop.xlane.xlu1 %5591 }
0x34da   :  { %v5599_v2 = vmul.f32 0.03125, %v5592_v38 }
0x34db   :  { %v5595_v23 = vpop.xlane.xlu0 %5594 }
0x34dc   :  { %v5602_v7 = vadd.f32 1e-05, %v5599_v2  ;;  %v5600_v9 = vmul.f32 0.03125, %v5595_v23 }
0x34dd   :  { %v5598_v25 = vpop.xlane.xlu1 %5597 }
0x34de   :  { %14256 = vrsqrt.f32 %v5602_v7  ;;  %v5603_v32 = vadd.f32 1e-05, %v5600_v9  ;;  %v5601_v43 = vmul.f32 0.03125, %v5598_v25 }
0x34e0   :  { %14258 = vrsqrt.f32 %v5603_v32  ;;  %v5604_v41 = vadd.f32 1e-05, %v5601_v43 }
0x34e2   :  { %14260 = vrsqrt.f32 %v5604_v41 }
0x34e8   :  { %v14257_v29 = vpop.eup %14256 }
0x34e9   :  { %v5608_v14 = vmul.f32 %v14257_v29, %v5584_v42 }
0x34ea   :  { %v14259_v12 = vpop.eup %14258 }
0x34eb   :  { %v5609_v47 = vmul.f32 %v14259_v12, %v5585_v3  ;;  %v5617_v18 = vmul.f32 %v15332_v21, %v5608_v14 }
0x34ec   :  { %v14261_v60 = vpop.eup %14260 }
0x34ed   :  { %v5610_v57 = vmul.f32 %v14261_v60, %v5586_v16  ;;  %v5618_v1 = vmul.f32 %v15332_v21, %v5609_v47  ;;  %v15341_v54 = vadd.f32 %v15336_v39, %v5617_v18 }
0x34ef   :  { %v5619_v51 = vmul.f32 %v15332_v21, %v5610_v57  ;;  %v15344_v26 = vadd.f32 %v15336_v39, %v5618_v1  ;;  %v5744_v57 = vld [vmem:[#allocation2 + $0x64c] sm:$0x1] }
0x34f0   :  { %v5745_v1 = vunpack.c.l.bf16 %v5744_v57 }
0x34f1   :  { %v5633_v31 = vpack.c.bf16 %v15344_v26, %v15341_v54  ;;  %v15349_v55 = vadd.f32 %v15336_v39, %v5619_v51 }
0x34f2   :  { %v15384_v51 = vrot.slane %v5745_v1, %v14658_v48 }
0x34f3   :  { %13268 = vmatprep.mubr.msk.bf16.mxu0 %vm178_vm2, %v5633_v31  ;;  %v5634_v35 = vpack.c.bf16 %v15349_v55, %v15349_v55 }
0x34f5   :  { %13269 = vmatmul.mubr.msk.bf16.vlgmr.msra.gmra.mrb[176].mxu0 %vm178_vm2, %v5634_v35 }
0x34f6   :  { %13285 = vmatpush3.bf16.msra.mxu0 %v14072_v10  ;;  %13288 = vmatprep.mubr.msk.bf16.mxu0 %vm14511_vm3, %v14510_v36 }
0x34f7   :  { %13286 = vmatprep.subr.bf16.mxu0 %v14510_v36 }
0x34fa   :  { %13287 = vmatpush3.bf16.msra.mxu0 %v14073_v19 }
0x34fb   :  { %13292 = vmatprep.subr.bf16.mxu0 %v14510_v36 }
0x35c8   :  { %v13270_v61 = vpop.f32.mrb[176].mxu0 }
0x35c9   :  { %v5702_v62 = vadd.f32 %v13270_v61, %v15376_v37  ;;  %v5693_v63 = vpop.f32.mrb[177].mxu0 }
0x35ca   :  { %v5694_v42 = vadd.f32 %v5693_v63, %v15376_v37  ;;  %v13271_v0 = vpop.f32.mrb[178].mxu0 }
0x35cb   :  { %v5712_v17 = vmul.f32 0.044715, %v5702_v62  ;;  %v5696_v3 = vpop.f32.mrb[179].mxu0  ;;  %v5709_v30 = vmul.f32 0.5, %v5702_v62 }
0x35cc   :  { %v5710_v20 = vmul.f32 0.044715, %v5694_v42  ;;  %v5697_v22 = vadd.f32 %v5696_v3, %v15376_v37  ;;  %v5707_v45 = vmul.f32 0.5, %v5694_v42 }
0x35cd   :  { %v5715_v16 = vmul.f32 %v5712_v17, %v5702_v62 }
0x35ce   :  { %v5713_v8 = vmul.f32 %v5710_v20, %v5694_v42  ;;  %v5711_v5 = vmul.f32 0.044715, %v5697_v22  ;;  %v5708_v24 = vmul.f32 0.5, %v5697_v22 }
0x35cf   :  { %v5718_v6 = vmul.f32 %v5715_v16, %v5702_v62 }
0x35d0   :  { %v5716_v13 = vmul.f32 %v5713_v8, %v5694_v42  ;;  %v5714_v15 = vmul.f32 %v5711_v5, %v5697_v22 }
0x35d1   :  { %v5721_v10 = vadd.f32 %v5718_v6, %v5702_v62 }
0x35d2   :  { %v5719_v19 = vadd.f32 %v5716_v13, %v5694_v42  ;;  %v5717_v38 = vmul.f32 %v5714_v15, %v5697_v22 }
0x35d3   :  { %v5724_v2 = vmul.f32 0.7978846, %v5721_v10 }
0x35d4   :  { %v5722_v23 = vmul.f32 0.7978846, %v5719_v19  ;;  %v5720_v7 = vadd.f32 %v5717_v38, %v5697_v22 }
0x35d5   :  { %14262 = vtanh.f32 %v5724_v2 }
0x35d6   :  { %14264 = vtanh.f32 %v5722_v23  ;;  %v5723_v9 = vmul.f32 0.7978846, %v5720_v7  ;;  %v5889_v7 = vadd.f32 %v15314_v50, %v14884_v53  ;;  %v14080_v53 = vld [vmem:[#allocation2 + $0x31c] sm:$0xff]  }
0x35d8   :  { %14266 = vtanh.f32 %v5723_v9 }
0x35df   :  { %v14263_v25 = vpop.eup %14262 }
0x35e0   :  { %v14265_v32 = vpop.eup %14264  ;;  %v5730_v43 = vadd.f32 1.0, %v14263_v25  ;;  %v5890_v25 = vadd.f32 %v15318_v46, %v14880_v52 }
0x35e1   :  { %v5728_v44 = vadd.f32 1.0, %v14265_v32  ;;  %v5891_v32 = vsel %vm178_vm2, %v5889_v7, 0.0 }
0x35e2   :  { %v14267_v41 = vpop.eup %14266  ;;  %v5733_v14 = vmul.f32 %v5730_v43, %v5709_v30  ;;  %v5894_v43 = vsel %vm5576_vm13, %v5890_v25, 0.0 }
0x35e3   :  { %v5729_v29 = vadd.f32 1.0, %v14267_v41  ;;  %v5731_v12 = vmul.f32 %v5728_v44, %v5707_v45  ;;  %v14078_v44 = vld [vmem:[#allocation2 + $0x30c] sm:$0xff]   ;;  %v14079_v41 = vld [vmem:[#allocation2 + $0x314] sm:$0xff]  }
0x35e4   :  { %v5743_v60 = vpack.c.bf16 %v5733_v14, %v5733_v14  ;;  %13304 = vmatprep.subr.bf16.mxu1 %v14078_v44 }
0x35e5   :  { %v5732_v47 = vmul.f32 %v5729_v29, %v5708_v24 }
0x35e7   :  { %v5742_v18 = vpack.c.bf16 %v5732_v47, %v5731_v12  ;;  %v5871_v47 = vld [vmem:[#allocation2 + $0x690] sm:$0x1] }
0x35e9   :  { %13280 = vmatprep.mubr.msk.bf16.mxu1 %vm5774_vm14, %v5742_v18 }
0x35ea   :  { %13281 = vmatmul.mubr.msk.bf16.vlgmr.msra.gmra.mrb[164].mxu1 %vm5774_vm14, %v5743_v60 }
0x35eb   :  { %13305 = vmatpush3.bf16.msra.mxu1 %v14078_v44 }
0x35ec   :  { %13306 = vmatprep.subr.bf16.mxu1 %v14079_v41 }
0x35ef   :  { %13307 = vmatpush3.bf16.msra.mxu1 %v14079_v41 }
0x35f0   :  { %13312 = vmatprep.subr.bf16.mxu1 %v14080_v53 }
0x36bd   :  { %v13282_v31 = vpop.f32.mrb[164].mxu1 }
0x36be   :  { %v5815_v35 = vpop.f32.mrb[165].mxu1  ;;  %v5824_v59 = vadd.f32 %v13282_v31, %v15384_v51 }
0x36bf   :  { %v5816_v11 = vadd.f32 %v5815_v35, %v15384_v51  ;;  %v13283_v61 = vpop.f32.mrb[166].mxu1  ;;  %v5872_v35 = vunpack.c.l.bf16 %v5871_v47 }
0x36c0   :  { %v5818_v62 = vpop.f32.mrb[167].mxu1  ;;  %v5831_v3 = vadd.f32 %v5824_v59, %v15349_v55  ;;  %v5880_v59 = vld [vmem:[#allocation2 + $0x694] sm:$0x1] }
0x36c1   :  { %v5819_v63 = vadd.f32 %v5818_v62, %v15384_v51  ;;  %v5829_v42 = vadd.f32 %v5816_v11, %v15341_v54 }
0x36c2   :  { %v5838_v22 = vsel %vm5576_vm13, %v5831_v3, 0.0 }
0x36c3   :  { %v5832_v0 = vsel %vm178_vm2, %v5829_v42, 0.0  ;;  %v5830_v17 = vadd.f32 %v5819_v63, %v15344_v26 }
0x36c4   :  { %5833 = vadd.xlane.f32.xlu0 %v5832_v0  ;;  %v5881_v0 = vunpack.c.l.bf16 %v5880_v59 }
0x36c5   :  { %v5835_v20 = vsel %vm178_vm2, %v5830_v17, 0.0 }
0x36c6   :  { %5836 = vadd.xlane.f32.xlu1 %v5835_v20 }
0x36c8   :  { %5839 = vadd.xlane.f32.xlu0 %v5838_v22 }
0x3751   :  { %v5834_v16 = vpop.xlane.xlu0 %5833 }
0x3752   :  { %v5841_v8 = vmul.f32 0.03125, %v5834_v16  ;;  %v15410_v16 = vrot.slane %v5881_v0, %v14658_v48 }
0x3753   :  { %v5837_v5 = vpop.xlane.xlu1 %5836 }
0x3754   :  { %v5844_v6 = vsub.f32 %v5829_v42, %v5841_v8  ;;  %v5842_v13 = vmul.f32 0.03125, %v5837_v5  ;;  %v15406_v42 = vrot.slane %v5872_v35, %v14658_v48 }
0x3755   :  { %v5840_v15 = vpop.xlane.xlu0 %5839 }
0x3756   :  { %v5845_v54 = vsub.f32 %v5830_v17, %v5842_v13  ;;  %v5843_v10 = vmul.f32 0.03125, %v5840_v15  ;;  %v5847_v19 = vmul.f32 %v5844_v6, %v5844_v6 }
0x3758   :  { %v5846_v38 = vsub.f32 %v5831_v3, %v5843_v10  ;;  %v5850_v26 = vsel %vm178_vm2, %v5847_v19, 0.0  ;;  %v5848_v55 = vmul.f32 %v5845_v54, %v5845_v54 }
0x3759   :  { %5851 = vadd.xlane.f32.xlu1 %v5850_v26 }
0x375a   :  { %v5853_v2 = vsel %vm178_vm2, %v5848_v55, 0.0  ;;  %v5849_v23 = vmul.f32 %v5846_v38, %v5846_v38 }
0x375b   :  { %5854 = vadd.xlane.f32.xlu0 %v5853_v2 }
0x375c   :  { %v5856_v9 = vsel %vm5576_vm13, %v5849_v23, 0.0 }
0x375d   :  { %5857 = vadd.xlane.f32.xlu1 %v5856_v9 }
0x375f   :  { %5892 = vadd.xlane.f32.xlu0 %v5891_v32 }
0x3761   :  { %5895 = vadd.xlane.f32.xlu1 %v5894_v43 }
0x37e6   :  { %v5852_v50 = vpop.xlane.xlu1 %5851 }
0x37e7   :  { %v5859_v30 = vmul.f32 0.03125, %v5852_v50 }
0x37e8   :  { %v5855_v45 = vpop.xlane.xlu0 %5854 }
0x37e9   :  { %v5862_v24 = vadd.f32 1e-05, %v5859_v30  ;;  %v5860_v52 = vmul.f32 0.03125, %v5855_v45 }
0x37ea   :  { %v5858_v46 = vpop.xlane.xlu1 %5857 }
0x37eb   :  { %14268 = vrsqrt.f32 %v5862_v24  ;;  %v5863_v29 = vadd.f32 1e-05, %v5860_v52  ;;  %v5861_v14 = vmul.f32 0.03125, %v5858_v46 }
0x37ec   :  { %v5893_v12 = vpop.xlane.xlu0 %5892 }
0x37ed   :  { %14270 = vrsqrt.f32 %v5863_v29  ;;  %v5864_v18 = vadd.f32 1e-05, %v5861_v14  ;;  %v5897_v60 = vmul.f32 0.03125, %v5893_v12  ;;  %v6150_v12 = vld [vmem:[#allocation2 + $0x344] sm:$0x1] }
0x37ee   :  { %v5896_v57 = vpop.xlane.xlu1 %5895 }
0x37ef   :  { %14272 = vrsqrt.f32 %v5864_v18  ;;  %v5899_v1 = vsub.f32 %v5889_v7, %v5897_v60  ;;  %v5898_v31 = vmul.f32 0.03125, %v5896_v57 }
0x37f1   :  { %v5900_v11 = vsub.f32 %v5890_v25, %v5898_v31  ;;  %v5901_v61 = vmul.f32 %v5899_v1, %v5899_v1 }
0x37f3   :  { %v5903_v62 = vsel %vm178_vm2, %v5901_v61, 0.0  ;;  %v5902_v63 = vmul.f32 %v5900_v11, %v5900_v11 }
0x37f4   :  { %5904 = vadd.xlane.f32.xlu0 %v5903_v62 }
0x37f5   :  { %v14269_v17 = vpop.eup %14268  ;;  %v5906_v3 = vsel %vm5576_vm13, %v5902_v63, 0.0 }
0x37f6   :  { %v5868_v20 = vmul.f32 %v14269_v17, %v5844_v6  ;;  %5907 = vadd.xlane.f32.xlu1 %v5906_v3  ;;  %v14082_v3 = vld [vmem:[#allocation2 + $0x34c] sm:$0xff]  }
0x37f7   :  { %v14271_v22 = vpop.eup %14270 }
0x37f8   :  { %v5877_v8 = vmul.f32 %v15406_v42, %v5868_v20  ;;  %v5869_v5 = vmul.f32 %v14271_v22, %v5845_v54 }
0x37f9   :  { %v14273_v13 = vpop.eup %14272 }
0x37fa   :  { %v5878_v15 = vmul.f32 %v15406_v42, %v5869_v5  ;;  %v5870_v10 = vmul.f32 %v14273_v13, %v5846_v38  ;;  %v15415_v19 = vadd.f32 %v15410_v16, %v5877_v8  ;;  %v14081_v38 = vld [vmem:[#allocation2 + $0x324] sm:$0xff]   ;;  %v14083_v5 = vld [vmem:[#allocation2 + $0x354] sm:$0xff]   ;;  %v14084_v13 = vld [vmem:[#allocation2 + $0x36c] sm:$0xff]  }
0x37fc   :  { %v15418_v26 = vadd.f32 %v15410_v16, %v5878_v15  ;;  %v5879_v6 = vmul.f32 %v15406_v42, %v5870_v10  ;;  %v14085_v15 = vld [vmem:[#allocation2 + $0x374] sm:$0xff]   ;;  %v14086_v10 = vld [vmem:[#allocation2 + $0x32c] sm:$0xff]  }
0x37fe   :  { %v15423_v55 = vpack.c.bf16 %v15418_v26, %v15415_v19  ;;  %v15426_v2 = vadd.f32 %v15410_v16, %v5879_v6 }
0x3800   :  { %v15430_v54 = vpack.c.bf16 %v15426_v2, %v15426_v2  ;;  %13308 = vmatprep.mubr.msk.bf16.mxu1 %vm178_vm2, %v15423_v55 }
0x3802   :  { %13309 = vmatmul.mubr.msk.bf16.vlgmr.msra.gmra.mrb[168].mxu1 %vm178_vm2, %v15430_v54 }
0x3803   :  { %13313 = vmatpush3.bf16.msra.mxu1 %v14080_v53  ;;  %13316 = vmatprep.mubr.msk.bf16.mxu1 %vm178_vm2, %v15423_v55 }
0x3804   :  { %13314 = vmatprep.subr.bf16.mxu1 %v14081_v38 }
0x3807   :  { %13315 = vmatpush3.bf16.msra.mxu1 %v14081_v38 }
0x380a   :  { %13317 = vmatmul.mubr.msk.bf16.vlgmr.msra.gmra.mrb[172].mxu1 %vm178_vm2, %v15430_v54 }
0x3881   :  { %v5905_v23 = vpop.xlane.xlu0 %5904 }
0x3882   :  { %v5909_v7 = vmul.f32 0.03125, %v5905_v23 }
0x3883   :  { %v5908_v9 = vpop.xlane.xlu1 %5907 }
0x3884   :  { %v5911_v25 = vadd.f32 1e-05, %v5909_v7  ;;  %v5910_v32 = vmul.f32 0.03125, %v5908_v9 }
0x3886   :  { %14274 = vrsqrt.f32 %v5911_v25  ;;  %v5912_v43 = vadd.f32 1e-05, %v5910_v32 }
0x3888   :  { %14276 = vrsqrt.f32 %v5912_v43 }
0x3890   :  { %v14275_v44 = vpop.eup %14274 }
0x3891   :  { %v5915_v41 = vmul.f32 %v14275_v44, %v5899_v1 }
0x3892   :  { %v14277_v50 = vpop.eup %14276 }
0x3893   :  { %v5917_v53 = vmul.f32 %v5915_v41, %v15332_v21  ;;  %v5916_v30 = vmul.f32 %v14277_v50, %v5900_v11 }
0x3895   :  { %v5918_v45 = vmul.f32 %v5916_v30, %v15332_v21  ;;  %v15443_v24 = vadd.f32 %v5917_v53, %v15336_v39  ;;  %v6074_v21 = vld [vmem:[#allocation2 + $0x340] sm:$0x1] }
0x3897   :  { %v15446_v52 = vadd.f32 %v5918_v45, %v15336_v39  ;;  %v6075_v39 = vunpack.c.l.bf16 %v6074_v21 }
0x3899   :  { %v5921_v46 = vpack.c.bf16 %v15446_v52, %v15443_v24  ;;  %v6079_v29 = vrot.slane %v6075_v39, %v14658_v48 }
0x389b   :  { %13289 = vmatmul.mubr.msk.bf16.vlgmr.msra.gmra.mrb[180].mxu0 %vm178_vm2, %v5921_v46 }
0x389c   :  { %13293 = vmatpush3.bf16.msra.mxu0 %v15359_v56  ;;  %13300 = vmatprep.mubr.msk.bf16.mxu0 %vm14511_vm3, %v14510_v36 }
0x389d   :  { %13294 = vmatprep.subr.bf16.mxu0 %v14510_v36 }
0x38a0   :  { %13295 = vmatpush3.bf16.msra.mxu0 %v15361_v58  ;;  %v6151_v58 = vunpack.c.l.bf16 %v6150_v12 }
0x38a1   :  { %13296 = vmatprep.subr.bf16.mxu0 %v14510_v36 }
0x38a2   :  { %v6155_v31 = vrot.slane %v6151_v58, %v14658_v48  ;;  %v6517_v58 = vld [vmem:[#allocation2 + $0x380] sm:$0x1] }
0x38a4   :  { %13297 = vmatpush3.bf16.msra.mxu0 %v15366_v40 }
0x38a5   :  { %13298 = vmatprep.subr.bf16.mxu0 %v14510_v36 }
0x38a8   :  { %13299 = vmatpush3.bf16.msra.mxu0 %v15370_v34 }
0x38a9   :  { %13320 = vmatprep.subr.bf16.mxu0 %v14086_v10 }
0x38d5   :  { %v13310_v56 = vpop.f32.mrb[168].mxu1 }
0x38d6   :  { %v6132_v14 = vpop.f32.mrb[169].mxu1  ;;  %v6141_v22 = vadd.f32 %v13310_v56, %v6079_v29 }
0x38d7   :  { %v13311_v47 = vpop.f32.mrb[170].mxu1  ;;  %v6133_v60 = vadd.f32 %v6132_v14, %v6079_v29 }
0x38d8   :  { %v6135_v18 = vpop.f32.mrb[171].mxu1  ;;  %v6287_v8 = vpack.c.bf16 %v6141_v22, %v6141_v22  ;;  %v15491_v22 = vld [vmem:[#allocation5 + $0x40] sm:$0x3] }
0x38d9   :  { %v6136_v57 = vadd.f32 %v6135_v18, %v6079_v29 }
0x38db   :  { %v6286_v1 = vpack.c.bf16 %v6136_v57, %v6133_v60  ;;  %v14087_v57 = vld [vmem:[#allocation2 + $0x334] sm:$0xff]  }
0x38dd   :  { %v13318_v40 = vpop.f32.mrb[172].mxu1  ;;  %13332 = vmatprep.mubr.msk.bf16.mxu1 %vm959_vm5, %v6286_v1 }
0x38de   :  { %v6202_v35 = vpop.f32.mrb[173].mxu1  ;;  %v6211_v11 = vadd.f32 %v13318_v40, %v6155_v31  ;;  %v6518_v40 = vunpack.c.l.bf16 %v6517_v58 }
0x38df   :  { %v13319_v34 = vpop.f32.mrb[174].mxu1  ;;  %v6203_v61 = vadd.f32 %v6202_v35, %v6155_v31 }
0x38e0   :  { %v6205_v59 = vpop.f32.mrb[175].mxu1  ;;  %v6289_v0 = vpack.c.bf16 %v6211_v11, %v6211_v11 }
0x38e1   :  { %v6206_v62 = vadd.f32 %v6205_v59, %v6155_v31 }
0x38e2   :  { %v6300_v20 = vsel %vm959_vm5, %v6289_v0, 0 }
0x38e3   :  { %v6288_v63 = vpack.c.bf16 %v6206_v62, %v6203_v61  ;;  %v15483_v62 = vld [vmem:[#allocation5 + $0x30] sm:$0xff] }
0x38e5   :  { %13974 = vmatprep.subr.msk.bf16.mxu1 %vm959_vm5, %v6288_v63  ;;  %v6297_v17 = vsel %vm959_vm5, %v6288_v63, 0 }
0x38e6   :  { %13329 = vmatpush3.bf16.xpose.msra.mxu1 %v6297_v17 }
0x38e7   :  { %13975 = vmatprep.subr.msk.bf16.mxu1 %vm959_vm5, %v6289_v0  ;;  %v6522_v0 = vrot.slane %v6518_v40, %v14658_v48  ;;  %v6220_v40 = vld [vmem:[#allocation2 + $0x348] sm:$0x1] }
0x38ee   :  { %13331 = vmatpush3.bf16.xpose.msra.mxu1 %v6300_v20 }
0x38ef   :  { %13350 = vmatprep.subr.bf16.mxu1 %v14082_v3 }
0x38f5   :  { %13333 = vmatmul.mubr.msk.bf16.vlgmr.msra.gmra.mrb[176].mxu1 %vm959_vm5, %v6287_v8 }
0x38f6   :  { %13351 = vmatpush3.bf16.msra.mxu1 %v14082_v3  ;;  %13354 = vmatprep.mubr.msk.bf16.mxu1 %vm178_vm2, %v15423_v55  ;;  %v15488_v3 = vld [vmem:[#allocation5 + $0x38] sm:$0xff] }
0x38f7   :  { %13352 = vmatprep.subr.bf16.mxu1 %v14083_v5 }
0x38fa   :  { %13353 = vmatpush3.bf16.msra.mxu1 %v14083_v5 }
0x38fb   :  { %13366 = vmatprep.subr.bf16.mxu1 %v14084_v13 }
0x38fd   :  { %13355 = vmatmul.mubr.msk.bf16.vlgmr.msra.gmra.mrb[180].mxu1 %vm178_vm2, %v15430_v54 }
0x38fe   :  { %13367 = vmatpush3.bf16.msra.mxu1 %v14084_v13  ;;  %13370 = vmatprep.mubr.msk.bf16.mxu1 %vm178_vm2, %v15423_v55 }
0x38ff   :  { %13368 = vmatprep.subr.bf16.mxu1 %v14085_v15 }
0x3902   :  { %13369 = vmatpush3.bf16.msra.mxu1 %v14085_v15 }
0x3905   :  { %13371 = vmatmul.mubr.msk.bf16.vlgmr.msra.gmra.mrb[184].mxu1 %vm178_vm2, %v15430_v54 }
0x396e   :  { %v5959_v6 = vpop.f32.mrb[180].mxu0 }
0x396f   :  { %v5960_v38 = vadd.f32 %v5959_v6, %v15376_v37  ;;  %v13290_v23 = vpop.f32.mrb[181].mxu0  ;;  %v6657_v6 = vld [vmem:[#allocation2 + $0x388] sm:$0x1] }
0x3970   :  { %v5962_v7 = vpop.f32.mrb[182].mxu0 }
0x3971   :  { %v5968_v9 = vmul.f32 0.044715, %v5960_v38  ;;  %v5963_v25 = vadd.f32 %v5962_v7, %v15376_v37  ;;  %v13291_v32 = vpop.f32.mrb[183].mxu0  ;;  %v5966_v14 = vmul.f32 0.5, %v5960_v38 }
0x3972   :  { %v6658_v32 = vunpack.c.l.bf16 %v6657_v6 }
0x3973   :  { %v5970_v43 = vmul.f32 %v5968_v9, %v5960_v38  ;;  %v5969_v44 = vmul.f32 0.044715, %v5963_v25  ;;  %v5967_v12 = vmul.f32 0.5, %v5963_v25 }
0x3975   :  { %v5972_v41 = vmul.f32 %v5970_v43, %v5960_v38  ;;  %v5971_v50 = vmul.f32 %v5969_v44, %v5963_v25  ;;  %v6662_v44 = vrot.slane %v6658_v32, %v14658_v48 }
0x3977   :  { %v5974_v53 = vadd.f32 %v5972_v41, %v5960_v38  ;;  %v5973_v30 = vmul.f32 %v5971_v50, %v5963_v25 }
0x3979   :  { %v5976_v45 = vmul.f32 0.7978846, %v5974_v53  ;;  %v5975_v46 = vadd.f32 %v5973_v30, %v5963_v25 }
0x397b   :  { %14278 = vtanh.f32 %v5976_v45  ;;  %v5977_v21 = vmul.f32 0.7978846, %v5975_v46 }
0x397d   :  { %14280 = vtanh.f32 %v5977_v21 }
0x3985   :  { %v14279_v39 = vpop.eup %14278 }
0x3986   :  { %v5980_v29 = vadd.f32 1.0, %v14279_v39 }
0x3987   :  { %v14281_v56 = vpop.eup %14280 }
0x3988   :  { %v5981_v47 = vadd.f32 1.0, %v14281_v56  ;;  %v5982_v18 = vmul.f32 %v5980_v29, %v5966_v14 }
0x398a   :  { %v5983_v37 = vmul.f32 %v5981_v47, %v5967_v12 }
0x398c   :  { %v5984_v60 = vpack.c.bf16 %v5983_v37, %v5982_v18 }
0x398e   :  { %13301 = vmatmul.mubr.msk.bf16.vlgmr.msra.gmra.mrb[184].mxu0 %vm5774_vm14, %v5984_v60 }
0x398f   :  { %13321 = vmatpush3.bf16.msra.mxu0 %v14086_v10  ;;  %13324 = vmatprep.mubr.msk.bf16.mxu0 %vm178_vm2, %v15423_v55 }
0x3990   :  { %13322 = vmatprep.subr.bf16.mxu0 %v14087_v57 }
0x3993   :  { %13323 = vmatpush3.bf16.msra.mxu0 %v14087_v57 }
0x3996   :  { %13325 = vmatmul.mubr.msk.bf16.vlgmr.msra.gmra.mrb[188].mxu0 %vm178_vm2, %v15430_v54 }
0x39c8   :  { %v13334_v1 = vpop.f32.mrb[176].mxu1 }
0x39c9   :  { %v6336_v31 = vpop.f32.mrb[177].mxu1  ;;  %v6352_v35 = vmul.f32 0.35355338, %v13334_v1 }
0x39ca   :  { %v6350_v34 = vmul.f32 0.35355338, %v6336_v31  ;;  %v13335_v59 = vpop.f32.mrb[178].mxu1 }
0x39cb   :  { %v6339_v11 = vpop.f32.mrb[179].mxu1  ;;  %v6355_v8 = vadd.f32 %v15491_v22, %v6352_v35 }
0x39cc   :  { %v6351_v61 = vmul.f32 0.35355338, %v6339_v11  ;;  %v6353_v63 = vadd.f32 %v15483_v62, %v6350_v34  ;;  %v6221_v11 = vunpack.c.l.bf16 %v6220_v40 }
0x39cd   :  { %v6362_v23 = vsel %vm1033_vm6, %v6355_v8, -inf }
0x39ce   :  { %v6356_v17 = vsel %vm1026_vm7, %v6353_v63, -inf  ;;  %v6354_v20 = vadd.f32 %v15488_v3, %v6351_v61  ;;  %v6225_v61 = vrot.slane %v6221_v11, %v14658_v48  ;;  %v14089_v11 = vld [vmem:[#allocation2 + $0x364] sm:$0xff]  }
0x39cf   :  { %6357 = vmax.xlane.f32.xlu0 %v6356_v17 }
0x39d0   :  { %v13356_v5 = vpop.f32.mrb[180].mxu1  ;;  %v6359_v13 = vsel %vm1026_vm7, %v6354_v20, -inf }
0x39d1   :  { %v15495_v15 = vadd.f32 %v13356_v5, %v6522_v0  ;;  %v6569_v10 = vpop.f32.mrb[181].mxu1  ;;  %6360 = vmax.xlane.f32.xlu1 %v6359_v13 }
0x39d2   :  { %v13357_v38 = vpop.f32.mrb[182].mxu1  ;;  %v15498_v9 = vadd.f32 %v6569_v10, %v6522_v0 }
0x39d3   :  { %v6572_v7 = vpop.f32.mrb[183].mxu1  ;;  %6363 = vmax.xlane.f32.xlu0 %v6362_v23 }
0x39d4   :  { %v15500_v25 = vadd.f32 %v6572_v7, %v6522_v0 }
0x39d6   :  { %v6723_v43 = vpack.c.bf16 %v15500_v25, %v15498_v9 }
0x39d8   :  { %v13372_v41 = vpop.f32.mrb[184].mxu1 }
0x39d9   :  { %v6709_v50 = vpop.f32.mrb[185].mxu1  ;;  %v6718_v45 = vadd.f32 %v13372_v41, %v6662_v44 }
0x39da   :  { %v13373_v53 = vpop.f32.mrb[186].mxu1  ;;  %v6710_v46 = vadd.f32 %v6709_v50, %v6662_v44 }
0x39db   :  { %v6712_v30 = vpop.f32.mrb[187].mxu1  ;;  %v6829_v29 = vpack.c.bf16 %v6718_v45, %v6718_v45 }
0x39dc   :  { %v6713_v21 = vadd.f32 %v6712_v30, %v6662_v44 }
0x39dd   :  { %v6837_v56 = vsel %vm293_vm4, %v6829_v29, 0 }
0x39de   :  { %v6828_v39 = vpack.c.bf16 %v6713_v21, %v6710_v46 }
0x39e0   :  { %13382 = vmatprep.subr.bf16.mxu1 %v6828_v39 }
0x39e1   :  { %13383 = vmatpush3.bf16.msra.mxu1 %v6828_v39 }
0x39e2   :  { %13980 = vmatprep.subr.msk.bf16.mxu1 %vm293_vm4, %v6829_v29 }
0x39e5   :  { %13385 = vmatpush3.bf16.msra.mxu1 %v6837_v56 }
0x3a5c   :  { %v6358_v14 = vpop.xlane.xlu0 %6357 }
0x3a5d   :  { %v6365_v12 = vsub.f32 %v6353_v63, %v6358_v14 }
0x3a5e   :  { %v6361_v47 = vpop.xlane.xlu1 %6360 }
0x3a5f   :  { %v6368_v18 = vmul.f32 1.442695, %v6365_v12  ;;  %v6366_v37 = vsub.f32 %v6354_v20, %v6361_v47 }
0x3a60   :  { %v6364_v60 = vpop.xlane.xlu0 %6363 }
0x3a61   :  { %14282 = vpow2.f32 %v6368_v18  ;;  %v6370_v57 = vmul.f32 1.442695, %v6366_v37  ;;  %v6367_v58 = vsub.f32 %v6355_v8, %v6364_v60  ;;  %v15507_v1 = vpop.f32.mrb[184].mxu0  ;;  %v6450_v18 = vld [vmem:[#allocation2 + $0x33c] sm:$0xf] }
0x3a62   :  { %v13302_v31 = vpop.f32.mrb[185].mxu0  ;;  %v6460_v37 = vsel %vm1131_vm8, %v6450_v18, 0  ;;  %v14088_v60 = vld [vmem:[#allocation2 + $0x35c] sm:$0xff]  }
0x3a63   :  { %14284 = vpow2.f32 %v6370_v57  ;;  %v6372_v35 = vmul.f32 1.442695, %v6367_v58  ;;  %v15509_v34 = vpop.f32.mrb[186].mxu0 }
0x3a64   :  { %v13303_v59 = vpop.f32.mrb[187].mxu0 }
0x3a65   :  { %14286 = vpow2.f32 %v6372_v35 }
0x3a69   :  { %v13326_v63 = vpop.f32.mrb[188].mxu0 }
0x3a6a   :  { %v6272_v0 = vpop.f32.mrb[189].mxu0  ;;  %v6281_v10 = vadd.f32 %v13326_v63, %v6225_v61 }
0x3a6b   :  { %v14283_v17 = vpop.eup %14282  ;;  %v13327_v20 = vpop.f32.mrb[190].mxu0  ;;  %v6273_v6 = vadd.f32 %v6272_v0, %v6225_v61  ;;  %v6587_v0 = vld [vmem:[#allocation2 + $0x384] sm:$0x1] }
0x3a6c   :  { %v6275_v5 = vpop.f32.mrb[191].mxu0  ;;  %v6374_v8 = vsel %vm1026_vm7, %v14283_v17, 0.0  ;;  %v6392_v41 = vpack.c.bf16 %v6281_v10, %v6281_v10 }
0x3a6d   :  { %v14285_v13 = vpop.eup %14284  ;;  %v6276_v38 = vadd.f32 %v6275_v5, %v6225_v61  ;;  %6375 = vadd.xlane.f32.xlu1 %v6374_v8  ;;  %v6588_v5 = vunpack.c.l.bf16 %v6587_v0 }
0x3a6e   :  { %v6377_v23 = vsel %vm1026_vm7, %v14285_v13, 0.0  ;;  %v6400_v50 = vsel %vm293_vm4, %v6392_v41, 0 }
0x3a6f   :  { %v14287_v7 = vpop.eup %14286  ;;  %v6391_v32 = vpack.c.bf16 %v6276_v38, %v6273_v6  ;;  %6378 = vadd.xlane.f32.xlu0 %v6377_v23  ;;  %v6592_v8 = vrot.slane %v6588_v5, %v14658_v48 }
0x3a70   :  { %v6380_v44 = vsel %vm1033_vm6, %v14287_v7, 0.0 }
0x3a71   :  { %13336 = vmatprep.subr.bf16.mxu0 %v6391_v32  ;;  %6381 = vadd.xlane.f32.xlu1 %v6380_v44  ;;  %v14090_v44 = vld [vmem:[#allocation2 + $0x38c] sm:$0xff]  }
0x3a72   :  { %13337 = vmatpush3.bf16.msra.mxu0 %v6391_v32 }
0x3a73   :  { %13976 = vmatprep.subr.msk.bf16.mxu0 %vm293_vm4, %v6392_v41 }
0x3a76   :  { %13339 = vmatpush3.bf16.msra.mxu0 %v6400_v50  ;;  %v6724_v50 = vpack.c.bf16 %v15495_v15, %v15495_v15  ;;  %v6954_v15 = vld [vmem:[#allocation2 + $0x3c0] sm:$0x1] }
0x3a77   :  { %13977 = vmatprep.subr.msk.bf16.mxu0 %vm1131_vm8, %v6450_v18 }
0x3afa   :  { %v6376_v53 = vpop.xlane.xlu1 %6375 }
0x3afb   :  { %14288 = vrcp.f32 %v6376_v53  ;;  %v14091_v53 = vld [vmem:[#allocation2 + $0x394] sm:$0xff]  }
0x3afc   :  { %v6379_v30 = vpop.xlane.xlu0 %6378 }
0x3afd   :  { %14290 = vrcp.f32 %v6379_v30  ;;  %v14092_v30 = vld [vmem:[#allocation2 + $0x3ac] sm:$0xff]  }
0x3afe   :  { %v6382_v45 = vpop.xlane.xlu1 %6381 }
0x3aff   :  { %14292 = vrcp.f32 %v6382_v45  ;;  %v14093_v45 = vld [vmem:[#allocation2 + $0x3b4] sm:$0xff]  }
0x3b05   :  { %v14289_v46 = vpop.eup %14288 }
0x3b06   :  { %v6386_v39 = vmul.f32 %v14289_v46, %v14283_v17 }
0x3b07   :  { %v14291_v21 = vpop.eup %14290 }
0x3b08   :  { %v6387_v29 = vmul.f32 %v14291_v21, %v14285_v13 }
0x3b09   :  { %v14293_v56 = vpop.eup %14292 }
0x3b0a   :  { %v6388_v14 = vmul.f32 %v14293_v56, %v14287_v7  ;;  %v6389_v12 = vpack.c.bf16 %v6387_v29, %v6386_v39  ;;  %v6955_v39 = vunpack.c.l.bf16 %v6954_v15 }
0x3b0c   :  { %13340 = vmatprep.mubr.msk.bf16.mxu0 %vm1026_vm7, %v6389_v12  ;;  %v6390_v47 = vpack.c.bf16 %v6388_v14, %v6388_v14 }
0x3b0e   :  { %13341 = vmatmul.mubr.msk.bf16.vlgmr.msra.gmra.mrb[192].mxu0 %vm1026_vm7, %v6390_v47 }
0x3b0f   :  { %13345 = vmatpush3.bf16.msra.mxu0 %v6460_v37  ;;  %v6959_v37 = vrot.slane %v6955_v39, %v14658_v48 }
0x3b10   :  { %13358 = vmatprep.subr.bf16.mxu0 %v14088_v60 }
0x3be1   :  { %v13342_v57 = vpop.f32.mrb[192].mxu0 }
0x3be2   :  { %v6436_v58 = vpop.f32.mrb[193].mxu0  ;;  %v6452_v59 = vpack.c.bf16 %v13342_v57, %v13342_v57 }
0x3be3   :  { %v13343_v31 = vpop.f32.mrb[194].mxu0 }
0x3be4   :  { %v6439_v40 = vpop.f32.mrb[195].mxu0 }
0x3be5   :  { %v6451_v35 = vpack.c.bf16 %v6439_v40, %v6436_v58 }
0x3be7   :  { %13346 = vmatprep.mubr.msk.bf16.mxu0 %vm959_vm5, %v6451_v35 }
0x3be8   :  { %13347 = vmatmul.mubr.msk.bf16.vlgmr.msra.gmra.mrb[196].mxu0 %vm959_vm5, %v6452_v59 }
0x3be9   :  { %13359 = vmatpush3.bf16.msra.mxu0 %v14088_v60  ;;  %13362 = vmatprep.mubr.msk.bf16.mxu0 %vm178_vm2, %v15423_v55 }
0x3bea   :  { %13360 = vmatprep.subr.bf16.mxu0 %v14089_v11 }
0x3bed   :  { %13361 = vmatpush3.bf16.msra.mxu0 %v14089_v11  ;;  %v7094_v11 = vld [vmem:[#allocation2 + $0x3c8] sm:$0x1] }
0x3bf0   :  { %13363 = vmatmul.mubr.msk.bf16.vlgmr.msra.gmra.mrb[200].mxu0 %vm178_vm2, %v15430_v54 }
0x3bf1   :  { %13378 = vmatprep.mubr.msk.bf16.mxu0 %vm959_vm5, %v6723_v43 }
0x3cbb   :  { %v15531_v61 = vpop.f32.mrb[196].mxu0 }
0x3cbc   :  { %v15533_v63 = vpop.f32.mrb[197].mxu0 }
0x3cbd   :  { %v13349_v17 = vpop.f32.mrb[198].mxu0 }
0x3cbe   :  { %v15535_v20 = vpop.f32.mrb[199].mxu0 }
0x3cc3   :  { %v13364_v13 = vpop.f32.mrb[200].mxu0 }
0x3cc4   :  { %v6639_v10 = vpop.f32.mrb[201].mxu0  ;;  %v6648_v23 = vadd.f32 %v13364_v13, %v6592_v8 }
0x3cc5   :  { %v13365_v6 = vpop.f32.mrb[202].mxu0  ;;  %v6640_v7 = vadd.f32 %v6639_v10, %v6592_v8  ;;  %v7095_v10 = vunpack.c.l.bf16 %v7094_v11 }
0x3cc6   :  { %v6642_v38 = vpop.f32.mrb[203].mxu0  ;;  %v6726_v43 = vpack.c.bf16 %v6648_v23, %v6648_v23 }
0x3cc7   :  { %v6643_v9 = vadd.f32 %v6642_v38, %v6592_v8  ;;  %v7099_v38 = vrot.slane %v7095_v10, %v14658_v48 }
0x3cc8   :  { %v6737_v41 = vsel %vm959_vm5, %v6726_v43, 0 }
0x3cc9   :  { %v6725_v25 = vpack.c.bf16 %v6643_v9, %v6640_v7 }
0x3ccb   :  { %13978 = vmatprep.subr.msk.bf16.mxu0 %vm959_vm5, %v6725_v25  ;;  %v6734_v32 = vsel %vm959_vm5, %v6725_v25, 0 }
0x3ccc   :  { %13375 = vmatpush3.bf16.xpose.msra.mxu0 %v6734_v32 }
0x3ccd   :  { %13979 = vmatprep.subr.msk.bf16.mxu0 %vm959_vm5, %v6726_v43 }
0x3cd4   :  { %13377 = vmatpush3.bf16.xpose.msra.mxu0 %v6737_v41 }
0x3cd5   :  { %13396 = vmatprep.subr.bf16.mxu0 %v14090_v44 }
0x3cdb   :  { %13379 = vmatmul.mubr.msk.bf16.vlgmr.msra.gmra.mrb[204].mxu0 %vm959_vm5, %v6724_v50 }
0x3cdc   :  { %13397 = vmatpush3.bf16.msra.mxu0 %v14090_v44  ;;  %13400 = vmatprep.mubr.msk.bf16.mxu0 %vm178_vm2, %v15423_v55 }
0x3cdd   :  { %13398 = vmatprep.subr.bf16.mxu0 %v14091_v53 }
0x3ce0   :  { %13399 = vmatpush3.bf16.msra.mxu0 %v14091_v53 }
0x3ce1   :  { %13412 = vmatprep.subr.bf16.mxu0 %v14092_v30 }
0x3ce3   :  { %13401 = vmatmul.mubr.msk.bf16.vlgmr.msra.gmra.mrb[208].mxu0 %vm178_vm2, %v15430_v54 }
0x3ce4   :  { %13413 = vmatpush3.bf16.msra.mxu0 %v14092_v30  ;;  %13416 = vmatprep.mubr.msk.bf16.mxu0 %vm178_vm2, %v15423_v55 }
0x3ce5   :  { %13414 = vmatprep.subr.bf16.mxu0 %v14093_v45 }
0x3ce8   :  { %13415 = vmatpush3.bf16.msra.mxu0 %v14093_v45 }
0x3ceb   :  { %13417 = vmatmul.mubr.msk.bf16.vlgmr.msra.gmra.mrb[212].mxu0 %vm178_vm2, %v15430_v54 }
0x3dae   :  { %v13380_v46 = vpop.f32.mrb[204].mxu0 }
0x3daf   :  { %v6773_v21 = vpop.f32.mrb[205].mxu0  ;;  %v6789_v29 = vmul.f32 0.35355338, %v13380_v46 }
0x3db0   :  { %v6787_v56 = vmul.f32 0.35355338, %v6773_v21  ;;  %v13381_v14 = vpop.f32.mrb[206].mxu0 }
0x3db1   :  { %v6776_v12 = vpop.f32.mrb[207].mxu0  ;;  %v6792_v58 = vadd.f32 %v15491_v22, %v6789_v29 }
0x3db2   :  { %v6788_v47 = vmul.f32 0.35355338, %v6776_v12  ;;  %v6790_v18 = vadd.f32 %v15483_v62, %v6787_v56 }
0x3db3   :  { %v6799_v17 = vsel %vm1033_vm6, %v6792_v58, -inf }
0x3db4   :  { %v6793_v60 = vsel %vm1026_vm7, %v6790_v18, -inf  ;;  %v6791_v57 = vadd.f32 %v15488_v3, %v6788_v47 }
0x3db5   :  { %6794 = vmax.xlane.f32.xlu0 %v6793_v60 }
0x3db6   :  { %v13402_v31 = vpop.f32.mrb[208].mxu0  ;;  %v6796_v40 = vsel %vm1026_vm7, %v6791_v57, -inf }
0x3db7   :  { %v15559_v35 = vadd.f32 %v13402_v31, %v6959_v37  ;;  %v7006_v59 = vpop.f32.mrb[209].mxu0  ;;  %6797 = vmax.xlane.f32.xlu1 %v6796_v40 }
0x3db8   :  { %v13403_v0 = vpop.f32.mrb[210].mxu0  ;;  %v15562_v8 = vadd.f32 %v7006_v59, %v6959_v37 }
0x3db9   :  { %6800 = vmax.xlane.f32.xlu0 %v6799_v17  ;;  %v7009_v5 = vpop.f32.mrb[211].mxu0 }
0x3dba   :  { %v15564_v13 = vadd.f32 %v7009_v5, %v6959_v37 }
0x3dbc   :  { %v7160_v6 = vpack.c.bf16 %v15564_v13, %v15562_v8 }
0x3dbe   :  { %v13418_v23 = vpop.f32.mrb[212].mxu0 }
0x3dbf   :  { %v7146_v7 = vpop.f32.mrb[213].mxu0  ;;  %v7155_v43 = vadd.f32 %v13418_v23, %v7099_v38 }
0x3dc0   :  { %v13419_v9 = vpop.f32.mrb[214].mxu0  ;;  %v7147_v32 = vadd.f32 %v7146_v7, %v7099_v38  ;;  %v6887_v7 = vld [vmem:[#allocation2 + $0x37c] sm:$0xf] }
0x3dc1   :  { %v7149_v25 = vpop.f32.mrb[215].mxu0  ;;  %v7266_v50 = vpack.c.bf16 %v7155_v43, %v7155_v43  ;;  %13981 = vmatprep.subr.msk.bf16.mxu1 %vm1131_vm8, %v6887_v7  ;;  %v6897_v9 = vsel %vm1131_vm8, %v6887_v7, 0  ;;  %v14099_v7 = vld [vmem:[#allocation2 + $0x3f4] sm:$0xff]  }
0x3dc2   :  { %v7150_v44 = vadd.f32 %v7149_v25, %v7099_v38  ;;  %v14094_v25 = vld [vmem:[#allocation2 + $0x39c] sm:$0xff]  }
0x3dc3   :  { %v7274_v53 = vsel %vm293_vm4, %v7266_v50, 0 }
0x3dc4   :  { %v7265_v41 = vpack.c.bf16 %v7150_v44, %v7147_v32 }
0x3dc6   :  { %13428 = vmatprep.subr.bf16.mxu0 %v7265_v41 }
0x3dc7   :  { %13429 = vmatpush3.bf16.msra.mxu0 %v7265_v41 }
0x3dc8   :  { %13984 = vmatprep.subr.msk.bf16.mxu0 %vm293_vm4, %v7266_v50 }
0x3dcb   :  { %13431 = vmatpush3.bf16.msra.mxu0 %v7274_v53 }
0x3e42   :  { %v6795_v30 = vpop.xlane.xlu0 %6794 }
0x3e43   :  { %v6802_v45 = vsub.f32 %v6790_v18, %v6795_v30  ;;  %v14095_v30 = vld [vmem:[#allocation2 + $0x3a4] sm:$0xff]  }
0x3e44   :  { %v6798_v15 = vpop.xlane.xlu1 %6797 }
0x3e45   :  { %v6805_v46 = vmul.f32 1.442695, %v6802_v45  ;;  %v6803_v21 = vsub.f32 %v6791_v57, %v6798_v15  ;;  %v6061_v45 = vld [vmem:[#allocation2 + $0x40c] sm:$0x1] }
0x3e46   :  { %v6801_v39 = vpop.xlane.xlu0 %6800  ;;  %v6062_v15 = vunpack.c.l.bf16 %v6061_v45 }
0x3e47   :  { %14294 = vpow2.f32 %v6805_v46  ;;  %v6807_v29 = vmul.f32 1.442695, %v6803_v21  ;;  %v6804_v56 = vsub.f32 %v6792_v58, %v6801_v39 }
0x3e48   :  { %v6066_v46 = vrot.slane %v6062_v15, %v14658_v48 }
0x3e49   :  { %14296 = vpow2.f32 %v6807_v29  ;;  %v6809_v14 = vmul.f32 1.442695, %v6804_v56 }
0x3e4a   :  { %v6512_v21 = vadd.f32 %v15531_v61, %v6066_v46  ;;  %v6510_v39 = vadd.f32 %v15533_v63, %v6066_v46 }
0x3e4b   :  { %14298 = vpow2.f32 %v6809_v14 }
0x3e51   :  { %v14295_v12 = vpop.eup %14294 }
0x3e52   :  { %v6811_v47 = vsel %vm1026_vm7, %v14295_v12, 0.0 }
0x3e53   :  { %v14297_v37 = vpop.eup %14296  ;;  %6812 = vadd.xlane.f32.xlu1 %v6811_v47  ;;  %v6511_v47 = vadd.f32 %v15535_v20, %v6066_v46 }
0x3e54   :  { %v6814_v60 = vsel %vm1026_vm7, %v14297_v37, 0.0 }
0x3e55   :  { %v14299_v31 = vpop.eup %14298  ;;  %6815 = vadd.xlane.f32.xlu0 %v6814_v60 }
0x3e56   :  { %v6817_v18 = vsel %vm1033_vm6, %v14299_v31, 0.0 }
0x3e57   :  { %6818 = vadd.xlane.f32.xlu1 %v6817_v18 }
0x3ee0   :  { %v6813_v57 = vpop.xlane.xlu1 %6812 }
0x3ee1   :  { %14300 = vrcp.f32 %v6813_v57 }
0x3ee2   :  { %v6816_v40 = vpop.xlane.xlu0 %6815 }
0x3ee3   :  { %14302 = vrcp.f32 %v6816_v40 }
0x3ee4   :  { %v6819_v58 = vpop.xlane.xlu1 %6818 }
0x3ee5   :  { %14304 = vrcp.f32 %v6819_v58 }
0x3eeb   :  { %v14301_v59 = vpop.eup %14300 }
0x3eec   :  { %v6823_v0 = vmul.f32 %v14301_v59, %v14295_v12  ;;  %v7024_v12 = vld [vmem:[#allocation2 + $0x3c4] sm:$0x1] }
0x3eed   :  { %v14303_v11 = vpop.eup %14302  ;;  %v7025_v60 = vunpack.c.l.bf16 %v7024_v12 }
0x3eee   :  { %v6824_v17 = vmul.f32 %v14303_v11, %v14297_v37 }
0x3eef   :  { %v14305_v5 = vpop.eup %14304 }
0x3ef0   :  { %v6825_v10 = vmul.f32 %v14305_v5, %v14299_v31  ;;  %v6826_v38 = vpack.c.bf16 %v6824_v17, %v6823_v0  ;;  %v7029_v31 = vrot.slane %v7025_v60, %v14658_v48  ;;  %v14096_v17 = vld [vmem:[#allocation2 + $0x3cc] sm:$0xff]  }
0x3ef2   :  { %13386 = vmatprep.mubr.msk.bf16.mxu1 %vm1026_vm7, %v6826_v38  ;;  %v6827_v23 = vpack.c.bf16 %v6825_v10, %v6825_v10  ;;  %v7161_v10 = vpack.c.bf16 %v15559_v35, %v15559_v35  ;;  %v14097_v38 = vld [vmem:[#allocation2 + $0x3d4] sm:$0xff]   ;;  %v7391_v35 = vld [vmem:[#allocation2 + $0x400] sm:$0x1] }
0x3ef4   :  { %13387 = vmatmul.mubr.msk.bf16.vlgmr.msra.gmra.mrb[188].mxu1 %vm1026_vm7, %v6827_v23  ;;  %v14098_v23 = vld [vmem:[#allocation2 + $0x3ec] sm:$0xff]  }
0x3ef5   :  { %13391 = vmatpush3.bf16.msra.mxu1 %v6897_v9 }
0x3ef6   :  { %13404 = vmatprep.subr.bf16.mxu1 %v14094_v25 }
0x3fc7   :  { %v13388_v43 = vpop.f32.mrb[188].mxu1 }
0x3fc8   :  { %v6873_v32 = vpop.f32.mrb[189].mxu1  ;;  %v6889_v53 = vpack.c.bf16 %v13388_v43, %v13388_v43  ;;  %v7392_v43 = vunpack.c.l.bf16 %v7391_v35 }
0x3fc9   :  { %v13389_v44 = vpop.f32.mrb[190].mxu1 }
0x3fca   :  { %v6876_v41 = vpop.f32.mrb[191].mxu1  ;;  %v7396_v45 = vrot.slane %v7392_v43, %v14658_v48 }
0x3fcb   :  { %v6888_v50 = vpack.c.bf16 %v6876_v41, %v6873_v32 }
0x3fcd   :  { %13392 = vmatprep.mubr.msk.bf16.mxu1 %vm959_vm5, %v6888_v50 }
0x3fce   :  { %13393 = vmatmul.mubr.msk.bf16.vlgmr.msra.gmra.mrb[192].mxu1 %vm959_vm5, %v6889_v53 }
0x3fcf   :  { %13405 = vmatpush3.bf16.msra.mxu1 %v14094_v25  ;;  %13408 = vmatprep.mubr.msk.bf16.mxu1 %vm178_vm2, %v15423_v55 }
0x3fd0   :  { %13406 = vmatprep.subr.bf16.mxu1 %v14095_v30 }
0x3fd3   :  { %13407 = vmatpush3.bf16.msra.mxu1 %v14095_v30 }
0x3fd6   :  { %13409 = vmatmul.mubr.msk.bf16.vlgmr.msra.gmra.mrb[196].mxu1 %vm178_vm2, %v15430_v54 }
0x3fd7   :  { %13424 = vmatprep.mubr.msk.bf16.mxu1 %vm959_vm5, %v7160_v6 }
0x40a1   :  { %v13394_v29 = vpop.f32.mrb[192].mxu1 }
0x40a2   :  { %v15591_v56 = vadd.f32 %v13394_v29, %v6512_v21  ;;  %v6933_v14 = vpop.f32.mrb[193].mxu1 }
0x40a3   :  { %v15594_v37 = vadd.f32 %v6933_v14, %v6510_v39  ;;  %v13395_v8 = vpop.f32.mrb[194].mxu1 }
0x40a4   :  { %v6936_v13 = vpop.f32.mrb[195].mxu1 }
0x40a5   :  { %v15596_v6 = vadd.f32 %v6936_v13, %v6511_v47  ;;  %v7531_v47 = vld [vmem:[#allocation2 + $0x408] sm:$0x1] }
0x40a9   :  { %v13410_v18 = vpop.f32.mrb[196].mxu1 }
0x40aa   :  { %v7076_v61 = vpop.f32.mrb[197].mxu1  ;;  %v7085_v40 = vadd.f32 %v13410_v18, %v7029_v31 }
0x40ab   :  { %v13411_v57 = vpop.f32.mrb[198].mxu1  ;;  %v7077_v58 = vadd.f32 %v7076_v61, %v7029_v31  ;;  %v7532_v61 = vunpack.c.l.bf16 %v7531_v47 }
0x40ac   :  { %v7079_v63 = vpop.f32.mrb[199].mxu1  ;;  %v7163_v0 = vpack.c.bf16 %v7085_v40, %v7085_v40 }
0x40ad   :  { %v7080_v59 = vadd.f32 %v7079_v63, %v7029_v31  ;;  %v7536_v63 = vrot.slane %v7532_v61, %v14658_v48 }
0x40ae   :  { %v7174_v5 = vsel %vm959_vm5, %v7163_v0, 0 }
0x40af   :  { %v7162_v11 = vpack.c.bf16 %v7080_v59, %v7077_v58 }
0x40b1   :  { %13982 = vmatprep.subr.msk.bf16.mxu1 %vm959_vm5, %v7162_v11  ;;  %v7171_v20 = vsel %vm959_vm5, %v7162_v11, 0 }
0x40b2   :  { %13421 = vmatpush3.bf16.xpose.msra.mxu1 %v7171_v20 }
0x40b3   :  { %13983 = vmatprep.subr.msk.bf16.mxu1 %vm959_vm5, %v7163_v0 }
0x40ba   :  { %13423 = vmatpush3.bf16.xpose.msra.mxu1 %v7174_v5 }
0x40bb   :  { %13442 = vmatprep.subr.bf16.mxu1 %v14096_v17 }
0x40c1   :  { %13425 = vmatmul.mubr.msk.bf16.vlgmr.msra.gmra.mrb[200].mxu1 %vm959_vm5, %v7161_v10 }
0x40c2   :  { %13443 = vmatpush3.bf16.msra.mxu1 %v14096_v17  ;;  %13446 = vmatprep.mubr.msk.bf16.mxu1 %vm178_vm2, %v15423_v55 }
0x40c3   :  { %13444 = vmatprep.subr.bf16.mxu1 %v14097_v38 }
0x40c6   :  { %13445 = vmatpush3.bf16.msra.mxu1 %v14097_v38 }
0x40c7   :  { %13458 = vmatprep.subr.bf16.mxu1 %v14098_v23 }
0x40c9   :  { %13447 = vmatmul.mubr.msk.bf16.vlgmr.msra.gmra.mrb[204].mxu1 %vm178_vm2, %v15430_v54 }
0x40ca   :  { %13459 = vmatpush3.bf16.msra.mxu1 %v14098_v23  ;;  %13462 = vmatprep.mubr.msk.bf16.mxu1 %vm178_vm2, %v15423_v55 }
0x40cb   :  { %13460 = vmatprep.subr.bf16.mxu1 %v14099_v7 }
0x40ce   :  { %13461 = vmatpush3.bf16.msra.mxu1 %v14099_v7 }
0x40d1   :  { %13463 = vmatmul.mubr.msk.bf16.vlgmr.msra.gmra.mrb[208].mxu1 %vm178_vm2, %v15430_v54 }
0x4194   :  { %v13426_v9 = vpop.f32.mrb[200].mxu1 }
0x4195   :  { %v7210_v25 = vpop.f32.mrb[201].mxu1  ;;  %v7226_v32 = vmul.f32 0.35355338, %v13426_v9 }
0x4196   :  { %v7224_v44 = vmul.f32 0.35355338, %v7210_v25  ;;  %v13427_v41 = vpop.f32.mrb[202].mxu1 }
0x4197   :  { %v7213_v50 = vpop.f32.mrb[203].mxu1  ;;  %v7229_v21 = vadd.f32 %v15491_v22, %v7226_v32 }
0x4198   :  { %v7225_v53 = vmul.f32 0.35355338, %v7213_v50  ;;  %v7227_v30 = vadd.f32 %v15483_v62, %v7224_v44 }
0x4199   :  { %v7236_v13 = vsel %vm1033_vm6, %v7229_v21, -inf }
0x419a   :  { %v7230_v15 = vsel %vm1026_vm7, %v7227_v30, -inf  ;;  %v7228_v46 = vadd.f32 %v15488_v3, %v7225_v53 }
0x419b   :  { %7231 = vmax.xlane.f32.xlu0 %v7230_v15 }
0x419c   :  { %v13448_v39 = vpop.f32.mrb[204].mxu1  ;;  %v7233_v29 = vsel %vm1026_vm7, %v7228_v46, -inf }
0x419d   :  { %v15620_v14 = vadd.f32 %v13448_v39, %v7396_v45  ;;  %v7443_v12 = vpop.f32.mrb[205].mxu1  ;;  %7234 = vmax.xlane.f32.xlu1 %v7233_v29 }
0x419e   :  { %v13449_v8 = vpop.f32.mrb[206].mxu1  ;;  %v15623_v31 = vadd.f32 %v7443_v12, %v7396_v45 }
0x419f   :  { %7237 = vmax.xlane.f32.xlu0 %v7236_v13  ;;  %v7446_v60 = vpop.f32.mrb[207].mxu1 }
0x41a0   :  { %v15625_v18 = vadd.f32 %v7446_v60, %v7396_v45 }
0x41a2   :  { %v7597_v57 = vpack.c.bf16 %v15625_v18, %v15623_v31 }
0x41a4   :  { %v13464_v40 = vpop.f32.mrb[208].mxu1 }
0x41a5   :  { %v7583_v58 = vpop.f32.mrb[209].mxu1  ;;  %v7592_v0 = vadd.f32 %v13464_v40, %v7536_v63 }
0x41a6   :  { %v13465_v59 = vpop.f32.mrb[210].mxu1  ;;  %v7584_v20 = vadd.f32 %v7583_v58, %v7536_v63  ;;  %v7324_v58 = vld [vmem:[#allocation2 + $0x3bc] sm:$0xf] }
0x41a7   :  { %v7586_v11 = vpop.f32.mrb[211].mxu1  ;;  %v7703_v10 = vpack.c.bf16 %v7592_v0, %v7592_v0  ;;  %13985 = vmatprep.subr.msk.bf16.mxu0 %vm1131_vm8, %v7324_v58  ;;  %v7334_v59 = vsel %vm1131_vm8, %v7324_v58, 0 }
0x41a8   :  { %v7587_v17 = vadd.f32 %v7586_v11, %v7536_v63  ;;  %v14100_v11 = vld [vmem:[#allocation2 + $0x3dc] sm:$0xff]  }
0x41a9   :  { %v7711_v38 = vsel %vm293_vm4, %v7703_v10, 0 }
0x41aa   :  { %v7702_v5 = vpack.c.bf16 %v7587_v17, %v7584_v20 }
0x41ac   :  { %13474 = vmatprep.subr.bf16.mxu1 %v7702_v5 }
0x41ad   :  { %13475 = vmatpush3.bf16.msra.mxu1 %v7702_v5 }
0x41ae   :  { %13988 = vmatprep.subr.msk.bf16.mxu1 %vm293_vm4, %v7703_v10 }
0x41b1   :  { %13477 = vmatpush3.bf16.msra.mxu1 %v7711_v38 }
0x4228   :  { %v7232_v23 = vpop.xlane.xlu0 %7231 }
0x4229   :  { %v7239_v7 = vsub.f32 %v7227_v30, %v7232_v23  ;;  %v14101_v23 = vld [vmem:[#allocation2 + $0x3e4] sm:$0xff]  }
0x422a   :  { %v7235_v35 = vpop.xlane.xlu1 %7234 }
0x422b   :  { %v7242_v9 = vmul.f32 1.442695, %v7239_v7  ;;  %v7240_v25 = vsub.f32 %v7228_v46, %v7235_v35 }
0x422c   :  { %v7238_v43 = vpop.xlane.xlu0 %7237 }
0x422d   :  { %14306 = vpow2.f32 %v7242_v9  ;;  %v7244_v32 = vmul.f32 1.442695, %v7240_v25  ;;  %v7241_v44 = vsub.f32 %v7229_v21, %v7238_v43  ;;  %v7461_v25 = vld [vmem:[#allocation2 + $0x404] sm:$0x1] }
0x422f   :  { %14308 = vpow2.f32 %v7244_v32  ;;  %v7246_v41 = vmul.f32 1.442695, %v7241_v44 }
0x4231   :  { %14310 = vpow2.f32 %v7246_v41 }
0x4237   :  { %v14307_v50 = vpop.eup %14306 }
0x4238   :  { %v7248_v53 = vsel %vm1026_vm7, %v14307_v50, 0.0 }
0x4239   :  { %v14309_v45 = vpop.eup %14308  ;;  %7249 = vadd.xlane.f32.xlu1 %v7248_v53 }
0x423a   :  { %v7251_v15 = vsel %vm1026_vm7, %v14309_v45, 0.0 }
0x423b   :  { %v14311_v39 = vpop.eup %14310  ;;  %7252 = vadd.xlane.f32.xlu0 %v7251_v15 }
0x423c   :  { %v7254_v30 = vsel %vm1033_vm6, %v14311_v39, 0.0 }
0x423d   :  { %7255 = vadd.xlane.f32.xlu1 %v7254_v30 }
0x42c6   :  { %v7250_v46 = vpop.xlane.xlu1 %7249 }
0x42c7   :  { %14312 = vrcp.f32 %v7250_v46 }
0x42c8   :  { %v7253_v29 = vpop.xlane.xlu0 %7252 }
0x42c9   :  { %14314 = vrcp.f32 %v7253_v29  ;;  %v7598_v29 = vpack.c.bf16 %v15620_v14, %v15620_v14 }
0x42ca   :  { %v7256_v21 = vpop.xlane.xlu1 %7255 }
0x42cb   :  { %14316 = vrcp.f32 %v7256_v21 }
0x42d1   :  { %v14313_v12 = vpop.eup %14312 }
0x42d2   :  { %v7260_v8 = vmul.f32 %v14313_v12, %v14307_v50  ;;  %v7462_v50 = vunpack.c.l.bf16 %v7461_v25 }
0x42d3   :  { %v14315_v47 = vpop.eup %14314 }
0x42d4   :  { %v7261_v13 = vmul.f32 %v14315_v47, %v14309_v45  ;;  %v7466_v53 = vrot.slane %v7462_v50, %v14658_v48 }
0x42d5   :  { %v14317_v60 = vpop.eup %14316 }
0x42d6   :  { %v7262_v61 = vmul.f32 %v14317_v60, %v14311_v39  ;;  %v7263_v63 = vpack.c.bf16 %v7261_v13, %v7260_v8 }
0x42d8   :  { %13432 = vmatprep.mubr.msk.bf16.mxu0 %vm1026_vm7, %v7263_v63  ;;  %v7264_v40 = vpack.c.bf16 %v7262_v61, %v7262_v61 }
0x42da   :  { %13433 = vmatmul.mubr.msk.bf16.vlgmr.msra.gmra.mrb[216].mxu0 %vm1026_vm7, %v7264_v40 }
0x42db   :  { %13437 = vmatpush3.bf16.msra.mxu0 %v7334_v59 }
0x42dc   :  { %13450 = vmatprep.subr.bf16.mxu0 %v14100_v11 }
0x43ad   :  { %v13434_v0 = vpop.f32.mrb[216].mxu0 }
0x43ae   :  { %v7310_v20 = vpop.f32.mrb[217].mxu0  ;;  %v7326_v38 = vpack.c.bf16 %v13434_v0, %v13434_v0 }
0x43af   :  { %v13435_v17 = vpop.f32.mrb[218].mxu0 }
0x43b0   :  { %v7313_v5 = vpop.f32.mrb[219].mxu0 }
0x43b1   :  { %v7325_v10 = vpack.c.bf16 %v7313_v5, %v7310_v20 }
0x43b3   :  { %13438 = vmatprep.mubr.msk.bf16.mxu0 %vm959_vm5, %v7325_v10 }
0x43b4   :  { %13439 = vmatmul.mubr.msk.bf16.vlgmr.msra.gmra.mrb[220].mxu0 %vm959_vm5, %v7326_v38 }
0x43b5   :  { %13451 = vmatpush3.bf16.msra.mxu0 %v14100_v11  ;;  %13454 = vmatprep.mubr.msk.bf16.mxu0 %vm178_vm2, %v15423_v55 }
0x43b6   :  { %13452 = vmatprep.subr.bf16.mxu0 %v14101_v23 }
0x43b9   :  { %13453 = vmatpush3.bf16.msra.mxu0 %v14101_v23 }
0x43bc   :  { %13455 = vmatmul.mubr.msk.bf16.vlgmr.msra.gmra.mrb[224].mxu0 %vm178_vm2, %v15430_v54 }
0x43bd   :  { %13470 = vmatprep.mubr.msk.bf16.mxu0 %vm959_vm5, %v7597_v57 }
0x4487   :  { %v13440_v7 = vpop.f32.mrb[220].mxu0 }
0x4488   :  { %v15650_v35 = vadd.f32 %v13440_v7, %v15591_v56  ;;  %v7370_v9 = vpop.f32.mrb[221].mxu0 }
0x4489   :  { %v15653_v43 = vadd.f32 %v7370_v9, %v15594_v37  ;;  %v13441_v32 = vpop.f32.mrb[222].mxu0  ;;  %v6026_v9 = vadd.f32 %v15509_v34, %v15384_v51 }
0x448a   :  { %v7373_v44 = vpop.f32.mrb[223].mxu0 }
0x448b   :  { %v15656_v41 = vadd.f32 %v7373_v44, %v15596_v6 }
0x448f   :  { %v13456_v31 = vpop.f32.mrb[224].mxu0 }
0x4490   :  { %v7513_v18 = vpop.f32.mrb[225].mxu0  ;;  %v7522_v15 = vadd.f32 %v13456_v31, %v7466_v53 }
0x4491   :  { %v13457_v57 = vpop.f32.mrb[226].mxu0  ;;  %v7514_v56 = vadd.f32 %v7513_v18, %v7466_v53  ;;  %v6030_v18 = vadd.f32 %v6026_v9, %v15446_v52 }
0x4492   :  { %v7516_v45 = vpop.f32.mrb[227].mxu0  ;;  %v7600_v46 = vpack.c.bf16 %v7522_v15, %v7522_v15 }
0x4493   :  { %v7517_v39 = vadd.f32 %v7516_v45, %v7466_v53 }
0x4494   :  { %v7611_v6 = vsel %vm959_vm5, %v7600_v46, 0 }
0x4495   :  { %v7599_v30 = vpack.c.bf16 %v7517_v39, %v7514_v56 }
0x4497   :  { %13986 = vmatprep.subr.msk.bf16.mxu0 %vm959_vm5, %v7599_v30  ;;  %v7608_v37 = vsel %vm959_vm5, %v7599_v30, 0 }
0x4498   :  { %13467 = vmatpush3.bf16.xpose.msra.mxu0 %v7608_v37 }
0x4499   :  { %13987 = vmatprep.subr.msk.bf16.mxu0 %vm959_vm5, %v7600_v46 }
0x44a0   :  { %13469 = vmatpush3.bf16.xpose.msra.mxu0 %v7611_v6 }
0x44a1   :  { %13488 = vmatprep.subr.bf16.mxu0 %v14510_v36 }
0x44a7   :  { %13471 = vmatmul.mubr.msk.bf16.vlgmr.msra.gmra.mrb[228].mxu0 %vm959_vm5, %v7598_v29 }
0x44a8   :  { %13492 = vmatprep.mubr.msk.bf16.mxu0 %vm14511_vm3, %v14510_v36 }
0x457a   :  { %v13472_v21 = vpop.f32.mrb[228].mxu0 }
0x457b   :  { %v7647_v12 = vpop.f32.mrb[229].mxu0  ;;  %v7663_v47 = vmul.f32 0.35355338, %v13472_v21 }
0x457c   :  { %v7661_v8 = vmul.f32 0.35355338, %v7647_v12  ;;  %v13473_v13 = vpop.f32.mrb[230].mxu0 }
0x457d   :  { %v7650_v60 = vpop.f32.mrb[231].mxu0  ;;  %v7666_v14 = vadd.f32 %v15491_v22, %v7663_v47  ;;  %v6023_v22 = vadd.f32 %v15507_v1, %v15384_v51  ;;  %v6034_v51 = vsel %vm5576_vm13, %v6030_v18, 0.0 }
0x457e   :  { %v7662_v61 = vmul.f32 0.35355338, %v7650_v60  ;;  %v7664_v63 = vadd.f32 %v15483_v62, %v7661_v8 }
0x457f   :  { %v7673_v11 = vsel %vm1033_vm6, %v7666_v14, -inf  ;;  %v6029_v50 = vadd.f32 %v6023_v22, %v15443_v24 }
0x4580   :  { %v7667_v40 = vsel %vm1026_vm7, %v7664_v63, -inf  ;;  %v7665_v58 = vadd.f32 %v15488_v3, %v7662_v61 }
0x4581   :  { %7668 = vmax.xlane.f32.xlu0 %v7667_v40  ;;  %v6031_v1 = vsel %vm178_vm2, %v6029_v50, 0.0  ;;  %v14102_v40 = vld [vmem:[#allocation2 + $0x410] sm:$0xff]  }
0x4582   :  { %v7670_v59 = vsel %vm1026_vm7, %v7665_v58, -inf  ;;  %13489 = vmatpush3.bf16.msra.mxu0 %v14102_v40 }
0x4583   :  { %7671 = vmax.xlane.f32.xlu1 %v7670_v59  ;;  %13490 = vmatprep.subr.bf16.mxu0 %v14510_v36 }
0x4585   :  { %7674 = vmax.xlane.f32.xlu0 %v7673_v11 }
0x460e   :  { %v7669_v0 = vpop.xlane.xlu0 %7668 }
0x460f   :  { %v7676_v20 = vsub.f32 %v7664_v63, %v7669_v0 }
0x4610   :  { %v7672_v17 = vpop.xlane.xlu1 %7671 }
0x4611   :  { %v7679_v5 = vmul.f32 1.442695, %v7676_v20  ;;  %v7677_v10 = vsub.f32 %v7665_v58, %v7672_v17  ;;  %v14103_v58 = vld [vmem:[#allocation2 + $0x418] sm:$0xff]  }
0x4612   :  { %v7675_v38 = vpop.xlane.xlu0 %7674  ;;  %13491 = vmatpush3.bf16.msra.mxu0 %v14103_v58 }
0x4613   :  { %14318 = vpow2.f32 %v7679_v5  ;;  %v7681_v62 = vmul.f32 1.442695, %v7677_v10  ;;  %v7678_v23 = vsub.f32 %v7666_v14, %v7675_v38  ;;  %13504 = vmatprep.subr.bf16.mxu0 %v14510_v36  ;;  %v7761_v14 = vld [vmem:[#allocation2 + $0x3fc] sm:$0xf] }
0x4614   :  { %13989 = vmatprep.subr.msk.bf16.mxu1 %vm1131_vm8, %v7761_v14  ;;  %v7771_v59 = vsel %vm1131_vm8, %v7761_v14, 0  ;;  %v7902_v14 = vld [vmem:[#allocation2 + $0x448] sm:$0x1] }
0x4615   :  { %14320 = vpow2.f32 %v7681_v62  ;;  %v7683_v3 = vmul.f32 1.442695, %v7678_v23 }
0x4617   :  { %14322 = vpow2.f32 %v7683_v3 }
0x461d   :  { %v14319_v7 = vpop.eup %14318 }
0x461e   :  { %v7685_v25 = vsel %vm1026_vm7, %v14319_v7, 0.0 }
0x461f   :  { %v14321_v32 = vpop.eup %14320  ;;  %7686 = vadd.xlane.f32.xlu1 %v7685_v25 }
0x4620   :  { %v7688_v44 = vsel %vm1026_vm7, %v14321_v32, 0.0 }
0x4621   :  { %v14323_v53 = vpop.eup %14322  ;;  %7689 = vadd.xlane.f32.xlu0 %v7688_v44 }
0x4622   :  { %v7691_v31 = vsel %vm1033_vm6, %v14323_v53, 0.0 }
0x4623   :  { %7692 = vadd.xlane.f32.xlu1 %v7691_v31 }
0x4625   :  { %6032 = vadd.xlane.f32.xlu0 %v6031_v1  ;;  %v14106_v1 = vld [vmem:[#allocation2 + $0x420] sm:$0xff]  }
0x4627   :  { %6035 = vadd.xlane.f32.xlu1 %v6034_v51 }
0x46ac   :  { %v7687_v34 = vpop.xlane.xlu1 %7686 }
0x46ad   :  { %14324 = vrcp.f32 %v7687_v34  ;;  %v14107_v34 = vld [vmem:[#allocation2 + $0x428] sm:$0xff]  }
0x46ae   :  { %v7690_v57 = vpop.xlane.xlu0 %7689 }
0x46af   :  { %14326 = vrcp.f32 %v7690_v57  ;;  %v7836_v57 = vld [vmem:[#allocation2 + $0x444] sm:$0x1] }
0x46b0   :  { %v7693_v45 = vpop.xlane.xlu1 %7692 }
0x46b1   :  { %14328 = vrcp.f32 %v7693_v45  ;;  %v7837_v45 = vunpack.c.l.bf16 %v7836_v57 }
0x46b2   :  { %v6033_v24 = vpop.xlane.xlu0 %6032 }
0x46b3   :  { %v6037_v15 = vmul.f32 0.03125, %v6033_v24  ;;  %v7841_v24 = vrot.slane %v7837_v45, %v14658_v48 }
0x46b4   :  { %v6036_v56 = vpop.xlane.xlu1 %6035 }
0x46b5   :  { %v6039_v39 = vsub.f32 %v6029_v50, %v6037_v15  ;;  %v6038_v30 = vmul.f32 0.03125, %v6036_v56  ;;  %v14105_v50 = vld [vmem:[#allocation2 + $0x438] sm:$0xff]   ;;  %v7965_v56 = vld [vmem:[#allocation2 + $0x44c] sm:$0x1] }
0x46b7   :  { %v14325_v46 = vpop.eup %14324  ;;  %v6040_v52 = vsub.f32 %v6030_v18, %v6038_v30  ;;  %v6041_v37 = vmul.f32 %v6039_v39, %v6039_v39 }
0x46b8   :  { %v7697_v12 = vmul.f32 %v14325_v46, %v14319_v7 }
0x46b9   :  { %v14327_v6 = vpop.eup %14326  ;;  %v6043_v29 = vsel %vm178_vm2, %v6041_v37, 0.0  ;;  %v6042_v21 = vmul.f32 %v6040_v52, %v6040_v52 }
0x46ba   :  { %6044 = vadd.xlane.f32.xlu0 %v6043_v29  ;;  %v7698_v47 = vmul.f32 %v14327_v6, %v14321_v32  ;;  %v14104_v32 = vld [vmem:[#allocation2 + $0x430] sm:$0xff]   ;;  %v7966_v6 = vunpack.c.l.bf16 %v7965_v56 }
0x46bb   :  { %v14329_v8 = vpop.eup %14328  ;;  %v6046_v13 = vsel %vm5576_vm13, %v6042_v21, 0.0 }
0x46bc   :  { %v7699_v60 = vmul.f32 %v14329_v8, %v14323_v53  ;;  %6047 = vadd.xlane.f32.xlu1 %v6046_v13  ;;  %v7700_v61 = vpack.c.bf16 %v7698_v47, %v7697_v12  ;;  %v7970_v21 = vrot.slane %v7966_v6, %v14658_v48 }
0x46be   :  { %13478 = vmatprep.mubr.msk.bf16.mxu1 %vm1026_vm7, %v7700_v61  ;;  %v7701_v63 = vpack.c.bf16 %v7699_v60, %v7699_v60 }
0x46c0   :  { %13479 = vmatmul.mubr.msk.bf16.vlgmr.msra.gmra.mrb[212].mxu1 %vm1026_vm7, %v7701_v63 }
0x46c1   :  { %13483 = vmatpush3.bf16.msra.mxu1 %v7771_v59 }
0x46c2   :  { %13496 = vmatprep.subr.bf16.mxu1 %v14510_v36 }
0x4747   :  { %v6045_v11 = vpop.xlane.xlu0 %6044 }
0x4748   :  { %v6049_v0 = vmul.f32 0.03125, %v6045_v11 }
0x4749   :  { %v6048_v20 = vpop.xlane.xlu1 %6047 }
0x474a   :  { %v6051_v17 = vadd.f32 1e-05, %v6049_v0  ;;  %v6050_v5 = vmul.f32 0.03125, %v6048_v20 }
0x474c   :  { %14330 = vrsqrt.f32 %v6051_v17  ;;  %v6052_v10 = vadd.f32 1e-05, %v6050_v5  ;;  %v7903_v5 = vunpack.c.l.bf16 %v7902_v14  ;;  %v14111_v14 = vld [vmem:[#allocation2 + $0x478] sm:$0xff]  }
0x474e   :  { %14332 = vrsqrt.f32 %v6052_v10 }
0x4756   :  { %v14331_v38 = vpop.eup %14330 }
0x4757   :  { %v6055_v62 = vmul.f32 %v14331_v38, %v6039_v39  ;;  %v7907_v38 = vrot.slane %v7903_v5, %v14658_v48  ;;  %v8203_v5 = vld [vmem:[#allocation2 + $0x484] sm:$0x1] }
0x4758   :  { %v14333_v23 = vpop.eup %14332 }
0x4759   :  { %v6057_v3 = vmul.f32 %v6055_v62, %v15406_v42  ;;  %v6056_v22 = vmul.f32 %v14333_v23, %v6040_v52 }
0x475b   :  { %v6058_v7 = vmul.f32 %v6056_v22, %v15406_v42  ;;  %v15698_v9 = vadd.f32 %v6057_v3, %v15410_v16 }
0x475d   :  { %v15701_v25 = vadd.f32 %v6058_v7, %v15410_v16 }
0x475f   :  { %v15705_v44 = vpack.c.bf16 %v15701_v25, %v15698_v9 }
0x4761   :  { %13493 = vmatmul.mubr.msk.bf16.vlgmr.msra.gmra.mrb[232].mxu0 %vm178_vm2, %v15705_v44 }
0x4762   :  { %13505 = vmatpush3.bf16.msra.mxu0 %v14104_v32  ;;  %13508 = vmatprep.mubr.msk.bf16.mxu0 %vm14511_vm3, %v14510_v36 }
0x4763   :  { %13506 = vmatprep.subr.bf16.mxu0 %v14510_v36 }
0x4766   :  { %13507 = vmatpush3.bf16.msra.mxu0 %v14105_v50 }
0x4767   :  { %13518 = vmatprep.subr.bf16.mxu0 %v14510_v36 }
0x4769   :  { %13509 = vmatmul.mubr.msk.bf16.vlgmr.msra.gmra.mrb[236].mxu0 %vm178_vm2, %v15705_v44 }
0x476a   :  { %13520 = vmatprep.mubr.msk.bf16.mxu0 %vm14511_vm3, %v14510_v36 }
0x4793   :  { %v13480_v42 = vpop.f32.mrb[212].mxu1 }
0x4794   :  { %v7747_v16 = vpop.f32.mrb[213].mxu1  ;;  %v7763_v51 = vpack.c.bf16 %v13480_v42, %v13480_v42 }
0x4795   :  { %v13481_v53 = vpop.f32.mrb[214].mxu1 }
0x4796   :  { %v7750_v31 = vpop.f32.mrb[215].mxu1 }
0x4797   :  { %v7762_v18 = vpack.c.bf16 %v7750_v31, %v7747_v16 }
0x4799   :  { %13484 = vmatprep.mubr.msk.bf16.mxu1 %vm959_vm5, %v7762_v18  ;;  %v15746_v18 = vld [vmem:[#allocation5 + $0xb0] sm:$0xff] }
0x479a   :  { %13485 = vmatmul.mubr.msk.bf16.vlgmr.msra.gmra.mrb[216].mxu1 %vm959_vm5, %v7763_v51 }
0x479b   :  { %13497 = vmatpush3.bf16.msra.mxu1 %v14106_v1  ;;  %13500 = vmatprep.mubr.msk.bf16.mxu1 %vm14511_vm3, %v14510_v36 }
0x479c   :  { %13498 = vmatprep.subr.bf16.mxu1 %v14510_v36 }
0x479f   :  { %13499 = vmatpush3.bf16.msra.mxu1 %v14107_v34  ;;  %v15750_v34 = vld [vmem:[#allocation5 + $0xb8] sm:$0x3] }
0x47a0   :  { %13512 = vmatprep.subr.bf16.mxu1 %v14510_v36 }
0x47a2   :  { %13501 = vmatmul.mubr.msk.bf16.vlgmr.msra.gmra.mrb[220].mxu1 %vm178_vm2, %v15705_v44 }
0x47a3   :  { %13514 = vmatprep.mubr.msk.bf16.mxu1 %vm14511_vm3, %v14510_v36 }
0x4834   :  { %v7891_v15 = vpop.f32.mrb[232].mxu0 }
0x4835   :  { %v13494_v39 = vpop.f32.mrb[233].mxu0  ;;  %v7892_v46 = vadd.f32 %v7891_v15, %v7841_v24 }
0x4836   :  { %v7894_v30 = vpop.f32.mrb[234].mxu0 }
0x4837   :  { %v7895_v52 = vadd.f32 %v7894_v30, %v7841_v24  ;;  %v13495_v37 = vpop.f32.mrb[235].mxu0 }
0x4839   :  { %v8024_v29 = vpack.c.bf16 %v7895_v52, %v7892_v46 }
0x483c   :  { %v8017_v12 = vpop.f32.mrb[236].mxu0 }
0x483d   :  { %v13510_v47 = vpop.f32.mrb[237].mxu0  ;;  %v8018_v13 = vadd.f32 %v8017_v12, %v7970_v21 }
0x483e   :  { %v8020_v8 = vpop.f32.mrb[238].mxu0 }
0x483f   :  { %v8021_v60 = vadd.f32 %v8020_v8, %v7970_v21  ;;  %v13511_v61 = vpop.f32.mrb[239].mxu0 }
0x4840   :  { %v14108_v61 = vld [vmem:[#allocation2 + $0x450] sm:$0xff]  }
0x4841   :  { %v8100_v63 = vpack.c.bf16 %v8021_v60, %v8018_v13 }
0x4843   :  { %v8105_v40 = vsel %vm720_vm9, %v8100_v63, 0 }
0x4844   :  { %13519 = vmatpush3.bf16.msra.mxu0 %v8105_v40  ;;  %v14109_v40 = vld [vmem:[#allocation2 + $0x458] sm:$0xff]  }
0x4845   :  { %13530 = vmatprep.subr.bf16.mxu0 %v14510_v36 }
0x486d   :  { %v13486_v58 = vpop.f32.mrb[216].mxu1 }
0x486e   :  { %v15732_v59 = vadd.f32 %v13486_v58, %v15650_v35  ;;  %v7807_v11 = vpop.f32.mrb[217].mxu1  ;;  %v14110_v58 = vld [vmem:[#allocation2 + $0x470] sm:$0xff]  }
0x486f   :  { %v15735_v0 = vadd.f32 %v7807_v11, %v15653_v43  ;;  %v13487_v20 = vpop.f32.mrb[218].mxu1  ;;  %v8148_v11 = vld [vmem:[#allocation2 + $0x440] sm:$0xf] }
0x4870   :  { %v7810_v17 = vpop.f32.mrb[219].mxu1  ;;  %v8154_v20 = vsel %vm1131_vm8, %v8148_v11, 0 }
0x4871   :  { %v15738_v10 = vadd.f32 %v7810_v17, %v15656_v41 }
0x4875   :  { %v7954_v62 = vpop.f32.mrb[220].mxu1 }
0x4876   :  { %v13502_v23 = vpop.f32.mrb[221].mxu1  ;;  %v7955_v22 = vadd.f32 %v7954_v62, %v7907_v38 }
0x4877   :  { %v7957_v3 = vpop.f32.mrb[222].mxu1  ;;  %v14112_v23 = vld [vmem:[#allocation2 + $0x460] sm:$0xff]  }
0x4878   :  { %v7958_v7 = vadd.f32 %v7957_v3, %v7907_v38  ;;  %v13503_v32 = vpop.f32.mrb[223].mxu1 }
0x4879   :  { %v14113_v32 = vld [vmem:[#allocation2 + $0x468] sm:$0xff]  }
0x487a   :  { %v8025_v35 = vpack.c.bf16 %v7958_v7, %v7955_v22  ;;  %v8204_v7 = vunpack.c.l.bf16 %v8203_v5 }
0x487c   :  { %v8030_v50 = vsel %vm959_vm5, %v8025_v35, 0  ;;  %v8208_v35 = vrot.slane %v8204_v7, %v14658_v48 }
0x487d   :  { %13513 = vmatpush3.bf16.xpose.msra.mxu1 %v8030_v50 }
0x487e   :  { %13524 = vmatprep.subr.bf16.mxu1 %v14510_v36 }
0x4884   :  { %13515 = vmatmul.mubr.msk.bf16.vlgmr.msra.gmra.mrb[224].mxu1 %vm959_vm5, %v8024_v29 }
0x4885   :  { %13526 = vmatprep.mubr.msk.bf16.mxu1 %vm14511_vm3, %v14510_v36  ;;  %13525 = vmatpush3.bf16.msra.mxu1 %v8154_v20 }
0x4886   :  { %13538 = vmatprep.subr.bf16.mxu1 %v14510_v36 }
0x4957   :  { %v8066_v43 = vpop.f32.mrb[224].mxu1 }
0x4958   :  { %v8073_v41 = vmul.f32 0.35355338, %v8066_v43  ;;  %v13516_v42 = vpop.f32.mrb[225].mxu1  ;;  %v8329_v43 = vld [vmem:[#allocation2 + $0x48c] sm:$0x1] }
0x4959   :  { %v8069_v16 = vpop.f32.mrb[226].mxu1 }
0x495a   :  { %v8074_v53 = vmul.f32 0.35355338, %v8069_v16  ;;  %v13517_v31 = vpop.f32.mrb[227].mxu1  ;;  %v8075_v1 = vadd.f32 %v15746_v18, %v8073_v41 }
0x495c   :  { %v8077_v51 = vsel %vm2750_vm10, %v8075_v1, -inf  ;;  %v8076_v57 = vadd.f32 %v15750_v34, %v8074_v53 }
0x495d   :  { %8078 = vmax.xlane.f32.xlu0 %v8077_v51 }
0x495e   :  { %v8080_v45 = vsel %vm2754_vm11, %v8076_v57, -inf }
0x495f   :  { %8081 = vmax.xlane.f32.xlu1 %v8080_v45 }
0x49ea   :  { %v8079_v24 = vpop.xlane.xlu0 %8078 }
0x49eb   :  { %v8083_v15 = vsub.f32 %v8075_v1, %v8079_v24  ;;  %v8330_v1 = vunpack.c.l.bf16 %v8329_v43 }
0x49ec   :  { %v8082_v56 = vpop.xlane.xlu1 %8081 }
0x49ed   :  { %v8085_v39 = vmul.f32 1.442695, %v8083_v15  ;;  %v8084_v30 = vsub.f32 %v8076_v57, %v8082_v56  ;;  %v8334_v57 = vrot.slane %v8330_v1, %v14658_v48 }
0x49ef   :  { %14334 = vpow2.f32 %v8085_v39  ;;  %v8087_v46 = vmul.f32 1.442695, %v8084_v30 }
0x49f1   :  { %14336 = vpow2.f32 %v8087_v46 }
0x49f9   :  { %v14335_v52 = vpop.eup %14334 }
0x49fa   :  { %v8089_v37 = vsel %vm2750_vm10, %v14335_v52, 0.0 }
0x49fb   :  { %v14337_v6 = vpop.eup %14336  ;;  %8090 = vadd.xlane.f32.xlu0 %v8089_v37 }
0x49fc   :  { %v8092_v29 = vsel %vm2754_vm11, %v14337_v6, 0.0 }
0x49fd   :  { %8093 = vadd.xlane.f32.xlu1 %v8092_v29 }
0x4a88   :  { %v8091_v21 = vpop.xlane.xlu0 %8090 }
0x4a89   :  { %14338 = vrcp.f32 %v8091_v21 }
0x4a8a   :  { %v8094_v12 = vpop.xlane.xlu1 %8093 }
0x4a8b   :  { %14340 = vrcp.f32 %v8094_v12 }
0x4a93   :  { %v14339_v47 = vpop.eup %14338 }
0x4a94   :  { %v8097_v13 = vmul.f32 %v14339_v47, %v14335_v52 }
0x4a95   :  { %v14341_v8 = vpop.eup %14340 }
0x4a96   :  { %v8098_v60 = vmul.f32 %v14341_v8, %v14337_v6  ;;  %v8266_v6 = vld [vmem:[#allocation2 + $0x488] sm:$0x1] }
0x4a97   :  { %v8267_v47 = vunpack.c.l.bf16 %v8266_v6  ;;  %v14116_v6 = vld [vmem:[#allocation2 + $0x4b0] sm:$0xff]  }
0x4a98   :  { %v8099_v63 = vpack.c.bf16 %v8098_v60, %v8097_v13 }
0x4a99   :  { %v8271_v8 = vrot.slane %v8267_v47, %v14658_v48 }
0x4a9a   :  { %13521 = vmatmul.mubr.msk.bf16.vlgmr.msra.gmra.mrb[240].mxu0 %vm2750_vm10, %v8099_v63 }
0x4a9b   :  { %13531 = vmatpush3.bf16.msra.mxu0 %v14108_v61  ;;  %13534 = vmatprep.mubr.msk.bf16.mxu0 %vm14511_vm3, %v14510_v36 }
0x4a9c   :  { %13532 = vmatprep.subr.bf16.mxu0 %v14510_v36 }
0x4a9f   :  { %13533 = vmatpush3.bf16.msra.mxu0 %v14109_v40 }
0x4aa0   :  { %13546 = vmatprep.subr.bf16.mxu0 %v14510_v36 }
0x4aa2   :  { %13535 = vmatmul.mubr.msk.bf16.vlgmr.msra.gmra.mrb[244].mxu0 %vm178_vm2, %v15705_v44 }
0x4aa3   :  { %13547 = vmatpush3.bf16.msra.mxu0 %v14110_v58  ;;  %13550 = vmatprep.mubr.msk.bf16.mxu0 %vm14511_vm3, %v14510_v36 }
0x4aa4   :  { %13548 = vmatprep.subr.bf16.mxu0 %v14510_v36 }
0x4aa7   :  { %13549 = vmatpush3.bf16.msra.mxu0 %v14111_v14 }
0x4aa8   :  { %13560 = vmatprep.subr.bf16.mxu0 %v14510_v36 }
0x4aaa   :  { %13551 = vmatmul.mubr.msk.bf16.vlgmr.msra.gmra.mrb[248].mxu0 %vm178_vm2, %v15705_v44 }
0x4aab   :  { %13562 = vmatprep.mubr.msk.bf16.mxu0 %vm14511_vm3, %v14510_v36 }
0x4b6d   :  { %v8141_v17 = vpop.f32.mrb[240].mxu0 }
0x4b6e   :  { %v13522_v38 = vpop.f32.mrb[241].mxu0 }
0x4b6f   :  { %v8144_v62 = vpop.f32.mrb[242].mxu0 }
0x4b70   :  { %v8149_v3 = vpack.c.bf16 %v8144_v62, %v8141_v17  ;;  %v13523_v22 = vpop.f32.mrb[243].mxu0 }
0x4b72   :  { %13527 = vmatmul.mubr.msk.bf16.vlgmr.msra.gmra.mrb[228].mxu1 %vm959_vm5, %v8149_v3 }
0x4b73   :  { %13539 = vmatpush3.bf16.msra.mxu1 %v14112_v23  ;;  %13542 = vmatprep.mubr.msk.bf16.mxu1 %vm14511_vm3, %v14510_v36 }
0x4b74   :  { %13540 = vmatprep.subr.bf16.mxu1 %v14510_v36 }
0x4b75   :  { %v8255_v50 = vpop.f32.mrb[244].mxu0 }
0x4b76   :  { %v13536_v41 = vpop.f32.mrb[245].mxu0  ;;  %v8256_v16 = vadd.f32 %v8255_v50, %v8208_v35 }
0x4b77   :  { %v8258_v42 = vpop.f32.mrb[246].mxu0  ;;  %13541 = vmatpush3.bf16.msra.mxu1 %v14113_v32 }
0x4b78   :  { %v8259_v53 = vadd.f32 %v8258_v42, %v8208_v35  ;;  %v13537_v31 = vpop.f32.mrb[247].mxu0  ;;  %13554 = vmatprep.subr.bf16.mxu1 %v14510_v36 }
0x4b7a   :  { %v8388_v51 = vpack.c.bf16 %v8259_v53, %v8256_v16  ;;  %13543 = vmatmul.mubr.msk.bf16.vlgmr.msra.gmra.mrb[232].mxu1 %vm178_vm2, %v15705_v44 }
0x4b7b   :  { %13556 = vmatprep.mubr.msk.bf16.mxu1 %vm14511_vm3, %v14510_v36 }
0x4b7d   :  { %v8381_v45 = vpop.f32.mrb[248].mxu0 }
0x4b7e   :  { %v13552_v24 = vpop.f32.mrb[249].mxu0  ;;  %v8382_v56 = vadd.f32 %v8381_v45, %v8334_v57 }
0x4b7f   :  { %v8384_v15 = vpop.f32.mrb[250].mxu0 }
0x4b80   :  { %v8385_v39 = vadd.f32 %v8384_v15, %v8334_v57  ;;  %v13553_v30 = vpop.f32.mrb[251].mxu0 }
0x4b81   :  { %v14114_v30 = vld [vmem:[#allocation2 + $0x490] sm:$0xff]  }
0x4b82   :  { %v8464_v46 = vpack.c.bf16 %v8385_v39, %v8382_v56 }
0x4b84   :  { %v8469_v52 = vsel %vm720_vm9, %v8464_v46, 0 }
0x4b85   :  { %13561 = vmatpush3.bf16.msra.mxu0 %v8469_v52  ;;  %v14115_v52 = vld [vmem:[#allocation2 + $0x498] sm:$0xff]  }
0x4b86   :  { %13572 = vmatprep.subr.bf16.mxu0 %v14510_v36 }
0x4c45   :  { %v15786_v37 = vpop.f32.mrb[228].mxu1 }
0x4c46   :  { %v13528_v29 = vpop.f32.mrb[229].mxu1 }
0x4c47   :  { %v15788_v21 = vpop.f32.mrb[230].mxu1  ;;  %v14117_v29 = vld [vmem:[#allocation2 + $0x4b8] sm:$0xff]  }
0x4c48   :  { %v13529_v12 = vpop.f32.mrb[231].mxu1 }
0x4c49   :  { %v8512_v12 = vld [vmem:[#allocation2 + $0x480] sm:$0xf] }
0x4c4a   :  { %v8518_v47 = vsel %vm1131_vm8, %v8512_v12, 0 }
0x4c4d   :  { %v8318_v13 = vpop.f32.mrb[232].mxu1 }
0x4c4e   :  { %v13544_v60 = vpop.f32.mrb[233].mxu1  ;;  %v8319_v63 = vadd.f32 %v8318_v13, %v8271_v8  ;;  %v8567_v13 = vld [vmem:[#allocation2 + $0x4c4] sm:$0x1] }
0x4c4f   :  { %v8321_v61 = vpop.f32.mrb[234].mxu1 }
0x4c50   :  { %v8322_v40 = vadd.f32 %v8321_v61, %v8271_v8  ;;  %v13545_v58 = vpop.f32.mrb[235].mxu1 }
0x4c52   :  { %v8389_v14 = vpack.c.bf16 %v8322_v40, %v8319_v63  ;;  %v14118_v63 = vld [vmem:[#allocation2 + $0x4a0] sm:$0xff]  }
0x4c54   :  { %v8394_v11 = vsel %vm959_vm5, %v8389_v14, 0  ;;  %v8568_v14 = vunpack.c.l.bf16 %v8567_v13 }
0x4c55   :  { %13555 = vmatpush3.bf16.xpose.msra.mxu1 %v8394_v11  ;;  %v14119_v11 = vld [vmem:[#allocation2 + $0x4a8] sm:$0xff]  }
0x4c56   :  { %13566 = vmatprep.subr.bf16.mxu1 %v14510_v36 }
0x4c5c   :  { %13557 = vmatmul.mubr.msk.bf16.vlgmr.msra.gmra.mrb[236].mxu1 %vm959_vm5, %v8388_v51 }
0x4c5d   :  { %13568 = vmatprep.mubr.msk.bf16.mxu1 %vm14511_vm3, %v14510_v36  ;;  %13567 = vmatpush3.bf16.msra.mxu1 %v8518_v47 }
0x4c5e   :  { %13580 = vmatprep.subr.bf16.mxu1 %v14510_v36 }
0x4d2f   :  { %v8430_v20 = vpop.f32.mrb[236].mxu1 }
0x4d30   :  { %v8437_v17 = vmul.f32 0.35355338, %v8430_v20  ;;  %v13558_v5 = vpop.f32.mrb[237].mxu1  ;;  %v8572_v20 = vrot.slane %v8568_v14, %v14658_v48 }
0x4d31   :  { %v8433_v38 = vpop.f32.mrb[238].mxu1  ;;  %v8693_v5 = vld [vmem:[#allocation2 + $0x4cc] sm:$0x1] }
0x4d32   :  { %v8438_v62 = vmul.f32 0.35355338, %v8433_v38  ;;  %v13559_v23 = vpop.f32.mrb[239].mxu1  ;;  %v8439_v3 = vadd.f32 %v15746_v18, %v8437_v17 }
0x4d34   :  { %v8441_v22 = vsel %vm2750_vm10, %v8439_v3, -inf  ;;  %v8440_v7 = vadd.f32 %v15750_v34, %v8438_v62 }
0x4d35   :  { %8442 = vmax.xlane.f32.xlu0 %v8441_v22 }
0x4d36   :  { %v8444_v32 = vsel %vm2754_vm11, %v8440_v7, -inf }
0x4d37   :  { %8445 = vmax.xlane.f32.xlu1 %v8444_v32 }
0x4dc2   :  { %v8443_v35 = vpop.xlane.xlu0 %8442 }
0x4dc3   :  { %v8447_v50 = vsub.f32 %v8439_v3, %v8443_v35 }
0x4dc4   :  { %v8446_v43 = vpop.xlane.xlu1 %8445 }
0x4dc5   :  { %v8449_v41 = vmul.f32 1.442695, %v8447_v50  ;;  %v8448_v42 = vsub.f32 %v8440_v7, %v8446_v43  ;;  %v8694_v7 = vunpack.c.l.bf16 %v8693_v5 }
0x4dc7   :  { %14342 = vpow2.f32 %v8449_v41  ;;  %v8451_v16 = vmul.f32 1.442695, %v8448_v42  ;;  %v8698_v35 = vrot.slane %v8694_v7, %v14658_v48 }
0x4dc9   :  { %14344 = vpow2.f32 %v8451_v16 }
0x4dd1   :  { %v14343_v53 = vpop.eup %14342 }
0x4dd2   :  { %v8453_v31 = vsel %vm2750_vm10, %v14343_v53, 0.0 }
0x4dd3   :  { %v14345_v1 = vpop.eup %14344  ;;  %8454 = vadd.xlane.f32.xlu0 %v8453_v31 }
0x4dd4   :  { %v8456_v51 = vsel %vm2754_vm11, %v14345_v1, 0.0 }
0x4dd5   :  { %8457 = vadd.xlane.f32.xlu1 %v8456_v51  ;;  %v7824_v51 = vld [vmem:[#allocation2 + $0x510] sm:$0x1] }
0x4e60   :  { %v8455_v57 = vpop.xlane.xlu0 %8454 }
0x4e61   :  { %14346 = vrcp.f32 %v8455_v57  ;;  %v7825_v57 = vunpack.c.l.bf16 %v7824_v51 }
0x4e62   :  { %v8458_v45 = vpop.xlane.xlu1 %8457 }
0x4e63   :  { %14348 = vrcp.f32 %v8458_v45  ;;  %v7829_v45 = vrot.slane %v7825_v57, %v14658_v48 }
0x4e6b   :  { %v14347_v24 = vpop.eup %14346 }
0x4e6c   :  { %v8461_v56 = vmul.f32 %v14347_v24, %v14343_v53  ;;  %v8197_v24 = vadd.f32 %v15786_v37, %v7829_v45 }
0x4e6d   :  { %v14349_v15 = vpop.eup %14348 }
0x4e6e   :  { %v8462_v39 = vmul.f32 %v14349_v15, %v14345_v1 }
0x4e70   :  { %v8463_v46 = vpack.c.bf16 %v8462_v39, %v8461_v56  ;;  %v8630_v56 = vld [vmem:[#allocation2 + $0x4c8] sm:$0x1]  ;;  %v8198_v39 = vadd.f32 %v15788_v21, %v7829_v45 }
0x4e71   :  { %v8631_v12 = vunpack.c.l.bf16 %v8630_v56 }
0x4e72   :  { %13563 = vmatmul.mubr.msk.bf16.vlgmr.msra.gmra.mrb[252].mxu0 %vm2750_vm10, %v8463_v46 }
0x4e73   :  { %13573 = vmatpush3.bf16.msra.mxu0 %v14114_v30  ;;  %13576 = vmatprep.mubr.msk.bf16.mxu0 %vm14511_vm3, %v14510_v36  ;;  %v8635_v47 = vrot.slane %v8631_v12, %v14658_v48 }
0x4e74   :  { %13574 = vmatprep.subr.bf16.mxu0 %v14510_v36 }
0x4e77   :  { %13575 = vmatpush3.bf16.msra.mxu0 %v14115_v52 }
0x4e78   :  { %13588 = vmatprep.subr.bf16.mxu0 %v14510_v36 }
0x4e7a   :  { %13577 = vmatmul.mubr.msk.bf16.vlgmr.msra.gmra.mrb[0].mxu0 %vm178_vm2, %v15705_v44 }
0x4e7b   :  { %13589 = vmatpush3.bf16.msra.mxu0 %v14116_v6  ;;  %13592 = vmatprep.mubr.msk.bf16.mxu0 %vm14511_vm3, %v14510_v36 }
0x4e7c   :  { %13590 = vmatprep.subr.bf16.mxu0 %v14510_v36 }
0x4e7f   :  { %13591 = vmatpush3.bf16.msra.mxu0 %v14117_v29 }
0x4e80   :  { %13602 = vmatprep.subr.bf16.mxu0 %v14510_v36 }
0x4e82   :  { %13593 = vmatmul.mubr.msk.bf16.vlgmr.msra.gmra.mrb[4].mxu0 %vm178_vm2, %v15705_v44 }
0x4e83   :  { %13604 = vmatprep.mubr.msk.bf16.mxu0 %vm14511_vm3, %v14510_v36 }
0x4f45   :  { %v8505_v8 = vpop.f32.mrb[252].mxu0 }
0x4f46   :  { %v13564_v60 = vpop.f32.mrb[253].mxu0 }
0x4f47   :  { %v8508_v61 = vpop.f32.mrb[254].mxu0 }
0x4f48   :  { %v8513_v40 = vpack.c.bf16 %v8508_v61, %v8505_v8  ;;  %v13565_v58 = vpop.f32.mrb[255].mxu0 }
0x4f4a   :  { %13569 = vmatmul.mubr.msk.bf16.vlgmr.msra.gmra.mrb[240].mxu1 %vm959_vm5, %v8513_v40 }
0x4f4b   :  { %13581 = vmatpush3.bf16.msra.mxu1 %v14118_v63  ;;  %13584 = vmatprep.mubr.msk.bf16.mxu1 %vm14511_vm3, %v14510_v36 }
0x4f4c   :  { %13582 = vmatprep.subr.bf16.mxu1 %v14510_v36 }
0x4f4d   :  { %v8619_v17 = vpop.f32.mrb[0].mxu0 }
0x4f4e   :  { %v13578_v38 = vpop.f32.mrb[1].mxu0  ;;  %v8620_v23 = vadd.f32 %v8619_v17, %v8572_v20 }
0x4f4f   :  { %v8622_v62 = vpop.f32.mrb[2].mxu0  ;;  %13583 = vmatpush3.bf16.msra.mxu1 %v14119_v11 }
0x4f50   :  { %v8623_v3 = vadd.f32 %v8622_v62, %v8572_v20  ;;  %v13579_v22 = vpop.f32.mrb[3].mxu0  ;;  %13596 = vmatprep.subr.bf16.mxu1 %v14510_v36 }
0x4f52   :  { %v8752_v32 = vpack.c.bf16 %v8623_v3, %v8620_v23  ;;  %13585 = vmatmul.mubr.msk.bf16.vlgmr.msra.gmra.mrb[244].mxu1 %vm178_vm2, %v15705_v44 }
0x4f53   :  { %13598 = vmatprep.mubr.msk.bf16.mxu1 %vm14511_vm3, %v14510_v36 }
0x4f55   :  { %v8745_v50 = vpop.f32.mrb[4].mxu0 }
0x4f56   :  { %v13594_v43 = vpop.f32.mrb[5].mxu0  ;;  %v8746_v42 = vadd.f32 %v8745_v50, %v8698_v35 }
0x4f57   :  { %v8748_v41 = vpop.f32.mrb[6].mxu0 }
0x4f58   :  { %v8749_v16 = vadd.f32 %v8748_v41, %v8698_v35  ;;  %v13595_v53 = vpop.f32.mrb[7].mxu0 }
0x4f5a   :  { %v8828_v31 = vpack.c.bf16 %v8749_v16, %v8746_v42 }
0x4f5c   :  { %v8833_v1 = vsel %vm720_vm9, %v8828_v31, 0 }
0x4f5d   :  { %13603 = vmatpush3.bf16.msra.mxu0 %v8833_v1 }
0x4f5e   :  { %13614 = vmatprep.subr.bf16.mxu0 %v14510_v36 }
0x501d   :  { %v8554_v15 = vpop.f32.mrb[240].mxu1 }
0x501e   :  { %v15835_v30 = vadd.f32 %v8554_v15, %v8197_v24  ;;  %v13570_v46 = vpop.f32.mrb[241].mxu1  ;;  %v14120_v15 = vld [vmem:[#allocation2 + $0x4d0] sm:$0xff]  }
0x501f   :  { %v8557_v52 = vpop.f32.mrb[242].mxu1  ;;  %v14122_v46 = vld [vmem:[#allocation2 + $0x4f0] sm:$0xff]  }
0x5020   :  { %v15837_v6 = vadd.f32 %v8557_v52, %v8198_v39  ;;  %v13571_v29 = vpop.f32.mrb[243].mxu1  ;;  %v14121_v39 = vld [vmem:[#allocation2 + $0x4d8] sm:$0xff]  }
0x5021   :  { %v14123_v52 = vld [vmem:[#allocation2 + $0x4f8] sm:$0xff]   ;;  %v8876_v29 = vld [vmem:[#allocation2 + $0x4c0] sm:$0xf] }
0x5022   :  { %v8882_v12 = vsel %vm1131_vm8, %v8876_v29, 0 }
0x5025   :  { %v8682_v8 = vpop.f32.mrb[244].mxu1 }
0x5026   :  { %v13586_v13 = vpop.f32.mrb[245].mxu1  ;;  %v8683_v61 = vadd.f32 %v8682_v8, %v8635_v47  ;;  %v8931_v8 = vld [vmem:[#allocation2 + $0x504] sm:$0x1] }
0x5027   :  { %v8685_v60 = vpop.f32.mrb[246].mxu1 }
0x5028   :  { %v8686_v63 = vadd.f32 %v8685_v60, %v8635_v47  ;;  %v13587_v37 = vpop.f32.mrb[247].mxu1 }
0x502a   :  { %v8753_v40 = vpack.c.bf16 %v8686_v63, %v8683_v61  ;;  %v14124_v61 = vld [vmem:[#allocation2 + $0x4e0] sm:$0xff]  }
0x502c   :  { %v8758_v58 = vsel %vm959_vm5, %v8753_v40, 0  ;;  %v8932_v40 = vunpack.c.l.bf16 %v8931_v8 }
0x502d   :  { %13597 = vmatpush3.bf16.xpose.msra.mxu1 %v8758_v58  ;;  %v14125_v58 = vld [vmem:[#allocation2 + $0x4e8] sm:$0xff]  }
0x502e   :  { %13608 = vmatprep.subr.bf16.mxu1 %v14510_v36 }
0x5034   :  { %13599 = vmatmul.mubr.msk.bf16.vlgmr.msra.gmra.mrb[248].mxu1 %vm959_vm5, %v8752_v32 }
0x5035   :  { %13610 = vmatprep.mubr.msk.bf16.mxu1 %vm14511_vm3, %v14510_v36  ;;  %13609 = vmatpush3.bf16.msra.mxu1 %v8882_v12 }
0x5036   :  { %13622 = vmatprep.subr.bf16.mxu1 %v14510_v36 }
0x5107   :  { %v8794_v21 = vpop.f32.mrb[248].mxu1 }
0x5108   :  { %v8801_v14 = vmul.f32 0.35355338, %v8794_v21  ;;  %v13600_v11 = vpop.f32.mrb[249].mxu1  ;;  %v8936_v21 = vrot.slane %v8932_v40, %v14658_v48 }
0x5109   :  { %v8797_v20 = vpop.f32.mrb[250].mxu1  ;;  %v9057_v11 = vld [vmem:[#allocation2 + $0x50c] sm:$0x1] }
0x510a   :  { %v8803_v17 = vadd.f32 %v15746_v18, %v8801_v14  ;;  %v8802_v5 = vmul.f32 0.35355338, %v8797_v20  ;;  %v13601_v38 = vpop.f32.mrb[251].mxu1 }
0x510c   :  { %v8804_v62 = vadd.f32 %v15750_v34, %v8802_v5  ;;  %v8805_v23 = vsel %vm2750_vm10, %v8803_v17, -inf }
0x510d   :  { %8806 = vmax.xlane.f32.xlu0 %v8805_v23  ;;  %v9058_v23 = vunpack.c.l.bf16 %v9057_v11 }
0x510e   :  { %v8808_v3 = vsel %vm2754_vm11, %v8804_v62, -inf }
0x510f   :  { %8809 = vmax.xlane.f32.xlu1 %v8808_v3 }
0x519a   :  { %v8807_v22 = vpop.xlane.xlu0 %8806 }
0x519b   :  { %v8811_v7 = vsub.f32 %v8803_v17, %v8807_v22  ;;  %v9062_v22 = vrot.slane %v9058_v23, %v14658_v48 }
0x519c   :  { %v8810_v32 = vpop.xlane.xlu1 %8809 }
0x519d   :  { %v8813_v35 = vmul.f32 1.442695, %v8811_v7  ;;  %v8812_v50 = vsub.f32 %v8804_v62, %v8810_v32 }
0x519f   :  { %14350 = vpow2.f32 %v8813_v35  ;;  %v8815_v43 = vmul.f32 1.442695, %v8812_v50 }
0x51a1   :  { %14352 = vpow2.f32 %v8815_v43 }
0x51a9   :  { %v14351_v41 = vpop.eup %14350 }
0x51aa   :  { %v8817_v42 = vsel %vm2750_vm10, %v14351_v41, 0.0 }
0x51ab   :  { %v14353_v16 = vpop.eup %14352  ;;  %8818 = vadd.xlane.f32.xlu0 %v8817_v42 }
0x51ac   :  { %v8820_v53 = vsel %vm2754_vm11, %v14353_v16, 0.0 }
0x51ad   :  { %8821 = vadd.xlane.f32.xlu1 %v8820_v53 }
0x5238   :  { %v8819_v31 = vpop.xlane.xlu0 %8818 }
0x5239   :  { %14354 = vrcp.f32 %v8819_v31  ;;  %v8994_v31 = vld [vmem:[#allocation2 + $0x508] sm:$0x1] }
0x523a   :  { %v8822_v1 = vpop.xlane.xlu1 %8821 }
0x523b   :  { %14356 = vrcp.f32 %v8822_v1 }
0x5243   :  { %v14355_v51 = vpop.eup %14354 }
0x5244   :  { %v8825_v45 = vmul.f32 %v14355_v51, %v14351_v41 }
0x5245   :  { %v14357_v57 = vpop.eup %14356 }
0x5246   :  { %v8826_v24 = vmul.f32 %v14357_v57, %v14353_v16 }
0x5248   :  { %v8827_v56 = vpack.c.bf16 %v8826_v24, %v8825_v45 }
0x524a   :  { %13605 = vmatmul.mubr.msk.bf16.vlgmr.msra.gmra.mrb[8].mxu0 %vm2750_vm10, %v8827_v56 }
0x524b   :  { %13615 = vmatpush3.bf16.msra.mxu0 %v14120_v15  ;;  %13618 = vmatprep.mubr.msk.bf16.mxu0 %vm14511_vm3, %v14510_v36  ;;  %v8995_v15 = vunpack.c.l.bf16 %v8994_v31 }
0x524c   :  { %13616 = vmatprep.subr.bf16.mxu0 %v14510_v36 }
0x524d   :  { %v8999_v56 = vrot.slane %v8995_v15, %v14658_v48 }
0x524f   :  { %13617 = vmatpush3.bf16.msra.mxu0 %v14121_v39 }
0x5250   :  { %13630 = vmatprep.subr.bf16.mxu0 %v14510_v36 }
0x5252   :  { %13619 = vmatmul.mubr.msk.bf16.vlgmr.msra.gmra.mrb[12].mxu0 %vm178_vm2, %v15705_v44 }
0x5253   :  { %13631 = vmatpush3.bf16.msra.mxu0 %v14122_v46  ;;  %13634 = vmatprep.mubr.msk.bf16.mxu0 %vm14511_vm3, %v14510_v36 }
0x5254   :  { %13632 = vmatprep.subr.bf16.mxu0 %v14510_v36 }
0x5257   :  { %13633 = vmatpush3.bf16.msra.mxu0 %v14123_v52 }
0x5258   :  { %13644 = vmatprep.subr.bf16.mxu0 %v14510_v36 }
0x525a   :  { %13635 = vmatmul.mubr.msk.bf16.vlgmr.msra.gmra.mrb[16].mxu0 %vm178_vm2, %v15705_v44 }
0x525b   :  { %13646 = vmatprep.mubr.msk.bf16.mxu0 %vm14511_vm3, %v14510_v36 }
0x531d   :  { %v8869_v47 = vpop.f32.mrb[8].mxu0 }
0x531e   :  { %v13606_v13 = vpop.f32.mrb[9].mxu0 }
0x531f   :  { %v8872_v60 = vpop.f32.mrb[10].mxu0 }
0x5320   :  { %v8877_v63 = vpack.c.bf16 %v8872_v60, %v8869_v47  ;;  %v13607_v37 = vpop.f32.mrb[11].mxu0 }
0x5322   :  { %13611 = vmatmul.mubr.msk.bf16.vlgmr.msra.gmra.mrb[252].mxu1 %vm959_vm5, %v8877_v63 }
0x5323   :  { %13623 = vmatpush3.bf16.msra.mxu1 %v14124_v61  ;;  %13626 = vmatprep.mubr.msk.bf16.mxu1 %vm14511_vm3, %v14510_v36 }
0x5324   :  { %13624 = vmatprep.subr.bf16.mxu1 %v14510_v36 }
0x5325   :  { %v8983_v14 = vpop.f32.mrb[12].mxu0 }
0x5326   :  { %v13620_v20 = vpop.f32.mrb[13].mxu0  ;;  %v8984_v5 = vadd.f32 %v8983_v14, %v8936_v21 }
0x5327   :  { %v8986_v17 = vpop.f32.mrb[14].mxu0  ;;  %13625 = vmatpush3.bf16.msra.mxu1 %v14125_v58 }
0x5328   :  { %v8987_v38 = vadd.f32 %v8986_v17, %v8936_v21  ;;  %v13621_v62 = vpop.f32.mrb[15].mxu0  ;;  %13638 = vmatprep.subr.bf16.mxu1 %v14510_v36 }
0x532a   :  { %v9116_v3 = vpack.c.bf16 %v8987_v38, %v8984_v5  ;;  %13627 = vmatmul.mubr.msk.bf16.vlgmr.msra.gmra.mrb[0].mxu1 %vm178_vm2, %v15705_v44 }
0x532b   :  { %13640 = vmatprep.mubr.msk.bf16.mxu1 %vm14511_vm3, %v14510_v36 }
0x532d   :  { %v9109_v7 = vpop.f32.mrb[16].mxu0 }
0x532e   :  { %v13636_v32 = vpop.f32.mrb[17].mxu0  ;;  %v9110_v50 = vadd.f32 %v9109_v7, %v9062_v22 }
0x532f   :  { %v9112_v35 = vpop.f32.mrb[18].mxu0 }
0x5330   :  { %v9113_v43 = vadd.f32 %v9112_v35, %v9062_v22  ;;  %v13637_v41 = vpop.f32.mrb[19].mxu0 }
0x5332   :  { %v9192_v42 = vpack.c.bf16 %v9113_v43, %v9110_v50 }
0x5334   :  { %v9197_v16 = vsel %vm720_vm9, %v9192_v42, 0  ;;  %v9291_v42 = vsel %vm293_vm4, %v15430_v54, 0 }
0x5335   :  { %13645 = vmatpush3.bf16.msra.mxu0 %v9197_v16  ;;  %v9240_v16 = vld [vmem:[#allocation2 + $0x500] sm:$0xf] }
0x5336   :  { %13656 = vmatprep.subr.bf16.mxu0 %v14510_v36 }
0x53f5   :  { %v8918_v53 = vpop.f32.mrb[252].mxu1 }
0x53f6   :  { %v15882_v1 = vadd.f32 %v8918_v53, %v15835_v30  ;;  %v13612_v51 = vpop.f32.mrb[253].mxu1 }
0x53f7   :  { %v8921_v57 = vpop.f32.mrb[254].mxu1 }
0x53f8   :  { %v15885_v45 = vadd.f32 %v8921_v57, %v15837_v6  ;;  %v13613_v24 = vpop.f32.mrb[255].mxu1 }
0x53f9   :  { %v9335_v24 = vsel %vm720_vm9, %v15705_v44, 0  ;;  %v14128_v44 = vld [vmem:[#allocation2 + $0x51c] sm:$0xff]  }
0x53fd   :  { %v9046_v39 = vpop.f32.mrb[0].mxu1 }
0x53fe   :  { %v13628_v46 = vpop.f32.mrb[1].mxu1  ;;  %v9047_v29 = vadd.f32 %v9046_v39, %v8999_v56 }
0x53ff   :  { %v9049_v52 = vpop.f32.mrb[2].mxu1  ;;  %v14126_v46 = vld [vmem:[#allocation2 + $0x514] sm:$0xff]  }
0x5400   :  { %v9050_v12 = vadd.f32 %v9049_v52, %v8999_v56  ;;  %v13629_v47 = vpop.f32.mrb[3].mxu1  ;;  %v14127_v52 = vld [vmem:[#allocation2 + $0x524] sm:$0xff]  }
0x5402   :  { %v9117_v8 = vpack.c.bf16 %v9050_v12, %v9047_v29  ;;  %v14129_v29 = vld [vmem:[#allocation2 + $0x52c] sm:$0xff]  }
0x5404   :  { %v9122_v13 = vsel %vm959_vm5, %v9117_v8, 0 }
0x5405   :  { %13639 = vmatpush3.bf16.xpose.msra.mxu1 %v9122_v13 }
0x5406   :  { %13650 = vmatprep.subr.bf16.mxu1 %v14510_v36 }
0x540c   :  { %13641 = vmatmul.mubr.msk.bf16.vlgmr.msra.gmra.mrb[4].mxu1 %vm959_vm5, %v9116_v3 }
0x540d   :  { %13652 = vmatprep.mubr.msk.bf16.mxu1 %vm14511_vm3, %v14510_v36 }
0x54df   :  { %v9158_v30 = vpop.f32.mrb[4].mxu1 }
0x54e0   :  { %v9165_v6 = vmul.f32 0.35355338, %v9158_v30  ;;  %v13642_v60 = vpop.f32.mrb[5].mxu1 }
0x54e1   :  { %v9161_v61 = vpop.f32.mrb[6].mxu1 }
0x54e2   :  { %v9167_v63 = vadd.f32 %v15746_v18, %v9165_v6  ;;  %v9166_v37 = vmul.f32 0.35355338, %v9161_v61  ;;  %v13643_v40 = vpop.f32.mrb[7].mxu1 }
0x54e4   :  { %v9168_v58 = vadd.f32 %v15750_v34, %v9166_v37  ;;  %v9169_v21 = vsel %vm2750_vm10, %v9167_v63, -inf }
0x54e5   :  { %9170 = vmax.xlane.f32.xlu0 %v9169_v21  ;;  %v14130_v21 = vld [vmem:[#allocation2 + $0x534] sm:$0xff]  }
0x54e6   :  { %v9172_v14 = vsel %vm2754_vm11, %v9168_v58, -inf }
0x54e7   :  { %9173 = vmax.xlane.f32.xlu1 %v9172_v14 }
0x5572   :  { %v9171_v11 = vpop.xlane.xlu0 %9170 }
0x5573   :  { %v9175_v20 = vsub.f32 %v9167_v63, %v9171_v11 }
0x5574   :  { %v9174_v17 = vpop.xlane.xlu1 %9173 }
0x5575   :  { %v9177_v5 = vmul.f32 1.442695, %v9175_v20  ;;  %v9176_v38 = vsub.f32 %v9168_v58, %v9174_v17  ;;  %v9391_v20 = vld [vmem:[#allocation2 + $0x548] sm:$0x1] }
0x5577   :  { %14358 = vpow2.f32 %v9177_v5  ;;  %v9179_v62 = vmul.f32 1.442695, %v9176_v38  ;;  %v9518_v5 = vld [vmem:[#allocation2 + $0x550] sm:$0x1]  ;;  %v9392_v38 = vunpack.c.l.bf16 %v9391_v20  ;;  %v9685_v20 = vld [vmem:[#allocation2 + $0x544] sm:$0xf] }
0x5579   :  { %14360 = vpow2.f32 %v9179_v62 }
0x5581   :  { %v14359_v23 = vpop.eup %14358 }
0x5582   :  { %v9181_v18 = vsel %vm2750_vm10, %v14359_v23, 0.0 }
0x5583   :  { %v14361_v3 = vpop.eup %14360  ;;  %9182 = vadd.xlane.f32.xlu0 %v9181_v18 }
0x5584   :  { %v9184_v34 = vsel %vm2754_vm11, %v14361_v3, 0.0 }
0x5585   :  { %9185 = vadd.xlane.f32.xlu1 %v9184_v34 }
0x5610   :  { %v9183_v22 = vpop.xlane.xlu0 %9182 }
0x5611   :  { %14362 = vrcp.f32 %v9183_v22  ;;  %v9519_v22 = vunpack.c.l.bf16 %v9518_v5 }
0x5612   :  { %v9186_v7 = vpop.xlane.xlu1 %9185 }
0x5613   :  { %14364 = vrcp.f32 %v9186_v7 }
0x561b   :  { %v14363_v32 = vpop.eup %14362 }
0x561c   :  { %v9189_v50 = vmul.f32 %v14363_v32, %v14359_v23 }
0x561d   :  { %v14365_v35 = vpop.eup %14364 }
0x561e   :  { %v9190_v43 = vmul.f32 %v14365_v35, %v14361_v3  ;;  %v9396_v35 = vrot.slane %v9392_v38, %v14658_v48  ;;  %v14136_v38 = vld [vmem:[#allocation2 + $0x564] sm:$0xff]  }
0x5620   :  { %v9191_v41 = vpack.c.bf16 %v9190_v43, %v9189_v50 }
0x5622   :  { %13647 = vmatmul.mubr.msk.bf16.vlgmr.msra.gmra.mrb[20].mxu0 %vm2750_vm10, %v9191_v41 }
0x5623   :  { %13657 = vmatpush3.bf16.msra.mxu0 %v15423_v55  ;;  %13660 = vmatprep.mubr.msk.bf16.mxu0 %vm14511_vm3, %v14510_v36  ;;  %v9246_v55 = vsel %vm1131_vm8, %v9240_v16, 0  ;;  %v9523_v16 = vrot.slane %v9519_v22, %v14658_v48  ;;  %v9862_v22 = vld [vmem:[#allocation2 + $0x590] sm:$0x1] }
0x5624   :  { %13658 = vmatprep.subr.bf16.mxu0 %v14510_v36  ;;  %13651 = vmatpush3.bf16.msra.mxu1 %v9246_v55 }
0x5625   :  { %13664 = vmatprep.subr.bf16.mxu1 %v14510_v36 }
0x5627   :  { %13659 = vmatpush3.bf16.msra.mxu0 %v9291_v42 }
0x5628   :  { %13670 = vmatprep.subr.bf16.mxu0 %v14510_v36 }
0x562a   :  { %13661 = vmatmul.mubr.msk.bf16.vlgmr.msra.gmra.mrb[24].mxu0 %vm1026_vm7, %v15116_v4 }
0x562b   :  { %13674 = vmatprep.mubr.msk.bf16.mxu0 %vm14511_vm3, %v14510_v36  ;;  %13671 = vmatpush3.bf16.msra.mxu0 %v14126_v46 }
0x562c   :  { %13672 = vmatprep.subr.bf16.mxu0 %v14510_v36 }
0x562f   :  { %13673 = vmatpush3.bf16.msra.mxu0 %v14128_v44  ;;  %v15959_v44 = vld [vmem:[#allocation5 + $0xe0] sm:$0xf] }
0x5630   :  { %13686 = vmatprep.subr.bf16.mxu0 %v14510_v36 }
0x56f5   :  { %v9233_v53 = vpop.f32.mrb[20].mxu0 }
0x56f6   :  { %v13648_v31 = vpop.f32.mrb[21].mxu0 }
0x56f7   :  { %v9236_v51 = vpop.f32.mrb[22].mxu0 }
0x56f8   :  { %v9241_v57 = vpack.c.bf16 %v9236_v51, %v9233_v53  ;;  %v13649_v54 = vpop.f32.mrb[23].mxu0 }
0x56fa   :  { %13653 = vmatmul.mubr.msk.bf16.vlgmr.msra.gmra.mrb[8].mxu1 %vm959_vm5, %v9241_v57 }
0x56fb   :  { %13665 = vmatpush3.bf16.msra.mxu1 %v9335_v24  ;;  %13666 = vmatprep.mubr.msk.bf16.mxu1 %vm14511_vm3, %v14510_v36 }
0x56fc   :  { %13678 = vmatprep.subr.bf16.mxu1 %v14510_v36 }
0x56fd   :  { %v9327_v4 = vpop.f32.mrb[24].mxu0 }
0x56fe   :  { %v13662_v15 = vpop.f32.mrb[25].mxu0  ;;  %v9333_v6 = vmul.f32 0.11111111, %v9327_v4 }
0x56ff   :  { %v9330_v56 = vpop.f32.mrb[26].mxu0 }
0x5700   :  { %v13663_v39 = vpop.f32.mrb[27].mxu0 }
0x5702   :  { %13667 = vmatmul.mubr.msk.bf16.vlgmr.msra.gmra.mrb[12].mxu1 %vm2750_vm10, %v15128_v27 }
0x5703   :  { %13682 = vmatprep.mubr.msk.bf16.mxu1 %vm14511_vm3, %v14510_v36  ;;  %13679 = vmatpush3.bf16.msra.mxu1 %v14127_v52 }
0x5704   :  { %13680 = vmatprep.subr.bf16.mxu1 %v14510_v36 }
0x5707   :  { %13681 = vmatpush3.bf16.msra.mxu1 %v14129_v29 }
0x5708   :  { %13694 = vmatprep.subr.bf16.mxu1 %v14510_v36 }
0x57cd   :  { %v9282_v27 = vpop.f32.mrb[8].mxu1 }
0x57ce   :  { %v15928_v12 = vadd.f32 %v9282_v27, %v15882_v1  ;;  %v13654_v47 = vpop.f32.mrb[9].mxu1  ;;  %v14131_v1 = vld [vmem:[#allocation2 + $0x53c] sm:$0xff]  }
0x57cf   :  { %v9285_v8 = vpop.f32.mrb[10].mxu1 }
0x57d0   :  { %v15931_v13 = vadd.f32 %v9285_v8, %v15885_v45  ;;  %v13655_v30 = vpop.f32.mrb[11].mxu1  ;;  %v9456_v45 = vld [vmem:[#allocation2 + $0x54c] sm:$0x1] }
0x57d1   :  { %v9457_v11 = vunpack.c.l.bf16 %v9456_v45  ;;  %v14134_v45 = vld [vmem:[#allocation2 + $0x574] sm:$0xff]  }
0x57d3   :  { %v9461_v17 = vrot.slane %v9457_v11, %v14658_v48  ;;  %v14135_v11 = vld [vmem:[#allocation2 + $0x57c] sm:$0xff]  }
0x57d5   :  { %v9371_v60 = vpop.f32.mrb[12].mxu1 }
0x57d6   :  { %v9377_v61 = vmul.f32 0.2, %v9371_v60  ;;  %v13668_v63 = vpop.f32.mrb[13].mxu1 }
0x57d7   :  { %v9374_v37 = vpop.f32.mrb[14].mxu1 }
0x57d8   :  { %v9378_v40 = vadd.f32 %v9377_v61, %v9333_v6  ;;  %v13669_v58 = vpop.f32.mrb[15].mxu1 }
0x57d9   :  { %v14132_v58 = vld [vmem:[#allocation2 + $0x554] sm:$0xff]  }
0x57da   :  { %v15933_v14 = vpack.c.bf16 %v9378_v40, %v9378_v40 }
0x57dc   :  { %13675 = vmatmul.mubr.msk.bf16.vlgmr.msra.gmra.mrb[28].mxu0 %vm178_vm2, %v15933_v14  ;;  %13683 = vmatmul.mubr.msk.bf16.vlgmr.msra.gmra.mrb[16].mxu1 %vm178_vm2, %v15933_v14 }
0x57dd   :  { %13687 = vmatpush3.bf16.msra.mxu0 %v14130_v21  ;;  %13690 = vmatprep.mubr.msk.bf16.mxu0 %vm14511_vm3, %v14510_v36 }
0x57de   :  { %13688 = vmatprep.subr.bf16.mxu0 %v14510_v36  ;;  %13696 = vmatprep.mubr.msk.bf16.mxu1 %vm14511_vm3, %v14510_v36 }
0x57e1   :  { %13689 = vmatpush3.bf16.msra.mxu0 %v14131_v1  ;;  %v14133_v1 = vld [vmem:[#allocation2 + $0x55c] sm:$0xff]  }
0x57e2   :  { %13700 = vmatprep.subr.bf16.mxu0 %v14510_v36 }
0x57e4   :  { %13691 = vmatmul.mubr.msk.bf16.vlgmr.msra.gmra.mrb[32].mxu0 %vm178_vm2, %v15933_v14 }
0x57e5   :  { %13702 = vmatprep.mubr.msk.bf16.mxu0 %vm14511_vm3, %v14510_v36 }
0x58af   :  { %v9446_v62 = vpop.f32.mrb[28].mxu0  ;;  %v9508_v23 = vpop.f32.mrb[16].mxu1 }
0x58b0   :  { %v9509_v18 = vadd.f32 %v9508_v23, %v9461_v17  ;;  %v13676_v3 = vpop.f32.mrb[29].mxu0  ;;  %v13684_v34 = vpop.f32.mrb[17].mxu1  ;;  %v9447_v55 = vadd.f32 %v9446_v62, %v9396_v35  ;;  %v9691_v17 = vsel %vm1131_vm8, %v9685_v20, 0  ;;  %v9863_v35 = vunpack.c.l.bf16 %v9862_v22  ;;  %v14140_v22 = vld [vmem:[#allocation2 + $0x5b4] sm:$0xff]  }
0x58b1   :  { %v9449_v7 = vpop.f32.mrb[30].mxu0  ;;  %v9511_v32 = vpop.f32.mrb[18].mxu1  ;;  %v14137_v34 = vld [vmem:[#allocation2 + $0x56c] sm:$0xff]  }
0x58b2   :  { %v9577_v50 = vpack.c.bf16 %v9509_v18, %v9509_v18  ;;  %v13677_v43 = vpop.f32.mrb[31].mxu0  ;;  %v13685_v41 = vpop.f32.mrb[19].mxu1  ;;  %v9576_v54 = vpack.c.bf16 %v9447_v55, %v9447_v55 }
0x58b3   :  { %v9867_v41 = vrot.slane %v9863_v35, %v14658_v48 }
0x58b4   :  { %v9582_v42 = vsel %vm959_vm5, %v9577_v50, 0 }
0x58b5   :  { %13695 = vmatpush3.bf16.xpose.msra.mxu1 %v9582_v42 }
0x58b6   :  { %13706 = vmatprep.subr.bf16.mxu1 %v14510_v36 }
0x58b7   :  { %v9570_v53 = vpop.f32.mrb[32].mxu0 }
0x58b8   :  { %v9571_v31 = vadd.f32 %v9570_v53, %v9523_v16  ;;  %v13692_v51 = vpop.f32.mrb[33].mxu0 }
0x58b9   :  { %v9573_v57 = vpop.f32.mrb[34].mxu0 }
0x58ba   :  { %v9638_v24 = vpack.c.bf16 %v9571_v31, %v9571_v31  ;;  %v13693_v4 = vpop.f32.mrb[35].mxu0 }
0x58bb   :  { %v9738_v4 = vld [vmem:[#allocation2 + $0x588] sm:$0x1] }
0x58bc   :  { %v9643_v15 = vsel %vm58_vm0, %v9638_v24, 0  ;;  %13697 = vmatmul.mubr.msk.bf16.vlgmr.msra.gmra.mrb[20].mxu1 %vm959_vm5, %v9576_v54  ;;  %v9800_v54 = vld [vmem:[#allocation2 + $0x58c] sm:$0x1] }
0x58bd   :  { %13701 = vmatpush3.bf16.msra.mxu0 %v9643_v15  ;;  %13708 = vmatprep.mubr.msk.bf16.mxu1 %vm14511_vm3, %v14510_v36  ;;  %v9801_v24 = vunpack.c.l.bf16 %v9800_v54 }
0x58be   :  { %13712 = vmatprep.subr.bf16.mxu0 %v14510_v36  ;;  %13707 = vmatpush3.bf16.msra.mxu1 %v9691_v17 }
0x58bf   :  { %13720 = vmatprep.subr.bf16.mxu1 %v14510_v36  ;;  %v9805_v15 = vrot.slane %v9801_v24, %v14658_v48 }
0x598f   :  { %v9618_v56 = vpop.f32.mrb[20].mxu1 }
0x5990   :  { %v9624_v39 = vmul.f32 0.35355338, %v9618_v56  ;;  %v13698_v46 = vpop.f32.mrb[21].mxu1  ;;  %v9739_v56 = vunpack.c.l.bf16 %v9738_v4 }
0x5991   :  { %v9621_v52 = vpop.f32.mrb[22].mxu1 }
0x5992   :  { %v9625_v29 = vadd.f32 %v15959_v44, %v9624_v39  ;;  %v13699_v27 = vpop.f32.mrb[23].mxu1 }
0x5993   :  { %v9743_v27 = vrot.slane %v9739_v56, %v14658_v48 }
0x5994   :  { %v9626_v47 = vsel %vm4311_vm12, %v9625_v29, -inf }
0x5995   :  { %9627 = vmax.xlane.f32.xlu0 %v9626_v47 }
0x5a22   :  { %v9628_v8 = vpop.xlane.xlu0 %9627 }
0x5a23   :  { %v9629_v30 = vsub.f32 %v9625_v29, %v9628_v8 }
0x5a25   :  { %v9630_v6 = vmul.f32 1.442695, %v9629_v30 }
0x5a27   :  { %14366 = vpow2.f32 %v9630_v6 }
0x5a31   :  { %v14367_v60 = vpop.eup %14366 }
0x5a32   :  { %v9632_v61 = vsel %vm4311_vm12, %v14367_v60, 0.0 }
0x5a33   :  { %9633 = vadd.xlane.f32.xlu1 %v9632_v61 }
0x5ac0   :  { %v9634_v63 = vpop.xlane.xlu1 %9633 }
0x5ac1   :  { %14368 = vrcp.f32 %v9634_v63 }
0x5acb   :  { %v14369_v37 = vpop.eup %14368 }
0x5acc   :  { %v9636_v40 = vmul.f32 %v14369_v37, %v14367_v60 }
0x5ace   :  { %v9637_v21 = vpack.c.bf16 %v9636_v40, %v9636_v40 }
0x5ad0   :  { %13703 = vmatmul.mubr.msk.bf16.vlgmr.msra.gmra.mrb[36].mxu0 %vm51_vm1, %v9637_v21 }
0x5ad1   :  { %13713 = vmatpush3.bf16.msra.mxu0 %v14132_v58  ;;  %13716 = vmatprep.mubr.msk.bf16.mxu0 %vm14511_vm3, %v14510_v36 }
0x5ad2   :  { %13714 = vmatprep.subr.bf16.mxu0 %v14510_v36 }
0x5ad5   :  { %13715 = vmatpush3.bf16.msra.mxu0 %v14133_v1 }
0x5ad6   :  { %13728 = vmatprep.subr.bf16.mxu0 %v14510_v36 }
0x5ad8   :  { %13717 = vmatmul.mubr.msk.bf16.vlgmr.msra.gmra.mrb[40].mxu0 %vm178_vm2, %v15933_v14 }
0x5ad9   :  { %13729 = vmatpush3.bf16.msra.mxu0 %v14134_v45  ;;  %13732 = vmatprep.mubr.msk.bf16.mxu0 %vm14511_vm3, %v14510_v36 }
0x5ada   :  { %13730 = vmatprep.subr.bf16.mxu0 %v14510_v36 }
0x5add   :  { %13731 = vmatpush3.bf16.msra.mxu0 %v14135_v11 }
0x5ade   :  { %13742 = vmatprep.subr.bf16.mxu0 %v14510_v36 }
0x5ae0   :  { %13733 = vmatmul.mubr.msk.bf16.vlgmr.msra.gmra.mrb[44].mxu0 %vm178_vm2, %v15933_v14 }
0x5ae1   :  { %13744 = vmatprep.mubr.msk.bf16.mxu0 %vm14511_vm3, %v14510_v36 }
0x5ba3   :  { %v9679_v5 = vpop.f32.mrb[36].mxu0 }
0x5ba4   :  { %v9686_v62 = vpack.c.bf16 %v9679_v5, %v9679_v5  ;;  %v13704_v23 = vpop.f32.mrb[37].mxu0 }
0x5ba5   :  { %v9682_v18 = vpop.f32.mrb[38].mxu0 }
0x5ba6   :  { %v13705_v3 = vpop.f32.mrb[39].mxu0  ;;  %13709 = vmatmul.mubr.msk.bf16.vlgmr.msra.gmra.mrb[24].mxu1 %vm959_vm5, %v9686_v62  ;;  %v14138_v18 = vld [vmem:[#allocation2 + $0x594] sm:$0xff]  }
0x5ba7   :  { %13721 = vmatpush3.bf16.msra.mxu1 %v14136_v38  ;;  %13724 = vmatprep.mubr.msk.bf16.mxu1 %vm14511_vm3, %v14510_v36 }
0x5ba8   :  { %13722 = vmatprep.subr.bf16.mxu1 %v14510_v36 }
0x5bab   :  { %v9790_v7 = vpop.f32.mrb[40].mxu0  ;;  %13723 = vmatpush3.bf16.msra.mxu1 %v14137_v34  ;;  %v14139_v34 = vld [vmem:[#allocation2 + $0x59c] sm:$0xff]  }
0x5bac   :  { %v13718_v32 = vpop.f32.mrb[41].mxu0  ;;  %13736 = vmatprep.subr.bf16.mxu1 %v14510_v36  ;;  %v9791_v6 = vadd.f32 %v9790_v7, %v9743_v27  ;;  %v14141_v7 = vld [vmem:[#allocation2 + $0x5bc] sm:$0xff]  }
0x5bad   :  { %v9793_v50 = vpop.f32.mrb[42].mxu0  ;;  %v10029_v32 = vld [vmem:[#allocation2 + $0x584] sm:$0xf] }
0x5bae   :  { %v13719_v43 = vpop.f32.mrb[43].mxu0  ;;  %13725 = vmatmul.mubr.msk.bf16.vlgmr.msra.gmra.mrb[28].mxu1 %vm178_vm2, %v15933_v14  ;;  %v9920_v60 = vpack.c.bf16 %v9791_v6, %v9791_v6  ;;  %v10035_v35 = vsel %vm1131_vm8, %v10029_v32, 0  ;;  %v10082_v6 = vld [vmem:[#allocation2 + $0x5c8] sm:$0x1] }
0x5baf   :  { %13738 = vmatprep.mubr.msk.bf16.mxu1 %vm14511_vm3, %v14510_v36  ;;  %v14142_v43 = vld [vmem:[#allocation2 + $0x5a4] sm:$0xff]  }
0x5bb3   :  { %v9914_v42 = vpop.f32.mrb[44].mxu0 }
0x5bb4   :  { %v9915_v16 = vadd.f32 %v9914_v42, %v9867_v41  ;;  %v13734_v55 = vpop.f32.mrb[45].mxu0 }
0x5bb5   :  { %v9917_v53 = vpop.f32.mrb[46].mxu0 }
0x5bb6   :  { %v9982_v31 = vpack.c.bf16 %v9915_v16, %v9915_v16  ;;  %v13735_v51 = vpop.f32.mrb[47].mxu0  ;;  %v14143_v53 = vld [vmem:[#allocation2 + $0x5ac] sm:$0xff]  }
0x5bb8   :  { %v9987_v57 = vsel %vm58_vm0, %v9982_v31, 0  ;;  %v10206_v31 = vld [vmem:[#allocation2 + $0x5d0] sm:$0x1] }
0x5bb9   :  { %13743 = vmatpush3.bf16.msra.mxu0 %v9987_v57  ;;  %v10207_v54 = vunpack.c.l.bf16 %v10206_v31  ;;  %v14146_v31 = vld [vmem:[#allocation2 + $0x5f4] sm:$0xff]  }
0x5bba   :  { %13754 = vmatprep.subr.bf16.mxu0 %v14510_v36 }
0x5c81   :  { %v9852_v39 = vpop.f32.mrb[28].mxu1 }
0x5c82   :  { %v9853_v46 = vadd.f32 %v9852_v39, %v9805_v15  ;;  %v13726_v52 = vpop.f32.mrb[29].mxu1  ;;  %v10211_v15 = vrot.slane %v10207_v54, %v14658_v48 }
0x5c83   :  { %v9855_v29 = vpop.f32.mrb[30].mxu1 }
0x5c84   :  { %v9921_v47 = vpack.c.bf16 %v9853_v46, %v9853_v46  ;;  %v13727_v8 = vpop.f32.mrb[31].mxu1 }
0x5c85   :  { %v10144_v8 = vld [vmem:[#allocation2 + $0x5cc] sm:$0x1] }
0x5c86   :  { %v9926_v30 = vsel %vm959_vm5, %v9921_v47, 0 }
0x5c87   :  { %13737 = vmatpush3.bf16.xpose.msra.mxu1 %v9926_v30  ;;  %v10145_v30 = vunpack.c.l.bf16 %v10144_v8 }
0x5c88   :  { %13748 = vmatprep.subr.bf16.mxu1 %v14510_v36 }
0x5c8e   :  { %13739 = vmatmul.mubr.msk.bf16.vlgmr.msra.gmra.mrb[32].mxu1 %vm959_vm5, %v9920_v60  ;;  %v10149_v60 = vrot.slane %v10145_v30, %v14658_v48 }
0x5c8f   :  { %13750 = vmatprep.mubr.msk.bf16.mxu1 %vm14511_vm3, %v14510_v36  ;;  %13749 = vmatpush3.bf16.msra.mxu1 %v10035_v35 }
0x5c90   :  { %13762 = vmatprep.subr.bf16.mxu1 %v14510_v36 }
0x5d61   :  { %v9962_v61 = vpop.f32.mrb[32].mxu1 }
0x5d62   :  { %v9968_v63 = vmul.f32 0.35355338, %v9962_v61  ;;  %v13740_v37 = vpop.f32.mrb[33].mxu1  ;;  %v10083_v61 = vunpack.c.l.bf16 %v10082_v6 }
0x5d63   :  { %v9965_v40 = vpop.f32.mrb[34].mxu1 }
0x5d64   :  { %v9969_v58 = vadd.f32 %v15959_v44, %v9968_v63  ;;  %v13741_v21 = vpop.f32.mrb[35].mxu1 }
0x5d65   :  { %v10087_v21 = vrot.slane %v10083_v61, %v14658_v48 }
0x5d66   :  { %v9970_v1 = vsel %vm4311_vm12, %v9969_v58, -inf }
0x5d67   :  { %9971 = vmax.xlane.f32.xlu0 %v9970_v1 }
0x5df4   :  { %v9972_v45 = vpop.xlane.xlu0 %9971 }
0x5df5   :  { %v9973_v11 = vsub.f32 %v9969_v58, %v9972_v45 }
0x5df7   :  { %v9974_v20 = vmul.f32 1.442695, %v9973_v11 }
0x5df9   :  { %14370 = vpow2.f32 %v9974_v20 }
0x5e03   :  { %v14371_v17 = vpop.eup %14370 }
0x5e04   :  { %v9976_v5 = vsel %vm4311_vm12, %v14371_v17, 0.0 }
0x5e05   :  { %9977 = vadd.xlane.f32.xlu1 %v9976_v5 }
0x5e92   :  { %v9978_v38 = vpop.xlane.xlu1 %9977 }
0x5e93   :  { %14372 = vrcp.f32 %v9978_v38 }
0x5e9d   :  { %v14373_v62 = vpop.eup %14372 }
0x5e9e   :  { %v9980_v23 = vmul.f32 %v14373_v62, %v14371_v17 }
0x5ea0   :  { %v9981_v3 = vpack.c.bf16 %v9980_v23, %v9980_v23 }
0x5ea2   :  { %13745 = vmatmul.mubr.msk.bf16.vlgmr.msra.gmra.mrb[48].mxu0 %vm51_vm1, %v9981_v3 }
0x5ea3   :  { %13755 = vmatpush3.bf16.msra.mxu0 %v14138_v18  ;;  %13758 = vmatprep.mubr.msk.bf16.mxu0 %vm14511_vm3, %v14510_v36 }
0x5ea4   :  { %13756 = vmatprep.subr.bf16.mxu0 %v14510_v36 }
0x5ea7   :  { %13757 = vmatpush3.bf16.msra.mxu0 %v14139_v34 }
0x5ea8   :  { %13770 = vmatprep.subr.bf16.mxu0 %v14510_v36 }
0x5eaa   :  { %13759 = vmatmul.mubr.msk.bf16.vlgmr.msra.gmra.mrb[52].mxu0 %vm178_vm2, %v15933_v14 }
0x5eab   :  { %13771 = vmatpush3.bf16.msra.mxu0 %v14140_v22  ;;  %13774 = vmatprep.mubr.msk.bf16.mxu0 %vm14511_vm3, %v14510_v36 }
0x5eac   :  { %13772 = vmatprep.subr.bf16.mxu0 %v14510_v36 }
0x5eaf   :  { %13773 = vmatpush3.bf16.msra.mxu0 %v14141_v7 }
0x5eb0   :  { %13784 = vmatprep.subr.bf16.mxu0 %v14510_v36 }
0x5eb2   :  { %13775 = vmatmul.mubr.msk.bf16.vlgmr.msra.gmra.mrb[56].mxu0 %vm178_vm2, %v15933_v14 }
0x5eb3   :  { %13786 = vmatprep.mubr.msk.bf16.mxu0 %vm14511_vm3, %v14510_v36 }
0x5f75   :  { %v10023_v50 = vpop.f32.mrb[48].mxu0 }
0x5f76   :  { %v10030_v41 = vpack.c.bf16 %v10023_v50, %v10023_v50  ;;  %v13746_v42 = vpop.f32.mrb[49].mxu0 }
0x5f77   :  { %v10026_v16 = vpop.f32.mrb[50].mxu0 }
0x5f78   :  { %v13747_v55 = vpop.f32.mrb[51].mxu0  ;;  %13751 = vmatmul.mubr.msk.bf16.vlgmr.msra.gmra.mrb[24].mxu1 %vm959_vm5, %v10030_v41  ;;  %v14144_v16 = vld [vmem:[#allocation2 + $0x5d4] sm:$0xff]  }
0x5f79   :  { %13763 = vmatpush3.bf16.msra.mxu1 %v14142_v43  ;;  %13766 = vmatprep.mubr.msk.bf16.mxu1 %vm14511_vm3, %v14510_v36 }
0x5f7a   :  { %13764 = vmatprep.subr.bf16.mxu1 %v14510_v36 }
0x5f7d   :  { %v10134_v51 = vpop.f32.mrb[52].mxu0  ;;  %13765 = vmatpush3.bf16.msra.mxu1 %v14143_v53  ;;  %v14145_v53 = vld [vmem:[#allocation2 + $0x5dc] sm:$0xff]  }
0x5f7e   :  { %v13760_v57 = vpop.f32.mrb[53].mxu0  ;;  %13778 = vmatprep.subr.bf16.mxu1 %v14510_v36  ;;  %v10135_v20 = vadd.f32 %v10134_v51, %v10087_v21  ;;  %v14147_v51 = vld [vmem:[#allocation2 + $0x5fc] sm:$0xff]  }
0x5f7f   :  { %v10137_v24 = vpop.f32.mrb[54].mxu0  ;;  %v10373_v57 = vld [vmem:[#allocation2 + $0x5c4] sm:$0xf] }
0x5f80   :  { %v13761_v4 = vpop.f32.mrb[55].mxu0  ;;  %13767 = vmatmul.mubr.msk.bf16.vlgmr.msra.gmra.mrb[36].mxu1 %vm178_vm2, %v15933_v14  ;;  %v10264_v17 = vpack.c.bf16 %v10135_v20, %v10135_v20  ;;  %v10379_v54 = vsel %vm1131_vm8, %v10373_v57, 0  ;;  %v10426_v20 = vld [vmem:[#allocation2 + $0x608] sm:$0x1] }
0x5f81   :  { %13780 = vmatprep.mubr.msk.bf16.mxu1 %vm14511_vm3, %v14510_v36  ;;  %v14148_v4 = vld [vmem:[#allocation2 + $0x5e4] sm:$0xff]  }
0x5f85   :  { %v10258_v56 = vpop.f32.mrb[56].mxu0 }
0x5f86   :  { %v10259_v39 = vadd.f32 %v10258_v56, %v10211_v15  ;;  %v13776_v46 = vpop.f32.mrb[57].mxu0 }
0x5f87   :  { %v10261_v52 = vpop.f32.mrb[58].mxu0 }
0x5f88   :  { %v10326_v29 = vpack.c.bf16 %v10259_v39, %v10259_v39  ;;  %v13777_v27 = vpop.f32.mrb[59].mxu0  ;;  %v14149_v52 = vld [vmem:[#allocation2 + $0x5ec] sm:$0xff]  }
0x5f8a   :  { %v10331_v47 = vsel %vm58_vm0, %v10326_v29, 0  ;;  %v10550_v29 = vld [vmem:[#allocation2 + $0x610] sm:$0x1] }
0x5f8b   :  { %13785 = vmatpush3.bf16.msra.mxu0 %v10331_v47  ;;  %v10551_v8 = vunpack.c.l.bf16 %v10550_v29 }
0x5f8c   :  { %13796 = vmatprep.subr.bf16.mxu0 %v14510_v36 }
0x6053   :  { %v10196_v63 = vpop.f32.mrb[36].mxu1 }
0x6054   :  { %v10197_v37 = vadd.f32 %v10196_v63, %v10149_v60  ;;  %v13768_v40 = vpop.f32.mrb[37].mxu1  ;;  %v10555_v60 = vrot.slane %v10551_v8, %v14658_v48  ;;  %v9379_v8 = vld [vmem:[#allocation2 + $0x614] sm:$0x1] }
0x6055   :  { %v10199_v58 = vpop.f32.mrb[38].mxu1 }
0x6056   :  { %v10265_v1 = vpack.c.bf16 %v10197_v37, %v10197_v37  ;;  %v13769_v45 = vpop.f32.mrb[39].mxu1 }
0x6057   :  { %v10488_v45 = vld [vmem:[#allocation2 + $0x60c] sm:$0x1] }
0x6058   :  { %v10270_v11 = vsel %vm959_vm5, %v10265_v1, 0 }
0x6059   :  { %13779 = vmatpush3.bf16.xpose.msra.mxu1 %v10270_v11  ;;  %v10489_v11 = vunpack.c.l.bf16 %v10488_v45 }
0x605a   :  { %13790 = vmatprep.subr.bf16.mxu1 %v14510_v36 }
0x6060   :  { %13781 = vmatmul.mubr.msk.bf16.vlgmr.msra.gmra.mrb[40].mxu1 %vm959_vm5, %v10264_v17  ;;  %v10493_v17 = vrot.slane %v10489_v11, %v14658_v48 }
0x6061   :  { %13792 = vmatprep.mubr.msk.bf16.mxu1 %vm14511_vm3, %v14510_v36  ;;  %13791 = vmatpush3.bf16.msra.mxu1 %v10379_v54 }
0x6062   :  { %13804 = vmatprep.subr.bf16.mxu1 %v14510_v36 }
0x6133   :  { %v10306_v5 = vpop.f32.mrb[40].mxu1 }
0x6134   :  { %v10312_v38 = vmul.f32 0.35355338, %v10306_v5  ;;  %v13782_v62 = vpop.f32.mrb[41].mxu1 }
0x6135   :  { %v10309_v23 = vpop.f32.mrb[42].mxu1 }
0x6136   :  { %v10313_v18 = vadd.f32 %v15959_v44, %v10312_v38  ;;  %v13783_v3 = vpop.f32.mrb[43].mxu1 }
0x6138   :  { %v10314_v34 = vsel %vm4311_vm12, %v10313_v18, -inf }
0x6139   :  { %10315 = vmax.xlane.f32.xlu0 %v10314_v34 }
0x61c6   :  { %v10316_v22 = vpop.xlane.xlu0 %10315 }
0x61c7   :  { %v10317_v7 = vsub.f32 %v10313_v18, %v10316_v22 }
0x61c9   :  { %v10318_v32 = vmul.f32 1.442695, %v10317_v7 }
0x61cb   :  { %14374 = vpow2.f32 %v10318_v32 }
0x61d5   :  { %v14375_v35 = vpop.eup %14374 }
0x61d6   :  { %v10320_v50 = vsel %vm4311_vm12, %v14375_v35, 0.0 }
0x61d7   :  { %10321 = vadd.xlane.f32.xlu1 %v10320_v50 }
0x6264   :  { %v10322_v43 = vpop.xlane.xlu1 %10321 }
0x6265   :  { %14376 = vrcp.f32 %v10322_v43 }
0x626f   :  { %v14377_v41 = vpop.eup %14376 }
0x6270   :  { %v10324_v42 = vmul.f32 %v14377_v41, %v14375_v35 }
0x6272   :  { %v10325_v55 = vpack.c.bf16 %v10324_v42, %v10324_v42 }
0x6274   :  { %13787 = vmatmul.mubr.msk.bf16.vlgmr.msra.gmra.mrb[60].mxu0 %vm51_vm1, %v10325_v55 }
0x6275   :  { %13797 = vmatpush3.bf16.msra.mxu0 %v14144_v16  ;;  %13800 = vmatprep.mubr.msk.bf16.mxu0 %vm14511_vm3, %v14510_v36 }
0x6276   :  { %13798 = vmatprep.subr.bf16.mxu0 %v14510_v36 }
0x6279   :  { %13799 = vmatpush3.bf16.msra.mxu0 %v14145_v53 }
0x627a   :  { %13812 = vmatprep.subr.bf16.mxu0 %v14510_v36 }
0x627c   :  { %13801 = vmatmul.mubr.msk.bf16.vlgmr.msra.gmra.mrb[64].mxu0 %vm178_vm2, %v15933_v14 }
0x627d   :  { %13813 = vmatpush3.bf16.msra.mxu0 %v14146_v31  ;;  %13816 = vmatprep.mubr.msk.bf16.mxu0 %vm14511_vm3, %v14510_v36 }
0x627e   :  { %13814 = vmatprep.subr.bf16.mxu0 %v14510_v36 }
0x6281   :  { %13815 = vmatpush3.bf16.msra.mxu0 %v14147_v51 }
0x6282   :  { %13826 = vmatprep.subr.bf16.mxu0 %v14510_v36 }
0x6284   :  { %13817 = vmatmul.mubr.msk.bf16.vlgmr.msra.gmra.mrb[68].mxu0 %vm178_vm2, %v15933_v14 }
0x6285   :  { %13828 = vmatprep.mubr.msk.bf16.mxu0 %vm14511_vm3, %v14510_v36 }
0x6347   :  { %v10367_v24 = vpop.f32.mrb[60].mxu0 }
0x6348   :  { %v10374_v15 = vpack.c.bf16 %v10367_v24, %v10367_v24  ;;  %v13788_v56 = vpop.f32.mrb[61].mxu0 }
0x6349   :  { %v10370_v39 = vpop.f32.mrb[62].mxu0 }
0x634a   :  { %v13789_v46 = vpop.f32.mrb[63].mxu0  ;;  %13793 = vmatmul.mubr.msk.bf16.vlgmr.msra.gmra.mrb[24].mxu1 %vm959_vm5, %v10374_v15 }
0x634b   :  { %13805 = vmatpush3.bf16.msra.mxu1 %v14148_v4  ;;  %13808 = vmatprep.mubr.msk.bf16.mxu1 %vm14511_vm3, %v14510_v36 }
0x634c   :  { %13806 = vmatprep.subr.bf16.mxu1 %v14510_v36 }
0x634f   :  { %v10478_v27 = vpop.f32.mrb[64].mxu0  ;;  %13807 = vmatpush3.bf16.msra.mxu1 %v14149_v52 }
0x6350   :  { %v13802_v47 = vpop.f32.mrb[65].mxu0  ;;  %13820 = vmatprep.subr.bf16.mxu1 %v14510_v36 }
0x6351   :  { %v10481_v30 = vpop.f32.mrb[66].mxu0 }
0x6352   :  { %v13803_v6 = vpop.f32.mrb[67].mxu0  ;;  %13809 = vmatmul.mubr.msk.bf16.vlgmr.msra.gmra.mrb[44].mxu1 %vm178_vm2, %v15933_v14  ;;  %v10427_v14 = vunpack.c.l.bf16 %v10426_v20  ;;  %v9380_v30 = vunpack.c.l.bf16 %v9379_v8 }
0x6353   :  { %13822 = vmatprep.mubr.msk.bf16.mxu1 %vm14511_vm3, %v14510_v36 }
0x6354   :  { %v10431_v18 = vrot.slane %v10427_v14, %v14658_v48 }
0x6356   :  { %v10479_v7 = vadd.f32 %v10478_v27, %v10431_v18 }
0x6357   :  { %v10602_v61 = vpop.f32.mrb[68].mxu0 }
0x6358   :  { %v10603_v63 = vadd.f32 %v10602_v61, %v10555_v60  ;;  %v13818_v37 = vpop.f32.mrb[69].mxu0  ;;  %v10608_v32 = vpack.c.bf16 %v10479_v7, %v10479_v7 }
0x6359   :  { %v10605_v40 = vpop.f32.mrb[70].mxu0 }
0x635a   :  { %v10670_v58 = vpack.c.bf16 %v10603_v63, %v10603_v63  ;;  %v13819_v21 = vpop.f32.mrb[71].mxu0 }
0x635c   :  { %v10675_v1 = vsel %vm58_vm0, %v10670_v58, 0 }
0x635d   :  { %13827 = vmatpush3.bf16.msra.mxu0 %v10675_v1 }
0x6425   :  { %v10540_v5 = vpop.f32.mrb[44].mxu1 }
0x6426   :  { %v10541_v38 = vadd.f32 %v10540_v5, %v10493_v17  ;;  %v13810_v62 = vpop.f32.mrb[45].mxu1 }
0x6427   :  { %v10543_v23 = vpop.f32.mrb[46].mxu1 }
0x6428   :  { %v10609_v3 = vpack.c.bf16 %v10541_v38, %v10541_v38  ;;  %v13811_v34 = vpop.f32.mrb[47].mxu1 }
0x642a   :  { %v10614_v22 = vsel %vm959_vm5, %v10609_v3, 0 }
0x642b   :  { %13821 = vmatpush3.bf16.xpose.msra.mxu1 %v10614_v22 }
0x642c   :  { %13832 = vmatprep.subr.bf16.mxu1 %v14510_v36 }
0x6432   :  { %13823 = vmatmul.mubr.msk.bf16.vlgmr.msra.gmra.mrb[48].mxu1 %vm959_vm5, %v10608_v32 }
0x6433   :  { %13834 = vmatprep.mubr.msk.bf16.mxu1 %vm14511_vm3, %v14510_v36 }
0x6505   :  { %v10650_v35 = vpop.f32.mrb[48].mxu1 }
0x6506   :  { %v10656_v50 = vmul.f32 0.35355338, %v10650_v35  ;;  %v13824_v43 = vpop.f32.mrb[49].mxu1 }
0x6507   :  { %v10653_v41 = vpop.f32.mrb[50].mxu1 }
0x6508   :  { %v10657_v42 = vadd.f32 %v15959_v44, %v10656_v50  ;;  %v13825_v16 = vpop.f32.mrb[51].mxu1  ;;  %v10717_v44 = vld [vmem:[#allocation2 + $0x604] sm:$0xf] }
0x6509   :  { %v10723_v39 = vsel %vm1131_vm8, %v10717_v44, 0 }
0x650a   :  { %v10658_v55 = vsel %vm4311_vm12, %v10657_v42, -inf  ;;  %13833 = vmatpush3.bf16.msra.mxu1 %v10723_v39 }
0x650b   :  { %10659 = vmax.xlane.f32.xlu0 %v10658_v55  ;;  %13844 = vmatprep.subr.bf16.mxu1 %v14510_v36 }
0x6598   :  { %v10660_v53 = vpop.xlane.xlu0 %10659 }
0x6599   :  { %v10661_v31 = vsub.f32 %v10657_v42, %v10660_v53 }
0x659b   :  { %v10662_v51 = vmul.f32 1.442695, %v10661_v31 }
0x659d   :  { %14378 = vpow2.f32 %v10662_v51 }
0x65a7   :  { %v14379_v57 = vpop.eup %14378 }
0x65a8   :  { %v10664_v54 = vsel %vm4311_vm12, %v14379_v57, 0.0 }
0x65a9   :  { %10665 = vadd.xlane.f32.xlu1 %v10664_v54 }
0x6636   :  { %v10666_v24 = vpop.xlane.xlu1 %10665 }
0x6637   :  { %14380 = vrcp.f32 %v10666_v24 }
0x6641   :  { %v14381_v4 = vpop.eup %14380 }
0x6642   :  { %v10668_v15 = vmul.f32 %v14381_v4, %v14379_v57 }
0x6644   :  { %v10669_v56 = vpack.c.bf16 %v10668_v15, %v10668_v15 }
0x6646   :  { %13829 = vmatmul.mubr.msk.bf16.vlgmr.msra.gmra.mrb[72].mxu0 %vm51_vm1, %v10669_v56 }
0x6647   :  { %13840 = vmatprep.mubr.msk.bf16.mxu0 %vm51_vm1, %v15297_v28  ;;  %v9384_v28 = vrot.slane %v9380_v30, %v14658_v48 }
0x6719   :  { %v10711_v46 = vpop.f32.mrb[72].mxu0 }
0x671a   :  { %v10718_v52 = vpack.c.bf16 %v10711_v46, %v10711_v46  ;;  %v13830_v29 = vpop.f32.mrb[73].mxu0 }
0x671b   :  { %v10714_v27 = vpop.f32.mrb[74].mxu0  ;;  %v14151_v29 = vld [vmem:[#allocation2 + $0x658] sm:$0xff]  }
0x671c   :  { %v13831_v47 = vpop.f32.mrb[75].mxu0  ;;  %13835 = vmatmul.mubr.msk.bf16.vlgmr.msra.gmra.mrb[24].mxu1 %vm959_vm5, %v10718_v52  ;;  %v14150_v52 = vld [vmem:[#allocation2 + $0x650] sm:$0xff]  }
0x671d   :  { %13846 = vmatprep.mubr.msk.bf16.mxu1 %vm14511_vm3, %v14510_v36 }
0x67ef   :  { %v10759_v6 = vpop.f32.mrb[24].mxu1 }
0x67f0   :  { %v13921_v60 = vadd.f32 %v10759_v6, %v9384_v28  ;;  %v13836_v61 = vpop.f32.mrb[25].mxu1 }
0x67f1   :  { %v10762_v63 = vpop.f32.mrb[26].mxu1 }
0x67f2   :  { %v10766_v37 = vpack.c.bf16 %v13921_v60, %v13921_v60  ;;  %v13837_v40 = vpop.f32.mrb[27].mxu1 }
0x67f4   :  { %v10768_v58 = vsel %vm58_vm0, %v10766_v37, 0  ;;  %13990 = vmatprep.subr.msk.bf16.mxu0 %vm58_vm0, %v10766_v37  ;;  %v10906_v37 = vld [vmem:[#allocation2 + $0x698] sm:$0x1] }
0x67f5   :  { %13839 = vmatpush3.bf16.msra.mxu0 %v10768_v58  ;;  %13845 = vmatpush3.bf16.msra.mxu1 %v10768_v58 }
0x67f6   :  { %13850 = vmatprep.subr.bf16.mxu0 %v14150_v52 }
0x67f8   :  { %13841 = vmatmul.mubr.msk.bf16.vlgmr.msra.gmra.mrb[76].mxu0 %vm51_vm1, %v15304_v49  ;;  %13847 = vmatmul.mubr.msk.bf16.vlgmr.msra.gmra.mrb[52].mxu1 %vm51_vm1, %v15306_v33 }
0x67f9   :  { %13851 = vmatpush3.bf16.msra.mxu0 %v14150_v52 }
0x67fa   :  { %13852 = vmatprep.subr.bf16.mxu0 %v14151_v29 }
0x67fd   :  { %13853 = vmatpush3.bf16.msra.mxu0 %v14151_v29 }
0x67fe   :  { %13870 = vmatprep.subr.bf16.mxu0 %v14510_v36 }
0x68cb   :  { %v13842_v21 = vpop.f32.mrb[76].mxu0  ;;  %v10855_v1 = vpop.f32.mrb[52].mxu1 }
0x68cc   :  { %v10820_v45 = vadd.f32 %v13842_v21, %v15732_v59  ;;  %v10862_v11 = vadd.f32 %v10855_v1, %v15928_v12  ;;  %v10804_v20 = vpop.f32.mrb[77].mxu0  ;;  %v13848_v17 = vpop.f32.mrb[53].mxu1 }
0x68cd   :  { %v10818_v14 = vadd.f32 %v10804_v20, %v15735_v0  ;;  %v13843_v5 = vpop.f32.mrb[78].mxu0  ;;  %v10858_v38 = vpop.f32.mrb[54].mxu1  ;;  %v10915_v20 = vld [vmem:[#allocation2 + $0x69c] sm:$0x1] }
0x68ce   :  { %v10863_v62 = vadd.f32 %v10858_v38, %v15931_v13  ;;  %v10807_v23 = vpop.f32.mrb[79].mxu0  ;;  %v13849_v18 = vpop.f32.mrb[55].mxu1  ;;  %v10866_v3 = vadd.f32 %v10820_v45, %v15426_v2  ;;  %v11183_v34 = vadd.f32 %v10862_v11, %v15698_v9  ;;  %v10907_v11 = vunpack.c.l.bf16 %v10906_v37 }
0x68cf   :  { %v10864_v49 = vadd.f32 %v10818_v14, %v15415_v19  ;;  %v10819_v33 = vadd.f32 %v10807_v23, %v15738_v10  ;;  %v10916_v5 = vunpack.c.l.bf16 %v10915_v20 }
0x68d0   :  { %v11184_v13 = vadd.f32 %v10863_v62, %v15701_v25  ;;  %v10873_v22 = vsel %vm5576_vm13, %v10866_v3, 0.0  ;;  %v11185_v19 = vsel %vm178_vm2, %v11183_v34, 0.0  ;;  %v10911_v14 = vrot.slane %v10907_v11, %v14658_v48 }
0x68d1   :  { %v10865_v59 = vadd.f32 %v10819_v33, %v15418_v26  ;;  %v10867_v12 = vsel %vm178_vm2, %v10864_v49, 0.0 }
0x68d2   :  { %10868 = vadd.xlane.f32.xlu0 %v10867_v12  ;;  %v11188_v2 = vsel %vm5576_vm13, %v11184_v13, 0.0 }
0x68d3   :  { %v10870_v0 = vsel %vm178_vm2, %v10865_v59, 0.0 }
0x68d4   :  { %10871 = vadd.xlane.f32.xlu1 %v10870_v0 }
0x68d6   :  { %10874 = vadd.xlane.f32.xlu0 %v10873_v22 }
0x68d8   :  { %11186 = vadd.xlane.f32.xlu1 %v11185_v19 }
0x68da   :  { %11189 = vadd.xlane.f32.xlu0 %v11188_v2 }
0x695f   :  { %v10869_v26 = vpop.xlane.xlu0 %10868 }
0x6960   :  { %v10876_v10 = vmul.f32 0.03125, %v10869_v26 }
0x6961   :  { %v10872_v7 = vpop.xlane.xlu1 %10871 }
0x6962   :  { %v10879_v32 = vsub.f32 %v10864_v49, %v10876_v10  ;;  %v10877_v35 = vmul.f32 0.03125, %v10872_v7  ;;  %v10920_v49 = vrot.slane %v10916_v5, %v14658_v48 }
0x6963   :  { %v10875_v9 = vpop.xlane.xlu0 %10874 }
0x6964   :  { %v10880_v50 = vsub.f32 %v10865_v59, %v10877_v35  ;;  %v10878_v43 = vmul.f32 0.03125, %v10875_v9  ;;  %v10882_v41 = vmul.f32 %v10879_v32, %v10879_v32 }
0x6965   :  { %v11187_v42 = vpop.xlane.xlu1 %11186 }
0x6966   :  { %v10881_v25 = vsub.f32 %v10866_v3, %v10878_v43  ;;  %v11191_v16 = vmul.f32 0.03125, %v11187_v42  ;;  %v10885_v55 = vsel %vm178_vm2, %v10882_v41, 0.0  ;;  %v10883_v53 = vmul.f32 %v10880_v50, %v10880_v50  ;;  %v14152_v42 = vld [vmem:[#allocation2 + $0x664] sm:$0xff]  }
0x6967   :  { %v11190_v31 = vpop.xlane.xlu0 %11189  ;;  %10886 = vadd.xlane.f32.xlu1 %v10885_v55  ;;  %13858 = vmatprep.subr.bf16.mxu1 %v14152_v42  ;;  %v14155_v55 = vld [vmem:[#allocation2 + $0x67c] sm:$0xff]  }
0x6968   :  { %v11193_v51 = vsub.f32 %v11183_v34, %v11191_v16  ;;  %v11192_v57 = vmul.f32 0.03125, %v11190_v31  ;;  %v10888_v54 = vsel %vm178_vm2, %v10883_v53, 0.0  ;;  %v10884_v24 = vmul.f32 %v10881_v25, %v10881_v25  ;;  %13859 = vmatpush3.bf16.msra.mxu1 %v14152_v42  ;;  %v14154_v16 = vld [vmem:[#allocation2 + $0x674] sm:$0xff]   ;;  %v10930_v53 = vld [vmem:[#allocation2 + $0x660] sm:$0x1] }
0x6969   :  { %10889 = vadd.xlane.f32.xlu0 %v10888_v54  ;;  %v10931_v31 = vunpack.c.l.bf16 %v10930_v53 }
0x696a   :  { %v11194_v4 = vsub.f32 %v11184_v13, %v11192_v57  ;;  %v10891_v15 = vsel %vm5576_vm13, %v10884_v24, 0.0  ;;  %v11195_v56 = vmul.f32 %v11193_v51, %v11193_v51 }
0x696b   :  { %10892 = vadd.xlane.f32.xlu1 %v10891_v15 }
0x696c   :  { %v11197_v44 = vsel %vm178_vm2, %v11195_v56, 0.0  ;;  %v11196_v39 = vmul.f32 %v11194_v4, %v11194_v4 }
0x696d   :  { %11198 = vadd.xlane.f32.xlu0 %v11197_v44 }
0x696e   :  { %v11200_v46 = vsel %vm5576_vm13, %v11196_v39, 0.0 }
0x696f   :  { %11201 = vadd.xlane.f32.xlu1 %v11200_v46 }
0x69f4   :  { %v10887_v27 = vpop.xlane.xlu1 %10886 }
0x69f5   :  { %v10894_v47 = vmul.f32 0.03125, %v10887_v27 }
0x69f6   :  { %v10890_v8 = vpop.xlane.xlu0 %10889 }
0x69f7   :  { %v10897_v30 = vadd.f32 1e-05, %v10894_v47  ;;  %v10895_v28 = vmul.f32 0.03125, %v10890_v8 }
0x69f8   :  { %v10893_v6 = vpop.xlane.xlu1 %10892 }
0x69f9   :  { %14382 = vrsqrt.f32 %v10897_v30  ;;  %v10898_v60 = vadd.f32 1e-05, %v10895_v28  ;;  %v10896_v61 = vmul.f32 0.03125, %v10893_v6 }
0x69fa   :  { %v11199_v63 = vpop.xlane.xlu0 %11198 }
0x69fb   :  { %14384 = vrsqrt.f32 %v10898_v60  ;;  %v10899_v40 = vadd.f32 1e-05, %v10896_v61  ;;  %v11203_v58 = vmul.f32 0.03125, %v11199_v63 }
0x69fc   :  { %v11202_v21 = vpop.xlane.xlu1 %11201 }
0x69fd   :  { %14386 = vrsqrt.f32 %v10899_v40  ;;  %v11205_v1 = vadd.f32 1e-05, %v11203_v58  ;;  %v11204_v45 = vmul.f32 0.03125, %v11202_v21 }
0x69ff   :  { %14388 = vrsqrt.f32 %v11205_v1  ;;  %v11206_v17 = vadd.f32 1e-05, %v11204_v45 }
0x6a01   :  { %14390 = vrsqrt.f32 %v11206_v17 }
0x6a03   :  { %v14383_v38 = vpop.eup %14382 }
0x6a04   :  { %v10903_v62 = vmul.f32 %v14383_v38, %v10879_v32 }
0x6a05   :  { %v14385_v23 = vpop.eup %14384 }
0x6a06   :  { %v10904_v18 = vmul.f32 %v14385_v23, %v10880_v50  ;;  %v10912_v33 = vmul.f32 %v10911_v14, %v10903_v62 }
0x6a07   :  { %v14387_v3 = vpop.eup %14386 }
0x6a08   :  { %v10905_v59 = vmul.f32 %v14387_v3, %v10881_v25  ;;  %v10913_v12 = vmul.f32 %v10911_v14, %v10904_v18  ;;  %v16118_v13 = vadd.f32 %v10920_v49, %v10912_v33  ;;  %v14153_v25 = vld [vmem:[#allocation2 + $0x66c] sm:$0xff]  }
0x6a09   :  { %v14389_v34 = vpop.eup %14388  ;;  %13860 = vmatprep.subr.bf16.mxu1 %v14153_v25 }
0x6a0a   :  { %v10914_v0 = vmul.f32 %v10911_v14, %v10905_v59  ;;  %v16120_v22 = vadd.f32 %v10920_v49, %v10913_v12  ;;  %v11209_v26 = vmul.f32 %v14389_v34, %v11193_v51  ;;  %13861 = vmatpush3.bf16.msra.mxu1 %v14153_v25  ;;  %v10935_v51 = vrot.slane %v10931_v31, %v14658_v48 }
0x6a0b   :  { %v14391_v19 = vpop.eup %14390  ;;  %13862 = vmatprep.subr.bf16.mxu1 %v14154_v16 }
0x6a0c   :  { %v16122_v2 = vadd.f32 %v10920_v49, %v10914_v0  ;;  %v11210_v10 = vmul.f32 %v14391_v19, %v11194_v4  ;;  %v10928_v7 = vpack.c.bf16 %v16120_v22, %v16118_v13  ;;  %v11211_v9 = vmul.f32 %v11209_v26, %v10911_v14 }
0x6a0e   :  { %v10929_v32 = vpack.c.bf16 %v16122_v2, %v16122_v2  ;;  %v11212_v35 = vmul.f32 %v11210_v10, %v10911_v14  ;;  %13854 = vmatprep.mubr.msk.bf16.mxu0 %vm178_vm2, %v10928_v7  ;;  %v16135_v43 = vadd.f32 %v11211_v9, %v10920_v49  ;;  %13863 = vmatpush3.bf16.msra.mxu1 %v14154_v16 }
0x6a0f   :  { %13864 = vmatprep.subr.bf16.mxu1 %v14155_v55 }
0x6a10   :  { %13855 = vmatmul.mubr.msk.bf16.vlgmr.msra.gmra.mrb[80].mxu0 %vm178_vm2, %v10929_v32  ;;  %v16132_v50 = vadd.f32 %v11212_v35, %v10920_v49 }
0x6a11   :  { %13871 = vmatpush3.bf16.msra.mxu0 %v14150_v52  ;;  %13874 = vmatprep.mubr.msk.bf16.mxu0 %vm14511_vm3, %v14510_v36 }
0x6a12   :  { %13872 = vmatprep.subr.bf16.mxu0 %v14510_v36  ;;  %v11215_v41 = vpack.c.bf16 %v16132_v50, %v16135_v43  ;;  %13865 = vmatpush3.bf16.msra.mxu1 %v14155_v55 }
0x6a13   :  { %13890 = vmatprep.subr.bf16.mxu1 %v14510_v36 }
0x6a15   :  { %13873 = vmatpush3.bf16.msra.mxu0 %v14151_v29 }
0x6a16   :  { %13878 = vmatprep.subr.bf16.mxu0 %v14510_v36 }
0x6a18   :  { %13875 = vmatmul.mubr.msk.bf16.vlgmr.msra.gmra.mrb[84].mxu0 %vm178_vm2, %v11215_v41 }
0x6a19   :  { %13886 = vmatprep.mubr.msk.bf16.mxu0 %vm14511_vm3, %v14510_v36  ;;  %13879 = vmatpush3.bf16.msra.mxu0 %v14152_v42 }
0x6a1a   :  { %13880 = vmatprep.subr.bf16.mxu0 %v14510_v36 }
0x6a1d   :  { %13881 = vmatpush3.bf16.msra.mxu0 %v14153_v25 }
0x6a1e   :  { %13882 = vmatprep.subr.bf16.mxu0 %v14510_v36 }
0x6a21   :  { %13883 = vmatpush3.bf16.msra.mxu0 %v14154_v16 }
0x6a22   :  { %13884 = vmatprep.subr.bf16.mxu0 %v14510_v36 }
0x6a25   :  { %13885 = vmatpush3.bf16.msra.mxu0 %v14155_v55 }
0x6a26   :  { %13906 = vmatprep.subr.bf16.mxu0 %v14510_v36 }
0x6ae3   :  { %v13856_v57 = vpop.f32.mrb[80].mxu0 }
0x6ae4   :  { %v10997_v54 = vadd.f32 %v13856_v57, %v10935_v51  ;;  %v10988_v24 = vpop.f32.mrb[81].mxu0 }
0x6ae5   :  { %v10989_v4 = vadd.f32 %v10988_v24, %v10935_v51  ;;  %v13857_v15 = vpop.f32.mrb[82].mxu0 }
0x6ae6   :  { %v11007_v56 = vmul.f32 0.044715, %v10997_v54  ;;  %v10991_v44 = vpop.f32.mrb[83].mxu0  ;;  %v11004_v26 = vmul.f32 0.5, %v10997_v54  ;;  %v11039_v15 = vld [vmem:[#allocation2 + $0x684] sm:$0x1] }
0x6ae7   :  { %v11005_v39 = vmul.f32 0.044715, %v10989_v4  ;;  %v10992_v46 = vadd.f32 %v10991_v44, %v10935_v51  ;;  %v11002_v10 = vmul.f32 0.5, %v10989_v4 }
0x6ae8   :  { %v11010_v52 = vmul.f32 %v11007_v56, %v10997_v54  ;;  %v11040_v56 = vunpack.c.l.bf16 %v11039_v15  ;;  %v11165_v15 = vld [vmem:[#allocation2 + $0x6a0] sm:$0x1] }
0x6ae9   :  { %v11008_v29 = vmul.f32 %v11005_v39, %v10989_v4  ;;  %v11006_v27 = vmul.f32 0.044715, %v10992_v46  ;;  %v11003_v7 = vmul.f32 0.5, %v10992_v46 }
0x6aea   :  { %v11013_v47 = vmul.f32 %v11010_v52, %v10997_v54  ;;  %v11044_v44 = vrot.slane %v11040_v56, %v14658_v48 }
0x6aeb   :  { %v11011_v8 = vmul.f32 %v11008_v29, %v10989_v4  ;;  %v11009_v30 = vmul.f32 %v11006_v27, %v10992_v46  ;;  %v11253_v28 = vpop.f32.mrb[84].mxu0 }
0x6aec   :  { %v11016_v6 = vadd.f32 %v11013_v47, %v10997_v54  ;;  %v11254_v60 = vadd.f32 %v11253_v28, %v10935_v51  ;;  %v13876_v61 = vpop.f32.mrb[85].mxu0 }
0x6aed   :  { %v11014_v63 = vadd.f32 %v11011_v8, %v10989_v4  ;;  %v11012_v37 = vmul.f32 %v11009_v30, %v10992_v46  ;;  %v11256_v40 = vpop.f32.mrb[86].mxu0 }
0x6aee   :  { %v11019_v58 = vmul.f32 0.7978846, %v11016_v6  ;;  %v11262_v21 = vmul.f32 0.044715, %v11254_v60  ;;  %v11257_v1 = vadd.f32 %v11256_v40, %v10935_v51  ;;  %v13877_v45 = vpop.f32.mrb[87].mxu0  ;;  %v11260_v31 = vmul.f32 0.5, %v11254_v60 }
0x6aef   :  { %v11017_v11 = vmul.f32 0.7978846, %v11014_v63  ;;  %v11015_v20 = vadd.f32 %v11012_v37, %v10992_v46 }
0x6af0   :  { %14392 = vtanh.f32 %v11019_v58  ;;  %v11264_v17 = vmul.f32 %v11262_v21, %v11254_v60  ;;  %v11263_v14 = vmul.f32 0.044715, %v11257_v1  ;;  %v11261_v51 = vmul.f32 0.5, %v11257_v1 }
0x6af1   :  { %14394 = vtanh.f32 %v11017_v11  ;;  %v11018_v5 = vmul.f32 0.7978846, %v11015_v20 }
0x6af2   :  { %v11266_v38 = vmul.f32 %v11264_v17, %v11254_v60  ;;  %v11265_v62 = vmul.f32 %v11263_v14, %v11257_v1 }
0x6af3   :  { %14396 = vtanh.f32 %v11018_v5 }
0x6af4   :  { %v11268_v23 = vadd.f32 %v11266_v38, %v11254_v60  ;;  %v11267_v18 = vmul.f32 %v11265_v62, %v11257_v1 }
0x6af6   :  { %v11270_v49 = vmul.f32 0.7978846, %v11268_v23  ;;  %v11269_v33 = vadd.f32 %v11267_v18, %v11257_v1 }
0x6af8   :  { %14398 = vtanh.f32 %v11270_v49  ;;  %v11271_v3 = vmul.f32 0.7978846, %v11269_v33 }
0x6afa   :  { %v14393_v59 = vpop.eup %14392  ;;  %14400 = vtanh.f32 %v11271_v3 }
0x6afb   :  { %v14395_v12 = vpop.eup %14394  ;;  %v11025_v34 = vadd.f32 1.0, %v14393_v59 }
0x6afc   :  { %v11023_v0 = vadd.f32 1.0, %v14395_v12 }
0x6afd   :  { %v14397_v19 = vpop.eup %14396  ;;  %v11028_v35 = vmul.f32 %v11025_v34, %v11004_v26 }
0x6afe   :  { %v11024_v32 = vadd.f32 1.0, %v14397_v19  ;;  %v11026_v9 = vmul.f32 %v11023_v0, %v11002_v10 }
0x6aff   :  { %v11038_v16 = vpack.c.bf16 %v11028_v35, %v11028_v35 }
0x6b00   :  { %v11027_v41 = vmul.f32 %v11024_v32, %v11003_v7 }
0x6b02   :  { %v14399_v42 = vpop.eup %14398  ;;  %v11037_v25 = vpack.c.bf16 %v11027_v41, %v11026_v9 }
0x6b03   :  { %v11274_v55 = vadd.f32 1.0, %v14399_v42 }
0x6b04   :  { %v14401_v53 = vpop.eup %14400  ;;  %13866 = vmatprep.mubr.msk.bf16.mxu1 %vm5774_vm14, %v11037_v25 }
0x6b05   :  { %v11275_v57 = vadd.f32 1.0, %v14401_v53  ;;  %13867 = vmatmul.mubr.msk.bf16.vlgmr.msra.gmra.mrb[56].mxu1 %vm5774_vm14, %v11038_v16  ;;  %v11276_v54 = vmul.f32 %v11274_v55, %v11260_v31 }
0x6b06   :  { %13894 = vmatprep.mubr.msk.bf16.mxu1 %vm14511_vm3, %v14510_v36 }
0x6b07   :  { %v11277_v24 = vmul.f32 %v11275_v57, %v11261_v51 }
0x6b09   :  { %v11278_v4 = vpack.c.bf16 %v11277_v24, %v11276_v54 }
0x6b0b   :  { %13887 = vmatmul.mubr.msk.bf16.vlgmr.msra.gmra.mrb[88].mxu0 %vm5774_vm14, %v11278_v4 }
0x6b0c   :  { %13908 = vmatprep.mubr.msk.bf16.mxu0 %vm14511_vm3, %v14510_v36 }
0x6bd8   :  { %v13868_v39 = vpop.f32.mrb[56].mxu1 }
0x6bd9   :  { %v11109_v46 = vpop.f32.mrb[57].mxu1  ;;  %v11118_v52 = vadd.f32 %v13868_v39, %v11044_v44 }
0x6bda   :  { %v11110_v29 = vadd.f32 %v11109_v46, %v11044_v44  ;;  %v13869_v27 = vpop.f32.mrb[58].mxu1  ;;  %v11174_v46 = vld [vmem:[#allocation2 + $0x6a4] sm:$0x1] }
0x6bdb   :  { %v11112_v47 = vpop.f32.mrb[59].mxu1  ;;  %v11125_v28 = vadd.f32 %v11118_v52, %v16122_v2  ;;  %v11166_v52 = vunpack.c.l.bf16 %v11165_v15  ;;  %v11175_v27 = vunpack.c.l.bf16 %v11174_v46 }
0x6bdc   :  { %v11123_v8 = vadd.f32 %v11110_v29, %v16118_v13  ;;  %v11113_v30 = vadd.f32 %v11112_v47, %v11044_v44 }
0x6bdd   :  { %v11132_v13 = vsel %vm5576_vm13, %v11125_v28, 0.0  ;;  %v11170_v47 = vrot.slane %v11166_v52, %v14658_v48 }
0x6bde   :  { %v11124_v6 = vadd.f32 %v11113_v30, %v16120_v22  ;;  %v11316_v60 = vpop.f32.mrb[88].mxu0  ;;  %v11126_v61 = vsel %vm178_vm2, %v11123_v8, 0.0 }
0x6bdf   :  { %v11317_v63 = vadd.f32 %v11316_v60, %v11044_v44  ;;  %11127 = vadd.xlane.f32.xlu0 %v11126_v61  ;;  %v13888_v37 = vpop.f32.mrb[89].mxu0 }
0x6be0   :  { %v11319_v40 = vpop.f32.mrb[90].mxu0  ;;  %v11129_v58 = vsel %vm178_vm2, %v11124_v6, 0.0 }
0x6be1   :  { %v11323_v21 = vadd.f32 %v11317_v63, %v16135_v43  ;;  %v11320_v1 = vadd.f32 %v11319_v40, %v11044_v44  ;;  %11130 = vadd.xlane.f32.xlu1 %v11129_v58  ;;  %v13889_v45 = vpop.f32.mrb[91].mxu0 }
0x6be3   :  { %v11324_v2 = vadd.f32 %v11320_v1, %v16132_v50  ;;  %11133 = vadd.xlane.f32.xlu0 %v11132_v13  ;;  %v11325_v22 = vsel %vm178_vm2, %v11323_v21, 0.0 }
0x6be5   :  { %11326 = vadd.xlane.f32.xlu1 %v11325_v22  ;;  %v11328_v11 = vsel %vm5576_vm13, %v11324_v2, 0.0 }
0x6be7   :  { %11329 = vadd.xlane.f32.xlu0 %v11328_v11 }
0x6c6c   :  { %v11128_v20 = vpop.xlane.xlu0 %11127 }
0x6c6d   :  { %v11135_v17 = vmul.f32 0.03125, %v11128_v20 }
0x6c6e   :  { %v11131_v14 = vpop.xlane.xlu1 %11130 }
0x6c6f   :  { %v11138_v5 = vsub.f32 %v11123_v8, %v11135_v17  ;;  %v11136_v38 = vmul.f32 0.03125, %v11131_v14 }
0x6c70   :  { %v11134_v43 = vpop.xlane.xlu0 %11133 }
0x6c71   :  { %v11139_v62 = vsub.f32 %v11124_v6, %v11136_v38  ;;  %v11137_v23 = vmul.f32 0.03125, %v11134_v43  ;;  %v11141_v18 = vmul.f32 %v11138_v5, %v11138_v5 }
0x6c72   :  { %v11327_v49 = vpop.xlane.xlu1 %11326 }
0x6c73   :  { %v11140_v33 = vsub.f32 %v11125_v28, %v11137_v23  ;;  %v11331_v3 = vmul.f32 0.03125, %v11327_v49  ;;  %v11144_v50 = vsel %vm178_vm2, %v11141_v18, 0.0  ;;  %v11142_v59 = vmul.f32 %v11139_v62, %v11139_v62 }
0x6c74   :  { %11145 = vadd.xlane.f32.xlu1 %v11144_v50  ;;  %v11330_v12 = vpop.xlane.xlu0 %11329  ;;  %v11179_v28 = vrot.slane %v11175_v27, %v14658_v48 }
0x6c75   :  { %v11333_v34 = vsub.f32 %v11323_v21, %v11331_v3  ;;  %v11332_v0 = vmul.f32 0.03125, %v11330_v12  ;;  %v11147_v19 = vsel %vm178_vm2, %v11142_v59, 0.0  ;;  %v11143_v26 = vmul.f32 %v11140_v33, %v11140_v33 }
0x6c76   :  { %11148 = vadd.xlane.f32.xlu0 %v11147_v19 }
0x6c77   :  { %v11334_v10 = vsub.f32 %v11324_v2, %v11332_v0  ;;  %v11150_v7 = vsel %vm5576_vm13, %v11143_v26, 0.0  ;;  %v11335_v32 = vmul.f32 %v11333_v34, %v11333_v34 }
0x6c78   :  { %11151 = vadd.xlane.f32.xlu1 %v11150_v7 }
0x6c79   :  { %v11337_v35 = vsel %vm178_vm2, %v11335_v32, 0.0  ;;  %v11336_v9 = vmul.f32 %v11334_v10, %v11334_v10 }
0x6c7a   :  { %11338 = vadd.xlane.f32.xlu0 %v11337_v35 }
0x6c7b   :  { %v11340_v41 = vsel %vm5576_vm13, %v11336_v9, 0.0 }
0x6c7c   :  { %11341 = vadd.xlane.f32.xlu1 %v11340_v41 }
0x6d01   :  { %v11146_v42 = vpop.xlane.xlu1 %11145 }
0x6d02   :  { %v11153_v25 = vmul.f32 0.03125, %v11146_v42 }
0x6d03   :  { %v11149_v16 = vpop.xlane.xlu0 %11148 }
0x6d04   :  { %v11156_v55 = vadd.f32 1e-05, %v11153_v25  ;;  %v11154_v53 = vmul.f32 0.03125, %v11149_v16 }
0x6d05   :  { %v11152_v31 = vpop.xlane.xlu1 %11151 }
0x6d06   :  { %14402 = vrsqrt.f32 %v11156_v55  ;;  %v11157_v51 = vadd.f32 1e-05, %v11154_v53  ;;  %v11155_v57 = vmul.f32 0.03125, %v11152_v31 }
0x6d07   :  { %v11339_v54 = vpop.xlane.xlu0 %11338 }
0x6d08   :  { %14404 = vrsqrt.f32 %v11157_v51  ;;  %v11158_v24 = vadd.f32 1e-05, %v11155_v57  ;;  %v11343_v4 = vmul.f32 0.03125, %v11339_v54 }
0x6d09   :  { %v11342_v56 = vpop.xlane.xlu1 %11341 }
0x6d0a   :  { %14406 = vrsqrt.f32 %v11158_v24  ;;  %v11345_v44 = vadd.f32 1e-05, %v11343_v4  ;;  %v11344_v39 = vmul.f32 0.03125, %v11342_v56 }
0x6d0c   :  { %14408 = vrsqrt.f32 %v11345_v44  ;;  %v11346_v29 = vadd.f32 1e-05, %v11344_v39 }
0x6d0e   :  { %14410 = vrsqrt.f32 %v11346_v29 }
0x6d10   :  { %v14403_v8 = vpop.eup %14402 }
0x6d11   :  { %v11162_v30 = vmul.f32 %v14403_v8, %v11138_v5  ;;  %v11401_v8 = vld [vmem:[#allocation2 + $0x6a8] sm:$0x1] }
0x6d12   :  { %v14405_v6 = vpop.eup %14404 }
0x6d13   :  { %v11171_v60 = vmul.f32 %v11170_v47, %v11162_v30  ;;  %v11163_v61 = vmul.f32 %v14405_v6, %v11139_v62 }
0x6d14   :  { %v14407_v63 = vpop.eup %14406 }
0x6d15   :  { %v11180_v37 = vadd.f32 %v11179_v28, %v11171_v60  ;;  %v11172_v40 = vmul.f32 %v11170_v47, %v11163_v61  ;;  %v11164_v58 = vmul.f32 %v14407_v63, %v11140_v33  ;;  %v11402_v60 = vunpack.c.l.bf16 %v11401_v8  ;;  %v11410_v63 = vld [vmem:[#allocation2 + $0x6ac] sm:$0x1] }
0x6d16   :  { %v14409_v21 = vpop.eup %14408 }
0x6d17   :  { %v11362_v1 = vsel %vm178_vm2, %v11180_v37, 0.0  ;;  %v11181_v45 = vadd.f32 %v11179_v28, %v11172_v40  ;;  %v11173_v13 = vmul.f32 %v11170_v47, %v11164_v58  ;;  %v11349_v2 = vmul.f32 %v14409_v21, %v11333_v34 }
0x6d18   :  { %v14411_v22 = vpop.eup %14410  ;;  %11363 = vadd.xlane.f32.xlu0 %v11362_v1  ;;  %v11411_v40 = vunpack.c.l.bf16 %v11410_v63  ;;  %v14159_v63 = vld [vmem:[#allocation2 + $0x6ec] sm:$0xff]  }
0x6d19   :  { %v11365_v11 = vsel %vm178_vm2, %v11181_v45, 0.0  ;;  %v11182_v20 = vadd.f32 %v11179_v28, %v11173_v13  ;;  %v11351_v17 = vmul.f32 %v11349_v2, %v11170_v47  ;;  %v11350_v14 = vmul.f32 %v14411_v22, %v11334_v10 }
0x6d1a   :  { %11366 = vadd.xlane.f32.xlu1 %v11365_v11  ;;  %v11415_v2 = vrot.slane %v11411_v40, %v14658_v48 }
0x6d1b   :  { %v11368_v5 = vsel %vm5576_vm13, %v11182_v20, 0.0  ;;  %v11353_v38 = vadd.f32 %v11351_v17, %v11179_v28  ;;  %v11352_v43 = vmul.f32 %v11350_v14, %v11170_v47 }
0x6d1c   :  { %11369 = vadd.xlane.f32.xlu0 %v11368_v5 }
0x6d1d   :  { %v11540_v62 = vsel %vm178_vm2, %v11353_v38, 0.0  ;;  %v11354_v23 = vadd.f32 %v11352_v43, %v11179_v28 }
0x6d1e   :  { %11541 = vadd.xlane.f32.xlu1 %v11540_v62 }
0x6d1f   :  { %v11543_v18 = vsel %vm5576_vm13, %v11354_v23, 0.0 }
0x6d20   :  { %11544 = vadd.xlane.f32.xlu0 %v11543_v18 }
0x6da5   :  { %v11364_v49 = vpop.xlane.xlu0 %11363 }
0x6da6   :  { %v11371_v33 = vmul.f32 0.03125, %v11364_v49 }
0x6da7   :  { %v11367_v3 = vpop.xlane.xlu1 %11366 }
0x6da8   :  { %v11374_v50 = vsub.f32 %v11180_v37, %v11371_v33  ;;  %v11372_v59 = vmul.f32 0.03125, %v11367_v3  ;;  %v11406_v37 = vrot.slane %v11402_v60, %v14658_v48 }
0x6da9   :  { %v11370_v12 = vpop.xlane.xlu0 %11369 }
0x6daa   :  { %v11375_v34 = vsub.f32 %v11181_v45, %v11372_v59  ;;  %v11373_v0 = vmul.f32 0.03125, %v11370_v12  ;;  %v11377_v19 = vmul.f32 %v11374_v50, %v11374_v50 }
0x6dab   :  { %v11542_v26 = vpop.xlane.xlu1 %11541 }
0x6dac   :  { %v11376_v10 = vsub.f32 %v11182_v20, %v11373_v0  ;;  %v11546_v7 = vmul.f32 0.03125, %v11542_v26  ;;  %v11380_v32 = vsel %vm178_vm2, %v11377_v19, 0.0  ;;  %v11378_v35 = vmul.f32 %v11375_v34, %v11375_v34  ;;  %v11570_v26 = vld [vmem:[#allocation5 + $0xd8] sm:$0x3] }
0x6dad   :  { %11381 = vadd.xlane.f32.xlu1 %v11380_v32  ;;  %v11545_v9 = vpop.xlane.xlu0 %11544  ;;  %v11571_v32 = vpack.c.bf16 %v11570_v26, %v11570_v26 }
0x6dae   :  { %v11548_v41 = vsub.f32 %v11353_v38, %v11546_v7  ;;  %v11547_v42 = vmul.f32 0.03125, %v11545_v9  ;;  %v11383_v25 = vsel %vm178_vm2, %v11378_v35, 0.0  ;;  %v11379_v16 = vmul.f32 %v11376_v10, %v11376_v10  ;;  %v14156_v35 = vld [vmem:[#allocation2 + $0x6d4] sm:$0xff]   ;;  %v14157_v9 = vld [vmem:[#allocation2 + $0x6dc] sm:$0xff]  }
0x6daf   :  { %11384 = vadd.xlane.f32.xlu0 %v11383_v25 }
0x6db0   :  { %v11549_v55 = vsub.f32 %v11354_v23, %v11547_v42  ;;  %v11386_v53 = vsel %vm5576_vm13, %v11379_v16, 0.0  ;;  %v11550_v31 = vmul.f32 %v11548_v41, %v11548_v41 }
0x6db1   :  { %11387 = vadd.xlane.f32.xlu1 %v11386_v53 }
0x6db2   :  { %v11552_v51 = vsel %vm178_vm2, %v11550_v31, 0.0  ;;  %v11551_v57 = vmul.f32 %v11549_v55, %v11549_v55 }
0x6db3   :  { %11553 = vadd.xlane.f32.xlu0 %v11552_v51 }
0x6db4   :  { %v11555_v54 = vsel %vm5576_vm13, %v11551_v57, 0.0 }
0x6db5   :  { %11556 = vadd.xlane.f32.xlu1 %v11555_v54 }
0x6e3a   :  { %v11382_v24 = vpop.xlane.xlu1 %11381 }
0x6e3b   :  { %v11389_v4 = vmul.f32 0.03125, %v11382_v24 }
0x6e3c   :  { %v11385_v15 = vpop.xlane.xlu0 %11384 }
0x6e3d   :  { %v11392_v56 = vadd.f32 1e-05, %v11389_v4  ;;  %v11390_v44 = vmul.f32 0.03125, %v11385_v15 }
0x6e3e   :  { %v11388_v39 = vpop.xlane.xlu1 %11387 }
0x6e3f   :  { %14412 = vrsqrt.f32 %v11392_v56  ;;  %v11393_v46 = vadd.f32 1e-05, %v11390_v44  ;;  %v11391_v52 = vmul.f32 0.03125, %v11388_v39 }
0x6e40   :  { %v11554_v29 = vpop.xlane.xlu0 %11553 }
0x6e41   :  { %14414 = vrsqrt.f32 %v11393_v46  ;;  %v11394_v27 = vadd.f32 1e-05, %v11391_v52  ;;  %v11558_v47 = vmul.f32 0.03125, %v11554_v29 }
0x6e42   :  { %v11557_v30 = vpop.xlane.xlu1 %11556 }
0x6e43   :  { %14416 = vrsqrt.f32 %v11394_v27  ;;  %v11560_v28 = vadd.f32 1e-05, %v11558_v47  ;;  %v11559_v6 = vmul.f32 0.03125, %v11557_v30 }
0x6e45   :  { %14418 = vrsqrt.f32 %v11560_v28  ;;  %v11561_v61 = vadd.f32 1e-05, %v11559_v6  ;;  %v14158_v6 = vld [vmem:[#allocation2 + $0x6e4] sm:$0xff]  }
0x6e47   :  { %14420 = vrsqrt.f32 %v11561_v61 }
0x6e49   :  { %v14413_v58 = vpop.eup %14412 }
0x6e4a   :  { %v11398_v21 = vmul.f32 %v14413_v58, %v11374_v50  ;;  %v11419_v50 = vld [vmem:[#allocation5 + $0x68] sm:$0x3] }
0x6e4b   :  { %v14415_v1 = vpop.eup %14414  ;;  %v11420_v19 = vpack.c.bf16 %v11419_v50, %v11419_v50 }
0x6e4c   :  { %v11399_v45 = vmul.f32 %v14415_v1, %v11375_v34  ;;  %v11407_v13 = vmul.f32 %v11406_v37, %v11398_v21  ;;  %v11355_v1 = vld [vmem:[#allocation2 + $0x6f4] sm:$0x1] }
0x6e4d   :  { %v14417_v22 = vpop.eup %14416 }
0x6e4e   :  { %v11408_v11 = vmul.f32 %v11406_v37, %v11399_v45  ;;  %v11400_v20 = vmul.f32 %v14417_v22, %v11376_v10  ;;  %v11416_v14 = vadd.f32 %v11415_v2, %v11407_v13  ;;  %v11356_v45 = vunpack.c.l.bf16 %v11355_v1 }
0x6e4f   :  { %v14419_v17 = vpop.eup %14418 }
0x6e50   :  { %v11417_v5 = vadd.f32 %v11415_v2, %v11408_v11  ;;  %v11409_v38 = vmul.f32 %v11406_v37, %v11400_v20  ;;  %v11564_v43 = vmul.f32 %v14419_v17, %v11548_v41  ;;  %v11360_v13 = vrot.slane %v11356_v45, %v14658_v48 }
0x6e51   :  { %v14421_v62 = vpop.eup %14420 }
0x6e52   :  { %v11421_v23 = vpack.c.bf16 %v11417_v5, %v11416_v14  ;;  %v11418_v18 = vadd.f32 %v11415_v2, %v11409_v38  ;;  %v11565_v49 = vmul.f32 %v14421_v62, %v11549_v55  ;;  %v11566_v33 = vmul.f32 %v11564_v43, %v11406_v37 }
0x6e54   :  { %13891 = vmatpush3.bf16.msra.mxu1 %v11421_v23  ;;  %v11422_v3 = vpack.c.bf16 %v11418_v18, %v11418_v18  ;;  %v11567_v59 = vmul.f32 %v11565_v49, %v11406_v37  ;;  %v11568_v34 = vadd.f32 %v11566_v33, %v11415_v2 }
0x6e55   :  { %13892 = vmatprep.subr.bf16.mxu1 %v14510_v36 }
0x6e56   :  { %v11427_v12 = vsel %vm293_vm4, %v11422_v3, 0  ;;  %v11569_v0 = vadd.f32 %v11567_v59, %v11415_v2 }
0x6e58   :  { %13893 = vmatpush3.bf16.msra.mxu1 %v11427_v12  ;;  %v11572_v10 = vpack.c.bf16 %v11569_v0, %v11568_v34 }
0x6e59   :  { %13898 = vmatprep.subr.bf16.mxu1 %v14510_v36 }
0x6e5a   :  { %v11577_v7 = vsel %vm720_vm9, %v11572_v10, 0 }
0x6e5b   :  { %13895 = vmatmul.mubr.msk.bf16.vlgmr.msra.gmra.mrb[60].mxu1 %vm1026_vm7, %v11420_v19  ;;  %13907 = vmatpush3.bf16.msra.mxu0 %v11577_v7 }
0x6e5c   :  { %13902 = vmatprep.mubr.msk.bf16.mxu1 %vm14511_vm3, %v14510_v36  ;;  %13899 = vmatpush3.bf16.msra.mxu1 %v14156_v35 }
0x6e5d   :  { %13900 = vmatprep.subr.bf16.mxu1 %v14510_v36 }
0x6e5e   :  { %13909 = vmatmul.mubr.msk.bf16.vlgmr.msra.gmra.mrb[92].mxu0 %vm2750_vm10, %v11571_v32 }
0x6e60   :  { %13901 = vmatpush3.bf16.msra.mxu1 %v14157_v9 }
0x6e61   :  { %13912 = vmatprep.subr.bf16.mxu1 %v14510_v36 }
0x6f2e   :  { %v11463_v41 = vpop.f32.mrb[60].mxu1 }
0x6f2f   :  { %v11469_v42 = vmul.f32 0.11111111, %v11463_v41  ;;  %v13896_v25 = vpop.f32.mrb[61].mxu1 }
0x6f30   :  { %v11466_v16 = vpop.f32.mrb[62].mxu1 }
0x6f31   :  { %v11471_v55 = vmul.f32 0.044715, %v11469_v42  ;;  %v11613_v53 = vpop.f32.mrb[92].mxu0  ;;  %v13897_v31 = vpop.f32.mrb[63].mxu1  ;;  %v11470_v8 = vmul.f32 0.5, %v11469_v42 }
0x6f32   :  { %v11619_v51 = vmul.f32 0.2, %v11613_v53  ;;  %v13910_v57 = vpop.f32.mrb[93].mxu0 }
0x6f33   :  { %v11472_v54 = vmul.f32 %v11471_v55, %v11469_v42  ;;  %v11616_v24 = vpop.f32.mrb[94].mxu0 }
0x6f34   :  { %v11621_v4 = vmul.f32 0.044715, %v11619_v51  ;;  %v13911_v15 = vpop.f32.mrb[95].mxu0  ;;  %v11620_v40 = vmul.f32 0.5, %v11619_v51 }
0x6f35   :  { %v11473_v56 = vmul.f32 %v11472_v54, %v11469_v42 }
0x6f36   :  { %v11622_v44 = vmul.f32 %v11621_v4, %v11619_v51 }
0x6f37   :  { %v11474_v39 = vadd.f32 %v11473_v56, %v11469_v42 }
0x6f38   :  { %v11623_v46 = vmul.f32 %v11622_v44, %v11619_v51 }
0x6f39   :  { %v11475_v52 = vmul.f32 0.7978846, %v11474_v39 }
0x6f3a   :  { %v11624_v29 = vadd.f32 %v11623_v46, %v11619_v51 }
0x6f3b   :  { %14422 = vtanh.f32 %v11475_v52 }
0x6f3c   :  { %v11625_v27 = vmul.f32 0.7978846, %v11624_v29 }
0x6f3e   :  { %14424 = vtanh.f32 %v11625_v27 }
0x6f45   :  { %v14423_v47 = vpop.eup %14422 }
0x6f46   :  { %v11477_v30 = vadd.f32 1.0, %v14423_v47 }
0x6f48   :  { %v11478_v28 = vmul.f32 %v11477_v30, %v11470_v8  ;;  %v14425_v61 = vpop.eup %14424 }
0x6f49   :  { %v11627_v37 = vadd.f32 1.0, %v14425_v61 }
0x6f4a   :  { %v11483_v60 = vpack.c.bf16 %v11478_v28, %v11478_v28 }
0x6f4b   :  { %v11628_v58 = vmul.f32 %v11627_v37, %v11620_v40 }
0x6f4c   :  { %13903 = vmatmul.mubr.msk.bf16.vlgmr.msra.gmra.mrb[64].mxu1 %vm178_vm2, %v11483_v60 }
0x6f4d   :  { %13913 = vmatpush3.bf16.msra.mxu1 %v14158_v6  ;;  %13916 = vmatprep.mubr.msk.bf16.mxu1 %vm14511_vm3, %v14510_v36  ;;  %v11633_v21 = vpack.c.bf16 %v11628_v58, %v11628_v58 }
0x6f4e   :  { %13914 = vmatprep.subr.bf16.mxu1 %v14510_v36 }
0x6f51   :  { %13915 = vmatpush3.bf16.msra.mxu1 %v14159_v63 }
0x6f58   :  { %13917 = vmatmul.mubr.msk.bf16.vlgmr.msra.gmra.mrb[64].mxu1 %vm178_vm2, %v11633_v21 }
0x702b   :  { %v11683_v2 = vpop.f32.mrb[64].mxu1 }
0x702c   :  { %v13922_v22 = vadd.f32 %v11683_v2, %v11360_v13  ;;  %v13918_v11 = vpop.f32.mrb[65].mxu1 }
0x702d   :  { %v11686_v20 = vpop.f32.mrb[66].mxu1 }
0x702e   :  { %11690 = vst [vmem:[#allocation7] sm:$0x3] %v13922_v22  ;;  %v13919_v17 = vpop.f32.mrb[67].mxu1 }
0x702f   :  { %14487 = shalt.err (!%p14484_p6)
}
0x7030   :  { %s14488_s23 = scalar_lea.hbm %s16217_s3, 32 }
0x7031   :  { %p14489_p7 = scmp.ne.s32.totalorder %s16217_s3, %s14488_s23  ;;  %p14492_p8 = scmp.lt.u32.totalorder %s14488_s23, %s16217_s3 }
0x7033   :  { %p14494_p9 = pnand %p14492_p8, %p14489_p7 }
0x7035   :  { %14497 = shalt.err (!%p14494_p9)
}
0x7036   :  { %11700 = dma.vmem_to_hbm [thread:$0]  %s11698_s19, 32, %s16217_s3, [#allocation4]  }
0x7037   :  { %14502 = dma.done.wait [#allocation4], 32  }
0x7038   :  { %14503 = vsyncadd [#allocation4], 4294967264 }
0x7039   :  { %11704 = vsyncpa [#allocation3], 1 }
0x703a   :  { %11705 = vsyncpa [#allocation6], 1 }
0x703b   :  { %11706 = vsyncpa [#allocation4], 1 }

</bundles_post_ra>
